<compile_context>
chip_gen: v7x
topology: tpu7x:2x2x1
jax: 0.10.0
libtpu: 0.0.40
codegen_flags: <defaults>
</compile_context>

<pallas_src>
import jax
import jax.numpy as jnp
from jax.experimental import pallas as pl
from jax.experimental.pallas import tpu as pltpu

LEAKY_SLOPE = 0.2
BN_EPS = 1e-5


def _leaky_relu(x, slope=LEAKY_SLOPE):
    return jnp.where(x >= 0, x, slope * x)


def _vmem_limit_bytes(*block_bytes):
    # double-buffered pipeline blocks + generous headroom, clamped so it stays
    # above the v5e/v6e defaults and below v7x physical VMEM.
    total = 2 * int(sum(block_bytes))
    return int(min(max(total + (16 << 20), 32 << 20), 64 << 20))


# ---------------------------------------------------------------------------
# Layer-1 kernel: plain lane-dense matmul (wrapper-side im2col, K padded).
# ---------------------------------------------------------------------------
def _make_matmul_leaky_kernel(apply_leaky):
    def kernel(x_ref, w_ref, b_ref, z_ref):
        z = jnp.dot(x_ref[0], w_ref[...], preferred_element_type=jnp.float32)
        z = z + b_ref[...]
        if apply_leaky:
            z = _leaky_relu(z)
        z_ref[0] = z.astype(z_ref.dtype)
    return kernel


def conv3x3_s2_small_cin(a, w, b, *, apply_leaky, out_dtype=jnp.bfloat16, k_pad=64):
    """3x3 / stride-2 / pad-1 conv for tiny c_in: the im2col slab is built
    lane-dense in the wrapper (K zero-padded to k_pad, weights padded to
    match); the kernel is one (Ho*Wo, K) @ (K, c_out) MXU matmul + bias
    (+ optional in-kernel LeakyReLU)."""
    n, h, wsp, c_in = a.shape
    c_out = w.shape[-1]
    ho, wo = h // 2, wsp // 2
    k_raw = 9 * c_in
    assert k_raw <= k_pad

    a_pad = jnp.pad(a.astype(jnp.bfloat16), ((0, 0), (1, 1), (1, 1), (0, 0)))
    taps = [a_pad[:, ky:ky + 2 * ho:2, kx:kx + 2 * wo:2, :]
            for ky in range(3) for kx in range(3)]
    im2col = jnp.concatenate(taps, axis=-1)                      # (n, ho, wo, 9*c_in)
    im2col = jnp.pad(im2col, ((0, 0), (0, 0), (0, 0), (0, k_pad - k_raw)))
    im2col = im2col.reshape(n, ho * wo, k_pad)                   # lane-dense K

    w2d = jnp.pad(w.astype(jnp.bfloat16).reshape(k_raw, c_out),
                  ((0, k_pad - k_raw), (0, 0)))
    b2d = b.astype(jnp.float32).reshape(1, c_out)

    limit = _vmem_limit_bytes(ho * wo * k_pad * 2, k_pad * c_out * 2, c_out * 4,
                              ho * wo * c_out * jnp.dtype(out_dtype).itemsize)

    z = pl.pallas_call(
        _make_matmul_leaky_kernel(apply_leaky),
        out_shape=jax.ShapeDtypeStruct((n, ho * wo, c_out), out_dtype),
        grid_spec=pltpu.PrefetchScalarGridSpec(
            num_scalar_prefetch=0,
            grid=(n,),
            in_specs=[pl.BlockSpec((1, ho * wo, k_pad), lambda i: (i, 0, 0)),
                      pl.BlockSpec((k_pad, c_out), lambda i: (0, 0)),
                      pl.BlockSpec((1, c_out), lambda i: (0, 0))],
            out_specs=pl.BlockSpec((1, ho * wo, c_out), lambda i: (i, 0, 0))),
        compiler_params=pltpu.CompilerParams(
            dimension_semantics=("parallel",), vmem_limit_bytes=limit),
    )(im2col, w2d, b2d)
    return z.reshape(n, ho, wo, c_out)


# ---------------------------------------------------------------------------
# Wide-c_in conv kernels: 9 accumulated tap matmuls, no materialized im2col.
# One grid step = one batch element, whole image per block.
# ---------------------------------------------------------------------------
def _make_conv_kernel_s2(ho, wo, c_in, with_stats):
    """3x3 / stride-2 / pad-1.  Inputs are the 4 spatial parity components of
    the zero-padded activation, so every tap is a unit-stride slice."""

    def kernel(q00_ref, q01_ref, q10_ref, q11_ref, w_ref, b_ref, *out_refs):
        z_ref = out_refs[0]
        q = ((q00_ref, q01_ref), (q10_ref, q11_ref))
        acc = None
        k = 0
        for ky in range(3):
            rp, ro = ky % 2, ky // 2      # padded row 2*oy+ky -> parity rp, row oy+ro
            for kx in range(3):
                cp, co = kx % 2, kx // 2
                tap = q[rp][cp][0, ro:ro + ho, co:co + wo, :].reshape(ho * wo, c_in)
                d = jnp.dot(tap, w_ref[k], preferred_element_type=jnp.float32)
                acc = d if acc is None else acc + d
                k += 1
        z = acc + b_ref[...]                                  # bias in f32
        z_ref[0] = z.astype(z_ref.dtype)                      # bf16 writeback
        if with_stats:                                        # stats from f32 acc
            out_refs[1][0] = jnp.sum(z, axis=0, keepdims=True)
            out_refs[2][0] = jnp.sum(z * z, axis=0, keepdims=True)

    return kernel


def _make_conv_kernel_s1(ho, wo, c_in, with_stats):
    """3x3 / stride-1 / pad-1 conv on the zero-padded activation."""

    def kernel(apad_ref, w_ref, b_ref, *out_refs):
        z_ref = out_refs[0]
        acc = None
        k = 0
        for ky in range(3):
            for kx in range(3):
                tap = apad_ref[0, ky:ky + ho, kx:kx + wo, :].reshape(ho * wo, c_in)
                d = jnp.dot(tap, w_ref[k], preferred_element_type=jnp.float32)
                acc = d if acc is None else acc + d
                k += 1
        z = acc + b_ref[...]
        z_ref[0] = z.astype(z_ref.dtype)
        if with_stats:
            out_refs[1][0] = jnp.sum(z, axis=0, keepdims=True)
            out_refs[2][0] = jnp.sum(z * z, axis=0, keepdims=True)

    return kernel


def conv3x3_tap(a, w, b, *, stride, with_stats, out_dtype=jnp.bfloat16):
    """3x3 conv, padding 1, given stride, for wide c_in (>= 64).  9 accumulated
    tap matmuls in bf16 with f32 accumulation.  Returns z (N,Ho,Wo,Cout) in
    out_dtype and, if with_stats, per-channel (sum, sum_sq) of the f32 conv
    output over (N,Ho,Wo) for training-mode BatchNorm."""
    n, h, wsp, c_in = a.shape
    c_out = w.shape[-1]
    ho, wo = (h // 2, wsp // 2) if stride == 2 else (h, wsp)

    # zero-pad AFTER activation (matches PyTorch conv padding semantics);
    # bf16 cast here halves the kernel's HBM/VMEM input traffic.
    a_pad = jnp.pad(a.astype(jnp.bfloat16), ((0, 0), (1, 1), (1, 1), (0, 0)))
    w3d = w.astype(jnp.bfloat16).reshape(9, c_in, c_out)        # per-tap slabs
    b2d = b.astype(jnp.float32).reshape(1, c_out)

    out_shape = [jax.ShapeDtypeStruct((n, ho * wo, c_out), out_dtype)]
    out_specs = [pl.BlockSpec((1, ho * wo, c_out), lambda i: (i, 0, 0))]
    out_bytes = ho * wo * c_out * jnp.dtype(out_dtype).itemsize
    if with_stats:
        out_shape += [jax.ShapeDtypeStruct((n, 1, c_out), jnp.float32)] * 2
        out_specs += [pl.BlockSpec((1, 1, c_out), lambda i: (i, 0, 0))] * 2
        out_bytes += 2 * c_out * 4

    # NOTE: the weight/bias index_maps are grid-invariant, so the pipeline only
    # fetches them once across grid steps; the second buffer they'd occupy is
    # covered by the vmem_limit headroom.  (pipeline_mode=pl.Buffered(1) would
    # reclaim it but is skipped for lowering-compatibility safety.)
    w_spec = pl.BlockSpec((9, c_in, c_out), lambda i: (0, 0, 0))
    b_spec = pl.BlockSpec((1, c_out), lambda i: (0, 0))

    if stride == 2:
        hp, wp = ho + 1, wo + 1
        # 4 spatial parity components of the padded activation (a single XLA
        # fusion together with the preceding BN/LeakyReLU and the bf16 cast).
        comps = [a_pad[:, r::2, s::2, :] for r in (0, 1) for s in (0, 1)]
        kernel = _make_conv_kernel_s2(ho, wo, c_in, with_stats)
        in_specs = [pl.BlockSpec((1, hp, wp, c_in), lambda i: (i, 0, 0, 0))
                    for _ in range(4)] + [w_spec, b_spec]
        args = (*comps, w3d, b2d)
        in_bytes = 4 * hp * wp * c_in * 2
    else:
        kernel = _make_conv_kernel_s1(ho, wo, c_in, with_stats)
        in_specs = [pl.BlockSpec((1, h + 2, wsp + 2, c_in), lambda i: (i, 0, 0, 0)),
                    w_spec, b_spec]
        args = (a_pad, w3d, b2d)
        in_bytes = (h + 2) * (wsp + 2) * c_in * 2

    limit = _vmem_limit_bytes(in_bytes, 9 * c_in * c_out * 2, c_out * 4, out_bytes)

    res = pl.pallas_call(
        kernel,
        out_shape=tuple(out_shape),
        grid_spec=pltpu.PrefetchScalarGridSpec(
            num_scalar_prefetch=0,
            grid=(n,),
            in_specs=in_specs,
            out_specs=tuple(out_specs),
        ),
        compiler_params=pltpu.CompilerParams(
            dimension_semantics=("parallel",),    # batch axis shardable (v7x)
            vmem_limit_bytes=limit),
    )(*args)

    z = res[0].reshape(n, ho, wo, c_out)
    if with_stats:
        return z, res[1].sum(axis=(0, 1)), res[2].sum(axis=(0, 1))
    return z, None, None


# ---------------------------------------------------------------------------
# Training-mode BatchNorm (biased batch variance) + LeakyReLU.  Shared by the
# Pallas path and the reference so both apply the identical formula to the
# bf16 conv output (stats always come from the f32 accumulator).
# ---------------------------------------------------------------------------
def _bn_leaky(z, s, ss, count, gamma, beta, eps=BN_EPS):
    mean = s / count
    var = jnp.maximum(ss / count - mean * mean, 0.0)
    scale = gamma * jax.lax.rsqrt(var + eps)
    shift = beta - mean * scale
    return _leaky_relu(z.astype(jnp.float32) * scale + shift)


# ---------------------------------------------------------------------------
# Full forward pass.
# ---------------------------------------------------------------------------
def discriminator_forward(img_A, img_B, params):
    (w1, b1), (w2, b2, g2, be2), (w3, b3, g3, be3), (w4, b4, g4, be4), (w5, b5) = params
    n = img_A.shape[0]

    x = jnp.concatenate([img_A, img_B], axis=-1)

    # block 1: conv s2 (tiny c_in -> lane-dense wrapper im2col, K padded to 64)
    #          with LeakyReLU fused in-kernel (no BN on this layer).
    a1 = conv3x3_s2_small_cin(x, w1, b1, apply_leaky=True)       # bf16

    # blocks 2-4: conv s2 (9-tap accumulated matmuls, bf16 z + f32 batch stats)
    #             -> BN (batch stats) -> LeakyReLU (fused by XLA with the next
    #             layer's pad / parity split / bf16 cast).
    z2, s2, ss2 = conv3x3_tap(a1, w2, b2, stride=2, with_stats=True)
    a2 = _bn_leaky(z2, s2, ss2, n * z2.shape[1] * z2.shape[2], g2, be2)

    z3, s3, ss3 = conv3x3_tap(a2, w3, b3, stride=2, with_stats=True)
    a3 = _bn_leaky(z3, s3, ss3, n * z3.shape[1] * z3.shape[2], g3, be3)

    z4, s4, ss4 = conv3x3_tap(a3, w4, b4, stride=2, with_stats=True)
    a4 = _bn_leaky(z4, s4, ss4, n * z4.shape[1] * z4.shape[2], g4, be4)

    # final conv: stride 1, 1 output channel -> lane-padded to 128 zero channels
    # for dense MXU output / stores, real channel sliced back outside.
    c_pad = 128
    w5p = jnp.pad(w5, ((0, 0), (0, 0), (0, 0), (0, c_pad - w5.shape[-1])))
    b5p = jnp.pad(b5, ((0, c_pad - b5.shape[0]),))
    out, _, _ = conv3x3_tap(a4, w5p, b5p, stride=1, with_stats=False,
                            out_dtype=jnp.float32)
    return out[..., :1]
    # TODO(synk): BatchNorm running_mean/running_var momentum updates are a
    # training-state side effect, not part of the returned tensor -> omitted.


# ---------------------------------------------------------------------------
# Pure-JAX reference with the same precision policy (bf16 MXU inputs, f32
# accumulation / BN statistics, bf16 inter-layer activations) for verification.
# ---------------------------------------------------------------------------
def reference_forward(img_A, img_B, params):
    (w1, b1), (w2, b2, g2, be2), (w3, b3, g3, be3), (w4, b4, g4, be4), (w5, b5) = params

    def conv(a, w, b, stride):
        y = jax.lax.conv_general_dilated(
            a.astype(jnp.bfloat16), w.astype(jnp.bfloat16),
            window_strides=(stride, stride), padding=((1, 1), (1, 1)),
            dimension_numbers=("NHWC", "HWIO", "NHWC"),
            preferred_element_type=jnp.float32)
        return y + b.astype(jnp.float32)

    def block(a, w, b, g, be):
        zf = conv(a, w, b, 2)                                   # f32
        s = jnp.sum(zf, axis=(0, 1, 2))
        ss = jnp.sum(zf * zf, axis=(0, 1, 2))
        count = zf.shape[0] * zf.shape[1] * zf.shape[2]
        return _bn_leaky(zf.astype(jnp.bfloat16), s, ss, count, g, be)

    x = jnp.concatenate([img_A, img_B], axis=-1)
    a = _leaky_relu(conv(x, w1, b1, 2)).astype(jnp.bfloat16)
    a = block(a, w2, b2, g2, be2)
    a = block(a, w3, b3, g3, be3)
    a = block(a, w4, b4, g4, be4)
    return conv(a, w5, b5, 1)


def init_params(key, in_channels=3):
    def conv_init(k, cin, cout):
        kw, kb = jax.random.split(k)
        bound = (cin * 9) ** -0.5
        w = jax.random.uniform(kw, (3, 3, cin, cout), jnp.float32, -bound, bound)
        b = jax.random.uniform(kb, (cout,), jnp.float32, -bound, bound)
        return w, b

    def bn_init(k, c):
        kg, kb = jax.random.split(k)
        gamma = 1.0 + 0.1 * jax.random.normal(kg, (c,), jnp.float32)
        beta = 0.1 * jax.random.normal(kb, (c,), jnp.float32)
        return gamma, beta

    ks = jax.random.split(key, 8)
    w1, b1 = conv_init(ks[0], 2 * in_channels, 64)
    w2, b2 = conv_init(ks[1], 64, 128)
    g2, be2 = bn_init(ks[2], 128)
    w3, b3 = conv_init(ks[3], 128, 256)
    g3, be3 = bn_init(ks[4], 256)
    w4, b4 = conv_init(ks[5], 256, 512)
    g4, be4 = bn_init(ks[6], 512)
    w5, b5 = conv_init(ks[7], 512, 1)
    return ((w1, b1), (w2, b2, g2, be2), (w3, b3, g3, be3),
            (w4, b4, g4, be4), (w5, b5))


if __name__ == "__main__":
    key = jax.random.PRNGKey(0)
    kp, ka, kb = jax.random.split(key, 3)

    N, H, W, C = 2, 32, 32, 3
    params = init_params(kp, in_channels=C)
    img_A = jax.random.normal(ka, (N, H, W, C), jnp.float32)
    img_B = jax.random.normal(kb, (N, H, W, C), jnp.float32)

    fwd = jax.jit(discriminator_forward)
    out = jax.block_until_ready(fwd(img_A, img_B, params))

    ref = jax.block_until_ready(jax.jit(reference_forward)(img_A, img_B, params))

    if out.shape != (N, H // 16, W // 16, 1):
        raise AssertionError(f"bad output shape {out.shape}")
    err = float(jnp.max(jnp.abs(out - ref)))
    if not jnp.allclose(out, ref, atol=1e-2, rtol=1e-2):
        raise AssertionError(f"mismatch: max abs err = {err}")
    print("KERNEL_OK")
</pallas_src>

<mosaic_0001>
module attributes {stable_mosaic.version = 11 : i64} {
  func.func @kernel(%arg0: i32, %arg1: memref<1x256x64xbf16, #tpu.memory_space<vmem>>, %arg2: memref<64x64xbf16, #tpu.memory_space<vmem>>, %arg3: memref<1x64xf32, #tpu.memory_space<vmem>>, %arg4: memref<1x256x64xbf16, #tpu.memory_space<vmem>>) attributes {dimension_semantics = [#tpu.dimension_semantics<parallel>], iteration_bounds = array<i64: 2>, scalar_prefetch = 0 : i64, scratch_operands = 0 : i64, tpu.core_type = #tpu.core_type<tc>, window_params = [{transform_indices = @transform_0, window_bounds = array<i64: 1, 256, 64>}, {pipeline_mode = #tpu.pipeline_mode<synchronous>, transform_indices = @transform_1, window_bounds = array<i64: 64, 64>}, {pipeline_mode = #tpu.pipeline_mode<synchronous>, transform_indices = @transform_2, window_bounds = array<i64: 1, 64>}, {transform_indices = @transform_3, window_bounds = array<i64: 1, 256, 64>}]} {
    %c0 = arith.constant 0 : index
    %c0_0 = arith.constant 0 : index
    %c0_1 = arith.constant 0 : index
    %0 = vector.load %arg1[%c0, %c0_0, %c0_1] : memref<1x256x64xbf16, #tpu.memory_space<vmem>>, vector<1x256x64xbf16>
    %1 = vector.shape_cast %0 : vector<1x256x64xbf16> to vector<256x64xbf16>
    %c0_2 = arith.constant 0 : index
    %c0_3 = arith.constant 0 : index
    %2 = vector.load %arg2[%c0_2, %c0_3] : memref<64x64xbf16, #tpu.memory_space<vmem>>, vector<64x64xbf16>
    %cst = arith.constant dense<0.000000e+00> : vector<256x64xf32>
    %3 = tpu.matmul %1, %2, %cst {dimension_numbers = #tpu.dot_dimension_numbers<[1], [0], [0], [1], [0, 0, 1, 1], [], []>} : vector<256x64xbf16>, vector<64x64xbf16>, vector<256x64xf32> -> vector<256x64xf32>
    %c0_4 = arith.constant 0 : index
    %c0_5 = arith.constant 0 : index
    %4 = vector.load %arg3[%c0_4, %c0_5] : memref<1x64xf32, #tpu.memory_space<vmem>>, vector<1x64xf32>
    %5 = vector.broadcast %4 : vector<1x64xf32> to vector<256x64xf32>
    %6 = arith.addf %3, %5 : vector<256x64xf32>
    %cst_6 = arith.constant 0.000000e+00 : f32
    %7 = vector.broadcast %cst_6 : f32 to vector<256x64xf32>
    %8 = arith.cmpf oge, %6, %7 : vector<256x64xf32>
    %cst_7 = arith.constant 2.000000e-01 : f32
    %9 = vector.broadcast %cst_7 : f32 to vector<256x64xf32>
    %10 = arith.mulf %9, %6 : vector<256x64xf32>
    %11 = arith.select %8, %6, %10 : vector<256x64xi1>, vector<256x64xf32>
    %12 = arith.truncf %11 : vector<256x64xf32> to vector<256x64xbf16>
    %c0_8 = arith.constant 0 : index
    %c0_9 = arith.constant 0 : index
    %c0_10 = arith.constant 0 : index
    %13 = vector.load %arg4[%c0_8, %c0_9, %c0_10] : memref<1x256x64xbf16, #tpu.memory_space<vmem>>, vector<1x256x64xbf16>
    %14 = vector.shape_cast %13 : vector<1x256x64xbf16> to vector<256x64xbf16>
    %15 = vector.shape_cast %12 : vector<256x64xbf16> to vector<1x256x64xbf16>
    tpu.vector_store %arg4[%c0_8, %c0_9, %c0_10], %15 {strides = array<i32>} : memref<1x256x64xbf16, #tpu.memory_space<vmem>>, vector<1x256x64xbf16>,
    return
  }
  func.func @transform_0(%arg0: i32) -> (i32, i32, i32) {
    %c0_i32 = arith.constant 0 : i32
    %c0_i32_0 = arith.constant 0 : i32
    %c0_i32_1 = arith.constant 0 : i32
    return %arg0, %c0_i32, %c0_i32_0 : i32, i32, i32
  }
  func.func @transform_1(%arg0: i32) -> (i32, i32) {
    %c0_i32 = arith.constant 0 : i32
    %c0_i32_0 = arith.constant 0 : i32
    %c0_i32_1 = arith.constant 0 : i32
    return %c0_i32, %c0_i32_0 : i32, i32
  }
  func.func @transform_2(%arg0: i32) -> (i32, i32) {
    %c0_i32 = arith.constant 0 : i32
    %c0_i32_0 = arith.constant 0 : i32
    %c0_i32_1 = arith.constant 0 : i32
    return %c0_i32, %c0_i32_0 : i32, i32
  }
  func.func @transform_3(%arg0: i32) -> (i32, i32, i32) {
    %c0_i32 = arith.constant 0 : i32
    %c0_i32_0 = arith.constant 0 : i32
    %c0_i32_1 = arith.constant 0 : i32
    return %arg0, %c0_i32, %c0_i32_0 : i32, i32, i32
  }
}

module attributes {stable_mosaic.version = 11 : i64} {
  func.func @kernel(%arg0: i32, %arg1: memref<1x9x9x64xbf16, #tpu.memory_space<vmem>>, %arg2: memref<1x9x9x64xbf16, #tpu.memory_space<vmem>>, %arg3: memref<1x9x9x64xbf16, #tpu.memory_space<vmem>>, %arg4: memref<1x9x9x64xbf16, #tpu.memory_space<vmem>>, %arg5: memref<9x64x128xbf16, #tpu.memory_space<vmem>>, %arg6: memref<1x128xf32, #tpu.memory_space<vmem>>, %arg7: memref<1x64x128xbf16, #tpu.memory_space<vmem>>, %arg8: memref<1x1x128xf32, #tpu.memory_space<vmem>>, %arg9: memref<1x1x128xf32, #tpu.memory_space<vmem>>) attributes {dimension_semantics = [#tpu.dimension_semantics<parallel>], iteration_bounds = array<i64: 2>, scalar_prefetch = 0 : i64, scratch_operands = 0 : i64, tpu.core_type = #tpu.core_type<tc>, window_params = [{transform_indices = @transform_0, window_bounds = array<i64: 1, 9, 9, 64>}, {transform_indices = @transform_1, window_bounds = array<i64: 1, 9, 9, 64>}, {transform_indices = @transform_2, window_bounds = array<i64: 1, 9, 9, 64>}, {transform_indices = @transform_3, window_bounds = array<i64: 1, 9, 9, 64>}, {pipeline_mode = #tpu.pipeline_mode<synchronous>, transform_indices = @transform_4, window_bounds = array<i64: 9, 64, 128>}, {pipeline_mode = #tpu.pipeline_mode<synchronous>, transform_indices = @transform_5, window_bounds = array<i64: 1, 128>}, {transform_indices = @transform_6, window_bounds = array<i64: 1, 64, 128>}, {transform_indices = @transform_7, window_bounds = array<i64: 1, 1, 128>}, {transform_indices = @transform_8, window_bounds = array<i64: 1, 1, 128>}]} {
    %c0 = arith.constant 0 : index
    %c0_0 = arith.constant 0 : index
    %c0_1 = arith.constant 0 : index
    %c0_2 = arith.constant 0 : index
    %0 = vector.load %arg1[%c0, %c0_0, %c0_1, %c0_2] : memref<1x9x9x64xbf16, #tpu.memory_space<vmem>>, vector<1x8x8x64xbf16>
    %1 = vector.shape_cast %0 : vector<1x8x8x64xbf16> to vector<8x8x64xbf16>
    %2 = vector.shape_cast %1 : vector<8x8x64xbf16> to vector<64x64xbf16>
    %c0_3 = arith.constant 0 : index
    %c0_4 = arith.constant 0 : index
    %c0_5 = arith.constant 0 : index
    %3 = vector.load %arg5[%c0_3, %c0_4, %c0_5] : memref<9x64x128xbf16, #tpu.memory_space<vmem>>, vector<1x64x128xbf16>
    %4 = vector.shape_cast %3 : vector<1x64x128xbf16> to vector<64x128xbf16>
    %cst = arith.constant dense<0.000000e+00> : vector<64x128xf32>
    %5 = tpu.matmul %2, %4, %cst {dimension_numbers = #tpu.dot_dimension_numbers<[1], [0], [0], [1], [0, 0, 1, 1], [], []>} : vector<64x64xbf16>, vector<64x128xbf16>, vector<64x128xf32> -> vector<64x128xf32>
    %c0_6 = arith.constant 0 : index
    %c0_7 = arith.constant 0 : index
    %c0_8 = arith.constant 0 : index
    %c0_9 = arith.constant 0 : index
    %6 = vector.load %arg2[%c0_6, %c0_7, %c0_8, %c0_9] : memref<1x9x9x64xbf16, #tpu.memory_space<vmem>>, vector<1x8x8x64xbf16>
    %7 = vector.shape_cast %6 : vector<1x8x8x64xbf16> to vector<8x8x64xbf16>
    %8 = vector.shape_cast %7 : vector<8x8x64xbf16> to vector<64x64xbf16>
    %c1 = arith.constant 1 : index
    %c0_10 = arith.constant 0 : index
    %c0_11 = arith.constant 0 : index
    %9 = vector.load %arg5[%c1, %c0_10, %c0_11] : memref<9x64x128xbf16, #tpu.memory_space<vmem>>, vector<1x64x128xbf16>
    %10 = vector.shape_cast %9 : vector<1x64x128xbf16> to vector<64x128xbf16>
    %cst_12 = arith.constant dense<0.000000e+00> : vector<64x128xf32>
    %11 = tpu.matmul %8, %10, %cst_12 {dimension_numbers = #tpu.dot_dimension_numbers<[1], [0], [0], [1], [0, 0, 1, 1], [], []>} : vector<64x64xbf16>, vector<64x128xbf16>, vector<64x128xf32> -> vector<64x128xf32>
    %12 = arith.addf %5, %11 : vector<64x128xf32>
    %c0_13 = arith.constant 0 : index
    %c0_14 = arith.constant 0 : index
    %c1_15 = arith.constant 1 : index
    %c0_16 = arith.constant 0 : index
    %13 = vector.load %arg1[%c0_13, %c0_14, %c1_15, %c0_16] : memref<1x9x9x64xbf16, #tpu.memory_space<vmem>>, vector<1x8x8x64xbf16>
    %14 = vector.shape_cast %13 : vector<1x8x8x64xbf16> to vector<8x8x64xbf16>
    %15 = vector.shape_cast %14 : vector<8x8x64xbf16> to vector<64x64xbf16>
    %c2 = arith.constant 2 : index
    %c0_17 = arith.constant 0 : index
    %c0_18 = arith.constant 0 : index
    %16 = vector.load %arg5[%c2, %c0_17, %c0_18] : memref<9x64x128xbf16, #tpu.memory_space<vmem>>, vector<1x64x128xbf16>
    %17 = vector.shape_cast %16 : vector<1x64x128xbf16> to vector<64x128xbf16>
    %cst_19 = arith.constant dense<0.000000e+00> : vector<64x128xf32>
    %18 = tpu.matmul %15, %17, %cst_19 {dimension_numbers = #tpu.dot_dimension_numbers<[1], [0], [0], [1], [0, 0, 1, 1], [], []>} : vector<64x64xbf16>, vector<64x128xbf16>, vector<64x128xf32> -> vector<64x128xf32>
    %19 = arith.addf %12, %18 : vector<64x128xf32>
    %c0_20 = arith.constant 0 : index
    %c0_21 = arith.constant 0 : index
    %c0_22 = arith.constant 0 : index
    %c0_23 = arith.constant 0 : index
    %20 = vector.load %arg3[%c0_20, %c0_21, %c0_22, %c0_23] : memref<1x9x9x64xbf16, #tpu.memory_space<vmem>>, vector<1x8x8x64xbf16>
    %21 = vector.shape_cast %20 : vector<1x8x8x64xbf16> to vector<8x8x64xbf16>
    %22 = vector.shape_cast %21 : vector<8x8x64xbf16> to vector<64x64xbf16>
    %c3 = arith.constant 3 : index
    %c0_24 = arith.constant 0 : index
    %c0_25 = arith.constant 0 : index
    %23 = vector.load %arg5[%c3, %c0_24, %c0_25] : memref<9x64x128xbf16, #tpu.memory_space<vmem>>, vector<1x64x128xbf16>
    %24 = vector.shape_cast %23 : vector<1x64x128xbf16> to vector<64x128xbf16>
    %cst_26 = arith.constant dense<0.000000e+00> : vector<64x128xf32>
    %25 = tpu.matmul %22, %24, %cst_26 {dimension_numbers = #tpu.dot_dimension_numbers<[1], [0], [0], [1], [0, 0, 1, 1], [], []>} : vector<64x64xbf16>, vector<64x128xbf16>, vector<64x128xf32> -> vector<64x128xf32>
    %26 = arith.addf %19, %25 : vector<64x128xf32>
    %c0_27 = arith.constant 0 : index
    %c0_28 = arith.constant 0 : index
    %c0_29 = arith.constant 0 : index
    %c0_30 = arith.constant 0 : index
    %27 = vector.load %arg4[%c0_27, %c0_28, %c0_29, %c0_30] : memref<1x9x9x64xbf16, #tpu.memory_space<vmem>>, vector<1x8x8x64xbf16>
    %28 = vector.shape_cast %27 : vector<1x8x8x64xbf16> to vector<8x8x64xbf16>
    %29 = vector.shape_cast %28 : vector<8x8x64xbf16> to vector<64x64xbf16>
    %c4 = arith.constant 4 : index
    %c0_31 = arith.constant 0 : index
    %c0_32 = arith.constant 0 : index
    %30 = vector.load %arg5[%c4, %c0_31, %c0_32] : memref<9x64x128xbf16, #tpu.memory_space<vmem>>, vector<1x64x128xbf16>
    %31 = vector.shape_cast %30 : vector<1x64x128xbf16> to vector<64x128xbf16>
    %cst_33 = arith.constant dense<0.000000e+00> : vector<64x128xf32>
    %32 = tpu.matmul %29, %31, %cst_33 {dimension_numbers = #tpu.dot_dimension_numbers<[1], [0], [0], [1], [0, 0, 1, 1], [], []>} : vector<64x64xbf16>, vector<64x128xbf16>, vector<64x128xf32> -> vector<64x128xf32>
    %33 = arith.addf %26, %32 : vector<64x128xf32>
    %c0_34 = arith.constant 0 : index
    %c0_35 = arith.constant 0 : index
    %c1_36 = arith.constant 1 : index
    %c0_37 = arith.constant 0 : index
    %34 = vector.load %arg3[%c0_34, %c0_35, %c1_36, %c0_37] : memref<1x9x9x64xbf16, #tpu.memory_space<vmem>>, vector<1x8x8x64xbf16>
    %35 = vector.shape_cast %34 : vector<1x8x8x64xbf16> to vector<8x8x64xbf16>
    %36 = vector.shape_cast %35 : vector<8x8x64xbf16> to vector<64x64xbf16>
    %c5 = arith.constant 5 : index
    %c0_38 = arith.constant 0 : index
    %c0_39 = arith.constant 0 : index
    %37 = vector.load %arg5[%c5, %c0_38, %c0_39] : memref<9x64x128xbf16, #tpu.memory_space<vmem>>, vector<1x64x128xbf16>
    %38 = vector.shape_cast %37 : vector<1x64x128xbf16> to vector<64x128xbf16>
    %cst_40 = arith.constant dense<0.000000e+00> : vector<64x128xf32>
    %39 = tpu.matmul %36, %38, %cst_40 {dimension_numbers = #tpu.dot_dimension_numbers<[1], [0], [0], [1], [0, 0, 1, 1], [], []>} : vector<64x64xbf16>, vector<64x128xbf16>, vector<64x128xf32> -> vector<64x128xf32>
    %40 = arith.addf %33, %39 : vector<64x128xf32>
    %c0_41 = arith.constant 0 : index
    %c1_42 = arith.constant 1 : index
    %c0_43 = arith.constant 0 : index
    %c0_44 = arith.constant 0 : index
    %41 = vector.load %arg1[%c0_41, %c1_42, %c0_43, %c0_44] : memref<1x9x9x64xbf16, #tpu.memory_space<vmem>>, vector<1x8x8x64xbf16>
    %42 = vector.shape_cast %41 : vector<1x8x8x64xbf16> to vector<8x8x64xbf16>
    %43 = vector.shape_cast %42 : vector<8x8x64xbf16> to vector<64x64xbf16>
    %c6 = arith.constant 6 : index
    %c0_45 = arith.constant 0 : index
    %c0_46 = arith.constant 0 : index
    %44 = vector.load %arg5[%c6, %c0_45, %c0_46] : memref<9x64x128xbf16, #tpu.memory_space<vmem>>, vector<1x64x128xbf16>
    %45 = vector.shape_cast %44 : vector<1x64x128xbf16> to vector<64x128xbf16>
    %cst_47 = arith.constant dense<0.000000e+00> : vector<64x128xf32>
    %46 = tpu.matmul %43, %45, %cst_47 {dimension_numbers = #tpu.dot_dimension_numbers<[1], [0], [0], [1], [0, 0, 1, 1], [], []>} : vector<64x64xbf16>, vector<64x128xbf16>, vector<64x128xf32> -> vector<64x128xf32>
    %47 = arith.addf %40, %46 : vector<64x128xf32>
    %c0_48 = arith.constant 0 : index
    %c1_49 = arith.constant 1 : index
    %c0_50 = arith.constant 0 : index
    %c0_51 = arith.constant 0 : index
    %48 = vector.load %arg2[%c0_48, %c1_49, %c0_50, %c0_51] : memref<1x9x9x64xbf16, #tpu.memory_space<vmem>>, vector<1x8x8x64xbf16>
    %49 = vector.shape_cast %48 : vector<1x8x8x64xbf16> to vector<8x8x64xbf16>
    %50 = vector.shape_cast %49 : vector<8x8x64xbf16> to vector<64x64xbf16>
    %c7 = arith.constant 7 : index
    %c0_52 = arith.constant 0 : index
    %c0_53 = arith.constant 0 : index
    %51 = vector.load %arg5[%c7, %c0_52, %c0_53] : memref<9x64x128xbf16, #tpu.memory_space<vmem>>, vector<1x64x128xbf16>
    %52 = vector.shape_cast %51 : vector<1x64x128xbf16> to vector<64x128xbf16>
    %cst_54 = arith.constant dense<0.000000e+00> : vector<64x128xf32>
    %53 = tpu.matmul %50, %52, %cst_54 {dimension_numbers = #tpu.dot_dimension_numbers<[1], [0], [0], [1], [0, 0, 1, 1], [], []>} : vector<64x64xbf16>, vector<64x128xbf16>, vector<64x128xf32> -> vector<64x128xf32>
    %54 = arith.addf %47, %53 : vector<64x128xf32>
    %c0_55 = arith.constant 0 : index
    %c1_56 = arith.constant 1 : index
    %c1_57 = arith.constant 1 : index
    %c0_58 = arith.constant 0 : index
    %55 = vector.load %arg1[%c0_55, %c1_56, %c1_57, %c0_58] : memref<1x9x9x64xbf16, #tpu.memory_space<vmem>>, vector<1x8x8x64xbf16>
    %56 = vector.shape_cast %55 : vector<1x8x8x64xbf16> to vector<8x8x64xbf16>
    %57 = vector.shape_cast %56 : vector<8x8x64xbf16> to vector<64x64xbf16>
    %c8 = arith.constant 8 : index
    %c0_59 = arith.constant 0 : index
    %c0_60 = arith.constant 0 : index
    %58 = vector.load %arg5[%c8, %c0_59, %c0_60] : memref<9x64x128xbf16, #tpu.memory_space<vmem>>, vector<1x64x128xbf16>
    %59 = vector.shape_cast %58 : vector<1x64x128xbf16> to vector<64x128xbf16>
    %cst_61 = arith.constant dense<0.000000e+00> : vector<64x128xf32>
    %60 = tpu.matmul %57, %59, %cst_61 {dimension_numbers = #tpu.dot_dimension_numbers<[1], [0], [0], [1], [0, 0, 1, 1], [], []>} : vector<64x64xbf16>, vector<64x128xbf16>, vector<64x128xf32> -> vector<64x128xf32>
    %61 = arith.addf %54, %60 : vector<64x128xf32>
    %c0_62 = arith.constant 0 : index
    %c0_63 = arith.constant 0 : index
    %62 = vector.load %arg6[%c0_62, %c0_63] : memref<1x128xf32, #tpu.memory_space<vmem>>, vector<1x128xf32>
    %63 = vector.broadcast %62 : vector<1x128xf32> to vector<64x128xf32>
    %64 = arith.addf %61, %63 : vector<64x128xf32>
    %65 = arith.truncf %64 : vector<64x128xf32> to vector<64x128xbf16>
    %c0_64 = arith.constant 0 : index
    %c0_65 = arith.constant 0 : index
    %c0_66 = arith.constant 0 : index
    %66 = vector.load %arg7[%c0_64, %c0_65, %c0_66] : memref<1x64x128xbf16, #tpu.memory_space<vmem>>, vector<1x64x128xbf16>
    %67 = vector.shape_cast %66 : vector<1x64x128xbf16> to vector<64x128xbf16>
    %68 = vector.shape_cast %65 : vector<64x128xbf16> to vector<1x64x128xbf16>
    tpu.vector_store %arg7[%c0_64, %c0_65, %c0_66], %68 {strides = array<i32>} : memref<1x64x128xbf16, #tpu.memory_space<vmem>>, vector<1x64x128xbf16>,
    %cst_67 = arith.constant dense<0.000000e+00> : vector<128xf32>
    %69 = vector.multi_reduction <add>, %64, %cst_67 [0] : vector<64x128xf32> to vector<128xf32>
    %70 = vector.shape_cast %69 : vector<128xf32> to vector<1x128xf32>
    %c0_68 = arith.constant 0 : index
    %c0_69 = arith.constant 0 : index
    %c0_70 = arith.constant 0 : index
    %71 = vector.load %arg8[%c0_68, %c0_69, %c0_70] : memref<1x1x128xf32, #tpu.memory_space<vmem>>, vector<1x1x128xf32>
    %72 = vector.shape_cast %71 : vector<1x1x128xf32> to vector<1x128xf32>
    %73 = vector.shape_cast %70 : vector<1x128xf32> to vector<1x1x128xf32>
    tpu.vector_store %arg8[%c0_68, %c0_69, %c0_70], %73 {strides = array<i32>} : memref<1x1x128xf32, #tpu.memory_space<vmem>>, vector<1x1x128xf32>,
    %74 = arith.mulf %64, %64 : vector<64x128xf32>
    %cst_71 = arith.constant dense<0.000000e+00> : vector<128xf32>
    %75 = vector.multi_reduction <add>, %74, %cst_71 [0] : vector<64x128xf32> to vector<128xf32>
    %76 = vector.shape_cast %75 : vector<128xf32> to vector<1x128xf32>
    %c0_72 = arith.constant 0 : index
    %c0_73 = arith.constant 0 : index
    %c0_74 = arith.constant 0 : index
    %77 = vector.load %arg9[%c0_72, %c0_73, %c0_74] : memref<1x1x128xf32, #tpu.memory_space<vmem>>, vector<1x1x128xf32>
    %78 = vector.shape_cast %77 : vector<1x1x128xf32> to vector<1x128xf32>
    %79 = vector.shape_cast %76 : vector<1x128xf32> to vector<1x1x128xf32>
    tpu.vector_store %arg9[%c0_72, %c0_73, %c0_74], %79 {strides = array<i32>} : memref<1x1x128xf32, #tpu.memory_space<vmem>>, vector<1x1x128xf32>,
    return
  }
  func.func @transform_0(%arg0: i32) -> (i32, i32, i32, i32) {
    %c0_i32 = arith.constant 0 : i32
    %c0_i32_0 = arith.constant 0 : i32
    %c0_i32_1 = arith.constant 0 : i32
    %c0_i32_2 = arith.constant 0 : i32
    return %arg0, %c0_i32, %c0_i32_0, %c0_i32_1 : i32, i32, i32, i32
  }
  func.func @transform_1(%arg0: i32) -> (i32, i32, i32, i32) {
    %c0_i32 = arith.constant 0 : i32
    %c0_i32_0 = arith.constant 0 : i32
    %c0_i32_1 = arith.constant 0 : i32
    %c0_i32_2 = arith.constant 0 : i32
    return %arg0, %c0_i32, %c0_i32_0, %c0_i32_1 : i32, i32, i32, i32
  }
  func.func @transform_2(%arg0: i32) -> (i32, i32, i32, i32) {
    %c0_i32 = arith.constant 0 : i32
    %c0_i32_0 = arith.constant 0 : i32
    %c0_i32_1 = arith.constant 0 : i32
    %c0_i32_2 = arith.constant 0 : i32
    return %arg0, %c0_i32, %c0_i32_0, %c0_i32_1 : i32, i32, i32, i32
  }
  func.func @transform_3(%arg0: i32) -> (i32, i32, i32, i32) {
    %c0_i32 = arith.constant 0 : i32
    %c0_i32_0 = arith.constant 0 : i32
    %c0_i32_1 = arith.constant 0 : i32
    %c0_i32_2 = arith.constant 0 : i32
    return %arg0, %c0_i32, %c0_i32_0, %c0_i32_1 : i32, i32, i32, i32
  }
  func.func @transform_4(%arg0: i32) -> (i32, i32, i32) {
    %c0_i32 = arith.constant 0 : i32
    %c0_i32_0 = arith.constant 0 : i32
    %c0_i32_1 = arith.constant 0 : i32
    %c0_i32_2 = arith.constant 0 : i32
    return %c0_i32, %c0_i32_0, %c0_i32_1 : i32, i32, i32
  }
  func.func @transform_5(%arg0: i32) -> (i32, i32) {
    %c0_i32 = arith.constant 0 : i32
    %c0_i32_0 = arith.constant 0 : i32
    %c0_i32_1 = arith.constant 0 : i32
    return %c0_i32, %c0_i32_0 : i32, i32
  }
  func.func @transform_6(%arg0: i32) -> (i32, i32, i32) {
    %c0_i32 = arith.constant 0 : i32
    %c0_i32_0 = arith.constant 0 : i32
    %c0_i32_1 = arith.constant 0 : i32
    return %arg0, %c0_i32, %c0_i32_0 : i32, i32, i32
  }
  func.func @transform_7(%arg0: i32) -> (i32, i32, i32) {
    %c0_i32 = arith.constant 0 : i32
    %c0_i32_0 = arith.constant 0 : i32
    %c0_i32_1 = arith.constant 0 : i32
    return %arg0, %c0_i32, %c0_i32_0 : i32, i32, i32
  }
  func.func @transform_8(%arg0: i32) -> (i32, i32, i32) {
    %c0_i32 = arith.constant 0 : i32
    %c0_i32_0 = arith.constant 0 : i32
    %c0_i32_1 = arith.constant 0 : i32
    return %arg0, %c0_i32, %c0_i32_0 : i32, i32, i32
  }
}

module attributes {stable_mosaic.version = 11 : i64} {
  func.func @kernel(%arg0: i32, %arg1: memref<1x5x5x128xbf16, #tpu.memory_space<vmem>>, %arg2: memref<1x5x5x128xbf16, #tpu.memory_space<vmem>>, %arg3: memref<1x5x5x128xbf16, #tpu.memory_space<vmem>>, %arg4: memref<1x5x5x128xbf16, #tpu.memory_space<vmem>>, %arg5: memref<9x128x256xbf16, #tpu.memory_space<vmem>>, %arg6: memref<1x256xf32, #tpu.memory_space<vmem>>, %arg7: memref<1x16x256xbf16, #tpu.memory_space<vmem>>, %arg8: memref<1x1x256xf32, #tpu.memory_space<vmem>>, %arg9: memref<1x1x256xf32, #tpu.memory_space<vmem>>) attributes {dimension_semantics = [#tpu.dimension_semantics<parallel>], iteration_bounds = array<i64: 2>, scalar_prefetch = 0 : i64, scratch_operands = 0 : i64, tpu.core_type = #tpu.core_type<tc>, window_params = [{transform_indices = @transform_0, window_bounds = array<i64: 1, 5, 5, 128>}, {transform_indices = @transform_1, window_bounds = array<i64: 1, 5, 5, 128>}, {transform_indices = @transform_2, window_bounds = array<i64: 1, 5, 5, 128>}, {transform_indices = @transform_3, window_bounds = array<i64: 1, 5, 5, 128>}, {pipeline_mode = #tpu.pipeline_mode<synchronous>, transform_indices = @transform_4, window_bounds = array<i64: 9, 128, 256>}, {pipeline_mode = #tpu.pipeline_mode<synchronous>, transform_indices = @transform_5, window_bounds = array<i64: 1, 256>}, {transform_indices = @transform_6, window_bounds = array<i64: 1, 16, 256>}, {transform_indices = @transform_7, window_bounds = array<i64: 1, 1, 256>}, {transform_indices = @transform_8, window_bounds = array<i64: 1, 1, 256>}]} {
    %c0 = arith.constant 0 : index
    %c0_0 = arith.constant 0 : index
    %c0_1 = arith.constant 0 : index
    %c0_2 = arith.constant 0 : index
    %0 = vector.load %arg1[%c0, %c0_0, %c0_1, %c0_2] : memref<1x5x5x128xbf16, #tpu.memory_space<vmem>>, vector<1x4x4x128xbf16>
    %1 = vector.shape_cast %0 : vector<1x4x4x128xbf16> to vector<4x4x128xbf16>
    %2 = vector.shape_cast %1 : vector<4x4x128xbf16> to vector<16x128xbf16>
    %c0_3 = arith.constant 0 : index
    %c0_4 = arith.constant 0 : index
    %c0_5 = arith.constant 0 : index
    %3 = vector.load %arg5[%c0_3, %c0_4, %c0_5] : memref<9x128x256xbf16, #tpu.memory_space<vmem>>, vector<1x128x256xbf16>
    %4 = vector.shape_cast %3 : vector<1x128x256xbf16> to vector<128x256xbf16>
    %cst = arith.constant dense<0.000000e+00> : vector<16x256xf32>
    %5 = tpu.matmul %2, %4, %cst {dimension_numbers = #tpu.dot_dimension_numbers<[1], [0], [0], [1], [0, 0, 1, 1], [], []>} : vector<16x128xbf16>, vector<128x256xbf16>, vector<16x256xf32> -> vector<16x256xf32>
    %c0_6 = arith.constant 0 : index
    %c0_7 = arith.constant 0 : index
    %c0_8 = arith.constant 0 : index
    %c0_9 = arith.constant 0 : index
    %6 = vector.load %arg2[%c0_6, %c0_7, %c0_8, %c0_9] : memref<1x5x5x128xbf16, #tpu.memory_space<vmem>>, vector<1x4x4x128xbf16>
    %7 = vector.shape_cast %6 : vector<1x4x4x128xbf16> to vector<4x4x128xbf16>
    %8 = vector.shape_cast %7 : vector<4x4x128xbf16> to vector<16x128xbf16>
    %c1 = arith.constant 1 : index
    %c0_10 = arith.constant 0 : index
    %c0_11 = arith.constant 0 : index
    %9 = vector.load %arg5[%c1, %c0_10, %c0_11] : memref<9x128x256xbf16, #tpu.memory_space<vmem>>, vector<1x128x256xbf16>
    %10 = vector.shape_cast %9 : vector<1x128x256xbf16> to vector<128x256xbf16>
    %cst_12 = arith.constant dense<0.000000e+00> : vector<16x256xf32>
    %11 = tpu.matmul %8, %10, %cst_12 {dimension_numbers = #tpu.dot_dimension_numbers<[1], [0], [0], [1], [0, 0, 1, 1], [], []>} : vector<16x128xbf16>, vector<128x256xbf16>, vector<16x256xf32> -> vector<16x256xf32>
    %12 = arith.addf %5, %11 : vector<16x256xf32>
    %c0_13 = arith.constant 0 : index
    %c0_14 = arith.constant 0 : index
    %c1_15 = arith.constant 1 : index
    %c0_16 = arith.constant 0 : index
    %13 = vector.load %arg1[%c0_13, %c0_14, %c1_15, %c0_16] : memref<1x5x5x128xbf16, #tpu.memory_space<vmem>>, vector<1x4x4x128xbf16>
    %14 = vector.shape_cast %13 : vector<1x4x4x128xbf16> to vector<4x4x128xbf16>
    %15 = vector.shape_cast %14 : vector<4x4x128xbf16> to vector<16x128xbf16>
    %c2 = arith.constant 2 : index
    %c0_17 = arith.constant 0 : index
    %c0_18 = arith.constant 0 : index
    %16 = vector.load %arg5[%c2, %c0_17, %c0_18] : memref<9x128x256xbf16, #tpu.memory_space<vmem>>, vector<1x128x256xbf16>
    %17 = vector.shape_cast %16 : vector<1x128x256xbf16> to vector<128x256xbf16>
    %cst_19 = arith.constant dense<0.000000e+00> : vector<16x256xf32>
    %18 = tpu.matmul %15, %17, %cst_19 {dimension_numbers = #tpu.dot_dimension_numbers<[1], [0], [0], [1], [0, 0, 1, 1], [], []>} : vector<16x128xbf16>, vector<128x256xbf16>, vector<16x256xf32> -> vector<16x256xf32>
    %19 = arith.addf %12, %18 : vector<16x256xf32>
    %c0_20 = arith.constant 0 : index
    %c0_21 = arith.constant 0 : index
    %c0_22 = arith.constant 0 : index
    %c0_23 = arith.constant 0 : index
    %20 = vector.load %arg3[%c0_20, %c0_21, %c0_22, %c0_23] : memref<1x5x5x128xbf16, #tpu.memory_space<vmem>>, vector<1x4x4x128xbf16>
    %21 = vector.shape_cast %20 : vector<1x4x4x128xbf16> to vector<4x4x128xbf16>
    %22 = vector.shape_cast %21 : vector<4x4x128xbf16> to vector<16x128xbf16>
    %c3 = arith.constant 3 : index
    %c0_24 = arith.constant 0 : index
    %c0_25 = arith.constant 0 : index
    %23 = vector.load %arg5[%c3, %c0_24, %c0_25] : memref<9x128x256xbf16, #tpu.memory_space<vmem>>, vector<1x128x256xbf16>
    %24 = vector.shape_cast %23 : vector<1x128x256xbf16> to vector<128x256xbf16>
    %cst_26 = arith.constant dense<0.000000e+00> : vector<16x256xf32>
    %25 = tpu.matmul %22, %24, %cst_26 {dimension_numbers = #tpu.dot_dimension_numbers<[1], [0], [0], [1], [0, 0, 1, 1], [], []>} : vector<16x128xbf16>, vector<128x256xbf16>, vector<16x256xf32> -> vector<16x256xf32>
    %26 = arith.addf %19, %25 : vector<16x256xf32>
    %c0_27 = arith.constant 0 : index
    %c0_28 = arith.constant 0 : index
    %c0_29 = arith.constant 0 : index
    %c0_30 = arith.constant 0 : index
    %27 = vector.load %arg4[%c0_27, %c0_28, %c0_29, %c0_30] : memref<1x5x5x128xbf16, #tpu.memory_space<vmem>>, vector<1x4x4x128xbf16>
    %28 = vector.shape_cast %27 : vector<1x4x4x128xbf16> to vector<4x4x128xbf16>
    %29 = vector.shape_cast %28 : vector<4x4x128xbf16> to vector<16x128xbf16>
    %c4 = arith.constant 4 : index
    %c0_31 = arith.constant 0 : index
    %c0_32 = arith.constant 0 : index
    %30 = vector.load %arg5[%c4, %c0_31, %c0_32] : memref<9x128x256xbf16, #tpu.memory_space<vmem>>, vector<1x128x256xbf16>
    %31 = vector.shape_cast %30 : vector<1x128x256xbf16> to vector<128x256xbf16>
    %cst_33 = arith.constant dense<0.000000e+00> : vector<16x256xf32>
    %32 = tpu.matmul %29, %31, %cst_33 {dimension_numbers = #tpu.dot_dimension_numbers<[1], [0], [0], [1], [0, 0, 1, 1], [], []>} : vector<16x128xbf16>, vector<128x256xbf16>, vector<16x256xf32> -> vector<16x256xf32>
    %33 = arith.addf %26, %32 : vector<16x256xf32>
    %c0_34 = arith.constant 0 : index
    %c0_35 = arith.constant 0 : index
    %c1_36 = arith.constant 1 : index
    %c0_37 = arith.constant 0 : index
    %34 = vector.load %arg3[%c0_34, %c0_35, %c1_36, %c0_37] : memref<1x5x5x128xbf16, #tpu.memory_space<vmem>>, vector<1x4x4x128xbf16>
    %35 = vector.shape_cast %34 : vector<1x4x4x128xbf16> to vector<4x4x128xbf16>
    %36 = vector.shape_cast %35 : vector<4x4x128xbf16> to vector<16x128xbf16>
    %c5 = arith.constant 5 : index
    %c0_38 = arith.constant 0 : index
    %c0_39 = arith.constant 0 : index
    %37 = vector.load %arg5[%c5, %c0_38, %c0_39] : memref<9x128x256xbf16, #tpu.memory_space<vmem>>, vector<1x128x256xbf16>
    %38 = vector.shape_cast %37 : vector<1x128x256xbf16> to vector<128x256xbf16>
    %cst_40 = arith.constant dense<0.000000e+00> : vector<16x256xf32>
    %39 = tpu.matmul %36, %38, %cst_40 {dimension_numbers = #tpu.dot_dimension_numbers<[1], [0], [0], [1], [0, 0, 1, 1], [], []>} : vector<16x128xbf16>, vector<128x256xbf16>, vector<16x256xf32> -> vector<16x256xf32>
    %40 = arith.addf %33, %39 : vector<16x256xf32>
    %c0_41 = arith.constant 0 : index
    %c1_42 = arith.constant 1 : index
    %c0_43 = arith.constant 0 : index
    %c0_44 = arith.constant 0 : index
    %41 = vector.load %arg1[%c0_41, %c1_42, %c0_43, %c0_44] : memref<1x5x5x128xbf16, #tpu.memory_space<vmem>>, vector<1x4x4x128xbf16>
    %42 = vector.shape_cast %41 : vector<1x4x4x128xbf16> to vector<4x4x128xbf16>
    %43 = vector.shape_cast %42 : vector<4x4x128xbf16> to vector<16x128xbf16>
    %c6 = arith.constant 6 : index
    %c0_45 = arith.constant 0 : index
    %c0_46 = arith.constant 0 : index
    %44 = vector.load %arg5[%c6, %c0_45, %c0_46] : memref<9x128x256xbf16, #tpu.memory_space<vmem>>, vector<1x128x256xbf16>
    %45 = vector.shape_cast %44 : vector<1x128x256xbf16> to vector<128x256xbf16>
    %cst_47 = arith.constant dense<0.000000e+00> : vector<16x256xf32>
    %46 = tpu.matmul %43, %45, %cst_47 {dimension_numbers = #tpu.dot_dimension_numbers<[1], [0], [0], [1], [0, 0, 1, 1], [], []>} : vector<16x128xbf16>, vector<128x256xbf16>, vector<16x256xf32> -> vector<16x256xf32>
    %47 = arith.addf %40, %46 : vector<16x256xf32>
    %c0_48 = arith.constant 0 : index
    %c1_49 = arith.constant 1 : index
    %c0_50 = arith.constant 0 : index
    %c0_51 = arith.constant 0 : index
    %48 = vector.load %arg2[%c0_48, %c1_49, %c0_50, %c0_51] : memref<1x5x5x128xbf16, #tpu.memory_space<vmem>>, vector<1x4x4x128xbf16>
    %49 = vector.shape_cast %48 : vector<1x4x4x128xbf16> to vector<4x4x128xbf16>
    %50 = vector.shape_cast %49 : vector<4x4x128xbf16> to vector<16x128xbf16>
    %c7 = arith.constant 7 : index
    %c0_52 = arith.constant 0 : index
    %c0_53 = arith.constant 0 : index
    %51 = vector.load %arg5[%c7, %c0_52, %c0_53] : memref<9x128x256xbf16, #tpu.memory_space<vmem>>, vector<1x128x256xbf16>
    %52 = vector.shape_cast %51 : vector<1x128x256xbf16> to vector<128x256xbf16>
    %cst_54 = arith.constant dense<0.000000e+00> : vector<16x256xf32>
    %53 = tpu.matmul %50, %52, %cst_54 {dimension_numbers = #tpu.dot_dimension_numbers<[1], [0], [0], [1], [0, 0, 1, 1], [], []>} : vector<16x128xbf16>, vector<128x256xbf16>, vector<16x256xf32> -> vector<16x256xf32>
    %54 = arith.addf %47, %53 : vector<16x256xf32>
    %c0_55 = arith.constant 0 : index
    %c1_56 = arith.constant 1 : index
    %c1_57 = arith.constant 1 : index
    %c0_58 = arith.constant 0 : index
    %55 = vector.load %arg1[%c0_55, %c1_56, %c1_57, %c0_58] : memref<1x5x5x128xbf16, #tpu.memory_space<vmem>>, vector<1x4x4x128xbf16>
    %56 = vector.shape_cast %55 : vector<1x4x4x128xbf16> to vector<4x4x128xbf16>
    %57 = vector.shape_cast %56 : vector<4x4x128xbf16> to vector<16x128xbf16>
    %c8 = arith.constant 8 : index
    %c0_59 = arith.constant 0 : index
    %c0_60 = arith.constant 0 : index
    %58 = vector.load %arg5[%c8, %c0_59, %c0_60] : memref<9x128x256xbf16, #tpu.memory_space<vmem>>, vector<1x128x256xbf16>
    %59 = vector.shape_cast %58 : vector<1x128x256xbf16> to vector<128x256xbf16>
    %cst_61 = arith.constant dense<0.000000e+00> : vector<16x256xf32>
    %60 = tpu.matmul %57, %59, %cst_61 {dimension_numbers = #tpu.dot_dimension_numbers<[1], [0], [0], [1], [0, 0, 1, 1], [], []>} : vector<16x128xbf16>, vector<128x256xbf16>, vector<16x256xf32> -> vector<16x256xf32>
    %61 = arith.addf %54, %60 : vector<16x256xf32>
    %c0_62 = arith.constant 0 : index
    %c0_63 = arith.constant 0 : index
    %62 = vector.load %arg6[%c0_62, %c0_63] : memref<1x256xf32, #tpu.memory_space<vmem>>, vector<1x256xf32>
    %63 = vector.broadcast %62 : vector<1x256xf32> to vector<16x256xf32>
    %64 = arith.addf %61, %63 : vector<16x256xf32>
    %65 = arith.truncf %64 : vector<16x256xf32> to vector<16x256xbf16>
    %c0_64 = arith.constant 0 : index
    %c0_65 = arith.constant 0 : index
    %c0_66 = arith.constant 0 : index
    %66 = vector.load %arg7[%c0_64, %c0_65, %c0_66] : memref<1x16x256xbf16, #tpu.memory_space<vmem>>, vector<1x16x256xbf16>
    %67 = vector.shape_cast %66 : vector<1x16x256xbf16> to vector<16x256xbf16>
    %68 = vector.shape_cast %65 : vector<16x256xbf16> to vector<1x16x256xbf16>
    tpu.vector_store %arg7[%c0_64, %c0_65, %c0_66], %68 {strides = array<i32>} : memref<1x16x256xbf16, #tpu.memory_space<vmem>>, vector<1x16x256xbf16>,
    %cst_67 = arith.constant dense<0.000000e+00> : vector<256xf32>
    %69 = vector.multi_reduction <add>, %64, %cst_67 [0] : vector<16x256xf32> to vector<256xf32>
    %70 = vector.shape_cast %69 : vector<256xf32> to vector<1x256xf32>
    %c0_68 = arith.constant 0 : index
    %c0_69 = arith.constant 0 : index
    %c0_70 = arith.constant 0 : index
    %71 = vector.load %arg8[%c0_68, %c0_69, %c0_70] : memref<1x1x256xf32, #tpu.memory_space<vmem>>, vector<1x1x256xf32>
    %72 = vector.shape_cast %71 : vector<1x1x256xf32> to vector<1x256xf32>
    %73 = vector.shape_cast %70 : vector<1x256xf32> to vector<1x1x256xf32>
    tpu.vector_store %arg8[%c0_68, %c0_69, %c0_70], %73 {strides = array<i32>} : memref<1x1x256xf32, #tpu.memory_space<vmem>>, vector<1x1x256xf32>,
    %74 = arith.mulf %64, %64 : vector<16x256xf32>
    %cst_71 = arith.constant dense<0.000000e+00> : vector<256xf32>
    %75 = vector.multi_reduction <add>, %74, %cst_71 [0] : vector<16x256xf32> to vector<256xf32>
    %76 = vector.shape_cast %75 : vector<256xf32> to vector<1x256xf32>
    %c0_72 = arith.constant 0 : index
    %c0_73 = arith.constant 0 : index
    %c0_74 = arith.constant 0 : index
    %77 = vector.load %arg9[%c0_72, %c0_73, %c0_74] : memref<1x1x256xf32, #tpu.memory_space<vmem>>, vector<1x1x256xf32>
    %78 = vector.shape_cast %77 : vector<1x1x256xf32> to vector<1x256xf32>
    %79 = vector.shape_cast %76 : vector<1x256xf32> to vector<1x1x256xf32>
    tpu.vector_store %arg9[%c0_72, %c0_73, %c0_74], %79 {strides = array<i32>} : memref<1x1x256xf32, #tpu.memory_space<vmem>>, vector<1x1x256xf32>,
    return
  }
  func.func @transform_0(%arg0: i32) -> (i32, i32, i32, i32) {
    %c0_i32 = arith.constant 0 : i32
    %c0_i32_0 = arith.constant 0 : i32
    %c0_i32_1 = arith.constant 0 : i32
    %c0_i32_2 = arith.constant 0 : i32
    return %arg0, %c0_i32, %c0_i32_0, %c0_i32_1 : i32, i32, i32, i32
  }
  func.func @transform_1(%arg0: i32) -> (i32, i32, i32, i32) {
    %c0_i32 = arith.constant 0 : i32
    %c0_i32_0 = arith.constant 0 : i32
    %c0_i32_1 = arith.constant 0 : i32
    %c0_i32_2 = arith.constant 0 : i32
    return %arg0, %c0_i32, %c0_i32_0, %c0_i32_1 : i32, i32, i32, i32
  }
  func.func @transform_2(%arg0: i32) -> (i32, i32, i32, i32) {
    %c0_i32 = arith.constant 0 : i32
    %c0_i32_0 = arith.constant 0 : i32
    %c0_i32_1 = arith.constant 0 : i32
    %c0_i32_2 = arith.constant 0 : i32
    return %arg0, %c0_i32, %c0_i32_0, %c0_i32_1 : i32, i32, i32, i32
  }
  func.func @transform_3(%arg0: i32) -> (i32, i32, i32, i32) {
    %c0_i32 = arith.constant 0 : i32
    %c0_i32_0 = arith.constant 0 : i32
    %c0_i32_1 = arith.constant 0 : i32
    %c0_i32_2 = arith.constant 0 : i32
    return %arg0, %c0_i32, %c0_i32_0, %c0_i32_1 : i32, i32, i32, i32
  }
  func.func @transform_4(%arg0: i32) -> (i32, i32, i32) {
    %c0_i32 = arith.constant 0 : i32
    %c0_i32_0 = arith.constant 0 : i32
    %c0_i32_1 = arith.constant 0 : i32
    %c0_i32_2 = arith.constant 0 : i32
    return %c0_i32, %c0_i32_0, %c0_i32_1 : i32, i32, i32
  }
  func.func @transform_5(%arg0: i32) -> (i32, i32) {
    %c0_i32 = arith.constant 0 : i32
    %c0_i32_0 = arith.constant 0 : i32
    %c0_i32_1 = arith.constant 0 : i32
    return %c0_i32, %c0_i32_0 : i32, i32
  }
  func.func @transform_6(%arg0: i32) -> (i32, i32, i32) {
    %c0_i32 = arith.constant 0 : i32
    %c0_i32_0 = arith.constant 0 : i32
    %c0_i32_1 = arith.constant 0 : i32
    return %arg0, %c0_i32, %c0_i32_0 : i32, i32, i32
  }
  func.func @transform_7(%arg0: i32) -> (i32, i32, i32) {
    %c0_i32 = arith.constant 0 : i32
    %c0_i32_0 = arith.constant 0 : i32
    %c0_i32_1 = arith.constant 0 : i32
    return %arg0, %c0_i32, %c0_i32_0 : i32, i32, i32
  }
  func.func @transform_8(%arg0: i32) -> (i32, i32, i32) {
    %c0_i32 = arith.constant 0 : i32
    %c0_i32_0 = arith.constant 0 : i32
    %c0_i32_1 = arith.constant 0 : i32
    return %arg0, %c0_i32, %c0_i32_0 : i32, i32, i32
  }
}

module attributes {stable_mosaic.version = 11 : i64} {
  func.func @kernel(%arg0: i32, %arg1: memref<1x3x3x256xbf16, #tpu.memory_space<vmem>>, %arg2: memref<1x3x3x256xbf16, #tpu.memory_space<vmem>>, %arg3: memref<1x3x3x256xbf16, #tpu.memory_space<vmem>>, %arg4: memref<1x3x3x256xbf16, #tpu.memory_space<vmem>>, %arg5: memref<9x256x512xbf16, #tpu.memory_space<vmem>>, %arg6: memref<1x512xf32, #tpu.memory_space<vmem>>, %arg7: memref<1x4x512xbf16, #tpu.memory_space<vmem>>, %arg8: memref<1x1x512xf32, #tpu.memory_space<vmem>>, %arg9: memref<1x1x512xf32, #tpu.memory_space<vmem>>) attributes {dimension_semantics = [#tpu.dimension_semantics<parallel>], iteration_bounds = array<i64: 2>, scalar_prefetch = 0 : i64, scratch_operands = 0 : i64, tpu.core_type = #tpu.core_type<tc>, window_params = [{transform_indices = @transform_0, window_bounds = array<i64: 1, 3, 3, 256>}, {transform_indices = @transform_1, window_bounds = array<i64: 1, 3, 3, 256>}, {transform_indices = @transform_2, window_bounds = array<i64: 1, 3, 3, 256>}, {transform_indices = @transform_3, window_bounds = array<i64: 1, 3, 3, 256>}, {pipeline_mode = #tpu.pipeline_mode<synchronous>, transform_indices = @transform_4, window_bounds = array<i64: 9, 256, 512>}, {pipeline_mode = #tpu.pipeline_mode<synchronous>, transform_indices = @transform_5, window_bounds = array<i64: 1, 512>}, {transform_indices = @transform_6, window_bounds = array<i64: 1, 4, 512>}, {transform_indices = @transform_7, window_bounds = array<i64: 1, 1, 512>}, {transform_indices = @transform_8, window_bounds = array<i64: 1, 1, 512>}]} {
    %c0 = arith.constant 0 : index
    %c0_0 = arith.constant 0 : index
    %c0_1 = arith.constant 0 : index
    %c0_2 = arith.constant 0 : index
    %0 = vector.load %arg1[%c0, %c0_0, %c0_1, %c0_2] : memref<1x3x3x256xbf16, #tpu.memory_space<vmem>>, vector<1x2x2x256xbf16>
    %1 = vector.shape_cast %0 : vector<1x2x2x256xbf16> to vector<2x2x256xbf16>
    %2 = vector.shape_cast %1 : vector<2x2x256xbf16> to vector<4x256xbf16>
    %c0_3 = arith.constant 0 : index
    %c0_4 = arith.constant 0 : index
    %c0_5 = arith.constant 0 : index
    %3 = vector.load %arg5[%c0_3, %c0_4, %c0_5] : memref<9x256x512xbf16, #tpu.memory_space<vmem>>, vector<1x256x512xbf16>
    %4 = vector.shape_cast %3 : vector<1x256x512xbf16> to vector<256x512xbf16>
    %cst = arith.constant dense<0.000000e+00> : vector<4x512xf32>
    %5 = tpu.matmul %2, %4, %cst {dimension_numbers = #tpu.dot_dimension_numbers<[1], [0], [0], [1], [0, 0, 1, 1], [], []>} : vector<4x256xbf16>, vector<256x512xbf16>, vector<4x512xf32> -> vector<4x512xf32>
    %c0_6 = arith.constant 0 : index
    %c0_7 = arith.constant 0 : index
    %c0_8 = arith.constant 0 : index
    %c0_9 = arith.constant 0 : index
    %6 = vector.load %arg2[%c0_6, %c0_7, %c0_8, %c0_9] : memref<1x3x3x256xbf16, #tpu.memory_space<vmem>>, vector<1x2x2x256xbf16>
    %7 = vector.shape_cast %6 : vector<1x2x2x256xbf16> to vector<2x2x256xbf16>
    %8 = vector.shape_cast %7 : vector<2x2x256xbf16> to vector<4x256xbf16>
    %c1 = arith.constant 1 : index
    %c0_10 = arith.constant 0 : index
    %c0_11 = arith.constant 0 : index
    %9 = vector.load %arg5[%c1, %c0_10, %c0_11] : memref<9x256x512xbf16, #tpu.memory_space<vmem>>, vector<1x256x512xbf16>
    %10 = vector.shape_cast %9 : vector<1x256x512xbf16> to vector<256x512xbf16>
    %cst_12 = arith.constant dense<0.000000e+00> : vector<4x512xf32>
    %11 = tpu.matmul %8, %10, %cst_12 {dimension_numbers = #tpu.dot_dimension_numbers<[1], [0], [0], [1], [0, 0, 1, 1], [], []>} : vector<4x256xbf16>, vector<256x512xbf16>, vector<4x512xf32> -> vector<4x512xf32>
    %12 = arith.addf %5, %11 : vector<4x512xf32>
    %c0_13 = arith.constant 0 : index
    %c0_14 = arith.constant 0 : index
    %c1_15 = arith.constant 1 : index
    %c0_16 = arith.constant 0 : index
    %13 = vector.load %arg1[%c0_13, %c0_14, %c1_15, %c0_16] : memref<1x3x3x256xbf16, #tpu.memory_space<vmem>>, vector<1x2x2x256xbf16>
    %14 = vector.shape_cast %13 : vector<1x2x2x256xbf16> to vector<2x2x256xbf16>
    %15 = vector.shape_cast %14 : vector<2x2x256xbf16> to vector<4x256xbf16>
    %c2 = arith.constant 2 : index
    %c0_17 = arith.constant 0 : index
    %c0_18 = arith.constant 0 : index
    %16 = vector.load %arg5[%c2, %c0_17, %c0_18] : memref<9x256x512xbf16, #tpu.memory_space<vmem>>, vector<1x256x512xbf16>
    %17 = vector.shape_cast %16 : vector<1x256x512xbf16> to vector<256x512xbf16>
    %cst_19 = arith.constant dense<0.000000e+00> : vector<4x512xf32>
    %18 = tpu.matmul %15, %17, %cst_19 {dimension_numbers = #tpu.dot_dimension_numbers<[1], [0], [0], [1], [0, 0, 1, 1], [], []>} : vector<4x256xbf16>, vector<256x512xbf16>, vector<4x512xf32> -> vector<4x512xf32>
    %19 = arith.addf %12, %18 : vector<4x512xf32>
    %c0_20 = arith.constant 0 : index
    %c0_21 = arith.constant 0 : index
    %c0_22 = arith.constant 0 : index
    %c0_23 = arith.constant 0 : index
    %20 = vector.load %arg3[%c0_20, %c0_21, %c0_22, %c0_23] : memref<1x3x3x256xbf16, #tpu.memory_space<vmem>>, vector<1x2x2x256xbf16>
    %21 = vector.shape_cast %20 : vector<1x2x2x256xbf16> to vector<2x2x256xbf16>
    %22 = vector.shape_cast %21 : vector<2x2x256xbf16> to vector<4x256xbf16>
    %c3 = arith.constant 3 : index
    %c0_24 = arith.constant 0 : index
    %c0_25 = arith.constant 0 : index
    %23 = vector.load %arg5[%c3, %c0_24, %c0_25] : memref<9x256x512xbf16, #tpu.memory_space<vmem>>, vector<1x256x512xbf16>
    %24 = vector.shape_cast %23 : vector<1x256x512xbf16> to vector<256x512xbf16>
    %cst_26 = arith.constant dense<0.000000e+00> : vector<4x512xf32>
    %25 = tpu.matmul %22, %24, %cst_26 {dimension_numbers = #tpu.dot_dimension_numbers<[1], [0], [0], [1], [0, 0, 1, 1], [], []>} : vector<4x256xbf16>, vector<256x512xbf16>, vector<4x512xf32> -> vector<4x512xf32>
    %26 = arith.addf %19, %25 : vector<4x512xf32>
    %c0_27 = arith.constant 0 : index
    %c0_28 = arith.constant 0 : index
    %c0_29 = arith.constant 0 : index
    %c0_30 = arith.constant 0 : index
    %27 = vector.load %arg4[%c0_27, %c0_28, %c0_29, %c0_30] : memref<1x3x3x256xbf16, #tpu.memory_space<vmem>>, vector<1x2x2x256xbf16>
    %28 = vector.shape_cast %27 : vector<1x2x2x256xbf16> to vector<2x2x256xbf16>
    %29 = vector.shape_cast %28 : vector<2x2x256xbf16> to vector<4x256xbf16>
    %c4 = arith.constant 4 : index
    %c0_31 = arith.constant 0 : index
    %c0_32 = arith.constant 0 : index
    %30 = vector.load %arg5[%c4, %c0_31, %c0_32] : memref<9x256x512xbf16, #tpu.memory_space<vmem>>, vector<1x256x512xbf16>
    %31 = vector.shape_cast %30 : vector<1x256x512xbf16> to vector<256x512xbf16>
    %cst_33 = arith.constant dense<0.000000e+00> : vector<4x512xf32>
    %32 = tpu.matmul %29, %31, %cst_33 {dimension_numbers = #tpu.dot_dimension_numbers<[1], [0], [0], [1], [0, 0, 1, 1], [], []>} : vector<4x256xbf16>, vector<256x512xbf16>, vector<4x512xf32> -> vector<4x512xf32>
    %33 = arith.addf %26, %32 : vector<4x512xf32>
    %c0_34 = arith.constant 0 : index
    %c0_35 = arith.constant 0 : index
    %c1_36 = arith.constant 1 : index
    %c0_37 = arith.constant 0 : index
    %34 = vector.load %arg3[%c0_34, %c0_35, %c1_36, %c0_37] : memref<1x3x3x256xbf16, #tpu.memory_space<vmem>>, vector<1x2x2x256xbf16>
    %35 = vector.shape_cast %34 : vector<1x2x2x256xbf16> to vector<2x2x256xbf16>
    %36 = vector.shape_cast %35 : vector<2x2x256xbf16> to vector<4x256xbf16>
    %c5 = arith.constant 5 : index
    %c0_38 = arith.constant 0 : index
    %c0_39 = arith.constant 0 : index
    %37 = vector.load %arg5[%c5, %c0_38, %c0_39] : memref<9x256x512xbf16, #tpu.memory_space<vmem>>, vector<1x256x512xbf16>
    %38 = vector.shape_cast %37 : vector<1x256x512xbf16> to vector<256x512xbf16>
    %cst_40 = arith.constant dense<0.000000e+00> : vector<4x512xf32>
    %39 = tpu.matmul %36, %38, %cst_40 {dimension_numbers = #tpu.dot_dimension_numbers<[1], [0], [0], [1], [0, 0, 1, 1], [], []>} : vector<4x256xbf16>, vector<256x512xbf16>, vector<4x512xf32> -> vector<4x512xf32>
    %40 = arith.addf %33, %39 : vector<4x512xf32>
    %c0_41 = arith.constant 0 : index
    %c1_42 = arith.constant 1 : index
    %c0_43 = arith.constant 0 : index
    %c0_44 = arith.constant 0 : index
    %41 = vector.load %arg1[%c0_41, %c1_42, %c0_43, %c0_44] : memref<1x3x3x256xbf16, #tpu.memory_space<vmem>>, vector<1x2x2x256xbf16>
    %42 = vector.shape_cast %41 : vector<1x2x2x256xbf16> to vector<2x2x256xbf16>
    %43 = vector.shape_cast %42 : vector<2x2x256xbf16> to vector<4x256xbf16>
    %c6 = arith.constant 6 : index
    %c0_45 = arith.constant 0 : index
    %c0_46 = arith.constant 0 : index
    %44 = vector.load %arg5[%c6, %c0_45, %c0_46] : memref<9x256x512xbf16, #tpu.memory_space<vmem>>, vector<1x256x512xbf16>
    %45 = vector.shape_cast %44 : vector<1x256x512xbf16> to vector<256x512xbf16>
    %cst_47 = arith.constant dense<0.000000e+00> : vector<4x512xf32>
    %46 = tpu.matmul %43, %45, %cst_47 {dimension_numbers = #tpu.dot_dimension_numbers<[1], [0], [0], [1], [0, 0, 1, 1], [], []>} : vector<4x256xbf16>, vector<256x512xbf16>, vector<4x512xf32> -> vector<4x512xf32>
    %47 = arith.addf %40, %46 : vector<4x512xf32>
    %c0_48 = arith.constant 0 : index
    %c1_49 = arith.constant 1 : index
    %c0_50 = arith.constant 0 : index
    %c0_51 = arith.constant 0 : index
    %48 = vector.load %arg2[%c0_48, %c1_49, %c0_50, %c0_51] : memref<1x3x3x256xbf16, #tpu.memory_space<vmem>>, vector<1x2x2x256xbf16>
    %49 = vector.shape_cast %48 : vector<1x2x2x256xbf16> to vector<2x2x256xbf16>
    %50 = vector.shape_cast %49 : vector<2x2x256xbf16> to vector<4x256xbf16>
    %c7 = arith.constant 7 : index
    %c0_52 = arith.constant 0 : index
    %c0_53 = arith.constant 0 : index
    %51 = vector.load %arg5[%c7, %c0_52, %c0_53] : memref<9x256x512xbf16, #tpu.memory_space<vmem>>, vector<1x256x512xbf16>
    %52 = vector.shape_cast %51 : vector<1x256x512xbf16> to vector<256x512xbf16>
    %cst_54 = arith.constant dense<0.000000e+00> : vector<4x512xf32>
    %53 = tpu.matmul %50, %52, %cst_54 {dimension_numbers = #tpu.dot_dimension_numbers<[1], [0], [0], [1], [0, 0, 1, 1], [], []>} : vector<4x256xbf16>, vector<256x512xbf16>, vector<4x512xf32> -> vector<4x512xf32>
    %54 = arith.addf %47, %53 : vector<4x512xf32>
    %c0_55 = arith.constant 0 : index
    %c1_56 = arith.constant 1 : index
    %c1_57 = arith.constant 1 : index
    %c0_58 = arith.constant 0 : index
    %55 = vector.load %arg1[%c0_55, %c1_56, %c1_57, %c0_58] : memref<1x3x3x256xbf16, #tpu.memory_space<vmem>>, vector<1x2x2x256xbf16>
    %56 = vector.shape_cast %55 : vector<1x2x2x256xbf16> to vector<2x2x256xbf16>
    %57 = vector.shape_cast %56 : vector<2x2x256xbf16> to vector<4x256xbf16>
    %c8 = arith.constant 8 : index
    %c0_59 = arith.constant 0 : index
    %c0_60 = arith.constant 0 : index
    %58 = vector.load %arg5[%c8, %c0_59, %c0_60] : memref<9x256x512xbf16, #tpu.memory_space<vmem>>, vector<1x256x512xbf16>
    %59 = vector.shape_cast %58 : vector<1x256x512xbf16> to vector<256x512xbf16>
    %cst_61 = arith.constant dense<0.000000e+00> : vector<4x512xf32>
    %60 = tpu.matmul %57, %59, %cst_61 {dimension_numbers = #tpu.dot_dimension_numbers<[1], [0], [0], [1], [0, 0, 1, 1], [], []>} : vector<4x256xbf16>, vector<256x512xbf16>, vector<4x512xf32> -> vector<4x512xf32>
    %61 = arith.addf %54, %60 : vector<4x512xf32>
    %c0_62 = arith.constant 0 : index
    %c0_63 = arith.constant 0 : index
    %62 = vector.load %arg6[%c0_62, %c0_63] : memref<1x512xf32, #tpu.memory_space<vmem>>, vector<1x512xf32>
    %63 = vector.broadcast %62 : vector<1x512xf32> to vector<4x512xf32>
    %64 = arith.addf %61, %63 : vector<4x512xf32>
    %65 = arith.truncf %64 : vector<4x512xf32> to vector<4x512xbf16>
    %c0_64 = arith.constant 0 : index
    %c0_65 = arith.constant 0 : index
    %c0_66 = arith.constant 0 : index
    %66 = vector.load %arg7[%c0_64, %c0_65, %c0_66] : memref<1x4x512xbf16, #tpu.memory_space<vmem>>, vector<1x4x512xbf16>
    %67 = vector.shape_cast %66 : vector<1x4x512xbf16> to vector<4x512xbf16>
    %68 = vector.shape_cast %65 : vector<4x512xbf16> to vector<1x4x512xbf16>
    tpu.vector_store %arg7[%c0_64, %c0_65, %c0_66], %68 {strides = array<i32>} : memref<1x4x512xbf16, #tpu.memory_space<vmem>>, vector<1x4x512xbf16>,
    %cst_67 = arith.constant dense<0.000000e+00> : vector<512xf32>
    %69 = vector.multi_reduction <add>, %64, %cst_67 [0] : vector<4x512xf32> to vector<512xf32>
    %70 = vector.shape_cast %69 : vector<512xf32> to vector<1x512xf32>
    %c0_68 = arith.constant 0 : index
    %c0_69 = arith.constant 0 : index
    %c0_70 = arith.constant 0 : index
    %71 = vector.load %arg8[%c0_68, %c0_69, %c0_70] : memref<1x1x512xf32, #tpu.memory_space<vmem>>, vector<1x1x512xf32>
    %72 = vector.shape_cast %71 : vector<1x1x512xf32> to vector<1x512xf32>
    %73 = vector.shape_cast %70 : vector<1x512xf32> to vector<1x1x512xf32>
    tpu.vector_store %arg8[%c0_68, %c0_69, %c0_70], %73 {strides = array<i32>} : memref<1x1x512xf32, #tpu.memory_space<vmem>>, vector<1x1x512xf32>,
    %74 = arith.mulf %64, %64 : vector<4x512xf32>
    %cst_71 = arith.constant dense<0.000000e+00> : vector<512xf32>
    %75 = vector.multi_reduction <add>, %74, %cst_71 [0] : vector<4x512xf32> to vector<512xf32>
    %76 = vector.shape_cast %75 : vector<512xf32> to vector<1x512xf32>
    %c0_72 = arith.constant 0 : index
    %c0_73 = arith.constant 0 : index
    %c0_74 = arith.constant 0 : index
    %77 = vector.load %arg9[%c0_72, %c0_73, %c0_74] : memref<1x1x512xf32, #tpu.memory_space<vmem>>, vector<1x1x512xf32>
    %78 = vector.shape_cast %77 : vector<1x1x512xf32> to vector<1x512xf32>
    %79 = vector.shape_cast %76 : vector<1x512xf32> to vector<1x1x512xf32>
    tpu.vector_store %arg9[%c0_72, %c0_73, %c0_74], %79 {strides = array<i32>} : memref<1x1x512xf32, #tpu.memory_space<vmem>>, vector<1x1x512xf32>,
    return
  }
  func.func @transform_0(%arg0: i32) -> (i32, i32, i32, i32) {
    %c0_i32 = arith.constant 0 : i32
    %c0_i32_0 = arith.constant 0 : i32
    %c0_i32_1 = arith.constant 0 : i32
    %c0_i32_2 = arith.constant 0 : i32
    return %arg0, %c0_i32, %c0_i32_0, %c0_i32_1 : i32, i32, i32, i32
  }
  func.func @transform_1(%arg0: i32) -> (i32, i32, i32, i32) {
    %c0_i32 = arith.constant 0 : i32
    %c0_i32_0 = arith.constant 0 : i32
    %c0_i32_1 = arith.constant 0 : i32
    %c0_i32_2 = arith.constant 0 : i32
    return %arg0, %c0_i32, %c0_i32_0, %c0_i32_1 : i32, i32, i32, i32
  }
  func.func @transform_2(%arg0: i32) -> (i32, i32, i32, i32) {
    %c0_i32 = arith.constant 0 : i32
    %c0_i32_0 = arith.constant 0 : i32
    %c0_i32_1 = arith.constant 0 : i32
    %c0_i32_2 = arith.constant 0 : i32
    return %arg0, %c0_i32, %c0_i32_0, %c0_i32_1 : i32, i32, i32, i32
  }
  func.func @transform_3(%arg0: i32) -> (i32, i32, i32, i32) {
    %c0_i32 = arith.constant 0 : i32
    %c0_i32_0 = arith.constant 0 : i32
    %c0_i32_1 = arith.constant 0 : i32
    %c0_i32_2 = arith.constant 0 : i32
    return %arg0, %c0_i32, %c0_i32_0, %c0_i32_1 : i32, i32, i32, i32
  }
  func.func @transform_4(%arg0: i32) -> (i32, i32, i32) {
    %c0_i32 = arith.constant 0 : i32
    %c0_i32_0 = arith.constant 0 : i32
    %c0_i32_1 = arith.constant 0 : i32
    %c0_i32_2 = arith.constant 0 : i32
    return %c0_i32, %c0_i32_0, %c0_i32_1 : i32, i32, i32
  }
  func.func @transform_5(%arg0: i32) -> (i32, i32) {
    %c0_i32 = arith.constant 0 : i32
    %c0_i32_0 = arith.constant 0 : i32
    %c0_i32_1 = arith.constant 0 : i32
    return %c0_i32, %c0_i32_0 : i32, i32
  }
  func.func @transform_6(%arg0: i32) -> (i32, i32, i32) {
    %c0_i32 = arith.constant 0 : i32
    %c0_i32_0 = arith.constant 0 : i32
    %c0_i32_1 = arith.constant 0 : i32
    return %arg0, %c0_i32, %c0_i32_0 : i32, i32, i32
  }
  func.func @transform_7(%arg0: i32) -> (i32, i32, i32) {
    %c0_i32 = arith.constant 0 : i32
    %c0_i32_0 = arith.constant 0 : i32
    %c0_i32_1 = arith.constant 0 : i32
    return %arg0, %c0_i32, %c0_i32_0 : i32, i32, i32
  }
  func.func @transform_8(%arg0: i32) -> (i32, i32, i32) {
    %c0_i32 = arith.constant 0 : i32
    %c0_i32_0 = arith.constant 0 : i32
    %c0_i32_1 = arith.constant 0 : i32
    return %arg0, %c0_i32, %c0_i32_0 : i32, i32, i32
  }
}

module attributes {stable_mosaic.version = 11 : i64} {
  func.func @kernel(%arg0: i32, %arg1: memref<1x4x4x512xbf16, #tpu.memory_space<vmem>>, %arg2: memref<9x512x128xbf16, #tpu.memory_space<vmem>>, %arg3: memref<1x128xf32, #tpu.memory_space<vmem>>, %arg4: memref<1x4x128xf32, #tpu.memory_space<vmem>>) attributes {dimension_semantics = [#tpu.dimension_semantics<parallel>], iteration_bounds = array<i64: 2>, scalar_prefetch = 0 : i64, scratch_operands = 0 : i64, tpu.core_type = #tpu.core_type<tc>, window_params = [{transform_indices = @transform_0, window_bounds = array<i64: 1, 4, 4, 512>}, {pipeline_mode = #tpu.pipeline_mode<synchronous>, transform_indices = @transform_1, window_bounds = array<i64: 9, 512, 128>}, {pipeline_mode = #tpu.pipeline_mode<synchronous>, transform_indices = @transform_2, window_bounds = array<i64: 1, 128>}, {transform_indices = @transform_3, window_bounds = array<i64: 1, 4, 128>}]} {
    %c0 = arith.constant 0 : index
    %c0_0 = arith.constant 0 : index
    %c0_1 = arith.constant 0 : index
    %c0_2 = arith.constant 0 : index
    %0 = vector.load %arg1[%c0, %c0_0, %c0_1, %c0_2] : memref<1x4x4x512xbf16, #tpu.memory_space<vmem>>, vector<1x2x2x512xbf16>
    %1 = vector.shape_cast %0 : vector<1x2x2x512xbf16> to vector<2x2x512xbf16>
    %2 = vector.shape_cast %1 : vector<2x2x512xbf16> to vector<4x512xbf16>
    %c0_3 = arith.constant 0 : index
    %c0_4 = arith.constant 0 : index
    %c0_5 = arith.constant 0 : index
    %3 = vector.load %arg2[%c0_3, %c0_4, %c0_5] : memref<9x512x128xbf16, #tpu.memory_space<vmem>>, vector<1x512x128xbf16>
    %4 = vector.shape_cast %3 : vector<1x512x128xbf16> to vector<512x128xbf16>
    %cst = arith.constant dense<0.000000e+00> : vector<4x128xf32>
    %5 = tpu.matmul %2, %4, %cst {dimension_numbers = #tpu.dot_dimension_numbers<[1], [0], [0], [1], [0, 0, 1, 1], [], []>} : vector<4x512xbf16>, vector<512x128xbf16>, vector<4x128xf32> -> vector<4x128xf32>
    %c0_6 = arith.constant 0 : index
    %c0_7 = arith.constant 0 : index
    %c1 = arith.constant 1 : index
    %c0_8 = arith.constant 0 : index
    %6 = vector.load %arg1[%c0_6, %c0_7, %c1, %c0_8] : memref<1x4x4x512xbf16, #tpu.memory_space<vmem>>, vector<1x2x2x512xbf16>
    %7 = vector.shape_cast %6 : vector<1x2x2x512xbf16> to vector<2x2x512xbf16>
    %8 = vector.shape_cast %7 : vector<2x2x512xbf16> to vector<4x512xbf16>
    %c1_9 = arith.constant 1 : index
    %c0_10 = arith.constant 0 : index
    %c0_11 = arith.constant 0 : index
    %9 = vector.load %arg2[%c1_9, %c0_10, %c0_11] : memref<9x512x128xbf16, #tpu.memory_space<vmem>>, vector<1x512x128xbf16>
    %10 = vector.shape_cast %9 : vector<1x512x128xbf16> to vector<512x128xbf16>
    %cst_12 = arith.constant dense<0.000000e+00> : vector<4x128xf32>
    %11 = tpu.matmul %8, %10, %cst_12 {dimension_numbers = #tpu.dot_dimension_numbers<[1], [0], [0], [1], [0, 0, 1, 1], [], []>} : vector<4x512xbf16>, vector<512x128xbf16>, vector<4x128xf32> -> vector<4x128xf32>
    %12 = arith.addf %5, %11 : vector<4x128xf32>
    %c0_13 = arith.constant 0 : index
    %c0_14 = arith.constant 0 : index
    %c2 = arith.constant 2 : index
    %c0_15 = arith.constant 0 : index
    %13 = vector.load %arg1[%c0_13, %c0_14, %c2, %c0_15] : memref<1x4x4x512xbf16, #tpu.memory_space<vmem>>, vector<1x2x2x512xbf16>
    %14 = vector.shape_cast %13 : vector<1x2x2x512xbf16> to vector<2x2x512xbf16>
    %15 = vector.shape_cast %14 : vector<2x2x512xbf16> to vector<4x512xbf16>
    %c2_16 = arith.constant 2 : index
    %c0_17 = arith.constant 0 : index
    %c0_18 = arith.constant 0 : index
    %16 = vector.load %arg2[%c2_16, %c0_17, %c0_18] : memref<9x512x128xbf16, #tpu.memory_space<vmem>>, vector<1x512x128xbf16>
    %17 = vector.shape_cast %16 : vector<1x512x128xbf16> to vector<512x128xbf16>
    %cst_19 = arith.constant dense<0.000000e+00> : vector<4x128xf32>
    %18 = tpu.matmul %15, %17, %cst_19 {dimension_numbers = #tpu.dot_dimension_numbers<[1], [0], [0], [1], [0, 0, 1, 1], [], []>} : vector<4x512xbf16>, vector<512x128xbf16>, vector<4x128xf32> -> vector<4x128xf32>
    %19 = arith.addf %12, %18 : vector<4x128xf32>
    %c0_20 = arith.constant 0 : index
    %c1_21 = arith.constant 1 : index
    %c0_22 = arith.constant 0 : index
    %c0_23 = arith.constant 0 : index
    %20 = vector.load %arg1[%c0_20, %c1_21, %c0_22, %c0_23] : memref<1x4x4x512xbf16, #tpu.memory_space<vmem>>, vector<1x2x2x512xbf16>
    %21 = vector.shape_cast %20 : vector<1x2x2x512xbf16> to vector<2x2x512xbf16>
    %22 = vector.shape_cast %21 : vector<2x2x512xbf16> to vector<4x512xbf16>
    %c3 = arith.constant 3 : index
    %c0_24 = arith.constant 0 : index
    %c0_25 = arith.constant 0 : index
    %23 = vector.load %arg2[%c3, %c0_24, %c0_25] : memref<9x512x128xbf16, #tpu.memory_space<vmem>>, vector<1x512x128xbf16>
    %24 = vector.shape_cast %23 : vector<1x512x128xbf16> to vector<512x128xbf16>
    %cst_26 = arith.constant dense<0.000000e+00> : vector<4x128xf32>
    %25 = tpu.matmul %22, %24, %cst_26 {dimension_numbers = #tpu.dot_dimension_numbers<[1], [0], [0], [1], [0, 0, 1, 1], [], []>} : vector<4x512xbf16>, vector<512x128xbf16>, vector<4x128xf32> -> vector<4x128xf32>
    %26 = arith.addf %19, %25 : vector<4x128xf32>
    %c0_27 = arith.constant 0 : index
    %c1_28 = arith.constant 1 : index
    %c1_29 = arith.constant 1 : index
    %c0_30 = arith.constant 0 : index
    %27 = vector.load %arg1[%c0_27, %c1_28, %c1_29, %c0_30] : memref<1x4x4x512xbf16, #tpu.memory_space<vmem>>, vector<1x2x2x512xbf16>
    %28 = vector.shape_cast %27 : vector<1x2x2x512xbf16> to vector<2x2x512xbf16>
    %29 = vector.shape_cast %28 : vector<2x2x512xbf16> to vector<4x512xbf16>
    %c4 = arith.constant 4 : index
    %c0_31 = arith.constant 0 : index
    %c0_32 = arith.constant 0 : index
    %30 = vector.load %arg2[%c4, %c0_31, %c0_32] : memref<9x512x128xbf16, #tpu.memory_space<vmem>>, vector<1x512x128xbf16>
    %31 = vector.shape_cast %30 : vector<1x512x128xbf16> to vector<512x128xbf16>
    %cst_33 = arith.constant dense<0.000000e+00> : vector<4x128xf32>
    %32 = tpu.matmul %29, %31, %cst_33 {dimension_numbers = #tpu.dot_dimension_numbers<[1], [0], [0], [1], [0, 0, 1, 1], [], []>} : vector<4x512xbf16>, vector<512x128xbf16>, vector<4x128xf32> -> vector<4x128xf32>
    %33 = arith.addf %26, %32 : vector<4x128xf32>
    %c0_34 = arith.constant 0 : index
    %c1_35 = arith.constant 1 : index
    %c2_36 = arith.constant 2 : index
    %c0_37 = arith.constant 0 : index
    %34 = vector.load %arg1[%c0_34, %c1_35, %c2_36, %c0_37] : memref<1x4x4x512xbf16, #tpu.memory_space<vmem>>, vector<1x2x2x512xbf16>
    %35 = vector.shape_cast %34 : vector<1x2x2x512xbf16> to vector<2x2x512xbf16>
    %36 = vector.shape_cast %35 : vector<2x2x512xbf16> to vector<4x512xbf16>
    %c5 = arith.constant 5 : index
    %c0_38 = arith.constant 0 : index
    %c0_39 = arith.constant 0 : index
    %37 = vector.load %arg2[%c5, %c0_38, %c0_39] : memref<9x512x128xbf16, #tpu.memory_space<vmem>>, vector<1x512x128xbf16>
    %38 = vector.shape_cast %37 : vector<1x512x128xbf16> to vector<512x128xbf16>
    %cst_40 = arith.constant dense<0.000000e+00> : vector<4x128xf32>
    %39 = tpu.matmul %36, %38, %cst_40 {dimension_numbers = #tpu.dot_dimension_numbers<[1], [0], [0], [1], [0, 0, 1, 1], [], []>} : vector<4x512xbf16>, vector<512x128xbf16>, vector<4x128xf32> -> vector<4x128xf32>
    %40 = arith.addf %33, %39 : vector<4x128xf32>
    %c0_41 = arith.constant 0 : index
    %c2_42 = arith.constant 2 : index
    %c0_43 = arith.constant 0 : index
    %c0_44 = arith.constant 0 : index
    %41 = vector.load %arg1[%c0_41, %c2_42, %c0_43, %c0_44] : memref<1x4x4x512xbf16, #tpu.memory_space<vmem>>, vector<1x2x2x512xbf16>
    %42 = vector.shape_cast %41 : vector<1x2x2x512xbf16> to vector<2x2x512xbf16>
    %43 = vector.shape_cast %42 : vector<2x2x512xbf16> to vector<4x512xbf16>
    %c6 = arith.constant 6 : index
    %c0_45 = arith.constant 0 : index
    %c0_46 = arith.constant 0 : index
    %44 = vector.load %arg2[%c6, %c0_45, %c0_46] : memref<9x512x128xbf16, #tpu.memory_space<vmem>>, vector<1x512x128xbf16>
    %45 = vector.shape_cast %44 : vector<1x512x128xbf16> to vector<512x128xbf16>
    %cst_47 = arith.constant dense<0.000000e+00> : vector<4x128xf32>
    %46 = tpu.matmul %43, %45, %cst_47 {dimension_numbers = #tpu.dot_dimension_numbers<[1], [0], [0], [1], [0, 0, 1, 1], [], []>} : vector<4x512xbf16>, vector<512x128xbf16>, vector<4x128xf32> -> vector<4x128xf32>
    %47 = arith.addf %40, %46 : vector<4x128xf32>
    %c0_48 = arith.constant 0 : index
    %c2_49 = arith.constant 2 : index
    %c1_50 = arith.constant 1 : index
    %c0_51 = arith.constant 0 : index
    %48 = vector.load %arg1[%c0_48, %c2_49, %c1_50, %c0_51] : memref<1x4x4x512xbf16, #tpu.memory_space<vmem>>, vector<1x2x2x512xbf16>
    %49 = vector.shape_cast %48 : vector<1x2x2x512xbf16> to vector<2x2x512xbf16>
    %50 = vector.shape_cast %49 : vector<2x2x512xbf16> to vector<4x512xbf16>
    %c7 = arith.constant 7 : index
    %c0_52 = arith.constant 0 : index
    %c0_53 = arith.constant 0 : index
    %51 = vector.load %arg2[%c7, %c0_52, %c0_53] : memref<9x512x128xbf16, #tpu.memory_space<vmem>>, vector<1x512x128xbf16>
    %52 = vector.shape_cast %51 : vector<1x512x128xbf16> to vector<512x128xbf16>
    %cst_54 = arith.constant dense<0.000000e+00> : vector<4x128xf32>
    %53 = tpu.matmul %50, %52, %cst_54 {dimension_numbers = #tpu.dot_dimension_numbers<[1], [0], [0], [1], [0, 0, 1, 1], [], []>} : vector<4x512xbf16>, vector<512x128xbf16>, vector<4x128xf32> -> vector<4x128xf32>
    %54 = arith.addf %47, %53 : vector<4x128xf32>
    %c0_55 = arith.constant 0 : index
    %c2_56 = arith.constant 2 : index
    %c2_57 = arith.constant 2 : index
    %c0_58 = arith.constant 0 : index
    %55 = vector.load %arg1[%c0_55, %c2_56, %c2_57, %c0_58] : memref<1x4x4x512xbf16, #tpu.memory_space<vmem>>, vector<1x2x2x512xbf16>
    %56 = vector.shape_cast %55 : vector<1x2x2x512xbf16> to vector<2x2x512xbf16>
    %57 = vector.shape_cast %56 : vector<2x2x512xbf16> to vector<4x512xbf16>
    %c8 = arith.constant 8 : index
    %c0_59 = arith.constant 0 : index
    %c0_60 = arith.constant 0 : index
    %58 = vector.load %arg2[%c8, %c0_59, %c0_60] : memref<9x512x128xbf16, #tpu.memory_space<vmem>>, vector<1x512x128xbf16>
    %59 = vector.shape_cast %58 : vector<1x512x128xbf16> to vector<512x128xbf16>
    %cst_61 = arith.constant dense<0.000000e+00> : vector<4x128xf32>
    %60 = tpu.matmul %57, %59, %cst_61 {dimension_numbers = #tpu.dot_dimension_numbers<[1], [0], [0], [1], [0, 0, 1, 1], [], []>} : vector<4x512xbf16>, vector<512x128xbf16>, vector<4x128xf32> -> vector<4x128xf32>
    %61 = arith.addf %54, %60 : vector<4x128xf32>
    %c0_62 = arith.constant 0 : index
    %c0_63 = arith.constant 0 : index
    %62 = vector.load %arg3[%c0_62, %c0_63] : memref<1x128xf32, #tpu.memory_space<vmem>>, vector<1x128xf32>
    %63 = vector.broadcast %62 : vector<1x128xf32> to vector<4x128xf32>
    %64 = arith.addf %61, %63 : vector<4x128xf32>
    %c0_64 = arith.constant 0 : index
    %c0_65 = arith.constant 0 : index
    %c0_66 = arith.constant 0 : index
    %65 = vector.load %arg4[%c0_64, %c0_65, %c0_66] : memref<1x4x128xf32, #tpu.memory_space<vmem>>, vector<1x4x128xf32>
    %66 = vector.shape_cast %65 : vector<1x4x128xf32> to vector<4x128xf32>
    %67 = vector.shape_cast %64 : vector<4x128xf32> to vector<1x4x128xf32>
    tpu.vector_store %arg4[%c0_64, %c0_65, %c0_66], %67 {strides = array<i32>} : memref<1x4x128xf32, #tpu.memory_space<vmem>>, vector<1x4x128xf32>,
    return
  }
  func.func @transform_0(%arg0: i32) -> (i32, i32, i32, i32) {
    %c0_i32 = arith.constant 0 : i32
    %c0_i32_0 = arith.constant 0 : i32
    %c0_i32_1 = arith.constant 0 : i32
    %c0_i32_2 = arith.constant 0 : i32
    return %arg0, %c0_i32, %c0_i32_0, %c0_i32_1 : i32, i32, i32, i32
  }
  func.func @transform_1(%arg0: i32) -> (i32, i32, i32) {
    %c0_i32 = arith.constant 0 : i32
    %c0_i32_0 = arith.constant 0 : i32
    %c0_i32_1 = arith.constant 0 : i32
    %c0_i32_2 = arith.constant 0 : i32
    return %c0_i32, %c0_i32_0, %c0_i32_1 : i32, i32, i32
  }
  func.func @transform_2(%arg0: i32) -> (i32, i32) {
    %c0_i32 = arith.constant 0 : i32
    %c0_i32_0 = arith.constant 0 : i32
    %c0_i32_1 = arith.constant 0 : i32
    return %c0_i32, %c0_i32_0 : i32, i32
  }
  func.func @transform_3(%arg0: i32) -> (i32, i32, i32) {
    %c0_i32 = arith.constant 0 : i32
    %c0_i32_0 = arith.constant 0 : i32
    %c0_i32_1 = arith.constant 0 : i32
    return %arg0, %c0_i32, %c0_i32_0 : i32, i32, i32
  }
}

</mosaic_0001>

<bundles_post_ra>
// kernel: discriminator_forward.5
= control target key start
LH: loop header
LB: loop body
LE: loop exit
PB: predicated region body
PF: predicated region fallthrough
CT: control target
= control target key end

     0   :  { %s1083_s12 = smov 0   ;;  %s1257_s0 = inlined_call_operand.vmem [shape: bf16[2,256,64], index: 0, kind: input, shape index: {}]   ;;  %s1258_s1 = inlined_call_operand.vmem [shape: bf16[64,64], index: 1, kind: input, shape index: {}]   ;;  %s1259_s2 = inlined_call_operand.vmem [shape: f32[1,64], index: 2, kind: input, shape index: {}]   ;;  %s1260_s3 = inlined_call_operand.vmem [shape: bf16[2,256,64], index: 3, kind: output, shape index: {}]  }
   0x1 LB: > { %s845_s13 = sadd.s32 4294967295, %s1061_s12   ;;  %p849_p0 = scmp.ge.s32.totalorder %s1061_s12, 1  ;;  %s1061_s12 = sphi %s1083_s12, %s13_s12  }
   0x2   : > { %p137_p1 = scmp.lt.s32.totalorder %s1061_s12, 3 }
   0x4   : > { %p138_p2 = pnand %p849_p0, %p137_p1 }
   0x5   : > { %v1035_v0 = vld [vmem:[%s1258_s1] sm:$0xff] (!%p138_p2)   ;;  %p161_p3 = scmp.lt.s32.totalorder (!%p138_p2), %s845_s13, 1  ;;  %v1036_v1 = vld [vmem:[%s1258_s1 + $0x8] sm:$0xff] (!%p138_p2)   ;;  %v1037_v2 = vld [vmem:[%s1258_s1 + $0x10] sm:$0xff] (!%p138_p2)   ;;  %vm323_vm0 = vcmask (!%p138_p2), 523264   ;;  %vm757_vm1 = vcmask (!%p138_p2), 519168  }
   0x6   : > { %141 = sbr.rel (%p138_p2) target bundleno = 280 (0x118), region = 32  ;;  %979 = vmatprep.subr.bf16.mxu0 (!%p138_p2), %v1035_v0  ;;  %1019 = vmatprep.subr.bf16.mxu1 (!%p138_p2), %v1035_v0  ;;  %v1038_v5 = vld [vmem:[%s1258_s1 + $0x18] sm:$0xff] (!%p138_p2)   ;;  %v1148_v20 = vld [vmem:[%s1259_s2] ss:$0 sm:$0xff] (!%p138_p2) }
   0x7   : > { %980 = vmatpush3.bf16.msra.mxu0 (!%p138_p2), %v1035_v0  ;;  %1023 = vmatpush3.bf16.msra.mxu1 (!%p138_p2), %v1035_v0 }
   0x8   : > { %981 = vmatprep.subr.bf16.mxu0 (!%p138_p2), %v1036_v1  ;;  %1020 = vmatprep.subr.bf16.mxu1 (!%p138_p2), %v1036_v1 }
   0xb   : > { %982 = vmatpush3.bf16.msra.mxu0 (!%p138_p2), %v1036_v1  ;;  %1024 = vmatpush3.bf16.msra.mxu1 (!%p138_p2), %v1036_v1 }
   0xc   : > { %983 = vmatprep.subr.bf16.mxu0 (!%p138_p2), %v1037_v2  ;;  %1021 = vmatprep.subr.bf16.mxu1 (!%p138_p2), %v1037_v2 }
   0xd   : > { %s1262_s13 = smov (!%p161_p3, %s845_s13), 1 }
   0xe   : > { %s925_s20 = sshll.u32 %s1262_s13, 7 }
   0xf   : > { %s1108_s23 = scalar_lea.vmem %s1257_s0, %s925_s20  ;;  %984 = vmatpush3.bf16.msra.mxu0 %v1037_v2  ;;  %1025 = vmatpush3.bf16.msra.mxu1 %v1037_v2  ;;  %s1159_s30 = scalar_lea.vmem %s1260_s3, %s925_s20 }
  0x10   : > { %v1039_v3 = vld [vmem:[%s1108_s23] sm:$0xff]   ;;  %985 = vmatprep.subr.bf16.mxu0 %v1038_v5  ;;  %1022 = vmatprep.subr.bf16.mxu1 %v1038_v5  ;;  %v1041_v6 = vld [vmem:[%s1108_s23 + $0x8] sm:$0xff]   ;;  %v1043_v8 = vld [vmem:[%s1108_s23 + $0x10] sm:$0xff]  }
  0x11   : > { %v1040_v4 = vld [vmem:[%s1108_s23 + $0x40] sm:$0xff]   ;;  %987 = vmatprep.mubr.msk.bf16.mxu0 %vm323_vm0, %v1039_v3  ;;  %v1042_v7 = vld [vmem:[%s1108_s23 + $0x48] sm:$0xff]   ;;  %v1044_v9 = vld [vmem:[%s1108_s23 + $0x50] sm:$0xff]  }
  0x12   : > { %1003 = vmatprep.mubr.msk.bf16.mxu1 %vm323_vm0, %v1040_v4  ;;  %v1045_v10 = vld [vmem:[%s1108_s23 + $0x18] sm:$0xff]   ;;  %v1047_v12 = vld [vmem:[%s1108_s23 + $0x20] sm:$0xff]   ;;  %v1049_v14 = vld [vmem:[%s1108_s23 + $0x28] sm:$0xff]  }
  0x13   : > { %986 = vmatpush3.bf16.msra.mxu0 %v1038_v5  ;;  %1026 = vmatpush3.bf16.msra.mxu1 %v1038_v5  ;;  %v1046_v11 = vld [vmem:[%s1108_s23 + $0x58] sm:$0xff]   ;;  %v1048_v13 = vld [vmem:[%s1108_s23 + $0x60] sm:$0xff]   ;;  %v1050_v15 = vld [vmem:[%s1108_s23 + $0x68] sm:$0xff]  }
  0x14   : > { %v1051_v16 = vld [vmem:[%s1108_s23 + $0x30] sm:$0xff]   ;;  %v1053_v18 = vld [vmem:[%s1108_s23 + $0x38] sm:$0xff]  }
  0x15   : > { %v1052_v17 = vld [vmem:[%s1108_s23 + $0x70] sm:$0xff]   ;;  %v1054_v19 = vld [vmem:[%s1108_s23 + $0x78] sm:$0xff]  }
  0x16   : > { %988 = vmatmul.mubr.msk.bf16.vlgmr.msra.gmra.mrb[0].mxu0 %vm323_vm0, %v1041_v6  ;;  %1004 = vmatmul.mubr.msk.bf16.vlgmr.msra.gmra.mrb[0].mxu1 %vm323_vm0, %v1042_v7 }
  0x17   : > { %991 = vmatprep.mubr.msk.bf16.mxu0 %vm323_vm0, %v1043_v8  ;;  %1007 = vmatprep.mubr.msk.bf16.mxu1 %vm323_vm0, %v1044_v9 }
  0x1e   : > { %992 = vmatmul.mubr.msk.bf16.gmra.mrb[4].mxu0 %vm323_vm0, %v1045_v10  ;;  %1008 = vmatmul.mubr.msk.bf16.gmra.mrb[4].mxu1 %vm323_vm0, %v1046_v11 }
  0x1f   : > { %995 = vmatprep.mubr.msk.bf16.mxu0 %vm323_vm0, %v1047_v12  ;;  %1011 = vmatprep.mubr.msk.bf16.mxu1 %vm323_vm0, %v1048_v13 }
  0x26   : > { %996 = vmatmul.mubr.msk.bf16.gmra.mrb[8].mxu0 %vm323_vm0, %v1049_v14  ;;  %1012 = vmatmul.mubr.msk.bf16.gmra.mrb[8].mxu1 %vm323_vm0, %v1050_v15 }
  0x27   : > { %999 = vmatprep.mubr.msk.bf16.mxu0 %vm323_vm0, %v1051_v16  ;;  %1015 = vmatprep.mubr.msk.bf16.mxu1 %vm323_vm0, %v1052_v17 }
  0x2e   : > { %1000 = vmatmul.mubr.msk.bf16.gmra.mrb[12].mxu0 %vm323_vm0, %v1053_v18  ;;  %1016 = vmatmul.mubr.msk.bf16.gmra.mrb[12].mxu1 %vm323_vm0, %v1054_v19 }
  0xe9   : > { %v989_v21 = vpop.f32.mrb[0].mxu0  ;;  %v1005_v22 = vpop.f32.mrb[0].mxu1 }
  0xea   : > { %v415_v23 = vadd.f32 %v989_v21, %v1148_v20  ;;  %v479_v24 = vadd.f32 %v1005_v22, %v1148_v20  ;;  %v406_v25 = vpop.f32.mrb[1].mxu0  ;;  %v470_v26 = vpop.f32.mrb[1].mxu1 }
  0xeb   : > { %v407_v27 = vadd.f32 %v1148_v20, %v406_v25  ;;  %v471_v28 = vadd.f32 %v1148_v20, %v470_v26  ;;  %v990_v29 = vpop.f32.mrb[2].mxu0  ;;  %v1006_v30 = vpop.f32.mrb[2].mxu1 }
  0xec   : > { %vm535_vm2 = vcmp.ge.f32.partialorder %v415_v23, 0.0  ;;  %v567_v31 = vmul.f32 0.2, %v415_v23  ;;  %vm551_vm3 = vcmp.ge.f32.partialorder %v479_v24, 0.0  ;;  %v583_v32 = vmul.f32 0.2, %v479_v24 }
  0xed   : > { %vm533_vm4 = vcmp.ge.f32.partialorder %v407_v27, 0.0  ;;  %v565_v33 = vmul.f32 0.2, %v407_v27  ;;  %vm549_vm5 = vcmp.ge.f32.partialorder %v471_v28, 0.0  ;;  %v581_v34 = vmul.f32 0.2, %v471_v28 }
  0xee   : > { %v599_v35 = vsel %vm535_vm2, %v415_v23, %v567_v31  ;;  %v615_v36 = vsel %vm551_vm3, %v479_v24, %v583_v32  ;;  %v418_v37 = vadd.f32 %v990_v29, %v1148_v20  ;;  %v482_v38 = vadd.f32 %v1006_v30, %v1148_v20  ;;  %v409_v39 = vpop.f32.mrb[3].mxu0  ;;  %v473_v40 = vpop.f32.mrb[3].mxu1 }
  0xef   : > { %v929_v41 = vpack.c.bf16 %v599_v35, %v599_v35  ;;  %v945_v42 = vpack.c.bf16 %v615_v36, %v615_v36  ;;  %v597_v43 = vsel %vm533_vm4, %v407_v27, %v565_v33  ;;  %v613_v44 = vsel %vm549_vm5, %v471_v28, %v581_v34 }
  0xf0   : > { %v927_v45 = vpack.c.bf16 %v597_v43, %v597_v43  ;;  %v943_v46 = vpack.c.bf16 %v613_v44, %v613_v44  ;;  %vm536_vm6 = vcmp.ge.f32.partialorder %v418_v37, 0.0  ;;  %v568_v47 = vmul.f32 0.2, %v418_v37 }
  0xf1   : > { %760 = vst.msk [vmem:[%s1159_s30 + $0x8] sm:$0xf] %vm757_vm1, %v929_v41  ;;  %776 = vst.msk [vmem:[%s1159_s30 + $0x48] sm:$0xf] %vm757_vm1, %v945_v42  ;;  %vm552_vm7 = vcmp.ge.f32.partialorder %v482_v38, 0.0  ;;  %v410_v49 = vadd.f32 %v1148_v20, %v409_v39  ;;  %v474_v50 = vadd.f32 %v1148_v20, %v473_v40  ;;  %v993_v51 = vpop.f32.mrb[4].mxu0 }
  0xf2   : > { %v584_v48 = vmul.f32 0.2, %v482_v38  ;;  %v1009_v52 = vpop.f32.mrb[4].mxu1  ;;  %758 = vst.msk [vmem:[%s1159_s30] sm:$0xf] %vm757_vm1, %v927_v45  ;;  %v600_v53 = vsel %vm536_vm6, %v418_v37, %v568_v47  ;;  %v431_v54 = vadd.f32 %v993_v51, %v1148_v20  ;;  %v422_v56 = vpop.f32.mrb[5].mxu0 }
  0xf3   : > { %774 = vst.msk [vmem:[%s1159_s30 + $0x40] sm:$0xf] %vm757_vm1, %v943_v46  ;;  %v495_v55 = vadd.f32 %v1009_v52, %v1148_v20  ;;  %v486_v57 = vpop.f32.mrb[5].mxu1  ;;  %v930_v58 = vpack.c.bf16 %v600_v53, %v600_v53  ;;  %vm534_vm8 = vcmp.ge.f32.partialorder %v410_v49, 0.0  ;;  %v566_v60 = vmul.f32 0.2, %v410_v49 }
  0xf4   : > { %v616_v59 = vsel %vm552_vm7, %v482_v38, %v584_v48  ;;  %v994_v61 = vpop.f32.mrb[6].mxu0  ;;  %v1010_v62 = vpop.f32.mrb[6].mxu1  ;;  %vm550_vm9 = vcmp.ge.f32.partialorder %v474_v50, 0.0  ;;  %v582_v0 = vmul.f32 0.2, %v474_v50  ;;  %vm539_vm10 = vcmp.ge.f32.partialorder %v431_v54, 0.0 }
  0xf5   : > { %v946_v63 = vpack.c.bf16 %v616_v59, %v616_v59  ;;  %v425_v1 = vpop.f32.mrb[7].mxu0  ;;  %v489_v2 = vpop.f32.mrb[7].mxu1  ;;  %761 = vst.msk [vmem:[%s1159_s30 + $0xc] sm:$0xf] %vm757_vm1, %v930_v58  ;;  %v598_v3 = vsel %vm534_vm8, %v410_v49, %v566_v60  ;;  %v571_v4 = vmul.f32 0.2, %v431_v54  ;;  %v423_v8 = vadd.f32 %v1148_v20, %v422_v56 }
  0xf6   : > { %vm555_vm11 = vcmp.ge.f32.partialorder %v495_v55, 0.0  ;;  %v587_v5 = vmul.f32 0.2, %v495_v55  ;;  %v928_v6 = vpack.c.bf16 %v598_v3, %v598_v3  ;;  %v614_v7 = vsel %vm550_vm9, %v474_v50, %v582_v0 }
  0xf7   : > { %777 = vst.msk [vmem:[%s1159_s30 + $0x4c] sm:$0xf] %vm757_vm1, %v946_v63  ;;  %v487_v9 = vadd.f32 %v1148_v20, %v486_v57  ;;  %v944_v10 = vpack.c.bf16 %v614_v7, %v614_v7  ;;  %v603_v11 = vsel %vm539_vm10, %v431_v54, %v571_v4  ;;  %v434_v13 = vadd.f32 %v994_v61, %v1148_v20 }
  0xf8   : > { %v619_v12 = vsel %vm555_vm11, %v495_v55, %v587_v5  ;;  %759 = vst.msk [vmem:[%s1159_s30 + $0x4] sm:$0xf] %vm757_vm1, %v928_v6  ;;  %v933_v14 = vpack.c.bf16 %v603_v11, %v603_v11  ;;  %vm537_vm12 = vcmp.ge.f32.partialorder %v423_v8, 0.0  ;;  %v569_v16 = vmul.f32 0.2, %v423_v8 }
  0xf9   : > { %v949_v15 = vpack.c.bf16 %v619_v12, %v619_v12  ;;  %775 = vst.msk [vmem:[%s1159_s30 + $0x44] sm:$0xf] %vm757_vm1, %v944_v10  ;;  %vm553_vm13 = vcmp.ge.f32.partialorder %v487_v9, 0.0  ;;  %v585_v17 = vmul.f32 0.2, %v487_v9  ;;  %vm540_vm14 = vcmp.ge.f32.partialorder %v434_v13, 0.0 }
  0xfa   : > { %v572_v18 = vmul.f32 0.2, %v434_v13  ;;  %764 = vst.msk [vmem:[%s1159_s30 + $0x18] sm:$0xf] %vm757_vm1, %v933_v14  ;;  %v601_v19 = vsel %vm537_vm12, %v423_v8, %v569_v16  ;;  %v498_v21 = vadd.f32 %v1010_v62, %v1148_v20  ;;  %v426_v22 = vadd.f32 %v1148_v20, %v425_v1  ;;  %v997_v24 = vpop.f32.mrb[8].mxu0  ;;  %v1013_v25 = vpop.f32.mrb[8].mxu1 }
  0xfb   : > { %780 = vst.msk [vmem:[%s1159_s30 + $0x58] sm:$0xf] %vm757_vm1, %v949_v15  ;;  %v490_v23 = vadd.f32 %v1148_v20, %v489_v2  ;;  %v931_v26 = vpack.c.bf16 %v601_v19, %v601_v19  ;;  %v617_v27 = vsel %vm553_vm13, %v487_v9, %v585_v17  ;;  %v447_v29 = vadd.f32 %v997_v24, %v1148_v20  ;;  %v438_v30 = vpop.f32.mrb[9].mxu0  ;;  %v502_v31 = vpop.f32.mrb[9].mxu1 }
  0xfc   : > { %v604_v28 = vsel %vm540_vm14, %v434_v13, %v572_v18  ;;  %v947_v32 = vpack.c.bf16 %v617_v27, %v617_v27  ;;  %vm556_vm15 = vcmp.ge.f32.partialorder %v498_v21, 0.0  ;;  %v588_v34 = vmul.f32 0.2, %v498_v21  ;;  %v998_v35 = vpop.f32.mrb[10].mxu0  ;;  %v1014_v36 = vpop.f32.mrb[10].mxu1 }
  0xfd   : > { %v934_v33 = vpack.c.bf16 %v604_v28, %v604_v28  ;;  %762 = vst.msk [vmem:[%s1159_s30 + $0x10] sm:$0xf] %vm757_vm1, %v931_v26  ;;  %vm538_vm0 = vcmp.ge.f32.partialorder %v426_v22, 0.0  ;;  %v570_v37 = vmul.f32 0.2, %v426_v22  ;;  %vm554_vm2 = vcmp.ge.f32.partialorder %v490_v23, 0.0 }
  0xfe   : > { %v586_v38 = vmul.f32 0.2, %v490_v23  ;;  %778 = vst.msk [vmem:[%s1159_s30 + $0x50] sm:$0xf] %vm757_vm1, %v947_v32  ;;  %v620_v39 = vsel %vm556_vm15, %v498_v21, %v588_v34  ;;  %vm543_vm3 = vcmp.ge.f32.partialorder %v447_v29, 0.0  ;;  %v511_v41 = vadd.f32 %v1013_v25, %v1148_v20  ;;  %v441_v42 = vpop.f32.mrb[11].mxu0 }
  0xff   : > { %765 = vst.msk [vmem:[%s1159_s30 + $0x1c] sm:$0xf] %vm757_vm1, %v934_v33  ;;  %v575_v40 = vmul.f32 0.2, %v447_v29  ;;  %v505_v43 = vpop.f32.mrb[11].mxu1  ;;  %v950_v44 = vpack.c.bf16 %v620_v39, %v620_v39  ;;  %v602_v45 = vsel %vm538_vm0, %v426_v22, %v570_v37  ;;  %v439_v47 = vadd.f32 %v1148_v20, %v438_v30 }
 0x100   : > { %v618_v46 = vsel %vm554_vm2, %v490_v23, %v586_v38  ;;  %v932_v48 = vpack.c.bf16 %v602_v45, %v602_v45  ;;  %vm559_vm4 = vcmp.ge.f32.partialorder %v511_v41, 0.0  ;;  %v591_v52 = vmul.f32 0.2, %v511_v41 }
 0x101   : > { %v948_v49 = vpack.c.bf16 %v618_v46, %v618_v46  ;;  %v607_v50 = vsel %vm543_vm3, %v447_v29, %v575_v40  ;;  %781 = vst.msk [vmem:[%s1159_s30 + $0x5c] sm:$0xf] %vm757_vm1, %v950_v44  ;;  %vm541_vm5 = vcmp.ge.f32.partialorder %v439_v47, 0.0  ;;  %v573_v53 = vmul.f32 0.2, %v439_v47  ;;  %v1001_v54 = vpop.f32.mrb[12].mxu0 }
 0x102   : > { %v937_v51 = vpack.c.bf16 %v607_v50, %v607_v50  ;;  %763 = vst.msk [vmem:[%s1159_s30 + $0x14] sm:$0xf] %vm757_vm1, %v932_v48  ;;  %v503_v55 = vadd.f32 %v1148_v20, %v502_v31  ;;  %v450_v56 = vadd.f32 %v998_v35, %v1148_v20  ;;  %v514_v57 = vadd.f32 %v1014_v36, %v1148_v20  ;;  %v1017_v59 = vpop.f32.mrb[12].mxu1  ;;  %v454_v60 = vpop.f32.mrb[13].mxu0 }
 0x103   : > { %779 = vst.msk [vmem:[%s1159_s30 + $0x54] sm:$0xf] %vm757_vm1, %v948_v49  ;;  %v442_v58 = vadd.f32 %v1148_v20, %v441_v42  ;;  %v623_v61 = vsel %vm559_vm4, %v511_v41, %v591_v52  ;;  %v605_v62 = vsel %vm541_vm5, %v439_v47, %v573_v53  ;;  %v506_v63 = vadd.f32 %v1148_v20, %v505_v43  ;;  %v518_v1 = vpop.f32.mrb[13].mxu1  ;;  %v1002_v2 = vpop.f32.mrb[14].mxu0 }
 0x104   : > { %768 = vst.msk [vmem:[%s1159_s30 + $0x28] sm:$0xf] %vm757_vm1, %v937_v51  ;;  %v463_v0 = vadd.f32 %v1001_v54, %v1148_v20  ;;  %v953_v3 = vpack.c.bf16 %v623_v61, %v623_v61  ;;  %v935_v4 = vpack.c.bf16 %v605_v62, %v605_v62  ;;  %vm557_vm6 = vcmp.ge.f32.partialorder %v503_v55, 0.0  ;;  %v1018_v6 = vpop.f32.mrb[14].mxu1  ;;  %v457_v7 = vpop.f32.mrb[15].mxu0 }
 0x105   : > { %v589_v5 = vmul.f32 0.2, %v503_v55  ;;  %vm544_vm7 = vcmp.ge.f32.partialorder %v450_v56, 0.0  ;;  %v576_v8 = vmul.f32 0.2, %v450_v56  ;;  %vm560_vm8 = vcmp.ge.f32.partialorder %v514_v57, 0.0 }
 0x106   : > { %v592_v9 = vmul.f32 0.2, %v514_v57  ;;  %784 = vst.msk [vmem:[%s1159_s30 + $0x68] sm:$0xf] %vm757_vm1, %v953_v3  ;;  %766 = vst.msk [vmem:[%s1159_s30 + $0x20] sm:$0xf] %vm757_vm1, %v935_v4  ;;  %v527_v24 = vadd.f32 %v1017_v59, %v1148_v20  ;;  %v455_v26 = vadd.f32 %v1148_v20, %v454_v60  ;;  %v519_v27 = vadd.f32 %v1148_v20, %v518_v1 }
 0x107   : > { %v621_v10 = vsel %vm557_vm6, %v503_v55, %v589_v5  ;;  %vm542_vm9 = vcmp.ge.f32.partialorder %v442_v58, 0.0  ;;  %v574_v11 = vmul.f32 0.2, %v442_v58  ;;  %vm558_vm10 = vcmp.ge.f32.partialorder %v506_v63, 0.0  ;;  %v521_v12 = vpop.f32.mrb[15].mxu1 }
 0x108   : > { %v951_v13 = vpack.c.bf16 %v621_v10, %v621_v10  ;;  %v608_v14 = vsel %vm544_vm7, %v450_v56, %v576_v8  ;;  %v624_v15 = vsel %vm560_vm8, %v514_v57, %v592_v9  ;;  %v590_v16 = vmul.f32 0.2, %v506_v63 }
 0x109   : > { %v938_v17 = vpack.c.bf16 %v608_v14, %v608_v14  ;;  %v954_v18 = vpack.c.bf16 %v624_v15, %v624_v15  ;;  %v606_v19 = vsel %vm542_vm9, %v442_v58, %v574_v11  ;;  %vm547_vm11 = vcmp.ge.f32.partialorder %v463_v0, 0.0 }
 0x10a   : > { %782 = vst.msk [vmem:[%s1159_s30 + $0x60] sm:$0xf] %vm757_vm1, %v951_v13  ;;  %v936_v21 = vpack.c.bf16 %v606_v19, %v606_v19  ;;  %v622_v22 = vsel %vm558_vm10, %v506_v63, %v590_v16  ;;  %v579_v23 = vmul.f32 0.2, %v463_v0  ;;  %v466_v28 = vadd.f32 %v1002_v2, %v1148_v20 }
 0x10b   : > { %769 = vst.msk [vmem:[%s1159_s30 + $0x2c] sm:$0xf] %vm757_vm1, %v938_v17  ;;  %785 = vst.msk [vmem:[%s1159_s30 + $0x6c] sm:$0xf] %vm757_vm1, %v954_v18  ;;  %v952_v25 = vpack.c.bf16 %v622_v22, %v622_v22  ;;  %vm563_vm12 = vcmp.ge.f32.partialorder %v527_v24, 0.0  ;;  %v530_v31 = vadd.f32 %v1018_v6, %v1148_v20  ;;  %vm545_vm13 = vcmp.ge.f32.partialorder %v455_v26, 0.0 }
 0x10c   : > { %767 = vst.msk [vmem:[%s1159_s30 + $0x24] sm:$0xf] %vm757_vm1, %v936_v21  ;;  %v611_v29 = vsel %vm547_vm11, %v463_v0, %v579_v23  ;;  %v595_v30 = vmul.f32 0.2, %v527_v24  ;;  %v577_v33 = vmul.f32 0.2, %v455_v26  ;;  %v458_v43 = vadd.f32 %v1148_v20, %v457_v7 }
 0x10d   : > { %783 = vst.msk [vmem:[%s1159_s30 + $0x64] sm:$0xf] %vm757_vm1, %v952_v25  ;;  %v941_v32 = vpack.c.bf16 %v611_v29, %v611_v29  ;;  %vm561_vm14 = vcmp.ge.f32.partialorder %v519_v27, 0.0  ;;  %v593_v35 = vmul.f32 0.2, %v519_v27  ;;  %vm548_vm15 = vcmp.ge.f32.partialorder %v466_v28, 0.0 }
 0x10e   : > { %v627_v34 = vsel %vm563_vm12, %v527_v24, %v595_v30  ;;  %v580_v36 = vmul.f32 0.2, %v466_v28  ;;  %v609_v38 = vsel %vm545_vm13, %v455_v26, %v577_v33  ;;  %vm564_vm0 = vcmp.ge.f32.partialorder %v530_v31, 0.0 }
 0x10f   : > { %772 = vst.msk [vmem:[%s1159_s30 + $0x38] sm:$0xf] %vm757_vm1, %v941_v32  ;;  %v957_v37 = vpack.c.bf16 %v627_v34, %v627_v34  ;;  %v596_v39 = vmul.f32 0.2, %v530_v31  ;;  %v939_v40 = vpack.c.bf16 %v609_v38, %v609_v38  ;;  %v625_v41 = vsel %vm561_vm14, %v519_v27, %v593_v35 }
 0x110   : > { %v612_v42 = vsel %vm548_vm15, %v466_v28, %v580_v36  ;;  %v955_v44 = vpack.c.bf16 %v625_v41, %v625_v41  ;;  %v522_v47 = vadd.f32 %v1148_v20, %v521_v12  ;;  %vm546_vm2 = vcmp.ge.f32.partialorder %v458_v43, 0.0 }
 0x111   : > { %788 = vst.msk [vmem:[%s1159_s30 + $0x78] sm:$0xf] %vm757_vm1, %v957_v37  ;;  %v942_v45 = vpack.c.bf16 %v612_v42, %v612_v42  ;;  %v628_v46 = vsel %vm564_vm0, %v530_v31, %v596_v39  ;;  %770 = vst.msk [vmem:[%s1159_s30 + $0x30] sm:$0xf] %vm757_vm1, %v939_v40  ;;  %v578_v49 = vmul.f32 0.2, %v458_v43 }
 0x112   : > { %v958_v48 = vpack.c.bf16 %v628_v46, %v628_v46  ;;  %786 = vst.msk [vmem:[%s1159_s30 + $0x70] sm:$0xf] %vm757_vm1, %v955_v44  ;;  %vm562_vm3 = vcmp.ge.f32.partialorder %v522_v47, 0.0  ;;  %v594_v50 = vmul.f32 0.2, %v522_v47 }
 0x113   : > { %773 = vst.msk [vmem:[%s1159_s30 + $0x3c] sm:$0xf] %vm757_vm1, %v942_v45  ;;  %v610_v51 = vsel %vm546_vm2, %v458_v43, %v578_v49 }
 0x114   : > { %789 = vst.msk [vmem:[%s1159_s30 + $0x7c] sm:$0xf] %vm757_vm1, %v958_v48  ;;  %v940_v52 = vpack.c.bf16 %v610_v51, %v610_v51  ;;  %v626_v53 = vsel %vm562_vm3, %v522_v47, %v594_v50 }
 0x115   : > { %v956_v54 = vpack.c.bf16 %v626_v53, %v626_v53 }
 0x116   : > { %771 = vst.msk [vmem:[%s1159_s30 + $0x34] sm:$0xf] %vm757_vm1, %v940_v52 }
 0x117   : > { %787 = vst.msk [vmem:[%s1159_s30 + $0x74] sm:$0xf] %vm757_vm1, %v956_v54 }
 0x118 PF: > { %s13_s12 = sadd.s32 1, %s1061_s12  }
 0x119   : > { %p10_p4 = scmp.ge.s32.totalorder %s13_s12, 4  }
 0x11b   :  { %12 = sbr.rel (!%p10_p4) target bundleno = 1 (0x1), region = 62 }

// kernel: discriminator_forward.6
= control target key start
LH: loop header
LB: loop body
LE: loop exit
PB: predicated region body
PF: predicated region fallthrough
CT: control target
= control target key end

     0   :  { %s2923_s27 = smov 0   ;;  %s3268_s0 = inlined_call_operand.vmem [shape: bf16[2,9,9,64], index: 0, kind: input, shape index: {}]   ;;  %s3269_s1 = inlined_call_operand.vmem [shape: bf16[2,9,9,64], index: 1, kind: input, shape index: {}]   ;;  %s3270_s2 = inlined_call_operand.vmem [shape: bf16[2,9,9,64], index: 2, kind: input, shape index: {}]   ;;  %s3271_s3 = inlined_call_operand.vmem [shape: bf16[2,9,9,64], index: 3, kind: input, shape index: {}]   ;;  %s3272_s4 = inlined_call_operand.vmem [shape: bf16[9,64,128], index: 4, kind: input, shape index: {}]   ;;  %s3273_s5 = inlined_call_operand.vmem [shape: f32[1,128], index: 5, kind: input, shape index: {}]   ;;  %s3274_s6 = inlined_call_operand.vmem [shape: bf16[2,64,128], index: 6, kind: output, shape index: {0}]   ;;  %s3275_s7 = inlined_call_operand.vmem [shape: f32[2,1,128], index: 7, kind: output, shape index: {1}]   ;;  %s3276_s8 = inlined_call_operand.vmem [shape: f32[2,1,128], index: 8, kind: output, shape index: {2}]  }
   0x1 LB: > { %s2255_s28 = sadd.s32 4294967295, %s2876_s27   ;;  %p2259_p0 = scmp.ge.s32.totalorder %s2876_s27, 1  ;;  %s2876_s27 = sphi %s2923_s27, %s19_s27  }
   0x2   : > { %p297_p1 = scmp.lt.s32.totalorder %s2876_s27, 3 }
   0x4   : > { %p298_p2 = pnand %p2259_p0, %p297_p1 }
   0x5   : > { %v2810_v0 = vld [vmem:[%s3272_s4 + $0x20] sm:$0xff] (!%p298_p2)   ;;  %p352_p3 = scmp.lt.s32.totalorder (!%p298_p2), %s2255_s28, 1  ;;  %v2812_v2 = vld [vmem:[%s3272_s4 + $0x28] sm:$0xff] (!%p298_p2)   ;;  %v2814_v4 = vld [vmem:[%s3272_s4 + $0x30] sm:$0xff] (!%p298_p2)   ;;  %vm461_vm0 = vcmask (!%p298_p2), 523264  }
   0x6   : > { %301 = sbr.rel (%p298_p2) target bundleno = 339 (0x153), region = 44  ;;  %v2811_v1 = vld [vmem:[%s3272_s4 + $0x80] sm:$0xff] (!%p298_p2)   ;;  %2585 = vmatprep.subr.bf16.mxu1 (!%p298_p2), %v2810_v0  ;;  %v2813_v3 = vld [vmem:[%s3272_s4 + $0x88] sm:$0xff] (!%p298_p2)   ;;  %v2815_v5 = vld [vmem:[%s3272_s4 + $0x90] sm:$0xff] (!%p298_p2)   ;;  %vm676_vm1 = vsmask.f32 (!%p298_p2), 3328 }
   0x7   : > { %2649 = vmatprep.subr.bf16.mxu0 (!%p298_p2), %v2811_v1  ;;  %2586 = vmatpush3.bf16.msra.mxu1 (!%p298_p2), %v2810_v0  ;;  %v2816_v6 = vld [vmem:[%s3272_s4 + $0x38] sm:$0xff] (!%p298_p2)   ;;  %v2821_v11 = vld [vmem:[%s3272_s4] sm:$0xff] (!%p298_p2)   ;;  %v2824_v14 = vld [vmem:[%s3272_s4 + $0x8] sm:$0xff] (!%p298_p2)   ;;  %vm677_vm2 = vsmask.f32 (!%p298_p2), 7440 }
   0x8   : > { %2650 = vmatpush3.bf16.msra.mxu0 (!%p298_p2), %v2811_v1  ;;  %2587 = vmatprep.subr.bf16.mxu1 (!%p298_p2), %v2812_v2  ;;  %v2817_v7 = vld [vmem:[%s3272_s4 + $0x98] sm:$0xff] (!%p298_p2)   ;;  %v2823_v12 = vld [vmem:[%s3272_s4 + $0xa0] sm:$0xff] (!%p298_p2)   ;;  %v2825_v15 = vld [vmem:[%s3272_s4 + $0xa8] sm:$0xff] (!%p298_p2)  }
   0x9   : > { %2651 = vmatprep.subr.bf16.mxu0 (!%p298_p2), %v2813_v3  ;;  %v2829_v19 = vld [vmem:[%s3272_s4 + $0x10] sm:$0xff] (!%p298_p2)   ;;  %v2832_v22 = vld [vmem:[%s3272_s4 + $0x18] sm:$0xff] (!%p298_p2)   ;;  %v2836_v37 = vld [vmem:[%s3272_s4 + $0x40] sm:$0xff] (!%p298_p2)  }
   0xa   : > { %v2831_v21 = vld [vmem:[%s3272_s4 + $0xb0] sm:$0xff] (!%p298_p2)   ;;  %v2833_v23 = vld [vmem:[%s3272_s4 + $0xb8] sm:$0xff] (!%p298_p2)   ;;  %vm3035_vm3 = vmor (!%p298_p2), %vm676_vm1, %vm677_vm2 }
   0xb   : > { %2588 = vmatpush3.bf16.msra.mxu1 (!%p298_p2), %v2812_v2  ;;  %v3042_v42 = vld [vmem:[%s3272_s4 + $0xc0] sm:$0xff] (!%p298_p2)   ;;  %v2838_v46 = vld [vmem:[%s3272_s4 + $0x48] sm:$0xff] (!%p298_p2)   ;;  %v2842_v2 = vld [vmem:[%s3272_s4 + $0x50] sm:$0xff] (!%p298_p2)  }
   0xc   : > { %2652 = vmatpush3.bf16.msra.mxu0 (!%p298_p2), %v2813_v3  ;;  %2589 = vmatprep.subr.bf16.mxu1 (!%p298_p2), %v2814_v4 }
   0xd   : > { %s3280_s28 = smov (!%p352_p3, %s2255_s28), 1  ;;  %2653 = vmatprep.subr.bf16.mxu0 %v2815_v5 }
   0xe   : > { %s2949_s17 = smul.u32 72, %s3280_s28  ;;  %s379_s29 = scalar_lea.vmem %s3275_s7, %s3280_s28 }
   0xf   : > { %2590 = vmatpush3.bf16.msra.mxu1 %v2814_v4  ;;  %s382_s12 = scalar_lea.vmem %s3276_s8, %s3280_s28 }
  0x10   : > { %s2961_s24 = scalar_lea.vmem %s3269_s1, %s2949_s17  ;;  %s2970_s9 = scalar_lea.vmem %s3271_s3, %s2949_s17  ;;  %2654 = vmatpush3.bf16.msra.mxu0 %v2815_v5  ;;  %2591 = vmatprep.subr.bf16.mxu1 %v2816_v6 }
  0x11   : > { %v2818_v8 = vld [vmem:[%s2961_s24] ss:$8 sps:$4 sm:$0xff]   ;;  %v2820_v10 = vld [vmem:[%s2961_s24 + $0x10] ss:$8 sps:$4 sm:$0xff]   ;;  %2655 = vmatprep.subr.bf16.mxu0 %v2817_v7  ;;  %s3002_s23 = scalar_lea.vmem %s3268_s0, %s2949_s17  ;;  %s3013_s10 = scalar_lea.vmem %s3270_s2, %s2949_s17 }
  0x12   : > { %v2819_v9 = vld [vmem:[%s2970_s9] ss:$8 sps:$4 sm:$0xff]   ;;  %2593 = vmatprep.mubr.msk.bf16.mxu1 %vm461_vm0, %v2818_v8  ;;  %v2822_v13 = vld [vmem:[%s2970_s9 + $0x10] ss:$8 sps:$4 sm:$0xff]   ;;  %v1214_v26 = vld [vmem:[%s3013_s10 + $0x4] sm:$0x1] }
  0x13   : > { %2657 = vmatprep.mubr.msk.bf16.mxu0 %vm461_vm0, %v2819_v9  ;;  %2592 = vmatpush3.bf16.msra.mxu1 %v2816_v6  ;;  %v2826_v16 = vld [vmem:[%s2961_s24 + $0x20] ss:$8 sps:$4 sm:$0xff]   ;;  %v2828_v18 = vld [vmem:[%s2961_s24 + $0x30] ss:$8 sps:$4 sm:$0xff]   ;;  %v1216_v30 = vld [vmem:[%s3013_s10 + $0xc] sm:$0x1] }
  0x14   : > { %2656 = vmatpush3.bf16.msra.mxu0 %v2817_v7  ;;  %2601 = vmatprep.subr.bf16.mxu1 %v2821_v11  ;;  %v2827_v17 = vld [vmem:[%s2970_s9 + $0x20] ss:$8 sps:$4 sm:$0xff]   ;;  %v2830_v20 = vld [vmem:[%s2970_s9 + $0x30] ss:$8 sps:$4 sm:$0xff]   ;;  %v1239_v31 = vshll.u32 %v1214_v26, 16  ;;  %v1253_v36 = vshll.u32 %v1216_v30, 16 }
  0x15   : > { %2665 = vmatprep.subr.bf16.mxu0 %v2823_v12  ;;  %v2834_v24 = vld [vmem:[%s3002_s23] ss:$8 sps:$4 sm:$0xff]   ;;  %v2835_v45 = vld [vmem:[%s3002_s23 + $0x10] ss:$8 sps:$4 sm:$0xff]   ;;  %v1218_v49 = vld [vmem:[%s3013_s10 + $0x14] sm:$0x1] }
  0x16   : > { %2594 = vmatmul.mubr.msk.bf16.vlgmr.msra.gmra.mrb[0].mxu1 %vm461_vm0, %v2820_v10  ;;  %v1213_v25 = vld [vmem:[%s3013_s10] sm:$0xf]  ;;  %v1215_v27 = vld [vmem:[%s3013_s10 + $0x8] sm:$0xf]  ;;  %v1241_v39 = vrot.slane %v1239_v31, 5  ;;  %v1255_v44 = vrot.slane %v1253_v36, 5 }
  0x17   : > { %2658 = vmatmul.mubr.msk.bf16.vlgmr.msra.gmra.mrb[0].mxu0 %vm461_vm0, %v2822_v13  ;;  %2602 = vmatpush3.bf16.msra.mxu1 %v2821_v11  ;;  %v1230_v28 = vshrl.u32 %v1213_v25, 16  ;;  %v1233_v29 = vshll.u32 %v1213_v25, 16  ;;  %v1244_v32 = vshrl.u32 %v1215_v27, 16  ;;  %v1247_v33 = vshll.u32 %v1215_v27, 16  ;;  %v1217_v48 = vld [vmem:[%s3013_s10 + $0x10] sm:$0xf] }
  0x18   : > { %2666 = vmatpush3.bf16.msra.mxu0 %v2823_v12  ;;  %2603 = vmatprep.subr.bf16.mxu1 %v2824_v14  ;;  %v1219_v51 = vld [vmem:[%s3013_s10 + $0x18] sm:$0xf]  ;;  %v1220_v52 = vld [vmem:[%s3013_s10 + $0x1c] sm:$0x1]  ;;  %v1258_v53 = vshrl.u32 %v1217_v48, 16  ;;  %v1261_v55 = vshll.u32 %v1217_v48, 16 }
  0x19   : > { %2667 = vmatprep.subr.bf16.mxu0 %v2825_v15  ;;  %2597 = vmatprep.mubr.msk.bf16.mxu1 %vm461_vm0, %v2826_v16  ;;  %v1232_v34 = vrot.slane %v1230_v28, 4  ;;  %v1235_v35 = vrot.slane %v1233_v29, 5  ;;  %v1246_v40 = vrot.slane %v1244_v32, 4  ;;  %v1249_v41 = vrot.slane %v1247_v33, 5  ;;  %v2840_v8 = vld [vmem:[%s3002_s23 + $0x20] ss:$8 sps:$4 sm:$0xff]  }
  0x1a   : > { %2661 = vmatprep.mubr.msk.bf16.mxu0 %vm461_vm0, %v2827_v17  ;;  %v1267_v56 = vshll.u32 %v1218_v49, 16  ;;  %v1272_v57 = vshrl.u32 %v1219_v51, 16  ;;  %v1260_v59 = vrot.slane %v1258_v53, 4  ;;  %v1275_v60 = vshll.u32 %v1219_v51, 16  ;;  %v1221_v9 = vld [vmem:[%s3013_s10 + $0x20] sm:$0xf] }
  0x1b   : > { %2604 = vmatpush3.bf16.msra.mxu1 %v2824_v14  ;;  %v1236_v43 = vor.u32 %v1235_v35, %v1232_v34  ;;  %v1250_v47 = vor.u32 %v1249_v41, %v1246_v40  ;;  %v1281_v61 = vshll.u32 %v1220_v52, 16  ;;  %v1263_v63 = vrot.slane %v1261_v55, 5  ;;  %v1222_v10 = vld [vmem:[%s3013_s10 + $0x24] sm:$0x1]  ;;  %v1223_v12 = vld [vmem:[%s3013_s10 + $0x28] sm:$0xf] }
  0x1c   : > { %2668 = vmatpush3.bf16.msra.mxu0 %v2825_v15  ;;  %2605 = vmatprep.subr.bf16.mxu1 %v2829_v19  ;;  %v1269_v0 = vrot.slane %v1267_v56, 5  ;;  %v1274_v1 = vrot.slane %v1272_v57, 4  ;;  %v1277_v4 = vrot.slane %v1275_v60, 5  ;;  %v1224_v13 = vld [vmem:[%s3013_s10 + $0x2c] sm:$0x1]  ;;  %v1286_v14 = vshrl.u32 %v1221_v9, 16 }
  0x1d   : > { %2669 = vmatprep.subr.bf16.mxu0 %v2831_v21  ;;  %v1237_v50 = vrot.slane %v1236_v43, 4  ;;  %v1251_v54 = vrot.slane %v1250_v47, 4  ;;  %v1283_v5 = vrot.slane %v1281_v61, 5  ;;  %v1264_v6 = vor.u32 %v1263_v63, %v1260_v59  ;;  %v2839_v25 = vld [vmem:[%s3272_s4 + $0xc8] sm:$0xff]   ;;  %v2841_v29 = vld [vmem:[%s3002_s23 + $0x30] ss:$8 sps:$4 sm:$0xff]  }
  0x1e   : > { %2598 = vmatmul.mubr.msk.bf16.gmra.mrb[4].mxu1 %vm461_vm0, %v2828_v18  ;;  %v1278_v7 = vor.u32 %v1277_v4, %v1274_v1  ;;  %v1289_v16 = vshll.u32 %v1221_v9, 16  ;;  %v1295_v17 = vshll.u32 %v1222_v10, 16  ;;  %v1300_v18 = vshrl.u32 %v1223_v12, 16  ;;  %v1225_v34 = vld [vmem:[%s3013_s10 + $0x30] sm:$0xf]  ;;  %v2845_v59 = vld [vmem:[%s3272_s4 + $0xd8] sm:$0xff]  }
  0x1f   : > { %2662 = vmatmul.mubr.msk.bf16.gmra.mrb[4].mxu0 %vm461_vm0, %v2830_v20  ;;  %2606 = vmatpush3.bf16.msra.mxu1 %v2829_v19  ;;  %v1242_v58 = vsel %vm3035_vm3, %v1237_v50, %v1241_v39  ;;  %v1256_v62 = vsel %vm3035_vm3, %v1251_v54, %v1255_v44  ;;  %v1265_v11 = vrot.slane %v1264_v6, 4  ;;  %v1288_v20 = vrot.slane %v1286_v14, 4  ;;  %v1226_v35 = vld [vmem:[%s3013_s10 + $0x34] sm:$0x1]  ;;  %v1227_v36 = vld [vmem:[%s3013_s10 + $0x38] sm:$0xf] }
  0x20   : > { %2670 = vmatpush3.bf16.msra.mxu0 %v2831_v21  ;;  %2607 = vmatprep.subr.bf16.mxu1 %v2832_v22  ;;  %v2366_v3 = vcombine.low %v1242_v58, %v1256_v62  ;;  %v1279_v15 = vrot.slane %v1278_v7, 4  ;;  %v1303_v21 = vshll.u32 %v1223_v12, 16  ;;  %v1291_v26 = vrot.slane %v1289_v16, 5  ;;  %v1228_v39 = vld [vmem:[%s3013_s10 + $0x3c] sm:$0x1]  ;;  %v2843_v44 = vld [vmem:[%s3272_s4 + $0xd0] sm:$0xff]  }
  0x21   : > { %2671 = vmatprep.subr.bf16.mxu0 %v2833_v23  ;;  %2609 = vmatprep.mubr.msk.bf16.mxu1 %vm461_vm0, %v2834_v24  ;;  %v1270_v19 = vsel %vm3035_vm3, %v1265_v11, %v1269_v0  ;;  %v1297_v27 = vrot.slane %v1295_v17, 5  ;;  %v1302_v28 = vrot.slane %v1300_v18, 4  ;;  %v1314_v40 = vshrl.u32 %v1225_v34, 16  ;;  %v660_v62 = vld [vmem:[%s3002_s23] sm:$0xf] }
  0x22   : > { %2673 = vmatprep.mubr.msk.bf16.mxu0 %vm461_vm0, %v2366_v3  ;;  %v1284_v24 = vsel %vm3035_vm3, %v1279_v15, %v1283_v5  ;;  %v1305_v31 = vrot.slane %v1303_v21, 5  ;;  %v1292_v33 = vor.u32 %v1291_v26, %v1288_v20  ;;  %v1317_v41 = vshll.u32 %v1225_v34, 16  ;;  %v661_v63 = vld [vmem:[%s3002_s23 + $0x4] sm:$0x1]  ;;  %v662_v0 = vld [vmem:[%s3002_s23 + $0x8] sm:$0xf] }
  0x23   : > { %2608 = vmatpush3.bf16.msra.mxu1 %v2832_v22  ;;  %v1309_v22 = vshll.u32 %v1224_v13, 16  ;;  %v2367_v30 = vcombine.low %v1270_v19, %v1284_v24  ;;  %v1323_v43 = vshll.u32 %v1226_v35, 16  ;;  %v1328_v47 = vshrl.u32 %v1227_v36, 16  ;;  %v2846_v18 = vld [vmem:[%s3002_s23 + $0x8] ss:$8 sps:$4 sm:$0xff]   ;;  %v2849_v19 = vld [vmem:[%s3272_s4 + $0xe0] sm:$0xff]  }
  0x24   : > { %2672 = vmatpush3.bf16.msra.mxu0 %v2833_v23  ;;  %2617 = vmatprep.subr.bf16.mxu1 %v2836_v37  ;;  %v2844_v23 = vld [vmem:[%s3272_s4 + $0x58] sm:$0xff]   ;;  %v1331_v48 = vshll.u32 %v1227_v36, 16  ;;  %v1337_v49 = vshll.u32 %v1228_v39, 16  ;;  %v1316_v51 = vrot.slane %v1314_v40, 4  ;;  %v1319_v52 = vrot.slane %v1317_v41, 5 }
  0x25   : > { %2681 = vmatprep.subr.bf16.mxu0 %v3042_v42  ;;  %v1311_v32 = vrot.slane %v1309_v22, 5  ;;  %v1325_v53 = vrot.slane %v1323_v43, 5  ;;  %v1330_v55 = vrot.slane %v1328_v47, 4  ;;  %v680_v3 = vshrl.u32 %v660_v62, 16  ;;  %v664_v22 = vld [vmem:[%s3002_s23 + $0x10] sm:$0xf] }
  0x26   : > { %2610 = vmatmul.mubr.msk.bf16.vlgmr.msra.gmra.mrb[0].mxu1 %vm461_vm0, %v2835_v45  ;;  %v3091_v45 = vld [vmem:[%s3272_s4 + $0x60] sm:$0xff]   ;;  %v1333_v56 = vrot.slane %v1331_v48, 5  ;;  %v1320_v58 = vor.u32 %v1319_v52, %v1316_v51  ;;  %v683_v4 = vshll.u32 %v660_v62, 16  ;;  %v689_v5 = vshll.u32 %v661_v63, 16  ;;  %v666_v24 = vld [vmem:[%s3002_s23 + $0x18] sm:$0xf] }
  0x27   : > { %2618 = vmatpush3.bf16.msra.mxu1 %v2836_v37  ;;  %2613 = vmatprep.mubr.msk.bf16.mxu1 %vm461_vm0, %v2840_v8  ;;  %v1306_v37 = vor.u32 %v1305_v31, %v1302_v28  ;;  %v694_v7 = vshrl.u32 %v662_v0, 16  ;;  %v697_v8 = vshll.u32 %v662_v0, 16  ;;  %v682_v11 = vrot.slane %v680_v3, 4  ;;  %v667_v26 = vld [vmem:[%s3002_s23 + $0x1c] sm:$0x1]  ;;  %v2851_v52 = vld [vmem:[%s3272_s4 + $0xe8] sm:$0xff]  }
  0x28   : > { %2619 = vmatprep.subr.bf16.mxu1 %v2838_v46  ;;  %2674 = vmatmul.mubr.msk.bf16.vlgmr.msra.gmra.mrb[0].mxu0 %vm461_vm0, %v2367_v30  ;;  %v1334_v61 = vor.u32 %v1333_v56, %v1330_v55  ;;  %v1321_v1 = vrot.slane %v1320_v58, 4  ;;  %v685_v12 = vrot.slane %v683_v4, 5  ;;  %v691_v13 = vrot.slane %v689_v5, 5  ;;  %v2848_v47 = vld [vmem:[%s3002_s23 + $0x18] ss:$8 sps:$4 sm:$0xff]   ;;  %v2850_v0 = vld [vmem:[%s3272_s4 + $0x68] sm:$0xff]  }
  0x29   : > { %2682 = vmatpush3.bf16.msra.mxu0 %v3042_v42  ;;  %v1307_v50 = vrot.slane %v1306_v37, 4  ;;  %v1339_v42 = vrot.slane %v1337_v49, 5  ;;  %v696_v15 = vrot.slane %v694_v7, 4  ;;  %v699_v16 = vrot.slane %v697_v8, 5  ;;  %v670_v56 = vld [vmem:[%s3002_s23 + $0x28] sm:$0xf] }
  0x2a   : > { %2683 = vmatprep.subr.bf16.mxu0 %v2839_v25  ;;  %v1335_v6 = vrot.slane %v1334_v61, 4  ;;  %v1326_v10 = vsel %vm3035_vm3, %v1321_v1, %v1325_v53  ;;  %v686_v21 = vor.u32 %v685_v12, %v682_v11  ;;  %v711_v28 = vshll.u32 %v664_v22, 16  ;;  %v668_v53 = vld [vmem:[%s3002_s23 + $0x20] sm:$0xf]  ;;  %v2855_v7 = vld [vmem:[%s3272_s4 + $0xf0] sm:$0xff]  }
  0x2b   : > { %2620 = vmatpush3.bf16.msra.mxu1 %v2838_v46  ;;  %v1293_v46 = vrot.slane %v1292_v33, 4  ;;  %v1312_v57 = vsel %vm3035_vm3, %v1307_v50, %v1311_v32  ;;  %v722_v31 = vshrl.u32 %v666_v24, 16  ;;  %v725_v32 = vshll.u32 %v666_v24, 16  ;;  %v672_v11 = vld [vmem:[%s3002_s23 + $0x30] sm:$0xf] }
  0x2c   : > { %2621 = vmatprep.subr.bf16.mxu1 %v2842_v2  ;;  %v1340_v14 = vsel %vm3035_vm3, %v1335_v6, %v1339_v42  ;;  %v687_v30 = vrot.slane %v686_v21, 4  ;;  %v731_v33 = vshll.u32 %v667_v26, 16  ;;  %v713_v36 = vrot.slane %v711_v28, 5  ;;  %v671_v42 = vld [vmem:[%s3002_s23 + $0x2c] sm:$0x1] }
  0x2d   : > { %v1298_v54 = vsel %vm3035_vm3, %v1293_v46, %v1297_v27  ;;  %2684 = vmatpush3.bf16.msra.mxu0 %v2839_v25  ;;  %v2369_v20 = vcombine.low %v1326_v10, %v1340_v14  ;;  %v700_v25 = vor.u32 %v699_v16, %v696_v15  ;;  %v708_v27 = vshrl.u32 %v664_v22, 16  ;;  %v2852_v6 = vld [vmem:[%s3002_s23 + $0x28] ss:$8 sps:$4 sm:$0xff]   ;;  %v673_v12 = vld [vmem:[%s3002_s23 + $0x34] sm:$0x1] }
  0x2e   : > { %2614 = vmatmul.mubr.msk.bf16.gmra.mrb[4].mxu1 %vm461_vm0, %v2841_v29  ;;  %v2368_v60 = vcombine.low %v1298_v54, %v1312_v57  ;;  %2685 = vmatprep.subr.bf16.mxu0 %v2843_v44  ;;  %v692_v39 = vsel %vm3035_vm3, %v687_v30, %v691_v13  ;;  %v724_v40 = vrot.slane %v722_v31, 4  ;;  %v727_v41 = vrot.slane %v725_v32, 5  ;;  %v669_v54 = vld [vmem:[%s3002_s23 + $0x24] sm:$0x1]  ;;  %v2853_v13 = vld [vmem:[%s3272_s4 + $0x70] sm:$0xff]   ;;  %v2856_v30 = vld [vmem:[%s3272_s4 + $0x78] sm:$0xff]  }
  0x2f   : > { %2622 = vmatpush3.bf16.msra.mxu1 %v2842_v2  ;;  %v663_v2 = vld [vmem:[%s3002_s23 + $0xc] sm:$0x1]  ;;  %v701_v34 = vrot.slane %v700_v25, 4  ;;  %v710_v35 = vrot.slane %v708_v27, 4  ;;  %v733_v43 = vrot.slane %v731_v33, 5  ;;  %v736_v57 = vshrl.u32 %v668_v53, 16 }
  0x30   : > { %2623 = vmatprep.subr.bf16.mxu1 %v2844_v23  ;;  %2677 = vmatprep.mubr.msk.bf16.mxu0 %vm461_vm0, %v2368_v60  ;;  %v703_v9 = vshll.u32 %v663_v2, 16  ;;  %v728_v49 = vor.u32 %v727_v41, %v724_v40  ;;  %v739_v58 = vshll.u32 %v668_v53, 16  ;;  %v745_v60 = vshll.u32 %v669_v54, 16  ;;  %v674_v15 = vld [vmem:[%s3002_s23 + $0x38] sm:$0xf]  ;;  %v2862_v40 = vld [vmem:[%s3272_s4 + $0x100] sm:$0xff]  }
  0x31   : > { %2686 = vmatpush3.bf16.msra.mxu0 %v2843_v44  ;;  %v714_v46 = vor.u32 %v713_v36, %v710_v35  ;;  %v750_v61 = vshrl.u32 %v670_v56, 16  ;;  %v753_v62 = vshll.u32 %v670_v56, 16  ;;  %v738_v1 = vrot.slane %v736_v57, 4  ;;  %v675_v16 = vld [vmem:[%s3002_s23 + $0x3c] sm:$0x1]  ;;  %v3191_v53 = vld [vmem:[%s3272_s4 + $0x110] sm:$0xff]  }
  0x32   : > { %v705_v17 = vrot.slane %v703_v9, 5  ;;  %2687 = vmatprep.subr.bf16.mxu0 %v2845_v59  ;;  %2678 = vmatmul.mubr.msk.bf16.gmra.mrb[4].mxu0 %vm461_vm0, %v2369_v20  ;;  %v729_v51 = vrot.slane %v728_v49, 4  ;;  %v741_v2 = vrot.slane %v739_v58, 5  ;;  %v759_v3 = vshll.u32 %v671_v42, 16  ;;  %v2854_v35 = vld [vmem:[%s3002_s23 + $0x38] ss:$8 sps:$4 sm:$0xff]  }
  0x33   : > { %2624 = vmatpush3.bf16.msra.mxu1 %v2844_v23  ;;  %v665_v23 = vld [vmem:[%s3002_s23 + $0x14] sm:$0x1]  ;;  %2689 = vmatprep.mubr.msk.bf16.mxu0 %vm461_vm0, %v2846_v18  ;;  %v715_v50 = vrot.slane %v714_v46, 4  ;;  %v752_v4 = vrot.slane %v750_v61, 4  ;;  %v755_v5 = vrot.slane %v753_v62, 5  ;;  %v747_v9 = vrot.slane %v745_v60, 5 }
  0x34   : > { %2633 = vmatprep.subr.bf16.mxu1 %v3091_v45  ;;  %v717_v29 = vshll.u32 %v665_v23, 16  ;;  %v706_v44 = vsel %vm3035_vm3, %v701_v34, %v705_v17  ;;  %v742_v8 = vor.u32 %v741_v2, %v738_v1  ;;  %v761_v10 = vrot.slane %v759_v3, 5  ;;  %v2863_v49 = vld [vmem:[%s3272_s4 + $0x108] sm:$0xff]   ;;  %v3199_v56 = vld [vmem:[%s3272_s4 + $0x118] sm:$0xff]   ;;  %v2436_v58 = vld [vmem:[%s3002_s23 + $0x10] sm:$0xf] }
  0x35   : > { %2688 = vmatpush3.bf16.msra.mxu0 %v2845_v59  ;;  %v2306_v48 = vcombine.low %v692_v39, %v706_v44  ;;  %v734_v59 = vsel %vm3035_vm3, %v729_v51, %v733_v43  ;;  %v756_v14 = vor.u32 %v755_v5, %v752_v4  ;;  %v764_v17 = vshrl.u32 %v672_v11, 16  ;;  %v2858_v44 = vld [vmem:[%s3013_s10] ss:$8 sps:$4 sm:$0xff]   ;;  %v2860_v51 = vld [vmem:[%s3013_s10 + $0x10] ss:$8 sps:$4 sm:$0xff]  }
  0x36   : > { %v719_v37 = vrot.slane %v717_v29, 5  ;;  %2697 = vmatprep.subr.bf16.mxu0 %v2849_v19  ;;  %v767_v18 = vshll.u32 %v672_v11, 16  ;;  %v743_v20 = vrot.slane %v742_v8, 4  ;;  %v773_v21 = vshll.u32 %v673_v12, 16  ;;  %v2864_v54 = vld [vmem:[%s3013_s10 + $0x20] ss:$8 sps:$4 sm:$0xff]  }
  0x37   : > { %2625 = vmatprep.mubr.msk.bf16.mxu1 %vm461_vm0, %v2306_v48  ;;  %v778_v22 = vshrl.u32 %v674_v15, 16  ;;  %v781_v23 = vshll.u32 %v674_v15, 16  ;;  %v757_v24 = vrot.slane %v756_v14, 4  ;;  %v787_v26 = vshll.u32 %v675_v16, 16  ;;  %v2434_v42 = vld [vmem:[%s3002_s23 + $0x8] sm:$0xf] }
  0x38   : > { %v720_v55 = vsel %vm3035_vm3, %v715_v50, %v719_v37  ;;  %v769_v25 = vrot.slane %v767_v18, 5  ;;  %v748_v27 = vsel %vm3035_vm3, %v743_v20, %v747_v9  ;;  %v775_v33 = vrot.slane %v773_v21, 5  ;;  %v2861_v50 = vld [vmem:[%s2961_s24 + $0x18] ss:$8 sps:$4 sm:$0xff]   ;;  %v2435_v57 = vld [vmem:[%s3002_s23 + $0xc] sm:$0x1] }
  0x39   : > { %v2307_v63 = vcombine.low %v720_v55, %v734_v59  ;;  %v780_v28 = vrot.slane %v778_v22, 4  ;;  %v783_v29 = vrot.slane %v781_v23, 5  ;;  %v762_v31 = vsel %vm3035_vm3, %v757_v24, %v761_v10  ;;  %v2867_v55 = vld [vmem:[%s2961_s24 + $0x38] ss:$8 sps:$4 sm:$0xff]   ;;  %v2437_v59 = vld [vmem:[%s3002_s23 + $0x14] sm:$0x1] }
  0x3a   : > { %2690 = vmatmul.mubr.msk.bf16.vlgmr.msra.gmra.mrb[0].mxu0 %vm461_vm0, %v2848_v47  ;;  %v789_v34 = vrot.slane %v787_v26, 5  ;;  %v2308_v36 = vcombine.low %v748_v27, %v762_v31  ;;  %v2859_v47 = vld [vmem:[%s2961_s24 + $0x8] ss:$8 sps:$4 sm:$0xff]   ;;  %v1782_v60 = vshrl.u32 %v2434_v42, 16  ;;  %v1785_v61 = vshll.u32 %v2434_v42, 16 }
  0x3b   : > { %2698 = vmatpush3.bf16.msra.mxu0 %v2849_v19  ;;  %2626 = vmatmul.mubr.msk.bf16.vlgmr.msra.gmra.mrb[0].mxu1 %vm461_vm0, %v2307_v63  ;;  %v2857_v19 = vld [vmem:[%s3272_s4 + $0xf8] sm:$0xff]   ;;  %v784_v37 = vor.u32 %v783_v29, %v780_v28  ;;  %v1791_v62 = vshll.u32 %v2435_v57, 16  ;;  %v1796_v63 = vshrl.u32 %v2436_v58, 16  ;;  %v1805_v1 = vshll.u32 %v2437_v59, 16  ;;  %v2442_v2 = vld [vmem:[%s3002_s23 + $0x28] sm:$0xf] }
  0x3c   : > { %2699 = vmatprep.subr.bf16.mxu0 %v2851_v52  ;;  %2634 = vmatpush3.bf16.msra.mxu1 %v3091_v45  ;;  %v766_v45 = vrot.slane %v764_v17, 4  ;;  %v1784_v3 = vrot.slane %v1782_v60, 4  ;;  %v1787_v4 = vrot.slane %v1785_v61, 5  ;;  %v2443_v5 = vld [vmem:[%s3002_s23 + $0x2c] sm:$0x1]  ;;  %v1838_v14 = vshrl.u32 %v2442_v2, 16 }
  0x3d   : > { %2693 = vmatprep.mubr.msk.bf16.mxu0 %vm461_vm0, %v2852_v6  ;;  %2635 = vmatprep.subr.bf16.mxu1 %v2850_v0  ;;  %v785_v41 = vrot.slane %v784_v37, 4  ;;  %v2444_v6 = vld [vmem:[%s3002_s23 + $0x30] sm:$0xf]  ;;  %v1793_v8 = vrot.slane %v1791_v62, 5  ;;  %v1798_v9 = vrot.slane %v1796_v63, 4  ;;  %v1807_v11 = vrot.slane %v1805_v1, 5 }
  0x3e   : > { %v770_v32 = vor.u32 %v769_v25, %v766_v45  ;;  %2629 = vmatprep.mubr.msk.bf16.mxu1 %vm461_vm0, %v2308_v36  ;;  %v2445_v12 = vld [vmem:[%s3002_s23 + $0x34] sm:$0x1]  ;;  %v1841_v15 = vshll.u32 %v2442_v2, 16  ;;  %v1847_v16 = vshll.u32 %v2443_v5, 16  ;;  %v2438_v17 = vld [vmem:[%s3002_s23 + $0x18] sm:$0xf] }
  0x3f   : > { %2700 = vmatpush3.bf16.msra.mxu0 %v2851_v52  ;;  %v790_v46 = vsel %vm3035_vm3, %v785_v41, %v789_v34  ;;  %v2865_v52 = vld [vmem:[%s2961_s24 + $0x28] ss:$8 sps:$4 sm:$0xff]   ;;  %v1855_v20 = vshll.u32 %v2444_v6, 16  ;;  %v1861_v21 = vshll.u32 %v2445_v12, 16  ;;  %v2439_v22 = vld [vmem:[%s3002_s23 + $0x1c] sm:$0x1] }
  0x40   : > { %2701 = vmatprep.subr.bf16.mxu0 %v2855_v7  ;;  %2636 = vmatpush3.bf16.msra.mxu1 %v2850_v0  ;;  %v771_v39 = vrot.slane %v770_v32, 4  ;;  %v1799_v0 = vshll.u32 %v2436_v58, 16  ;;  %v1840_v24 = vrot.slane %v1838_v14, 4  ;;  %v1843_v45 = vrot.slane %v1841_v15, 5  ;;  %v2440_v26 = vld [vmem:[%s3002_s23 + $0x20] sm:$0xf] }
  0x41   : > { %2637 = vmatprep.subr.bf16.mxu1 %v2853_v13  ;;  %v1849_v25 = vrot.slane %v1847_v16, 5  ;;  %v1857_v29 = vrot.slane %v1855_v20, 5  ;;  %v1813_v34 = vshll.u32 %v2438_v17, 16  ;;  %v2441_v37 = vld [vmem:[%s3002_s23 + $0x24] sm:$0x1] }
  0x42   : > { %2694 = vmatmul.mubr.msk.bf16.gmra.mrb[4].mxu0 %vm461_vm0, %v2854_v35  ;;  %v776_v43 = vsel %vm3035_vm3, %v771_v39, %v775_v33  ;;  %v1801_v10 = vrot.slane %v1799_v0, 5  ;;  %v1844_v32 = vor.u32 %v1843_v45, %v1840_v24  ;;  %v1810_v33 = vshrl.u32 %v2438_v17, 16  ;;  %v2446_v41 = vld [vmem:[%s3002_s23 + $0x38] sm:$0xf]  ;;  %v2448_v42 = vld [vmem:[%s3002_s23 + $0x40] sm:$0xf] }
  0x43   : > { %2702 = vmatpush3.bf16.msra.mxu0 %v2855_v7  ;;  %v2309_v48 = vcombine.low %v776_v43, %v790_v46  ;;  %2705 = vmatprep.mubr.msk.bf16.mxu0 %vm461_vm0, %v2859_v47  ;;  %v2866_v7 = vld [vmem:[%s3013_s10 + $0x30] ss:$8 sps:$4 sm:$0xff]   ;;  %v1819_v39 = vshll.u32 %v2439_v22, 16  ;;  %v1815_v47 = vrot.slane %v1813_v34, 5  ;;  %v2449_v60 = vld [vmem:[%s3002_s23 + $0x44] sm:$0x1] }
  0x44   : > { %2703 = vmatprep.subr.bf16.mxu0 %v2857_v19  ;;  %2638 = vmatpush3.bf16.msra.mxu1 %v2853_v13  ;;  %v1788_v13 = vor.u32 %v1787_v4, %v1784_v3  ;;  %v1802_v18 = vor.u32 %v1801_v10, %v1798_v9  ;;  %v1812_v46 = vrot.slane %v1810_v33, 4  ;;  %v1869_v61 = vshll.u32 %v2446_v41, 16  ;;  %s2481_s10 = sshll.u32 %s3280_s28, 5 }
  0x45   : > { %2639 = vmatprep.subr.bf16.mxu1 %v2856_v30  ;;  %2630 = vmatmul.mubr.msk.bf16.gmra.mrb[4].mxu1 %vm461_vm0, %v2309_v48  ;;  %v1821_v58 = vrot.slane %v1819_v39, 5  ;;  %v1880_v5 = vshrl.u32 %v2448_v42, 16  ;;  %s376_s22 = scalar_lea.vmem %s3274_s6, %s2481_s10 }
  0x46   : > { %2641 = vmatprep.mubr.msk.bf16.mxu1 %vm461_vm0, %v2858_v44  ;;  %v1789_v23 = vrot.slane %v1788_v13, 4  ;;  %v1803_v27 = vrot.slane %v1802_v18, 4  ;;  %v1845_v44 = vrot.slane %v1844_v32, 4  ;;  %v1871_v4 = vrot.slane %v1869_v61, 5 }
  0x47   : > { %2704 = vmatpush3.bf16.msra.mxu0 %v2857_v19  ;;  %v1852_v19 = vshrl.u32 %v2444_v6, 16  ;;  %v1883_v6 = vshll.u32 %v2448_v42, 16 }
  0x48   : > { %2713 = vmatprep.subr.bf16.mxu0 %v2862_v40  ;;  %2640 = vmatpush3.bf16.msra.mxu1 %v2856_v30  ;;  %v1863_v30 = vrot.slane %v1861_v21, 5  ;;  %v1794_v31 = vsel %vm3035_vm3, %v1789_v23, %v1793_v8  ;;  %v1808_v35 = vsel %vm3035_vm3, %v1803_v27, %v1807_v11  ;;  %v1882_v11 = vrot.slane %v1880_v5, 4 }
  0x49   : > { %2729 = vmatprep.subr.bf16.mxu1 %v2862_v40  ;;  %v1854_v28 = vrot.slane %v1852_v19, 4  ;;  %v2458_v43 = vcombine.low %v1794_v31, %v1808_v35 }
  0x4a   : > { %2706 = vmatmul.mubr.msk.bf16.vlgmr.msra.gmra.mrb[0].mxu0 %vm461_vm0, %v2861_v50  ;;  %v1827_v50 = vshll.u32 %v2440_v26, 16 }
  0x4b   : > { %2714 = vmatpush3.bf16.msra.mxu0 %v2862_v40  ;;  %2709 = vmatprep.mubr.msk.bf16.mxu0 %vm461_vm0, %v2865_v52  ;;  %v1858_v36 = vor.u32 %v1857_v29, %v1854_v28  ;;  %v1850_v52 = vsel %vm3035_vm3, %v1845_v44, %v1849_v25 }
  0x4c   : > { %2715 = vmatprep.subr.bf16.mxu0 %v2863_v49  ;;  %v1829_v59 = vrot.slane %v1827_v50, 5 }
  0x4d   : > { %2642 = vmatmul.mubr.msk.bf16.vlgmr.msra.gmra.mrb[0].mxu1 %vm461_vm0, %v2860_v51  ;;  %v1859_v48 = vrot.slane %v1858_v36, 4  ;;  %v2447_v51 = vld [vmem:[%s3002_s23 + $0x3c] sm:$0x1] }
  0x4e   : > { %2733 = vmatpush3.bf16.msra.mxu1 %v2862_v40  ;;  %2645 = vmatprep.mubr.msk.bf16.mxu1 %vm461_vm0, %v2864_v54  ;;  %v1824_v40 = vshrl.u32 %v2440_v26, 16  ;;  %v1816_v54 = vor.u32 %v1815_v47, %v1812_v46  ;;  %v1875_v1 = vshll.u32 %v2447_v51, 16 }
  0x4f   : > { %2716 = vmatpush3.bf16.msra.mxu0 %v2863_v49  ;;  %2730 = vmatprep.subr.bf16.mxu1 %v2863_v49  ;;  %v1864_v57 = vsel %vm3035_vm3, %v1859_v48, %v1863_v30 }
  0x50   : > { %2717 = vmatprep.subr.bf16.mxu0 %v3191_v53  ;;  %v2460_v62 = vcombine.low %v1850_v52, %v1864_v57  ;;  %v1817_v63 = vrot.slane %v1816_v54, 4  ;;  %v1877_v12 = vrot.slane %v1875_v1, 5 }
  0x52   : > { %2710 = vmatmul.mubr.msk.bf16.gmra.mrb[4].mxu0 %vm461_vm0, %v2867_v55  ;;  %2734 = vmatpush3.bf16.msra.mxu1 %v2863_v49  ;;  %v1826_v49 = vrot.slane %v1824_v40, 4  ;;  %v1833_v55 = vshll.u32 %v2441_v37, 16  ;;  %v1822_v8 = vsel %vm3035_vm3, %v1817_v63, %v1821_v58  ;;  %v2470_v40 = vld [vmem:[%s3273_s5] ss:$0 sm:$0xff] }
  0x53   : > { %2718 = vmatpush3.bf16.msra.mxu0 %v3191_v53  ;;  %2731 = vmatprep.subr.bf16.mxu1 %v3191_v53 }
  0x54   : > { %2719 = vmatprep.subr.bf16.mxu0 %v3199_v56  ;;  %2721 = vmatprep.mubr.msk.bf16.mxu0 %vm461_vm0, %v2458_v43  ;;  %v1830_v2 = vor.u32 %v1829_v59, %v1826_v49  ;;  %v1835_v3 = vrot.slane %v1833_v55, 5 }
  0x55   : > { %2646 = vmatmul.mubr.msk.bf16.gmra.mrb[4].mxu1 %vm461_vm0, %v2866_v7  ;;  %v1889_v7 = vshll.u32 %v2449_v60, 16 }
  0x56   : > { %2735 = vmatpush3.bf16.msra.mxu1 %v3191_v53  ;;  %v1866_v53 = vshrl.u32 %v2446_v41, 16  ;;  %2725 = vmatprep.mubr.msk.bf16.mxu1 %vm461_vm0, %v2460_v62  ;;  %v1831_v9 = vrot.slane %v1830_v2, 4 }
  0x57   : > { %2720 = vmatpush3.bf16.msra.mxu0 %v3199_v56  ;;  %2732 = vmatprep.subr.bf16.mxu1 %v3199_v56  ;;  %v1891_v17 = vrot.slane %v1889_v7, 5 }
  0x58   : > { %v1868_v0 = vrot.slane %v1866_v53, 4  ;;  %v1836_v13 = vsel %vm3035_vm3, %v1831_v9, %v1835_v3 }
  0x59   : > { %v2459_v15 = vcombine.low %v1822_v8, %v1836_v13 }
  0x5a   : > { %2736 = vmatpush3.bf16.msra.mxu1 %v3199_v56  ;;  %v1872_v10 = vor.u32 %v1871_v4, %v1868_v0  ;;  %v1885_v56 = vrot.slane %v1883_v6, 5 }
  0x5b   : > { %2722 = vmatmul.mubr.msk.bf16.vlgmr.msra.gmra.mrb[0].mxu0 %vm461_vm0, %v2459_v15 }
  0x5c   : > { %v1873_v14 = vrot.slane %v1872_v10, 4  ;;  %v1886_v16 = vor.u32 %v1885_v56, %v1882_v11 }
  0x5e   : > { %v1878_v18 = vsel %vm3035_vm3, %v1873_v14, %v1877_v12  ;;  %v1887_v19 = vrot.slane %v1886_v16, 4 }
  0x60   : > { %v1892_v20 = vsel %vm3035_vm3, %v1887_v19, %v1891_v17 }
  0x61   : > { %v2461_v21 = vcombine.low %v1878_v18, %v1892_v20 }
  0x63   : > { %2726 = vmatmul.mubr.msk.bf16.vlgmr.msra.gmra.mrb[8].mxu1 %vm461_vm0, %v2461_v21 }
 0x120   : > { %v2643_v22 = vpop.f32.mrb[0].mxu1 }
 0x121   : > { %v1028_v23 = vpop.f32.mrb[1].mxu1 }
 0x122   : > { %v2644_v24 = vpop.f32.mrb[2].mxu1 }
 0x123   : > { %v1031_v25 = vpop.f32.mrb[3].mxu1 }
 0x125   : > { %v2711_v45 = vpop.f32.mrb[4].mxu0 }
 0x126   : > { %v1742_v26 = vpop.f32.mrb[5].mxu0 }
 0x127   : > { %v2712_v27 = vpop.f32.mrb[6].mxu0 }
 0x128   : > { %v1745_v28 = vpop.f32.mrb[7].mxu0  ;;  %v2647_v29 = vpop.f32.mrb[4].mxu1 }
 0x129   : > { %v2741_v30 = vadd.f32 %v2711_v45, %v2647_v29  ;;  %v1044_v31 = vpop.f32.mrb[5].mxu1 }
 0x12a   : > { %v2743_v32 = vadd.f32 %v1742_v26, %v1044_v31  ;;  %v2648_v33 = vpop.f32.mrb[6].mxu1 }
 0x12b   : > { %v2745_v34 = vadd.f32 %v2712_v27, %v2648_v33  ;;  %v1047_v38 = vpop.f32.mrb[7].mxu1 }
 0x12c   : > { %v2747_v35 = vadd.f32 %v1745_v28, %v1047_v38 }
 0x12e   : > { %v2723_v36 = vpop.f32.mrb[0].mxu0 }
 0x12f   : > { %v2737_v37 = vadd.f32 %v2723_v36, %v2643_v22  ;;  %v1984_v39 = vpop.f32.mrb[1].mxu0 }
 0x130   : > { %v2738_v41 = vadd.f32 %v1984_v39, %v1028_v23  ;;  %v2724_v43 = vpop.f32.mrb[2].mxu0 }
 0x131   : > { %v2739_v44 = vadd.f32 %v2724_v43, %v2644_v24  ;;  %v1987_v46 = vpop.f32.mrb[3].mxu0  ;;  %v2032_v48 = vadd.f32 %v2737_v37, %v2470_v40 }
 0x132   : > { %v2740_v47 = vadd.f32 %v1987_v46, %v1031_v25  ;;  %v2030_v50 = vadd.f32 %v2738_v41, %v2470_v40 }
 0x133   : > { %v2033_v51 = vadd.f32 %v2739_v44, %v2470_v40  ;;  %v2094_v4 = vmul.f32 %v2032_v48, %v2032_v48 }
 0x134   : > { %v2031_v55 = vadd.f32 %v2740_v47, %v2470_v40  ;;  %v2092_v62 = vmul.f32 %v2030_v50, %v2030_v50 }
 0x135   : > { %v2498_v53 = vpack.c.bf16 %v2033_v51, %v2032_v48  ;;  %v2095_v10 = vmul.f32 %v2033_v51, %v2033_v51 }
 0x136   : > { %v2727_v49 = vpop.f32.mrb[8].mxu1  ;;  %v2493_v59 = vpack.c.bf16 %v2031_v55, %v2030_v50  ;;  %v2078_v60 = vadd.f32 %v2031_v55, %v2030_v50  ;;  %v2093_v63 = vmul.f32 %v2031_v55, %v2031_v55 }
 0x137   : > { %v2742_v52 = vadd.f32 %v2741_v30, %v2727_v49  ;;  %v2000_v54 = vpop.f32.mrb[9].mxu1  ;;  %2510 = vst [vmem:[%s376_s22 + $0x8] sm:$0xff] %v2498_v53  }
 0x138   : > { %v2744_v42 = vadd.f32 %v2743_v32, %v2000_v54  ;;  %v2728_v57 = vpop.f32.mrb[10].mxu1  ;;  %2494 = vst [vmem:[%s376_s22] sm:$0xff] %v2493_v59   ;;  %v2079_v3 = vadd.f32 %v2078_v60, %v2032_v48  ;;  %v2100_v6 = vadd.f32 %v2093_v63, %v2092_v62 }
 0x139   : > { %v2746_v58 = vadd.f32 %v2745_v34, %v2728_v57  ;;  %v2003_v61 = vpop.f32.mrb[11].mxu1  ;;  %v2036_v1 = vadd.f32 %v2742_v52, %v2470_v40 }
 0x13a   : > { %v2748_v0 = vadd.f32 %v2747_v35, %v2003_v61  ;;  %v2034_v5 = vadd.f32 %v2744_v42, %v2470_v40  ;;  %v2080_v9 = vadd.f32 %v2079_v3, %v2033_v51  ;;  %v2101_v11 = vadd.f32 %v2100_v6, %v2094_v4 }
 0x13b   : > { %v2037_v2 = vadd.f32 %v2746_v58, %v2470_v40  ;;  %v2098_v19 = vmul.f32 %v2036_v1, %v2036_v1 }
 0x13c   : > { %v2035_v7 = vadd.f32 %v2748_v0, %v2470_v40  ;;  %v2081_v56 = vadd.f32 %v2080_v9, %v2034_v5  ;;  %v2096_v13 = vmul.f32 %v2034_v5, %v2034_v5  ;;  %v2102_v14 = vadd.f32 %v2101_v11, %v2095_v10 }
 0x13d   : > { %v2508_v8 = vpack.c.bf16 %v2037_v2, %v2036_v1  ;;  %v2099_v22 = vmul.f32 %v2037_v2, %v2037_v2 }
 0x13e   : > { %v2503_v12 = vpack.c.bf16 %v2035_v7, %v2034_v5  ;;  %v2082_v15 = vadd.f32 %v2081_v56, %v2035_v7  ;;  %v2097_v16 = vmul.f32 %v2035_v7, %v2035_v7  ;;  %v2103_v17 = vadd.f32 %v2102_v14, %v2096_v13 }
 0x13f   : > { %2512 = vst [vmem:[%s376_s22 + $0x18] sm:$0xff] %v2508_v8  }
 0x140   : > { %2511 = vst [vmem:[%s376_s22 + $0x10] sm:$0xff] %v2503_v12   ;;  %v2083_v18 = vadd.f32 %v2082_v15, %v2036_v1  ;;  %v2104_v20 = vadd.f32 %v2103_v17, %v2097_v16 }
 0x142   : > { %v2084_v21 = vadd.f32 %v2083_v18, %v2037_v2  ;;  %v2105_v23 = vadd.f32 %v2104_v20, %v2098_v19 }
 0x144   : > { %v2085_v24 = vrot.slane %v2084_v21, 4  ;;  %v2106_v45 = vadd.f32 %v2105_v23, %v2099_v22 }
 0x146   : > { %v2086_v25 = vadd.f32 %v2085_v24, %v2084_v21  ;;  %v2107_v26 = vrot.slane %v2106_v45, 4 }
 0x148   : > { %v2087_v27 = vrot.slane %v2086_v25, 2  ;;  %v2108_v28 = vadd.f32 %v2107_v26, %v2106_v45 }
 0x14a   : > { %v2088_v29 = vadd.f32 %v2087_v27, %v2086_v25  ;;  %v2109_v30 = vrot.slane %v2108_v28, 2 }
 0x14c   : > { %v2089_v31 = vrot.slane %v2088_v29, 1  ;;  %v2110_v32 = vadd.f32 %v2109_v30, %v2108_v28 }
 0x14e   : > { %v2090_v33 = vadd.f32 %v2089_v31, %v2088_v29  ;;  %v2111_v34 = vrot.slane %v2110_v32, 1 }
 0x150   : > { %2091 = vst [vmem:[%s379_s29] sm:$0x1] %v2090_v33  ;;  %v2112_v38 = vadd.f32 %v2111_v34, %v2110_v32 }
 0x152   : > { %2113 = vst [vmem:[%s382_s12] sm:$0x1] %v2112_v38 }
 0x153 PF: > { %s19_s27 = sadd.s32 1, %s2876_s27  }
 0x154   : > { %p16_p4 = scmp.ge.s32.totalorder %s19_s27, 4  }
 0x156   :  { %18 = sbr.rel (!%p16_p4) target bundleno = 1 (0x1), region = 117 }

// kernel: discriminator_forward.7
= control target key start
LH: loop header
LB: loop body
LE: loop exit
PB: predicated region body
PF: predicated region fallthrough
CT: control target
= control target key end

     0   :  { %s3095_s27 = smov 0   ;;  %s3686_s0 = inlined_call_operand.vmem [shape: bf16[2,5,5,128], index: 0, kind: input, shape index: {}]   ;;  %s3687_s1 = inlined_call_operand.vmem [shape: bf16[2,5,5,128], index: 1, kind: input, shape index: {}]   ;;  %s3688_s2 = inlined_call_operand.vmem [shape: bf16[2,5,5,128], index: 2, kind: input, shape index: {}]   ;;  %s3689_s3 = inlined_call_operand.vmem [shape: bf16[2,5,5,128], index: 3, kind: input, shape index: {}]   ;;  %s3690_s4 = inlined_call_operand.vmem [shape: bf16[9,128,256], index: 4, kind: input, shape index: {}]   ;;  %s3691_s5 = inlined_call_operand.vmem [shape: f32[1,256], index: 5, kind: input, shape index: {}]   ;;  %s3692_s6 = inlined_call_operand.vmem [shape: bf16[2,16,256], index: 6, kind: output, shape index: {0}]   ;;  %s3693_s7 = inlined_call_operand.vmem [shape: f32[2,1,256], index: 7, kind: output, shape index: {1}]   ;;  %s3694_s8 = inlined_call_operand.vmem [shape: f32[2,1,256], index: 8, kind: output, shape index: {2}]  }
   0x1 LB: > { %s2439_s28 = sadd.s32 4294967295, %s3045_s27   ;;  %p2443_p0 = scmp.ge.s32.totalorder %s3045_s27, 1  ;;  %s3045_s27 = sphi %s3095_s27, %s19_s27  }
   0x2   : > { %p297_p1 = scmp.lt.s32.totalorder %s3045_s27, 3 }
   0x4   : > { %p298_p2 = pnand %p2443_p0, %p297_p1 }
   0x5   : > { %v2799_v0 = vld [vmem:[%s3690_s4 + $0x84] ss:$8 sps:$4 sm:$0xff] (!%p298_p2)   ;;  %v3047_v2 = vmov (!%p298_p2), 0   ;;  %v2803_v3 = vld [vmem:[%s3690_s4 + $0x80] ss:$8 sps:$4 sm:$0xff] (!%p298_p2)   ;;  %p354_p3 = scmp.lt.s32.totalorder (!%p298_p2), %s2439_s28, 1  ;;  %v438_v23 = vlaneseq (!%p298_p2) }
   0x6   : > { %301 = sbr.rel (%p298_p2) target bundleno = 411 (0x19b), region = 44  ;;  %v2801_v1 = vld [vmem:[%s3690_s4 + $0x204] ss:$8 sps:$4 sm:$0xff] (!%p298_p2)   ;;  %563 = vmatprep.mubr.bf16.mxu1 (!%p298_p2), %v3047_v2  ;;  %1309 = vmatprep.mubr.bf16.mxu0 (!%p298_p2), %v3047_v2  ;;  %v2804_v4 = vld [vmem:[%s3690_s4 + $0x200] ss:$8 sps:$4 sm:$0xff] (!%p298_p2)  }
   0x7   : > { %531 = vmatprep.subr.bf16.mxu1 (!%p298_p2), %v2799_v0  ;;  %1277 = vmatprep.subr.bf16.mxu0 (!%p298_p2), %v2801_v1  ;;  %v2805_v5 = vld [vmem:[%s3690_s4 + $0x94] ss:$8 sps:$4 sm:$0xff] (!%p298_p2)   ;;  %v2809_v7 = vld [vmem:[%s3690_s4 + $0x90] ss:$8 sps:$4 sm:$0xff] (!%p298_p2)   ;;  %v2811_v9 = vld [vmem:[%s3690_s4 + $0xa4] ss:$8 sps:$4 sm:$0xff] (!%p298_p2)  }
   0x8   : > { %532 = vmatpush1.bf16.msra.mxu1 (!%p298_p2), %v2803_v3  ;;  %1278 = vmatpush1.bf16.msra.mxu0 (!%p298_p2), %v2804_v4  ;;  %v2807_v6 = vld [vmem:[%s3690_s4 + $0x214] ss:$8 sps:$4 sm:$0xff] (!%p298_p2)   ;;  %v2810_v8 = vld [vmem:[%s3690_s4 + $0x210] ss:$8 sps:$4 sm:$0xff] (!%p298_p2)   ;;  %v2813_v10 = vld [vmem:[%s3690_s4 + $0x224] ss:$8 sps:$4 sm:$0xff] (!%p298_p2)  }
   0x9   : > { %533 = vmatprep.subr.bf16.mxu1 (!%p298_p2), %v2805_v5  ;;  %1279 = vmatprep.subr.bf16.mxu0 (!%p298_p2), %v2807_v6  ;;  %v2815_v11 = vld [vmem:[%s3690_s4 + $0xa0] ss:$8 sps:$4 sm:$0xff] (!%p298_p2)   ;;  %v2817_v13 = vld [vmem:[%s3690_s4 + $0xb4] ss:$8 sps:$4 sm:$0xff] (!%p298_p2)   ;;  %v2821_v15 = vld [vmem:[%s3690_s4 + $0xb0] ss:$8 sps:$4 sm:$0xff] (!%p298_p2)  }
   0xa   : > { %v2816_v12 = vld [vmem:[%s3690_s4 + $0x220] ss:$8 sps:$4 sm:$0xff] (!%p298_p2)   ;;  %v2819_v14 = vld [vmem:[%s3690_s4 + $0x234] ss:$8 sps:$4 sm:$0xff] (!%p298_p2)   ;;  %v2822_v16 = vld [vmem:[%s3690_s4 + $0x230] ss:$8 sps:$4 sm:$0xff] (!%p298_p2)  }
   0xb   : > { %v2823_v17 = vld [vmem:[%s3690_s4 + $0xc4] ss:$8 sps:$4 sm:$0xff] (!%p298_p2)   ;;  %v2827_v19 = vld [vmem:[%s3690_s4 + $0xc0] ss:$8 sps:$4 sm:$0xff] (!%p298_p2)   ;;  %v3048_v21 = vmov (!%p298_p2), 1983009808  }
   0xc   : > { %534 = vmatpush1.bf16.msra.mxu1 (!%p298_p2), %v2809_v7  ;;  %1280 = vmatpush1.bf16.msra.mxu0 (!%p298_p2), %v2810_v8  ;;  %v2825_v18 = vld [vmem:[%s3690_s4 + $0x244] ss:$8 sps:$4 sm:$0xff] (!%p298_p2)   ;;  %v2828_v20 = vld [vmem:[%s3690_s4 + $0x240] ss:$8 sps:$4 sm:$0xff] (!%p298_p2)   ;;  %v436_v22 = vunpack.c.l.s4 (!%p298_p2), %v3048_v21  ;;  %v2829_v24 = vld [vmem:[%s3690_s4 + $0xd4] ss:$8 sps:$4 sm:$0xff] (!%p298_p2)  }
   0xd   : > { %535 = vmatprep.subr.bf16.mxu1 %v2811_v9  ;;  %1281 = vmatprep.subr.bf16.mxu0 %v2813_v10  ;;  %s3702_s28 = smov (!%p354_p3, %s2439_s28), 1  ;;  %v2831_v25 = vld [vmem:[%s3690_s4 + $0x254] ss:$8 sps:$4 sm:$0xff]   ;;  %v2833_v26 = vld [vmem:[%s3690_s4 + $0xd0] ss:$8 sps:$4 sm:$0xff]   ;;  %v3184_v28 = vshrl.u32 %v438_v23, 7 }
   0xe   : > { %s3178_s11 = smul.u32 20, %s3702_s28  ;;  %v437_v27 = vunpack.c.0.s8 %v436_v22  ;;  %v2834_v29 = vld [vmem:[%s3690_s4 + $0x250] ss:$8 sps:$4 sm:$0xff]   ;;  %v2835_v30 = vld [vmem:[%s3690_s4 + $0xe4] ss:$8 sps:$4 sm:$0xff]   ;;  %vm2246_vm7 = vcmp.lt.s32.totalorder %v438_v23, 256 }
   0xf   : > { %v2837_v31 = vld [vmem:[%s3690_s4 + $0x264] ss:$8 sps:$4 sm:$0xff]   ;;  %v2839_v32 = vld [vmem:[%s3690_s4 + $0xe0] ss:$8 sps:$4 sm:$0xff]   ;;  %v2841_v34 = vld [vmem:[%s3690_s4 + $0xf4] ss:$8 sps:$4 sm:$0xff]  }
  0x10   : > { %536 = vmatpush1.bf16.msra.mxu1 %v2815_v11  ;;  %1282 = vmatpush1.bf16.msra.mxu0 %v2816_v12  ;;  %v2840_v33 = vld [vmem:[%s3690_s4 + $0x260] ss:$8 sps:$4 sm:$0xff]   ;;  %s3205_s26 = scalar_lea.vmem %s3687_s1, %s3178_s11  ;;  %v2843_v35 = vld [vmem:[%s3690_s4 + $0x274] ss:$8 sps:$4 sm:$0xff]   ;;  %v3214_v36 = vsub.s32 %v437_v27, %v3184_v28  ;;  %s373_s14 = scalar_lea.vmem %s3689_s3, %s3178_s11  ;;  %v2845_v39 = vld [vmem:[%s3690_s4 + $0xf0] ss:$8 sps:$4 sm:$0xff]  }
  0x11   : > { %537 = vmatprep.subr.bf16.mxu1 %v2817_v13  ;;  %1283 = vmatprep.subr.bf16.mxu0 %v2819_v14  ;;  %v3027_v37 = vld.sshfl [vmem:[%s3205_s26] sm:$0xf pattern:$0x76325410]  ;;  %v2846_v40 = vld [vmem:[%s3690_s4 + $0x270] ss:$8 sps:$4 sm:$0xff]   ;;  %s3294_s25 = scalar_lea.vmem %s3686_s0, %s3178_s11  ;;  %s3303_s12 = scalar_lea.vmem %s3688_s2, %s3178_s11 }
  0x12   : > { %v3028_v38 = vld.sshfl [vmem:[%s3205_s26 + $0x8] sm:$0xf pattern:$0x76325410]  ;;  %v2859_v49 = vld [vmem:[%s3690_s4 + $0x14] ss:$8 sps:$4 sm:$0xff]  }
  0x13   : > { %v3029_v41 = vld.sshfl [vmem:[%s373_s14] sm:$0xf pattern:$0x76325410]  ;;  %v449_v47 = vcombine.low %v3027_v37, %v3028_v38  ;;  %v2862_v50 = vld [vmem:[%s3690_s4 + $0x294] ss:$8 sps:$4 sm:$0xff]  }
  0x14   : > { %538 = vmatpush1.bf16.msra.mxu1 %v2821_v15  ;;  %1284 = vmatpush1.bf16.msra.mxu0 %v2822_v16  ;;  %v3030_v42 = vld.sshfl [vmem:[%s373_s14 + $0x8] sm:$0xf pattern:$0x76325410]  ;;  %v2857_v51 = vld [vmem:[%s3690_s4 + $0x10] ss:$8 sps:$4 sm:$0xff]  }
  0x15   : > { %539 = vmatprep.subr.bf16.mxu1 %v2823_v17  ;;  %1285 = vmatprep.subr.bf16.mxu0 %v2825_v18  ;;  %v2849_v43 = vld [vmem:[%s3690_s4 + $0x4] ss:$8 sps:$4 sm:$0xff]   ;;  %v2847_v45 = vld [vmem:[%s3690_s4] ss:$8 sps:$4 sm:$0xff]   ;;  %v1195_v48 = vcombine.low %v3029_v41, %v3030_v42  ;;  %v2860_v52 = vld [vmem:[%s3690_s4 + $0x290] ss:$8 sps:$4 sm:$0xff]  }
  0x16   : > { %v2852_v44 = vld [vmem:[%s3690_s4 + $0x284] ss:$8 sps:$4 sm:$0xff]   ;;  %v2850_v46 = vld [vmem:[%s3690_s4 + $0x280] ss:$8 sps:$4 sm:$0xff]   ;;  %v2871_v57 = vld [vmem:[%s3690_s4 + $0x34] ss:$8 sps:$4 sm:$0xff]  }
  0x17   : > { %v2865_v53 = vld [vmem:[%s3690_s4 + $0x24] ss:$8 sps:$4 sm:$0xff]   ;;  %v2863_v55 = vld [vmem:[%s3690_s4 + $0x20] ss:$8 sps:$4 sm:$0xff]   ;;  %v2874_v58 = vld [vmem:[%s3690_s4 + $0x2b4] ss:$8 sps:$4 sm:$0xff]  }
  0x18   : > { %540 = vmatpush1.bf16.msra.mxu1 %v2827_v19  ;;  %1286 = vmatpush1.bf16.msra.mxu0 %v2828_v20  ;;  %v2868_v54 = vld [vmem:[%s3690_s4 + $0x2a4] ss:$8 sps:$4 sm:$0xff]   ;;  %v2866_v56 = vld [vmem:[%s3690_s4 + $0x2a0] ss:$8 sps:$4 sm:$0xff]   ;;  %v2869_v59 = vld [vmem:[%s3690_s4 + $0x30] ss:$8 sps:$4 sm:$0xff]  }
  0x19   : > { %541 = vmatprep.subr.bf16.mxu1 %v2829_v24  ;;  %1287 = vmatprep.subr.bf16.mxu0 %v2831_v25  ;;  %v2872_v60 = vld [vmem:[%s3690_s4 + $0x2b0] ss:$8 sps:$4 sm:$0xff]   ;;  %v2877_v61 = vld [vmem:[%s3690_s4 + $0x44] ss:$8 sps:$4 sm:$0xff]   ;;  %vm759_vm0 = vsmask.f32 1280 }
  0x1a   : > { %v2880_v62 = vld [vmem:[%s3690_s4 + $0x2c4] ss:$8 sps:$4 sm:$0xff]   ;;  %vm760_vm1 = vsmask.f32 3336  ;;  %vm762_vm2 = vsmask.f32 5392 }
  0x1b   : > { %v2875_v63 = vld [vmem:[%s3690_s4 + $0x40] ss:$8 sps:$4 sm:$0xff]   ;;  %v2883_v1 = vld [vmem:[%s3690_s4 + $0x54] ss:$8 sps:$4 sm:$0xff]   ;;  %vm764_vm3 = vsmask.f32 7448  ;;  %vm3326_vm4 = vmor %vm759_vm0, %vm760_vm1 }
  0x1c   : > { %542 = vmatpush1.bf16.msra.mxu1 %v2833_v26  ;;  %1288 = vmatpush1.bf16.msra.mxu0 %v2834_v29  ;;  %v2878_v0 = vld [vmem:[%s3690_s4 + $0x2c0] ss:$8 sps:$4 sm:$0xff]   ;;  %v2886_v3 = vld [vmem:[%s3690_s4 + $0x2d4] ss:$8 sps:$4 sm:$0xff]   ;;  %v2881_v4 = vld [vmem:[%s3690_s4 + $0x50] ss:$8 sps:$4 sm:$0xff]  }
  0x1d   : > { %543 = vmatprep.subr.bf16.mxu1 %v2835_v30  ;;  %1289 = vmatprep.subr.bf16.mxu0 %v2837_v31  ;;  %v2884_v5 = vld [vmem:[%s3690_s4 + $0x2d0] ss:$8 sps:$4 sm:$0xff]   ;;  %v2889_v6 = vld [vmem:[%s3690_s4 + $0x64] ss:$8 sps:$4 sm:$0xff]   ;;  %v2887_v20 = vld [vmem:[%s3690_s4 + $0x60] ss:$8 sps:$4 sm:$0xff]  }
  0x1e   : > { %v2892_v7 = vld [vmem:[%s3690_s4 + $0x2e4] ss:$8 sps:$4 sm:$0xff]   ;;  %v2600_v9 = vld.sshfl [vmem:[%s3303_s12] sm:$0x13 pattern:$0x76325410]  ;;  %vm3348_vm5 = vmor %vm3326_vm4, %vm762_vm2 }
  0x1f   : > { %v3321_v8 = vld.sshfl [vmem:[%s3294_s25] sm:$0xf pattern:$0x76325410]  ;;  %v1339_v12 = vcombine.high %v2600_v9, %v2600_v9  ;;  %v1365_v13 = vshrl.u32 %v2600_v9, 16  ;;  %v1368_v14 = vshll.u32 %v2600_v9, 16  ;;  %vm3358_vm6 = vmor %vm3348_vm5, %vm764_vm3 }
  0x20   : > { %544 = vmatpush1.bf16.msra.mxu1 %v2839_v32  ;;  %1290 = vmatpush1.bf16.msra.mxu0 %v2840_v33  ;;  %v2601_v11 = vld.sshfl [vmem:[%s3303_s12 + $0x4] sm:$0x13 pattern:$0x76325410]  ;;  %v2890_v21 = vld [vmem:[%s3690_s4 + $0x2e0] ss:$8 sps:$4 sm:$0xff]  }
  0x21   : > { %545 = vmatprep.subr.bf16.mxu1 %v2841_v34  ;;  %1291 = vmatprep.subr.bf16.mxu0 %v2843_v35  ;;  %v3332_v15 = vld.sshfl [vmem:[%s3294_s25 + $0x8] sm:$0xf pattern:$0x76325410]  ;;  %v1347_v17 = vcombine.high %v2601_v11, %v2601_v11  ;;  %v1379_v18 = vshrl.u32 %v2601_v11, 16  ;;  %v1382_v19 = vshll.u32 %v2601_v11, 16 }
  0x22   : > { %v2602_v16 = vld.sshfl [vmem:[%s3303_s12 + $0x8] sm:$0x13 pattern:$0x76325410]  ;;  %v1367_v25 = vrot.slane %v1365_v13, 6  ;;  %v1370_v26 = vrot.slane %v1368_v14, 7 }
  0x23   : > { %v2603_v22 = vld.sshfl [vmem:[%s3303_s12 + $0xc] sm:$0x13 pattern:$0x76325410]  ;;  %v1355_v24 = vcombine.high %v2602_v16, %v2602_v16  ;;  %v2895_v27 = vld [vmem:[%s3690_s4 + $0x74] ss:$8 sps:$4 sm:$0xff]  }
  0x24   : > { %546 = vmatpush1.bf16.msra.mxu1 %v2845_v39  ;;  %1292 = vmatpush1.bf16.msra.mxu0 %v2846_v40  ;;  %v1363_v30 = vcombine.high %v2603_v22, %v2603_v22  ;;  %v1374_v31 = vshll.u32 %v1339_v12, 16  ;;  %v1381_v32 = vrot.slane %v1379_v18, 6  ;;  %v2898_v33 = vld [vmem:[%s3690_s4 + $0x2f4] ss:$8 sps:$4 sm:$0xff]   ;;  %v1371_v34 = vor.u32 %v1370_v26, %v1367_v25  ;;  %v2907_v11 = vld [vmem:[%s3690_s4 + $0x110] ss:$8 sps:$4 sm:$0xff]  }
  0x25   : > { %676 = vmatprep.subr.bf16.mxu1 %v2849_v43  ;;  %1535 = vmatprep.subr.bf16.mxu0 %v2852_v44  ;;  %v1384_v35 = vrot.slane %v1382_v19, 7  ;;  %v1388_v37 = vshll.u32 %v1347_v17, 16  ;;  %v1393_v38 = vshrl.u32 %v2602_v16, 16  ;;  %v1396_v40 = vshll.u32 %v2602_v16, 16  ;;  %v2915_v12 = vld [vmem:[%s3690_s4 + $0x124] ss:$8 sps:$4 sm:$0xff]  }
  0x26   : > { %v1376_v39 = vrot.slane %v1374_v31, 7  ;;  %v1402_v41 = vshll.u32 %v1355_v24, 16  ;;  %v1407_v42 = vshrl.u32 %v2603_v22, 16  ;;  %v1372_v44 = vrot.slane %v1371_v34, 2  ;;  %v2902_v14 = vld [vmem:[%s3690_s4 + $0x300] ss:$8 sps:$4 sm:$0xff]  }
  0x27   : > { %564 = vmatmul.mubr.bf16.vlgmr.msra.gmra.mrb[0].mxu1 %v449_v47  ;;  %1310 = vmatmul.mubr.bf16.vlgmr.msra.gmra.mrb[0].mxu0 %v1195_v48  ;;  %v1395_v47 = vrot.slane %v1393_v38, 6  ;;  %v2893_v48 = vld [vmem:[%s3690_s4 + $0x70] ss:$8 sps:$4 sm:$0xff]   ;;  %v2912_v16 = vld [vmem:[%s3690_s4 + $0x314] ss:$8 sps:$4 sm:$0xff]   ;;  %s2752_s11 = sshll.u32 %s3702_s28, 4 }
  0x28   : > { %677 = vmatpush1.bf16.msra.mxu1 %v2847_v45  ;;  %1536 = vmatpush1.bf16.msra.mxu0 %v2850_v46  ;;  %v1385_v45 = vor.u32 %v1384_v35, %v1381_v32  ;;  %v1390_v46 = vrot.slane %v1388_v37, 7  ;;  %v2913_v17 = vld [vmem:[%s3690_s4 + $0x120] ss:$8 sps:$4 sm:$0xff]   ;;  %v2921_v18 = vld [vmem:[%s3690_s4 + $0x134] ss:$8 sps:$4 sm:$0xff]   ;;  %s378_s21 = scalar_lea.vmem %s3692_s6, %s2752_s11 }
  0x29   : > { %678 = vmatprep.subr.bf16.mxu1 %v2859_v49  ;;  %1537 = vmatprep.subr.bf16.mxu0 %v2862_v50  ;;  %v1398_v49 = vrot.slane %v1396_v40, 7  ;;  %v1409_v50 = vrot.slane %v1407_v42, 6  ;;  %v2910_v19 = vld [vmem:[%s3690_s4 + $0x310] ss:$8 sps:$4 sm:$0xff]   ;;  %v2927_v24 = vld [vmem:[%s3690_s4 + $0x144] ss:$8 sps:$4 sm:$0xff]  }
  0x2a   : > { %708 = vmatprep.mubr.bf16.mxu1 %v3047_v2  ;;  %1567 = vmatprep.mubr.bf16.mxu0 %v3047_v2  ;;  %v2924_v25 = vld [vmem:[%s3690_s4 + $0x334] ss:$8 sps:$4 sm:$0xff]   ;;  %v2925_v26 = vld [vmem:[%s3690_s4 + $0x140] ss:$8 sps:$4 sm:$0xff]  }
  0x2b   : > { %v2933_v29 = vld [vmem:[%s3690_s4 + $0x154] ss:$8 sps:$4 sm:$0xff]   ;;  %v2502_v34 = vld.sshfl [vmem:[%s3294_s25 + $0x8] sm:$0x13 pattern:$0x76325410] }
  0x2c   : > { %679 = vmatpush1.bf16.msra.mxu1 %v2857_v51  ;;  %1538 = vmatpush1.bf16.msra.mxu0 %v2860_v52  ;;  %v1410_v51 = vshll.u32 %v2603_v22, 16  ;;  %v2896_v52 = vld [vmem:[%s3690_s4 + $0x2f0] ss:$8 sps:$4 sm:$0xff]   ;;  %v2916_v22 = vld [vmem:[%s3690_s4 + $0x320] ss:$8 sps:$4 sm:$0xff]  }
  0x2d   : > { %680 = vmatprep.subr.bf16.mxu1 %v2865_v53  ;;  %1539 = vmatprep.subr.bf16.mxu0 %v2868_v54  ;;  %v2901_v53 = vld [vmem:[%s3690_s4 + $0x104] ss:$8 sps:$4 sm:$0xff]   ;;  %v1386_v54 = vrot.slane %v1385_v45, 2 }
  0x2e   : > { %v2503_v40 = vld.sshfl [vmem:[%s3294_s25 + $0xc] sm:$0x13 pattern:$0x76325410] }
  0x2f   : > { %v2930_v45 = vld [vmem:[%s3690_s4 + $0x344] ss:$8 sps:$4 sm:$0xff]  }
  0x30   : > { %681 = vmatpush1.bf16.msra.mxu1 %v2863_v55  ;;  %1540 = vmatpush1.bf16.msra.mxu0 %v2866_v56  ;;  %v1416_v55 = vshll.u32 %v1363_v30, 16  ;;  %v2904_v56 = vld [vmem:[%s3690_s4 + $0x304] ss:$8 sps:$4 sm:$0xff]  }
  0x31   : > { %682 = vmatprep.subr.bf16.mxu1 %v2871_v57  ;;  %1541 = vmatprep.subr.bf16.mxu0 %v2874_v58  ;;  %v1377_v57 = vsel %vm3358_vm6, %v1372_v44, %v1376_v39  ;;  %v1399_v58 = vor.u32 %v1398_v49, %v1395_v47  ;;  %v2501_v30 = vld.sshfl [vmem:[%s3294_s25 + $0x4] sm:$0x13 pattern:$0x76325410]  ;;  %v2922_v39 = vld [vmem:[%s3690_s4 + $0x330] ss:$8 sps:$4 sm:$0xff]   ;;  %v758_v47 = vcombine.high %v2503_v40, %v2503_v40 }
  0x32   : > { %v742_v35 = vcombine.high %v2501_v30, %v2501_v30  ;;  %v781_v37 = vshrl.u32 %v2501_v30, 16  ;;  %v784_v38 = vshll.u32 %v2501_v30, 16  ;;  %v2940_v30 = vld [vmem:[%s3690_s4 + $0x360] ss:$8 sps:$4 sm:$0xff]  }
  0x34   : > { %683 = vmatpush1.bf16.msra.mxu1 %v2869_v59  ;;  %1542 = vmatpush1.bf16.msra.mxu0 %v2872_v60  ;;  %v1404_v59 = vrot.slane %v1402_v41, 7  ;;  %v1412_v60 = vrot.slane %v1410_v51, 7  ;;  %v750_v41 = vcombine.high %v2502_v34, %v2502_v34  ;;  %v783_v49 = vrot.slane %v781_v37, 6  ;;  %v2939_v51 = vld [vmem:[%s3690_s4 + $0x164] ss:$8 sps:$4 sm:$0xff]  }
  0x35   : > { %684 = vmatprep.subr.bf16.mxu1 %v2877_v61  ;;  %1543 = vmatprep.subr.bf16.mxu0 %v2880_v62  ;;  %v1391_v61 = vsel %vm3358_vm6, %v1386_v54, %v1390_v46  ;;  %v594_v62 = vcombine.low %v3321_v8, %v3332_v15  ;;  %v2931_v46 = vld [vmem:[%s3690_s4 + $0x150] ss:$8 sps:$4 sm:$0xff]   ;;  %v795_v54 = vshrl.u32 %v2502_v34, 16 }
  0x36   : > { %v2946_v37 = vld [vmem:[%s3690_s4 + $0x370] ss:$8 sps:$4 sm:$0xff]  }
  0x38   : > { %685 = vmatpush1.bf16.msra.mxu1 %v2875_v63  ;;  %1544 = vmatpush1.bf16.msra.mxu0 %v2878_v0  ;;  %v1400_v63 = vrot.slane %v1399_v58, 2  ;;  %v1413_v0 = vor.u32 %v1412_v60, %v1409_v50  ;;  %v786_v50 = vrot.slane %v784_v38, 7  ;;  %v804_v58 = vshll.u32 %v750_v41, 16 }
  0x39   : > { %686 = vmatprep.subr.bf16.mxu1 %v2883_v1  ;;  %1545 = vmatprep.subr.bf16.mxu0 %v2886_v3  ;;  %v1418_v1 = vrot.slane %v1416_v55, 7  ;;  %v2899_v3 = vld [vmem:[%s3690_s4 + $0x100] ss:$8 sps:$4 sm:$0xff]   ;;  %v798_v55 = vshll.u32 %v2502_v34, 16 }
  0x3c   : > { %687 = vmatpush1.bf16.msra.mxu1 %v2881_v4  ;;  %1546 = vmatpush1.bf16.msra.mxu0 %v2884_v5  ;;  %v1437_v4 = vcombine.low %v1377_v57, %v1391_v61  ;;  %v1405_v5 = vsel %vm3358_vm6, %v1400_v63, %v1404_v59  ;;  %v787_v57 = vor.u32 %v786_v50, %v783_v49  ;;  %v809_v59 = vshrl.u32 %v2503_v40, 16  ;;  %v2971_v49 = vld [vmem:[%s3690_s4 + $0x1b4] ss:$8 sps:$4 sm:$0xff]   ;;  %v2968_v50 = vld [vmem:[%s3690_s4 + $0x3a4] ss:$8 sps:$4 sm:$0xff]  }
  0x3d   : > { %688 = vmatprep.subr.bf16.mxu1 %v2889_v6  ;;  %1547 = vmatprep.subr.bf16.mxu0 %v2892_v7  ;;  %v1414_v6 = vrot.slane %v1413_v0, 2  ;;  %v2909_v7 = vld [vmem:[%s3690_s4 + $0x114] ss:$8 sps:$4 sm:$0xff]   ;;  %v800_v63 = vrot.slane %v798_v55, 7  ;;  %v2975_v55 = vld [vmem:[%s3690_s4 + $0x1c0] ss:$8 sps:$4 sm:$0xff]  }
  0x3e   : > { %v1445_v10 = vrot.slane %v1437_v4, %v3214_v36  ;;  %v788_v0 = vrot.slane %v787_v57, 2  ;;  %v2928_v4 = vld [vmem:[%s3690_s4 + $0x340] ss:$8 sps:$4 sm:$0xff]   ;;  %v2983_v57 = vld [vmem:[%s3690_s4 + $0x1d4] ss:$8 sps:$4 sm:$0xff]  }
  0x3f   : > { %v1419_v8 = vsel %vm3358_vm6, %v1414_v6, %v1418_v1  ;;  %v811_v1 = vrot.slane %v809_v59, 6  ;;  %v806_v6 = vrot.slane %v804_v58, 7  ;;  %v2980_v58 = vld [vmem:[%s3690_s4 + $0x3c4] ss:$8 sps:$4 sm:$0xff]   ;;  %v2981_v59 = vld [vmem:[%s3690_s4 + $0x1d0] ss:$8 sps:$4 sm:$0xff]  }
  0x40   : > { %689 = vmatpush1.bf16.msra.mxu1 %v2887_v20  ;;  %1548 = vmatpush1.bf16.msra.mxu0 %v2890_v21  ;;  %v1438_v9 = vcombine.low %v1405_v5, %v1419_v8  ;;  %v2918_v20 = vld [vmem:[%s3690_s4 + $0x324] ss:$8 sps:$4 sm:$0xff]   ;;  %v2919_v21 = vld [vmem:[%s3690_s4 + $0x130] ss:$8 sps:$4 sm:$0xff]   ;;  %v2936_v8 = vld [vmem:[%s3690_s4 + $0x354] ss:$8 sps:$4 sm:$0xff]  }
  0x41   : > { %690 = vmatprep.subr.bf16.mxu1 %v2895_v27  ;;  %1549 = vmatprep.subr.bf16.mxu0 %v2898_v33  ;;  %v2500_v27 = vld.sshfl [vmem:[%s3294_s25] sm:$0x13 pattern:$0x76325410] }
  0x42   : > { %v1452_v13 = vrot.slane %v1438_v9, %v3214_v36  ;;  %v734_v31 = vcombine.high %v2500_v27, %v2500_v27  ;;  %v767_v32 = vshrl.u32 %v2500_v27, 16  ;;  %v770_v33 = vshll.u32 %v2500_v27, 16  ;;  %v2937_v9 = vld [vmem:[%s3690_s4 + $0x160] ss:$8 sps:$4 sm:$0xff]  }
  0x44   : > { %691 = vmatpush1.bf16.msra.mxu1 %v2893_v48  ;;  %1550 = vmatpush1.bf16.msra.mxu0 %v2896_v52  ;;  %v1453_v15 = vcombine.low %v1445_v10, %v1452_v13  ;;  %v769_v42 = vrot.slane %v767_v32, 6  ;;  %v772_v44 = vrot.slane %v770_v33, 7  ;;  %v776_v48 = vshll.u32 %v734_v31, 16  ;;  %v2945_v13 = vld [vmem:[%s3690_s4 + $0x174] ss:$8 sps:$4 sm:$0xff]  }
  0x45   : > { %937 = vmatprep.subr.bf16.mxu1 %v2901_v53  ;;  %1706 = vmatprep.subr.bf16.mxu0 %v2904_v56  ;;  %v790_v53 = vshll.u32 %v742_v35, 16  ;;  %v2948_v33 = vld [vmem:[%s3690_s4 + $0x374] ss:$8 sps:$4 sm:$0xff]   ;;  %v2949_v35 = vld [vmem:[%s3690_s4 + $0x180] ss:$8 sps:$4 sm:$0xff]  }
  0x46   : > { %v773_v52 = vor.u32 %v772_v44, %v769_v42  ;;  %v778_v56 = vrot.slane %v776_v48, 7  ;;  %v2957_v42 = vld [vmem:[%s3690_s4 + $0x190] ss:$8 sps:$4 sm:$0xff]   ;;  %v2952_v44 = vld [vmem:[%s3690_s4 + $0x380] ss:$8 sps:$4 sm:$0xff]  }
  0x47   : > { %709 = vmatmul.mubr.bf16.vlgmr.msra.gmra.mrb[0].mxu1 %v594_v62  ;;  %1568 = vmatmul.mubr.bf16.vlgmr.msra.gmra.mrb[0].mxu0 %v1453_v15  ;;  %v792_v61 = vrot.slane %v790_v53, 7  ;;  %v797_v62 = vrot.slane %v795_v54, 6  ;;  %v2963_v48 = vld [vmem:[%s3690_s4 + $0x1a0] ss:$8 sps:$4 sm:$0xff]   ;;  %v2977_v53 = vld [vmem:[%s3690_s4 + $0x1c4] ss:$8 sps:$4 sm:$0xff]  }
  0x48   : > { %938 = vmatpush1.bf16.msra.mxu1 %v2899_v3  ;;  %969 = vmatprep.mubr.bf16.mxu1 %v3047_v2  ;;  %v774_v60 = vrot.slane %v773_v52, 2  ;;  %v812_v3 = vshll.u32 %v2503_v40, 16  ;;  %v2954_v40 = vld [vmem:[%s3690_s4 + $0x384] ss:$8 sps:$4 sm:$0xff]   ;;  %v2966_v52 = vld [vmem:[%s3690_s4 + $0x3a0] ss:$8 sps:$4 sm:$0xff]  }
  0x49   : > { %939 = vmatprep.subr.bf16.mxu1 %v2909_v7  ;;  %1707 = vmatpush1.bf16.msra.mxu0 %v2902_v14  ;;  %v801_v5 = vor.u32 %v800_v63, %v797_v62  ;;  %v818_v7 = vshll.u32 %v758_v47, 16  ;;  %v2960_v47 = vld [vmem:[%s3690_s4 + $0x390] ss:$8 sps:$4 sm:$0xff]   ;;  %v2974_v54 = vld [vmem:[%s3690_s4 + $0x3b4] ss:$8 sps:$4 sm:$0xff]  }
  0x4a   : > { %1738 = vmatprep.mubr.bf16.mxu0 %v3047_v2  ;;  %1708 = vmatprep.subr.bf16.mxu0 %v2912_v16  ;;  %v779_v10 = vsel %vm3358_vm6, %v774_v60, %v778_v56  ;;  %v2972_v56 = vld [vmem:[%s3690_s4 + $0x3b0] ss:$8 sps:$4 sm:$0xff]   ;;  %v2978_v60 = vld [vmem:[%s3690_s4 + $0x3c0] ss:$8 sps:$4 sm:$0xff]   ;;  %v2986_v62 = vld [vmem:[%s3690_s4 + $0x3d4] ss:$8 sps:$4 sm:$0xff]  }
  0x4b   : > { %v802_v14 = vrot.slane %v801_v5, 2  ;;  %v820_v16 = vrot.slane %v818_v7, 7  ;;  %v2715_v63 = vld.sshfl [vmem:[%s3294_s25 + $0x10] sm:$0x13 pattern:$0x76325410] }
  0x4c   : > { %940 = vmatpush1.bf16.msra.mxu1 %v2907_v11  ;;  %v3465_v11 = vsel %vm3358_vm6, %v788_v0, %v792_v61  ;;  %v2989_v61 = vld [vmem:[%s3690_s4 + $0x1e4] ss:$8 sps:$4 sm:$0xff]   ;;  %v2010_v5 = vshll.u32 %v2715_v63, 16  ;;  %v2987_v7 = vld [vmem:[%s3690_s4 + $0x1e0] ss:$8 sps:$4 sm:$0xff]  }
  0x4d   : > { %941 = vmatprep.subr.bf16.mxu1 %v2915_v12  ;;  %1709 = vmatpush1.bf16.msra.mxu0 %v2910_v19  ;;  %v814_v12 = vrot.slane %v812_v3, 7  ;;  %v3478_v19 = vsel %vm3358_vm6, %v802_v14, %v806_v6  ;;  %v3035_v0 = vld.sshfl [vmem:[%s3303_s12] sm:$0xf pattern:$0x76325410]  ;;  %v1963_v3 = vcombine.high %v2715_v63, %v2715_v63 }
  0x4e   : > { %1710 = vmatprep.subr.bf16.mxu0 %v2918_v20  ;;  %v839_v20 = vcombine.low %v779_v10, %v3465_v11  ;;  %v2984_v6 = vld [vmem:[%s3690_s4 + $0x3d0] ss:$8 sps:$4 sm:$0xff]   ;;  %v2012_v10 = vrot.slane %v2010_v5, 7 }
  0x4f   : > { %v815_v15 = vor.u32 %v814_v12, %v811_v1  ;;  %v3036_v1 = vld.sshfl [vmem:[%s3303_s12 + $0x8] sm:$0xf pattern:$0x76325410]  ;;  %v2016_v12 = vshll.u32 %v1963_v3, 16 }
  0x50   : > { %942 = vmatpush1.bf16.msra.mxu1 %v2913_v17  ;;  %v2934_v17 = vld [vmem:[%s3690_s4 + $0x350] ss:$8 sps:$4 sm:$0xff]   ;;  %v847_v32 = vrot.slane %v839_v20, %v3214_v36  ;;  %v2990_v20 = vld [vmem:[%s3690_s4 + $0x3e0] ss:$8 sps:$4 sm:$0xff]  }
  0x51   : > { %943 = vmatprep.subr.bf16.mxu1 %v2921_v18  ;;  %1711 = vmatpush1.bf16.msra.mxu0 %v2916_v22  ;;  %v2942_v18 = vld [vmem:[%s3690_s4 + $0x364] ss:$8 sps:$4 sm:$0xff]  }
  0x52   : > { %1712 = vmatprep.subr.bf16.mxu0 %v2924_v25  ;;  %v2951_v22 = vld [vmem:[%s3690_s4 + $0x184] ss:$8 sps:$4 sm:$0xff]   ;;  %v2037_v25 = vcombine.low %v3465_v11, %v3478_v19  ;;  %v3001_v11 = vld [vmem:[%s3690_s4 + $0x400] ss:$8 sps:$4 sm:$0xff]  }
  0x54   : > { %944 = vmatpush1.bf16.msra.mxu1 %v2919_v21  ;;  %v2943_v21 = vld [vmem:[%s3690_s4 + $0x170] ss:$8 sps:$4 sm:$0xff]  }
  0x55   : > { %945 = vmatprep.subr.bf16.mxu1 %v2927_v24  ;;  %1713 = vmatpush1.bf16.msra.mxu0 %v2922_v39  ;;  %v816_v24 = vrot.slane %v815_v15, 2  ;;  %v2959_v39 = vld [vmem:[%s3690_s4 + $0x194] ss:$8 sps:$4 sm:$0xff]   ;;  %v2018_v15 = vrot.slane %v2016_v12, 7 }
  0x56   : > { %1714 = vmatprep.subr.bf16.mxu0 %v2930_v45  ;;  %v2965_v45 = vld [vmem:[%s3690_s4 + $0x1a4] ss:$8 sps:$4 sm:$0xff]  }
  0x57   : > { %v3492_v27 = vsel %vm3358_vm6, %v816_v24, %v820_v16  ;;  %v2993_v16 = vld [vmem:[%s3690_s4 + $0x1f0] ss:$8 sps:$4 sm:$0xff]   ;;  %v1025_v24 = vcombine.low %v3035_v0, %v3036_v1 }
  0x58   : > { %946 = vmatpush1.bf16.msra.mxu1 %v2925_v26  ;;  %v3033_v26 = vld.sshfl [vmem:[%s3294_s25 + $0x4] sm:$0xf pattern:$0x76325410]  ;;  %v840_v31 = vcombine.low %v3478_v19, %v3492_v27  ;;  %v3008_v19 = vld [vmem:[%s3690_s4 + $0x414] ss:$8 sps:$4 sm:$0xff]  }
  0x59   : > { %947 = vmatprep.subr.bf16.mxu1 %v2933_v29  ;;  %1715 = vmatpush1.bf16.msra.mxu0 %v2928_v4  ;;  %v3034_v29 = vld.sshfl [vmem:[%s3294_s25 + $0xc] sm:$0xf pattern:$0x76325410]  ;;  %v2007_v4 = vshrl.u32 %v2715_v63, 16 }
  0x5a   : > { %1716 = vmatprep.subr.bf16.mxu0 %v2936_v8  ;;  %v854_v34 = vrot.slane %v840_v31, %v3214_v36  ;;  %v1624_v41 = vcombine.low %v3033_v26, %v3034_v29  ;;  %v2995_v8 = vld [vmem:[%s3690_s4 + $0x1f4] ss:$8 sps:$4 sm:$0xff]   ;;  %v2996_v31 = vld [vmem:[%s3690_s4 + $0x3f0] ss:$8 sps:$4 sm:$0xff]  }
  0x5c   : > { %948 = vmatpush1.bf16.msra.mxu1 %v2931_v46  ;;  %v855_v38 = vcombine.low %v847_v32, %v854_v34  ;;  %v2962_v46 = vld [vmem:[%s3690_s4 + $0x394] ss:$8 sps:$4 sm:$0xff]   ;;  %v3003_v32 = vld [vmem:[%s3690_s4 + $0x404] ss:$8 sps:$4 sm:$0xff]   ;;  %v3009_v34 = vld [vmem:[%s3690_s4 + $0x420] ss:$8 sps:$4 sm:$0xff]  }
  0x5d   : > { %949 = vmatprep.subr.bf16.mxu1 %v2939_v51  ;;  %1717 = vmatpush1.bf16.msra.mxu0 %v2934_v17  ;;  %v2969_v51 = vld [vmem:[%s3690_s4 + $0x1b0] ss:$8 sps:$4 sm:$0xff]   ;;  %v3037_v17 = vld.sshfl [vmem:[%s3205_s26 + $0x4] sm:$0xf pattern:$0x76325410] }
  0x5e   : > { %1718 = vmatprep.subr.bf16.mxu0 %v2942_v18  ;;  %v3038_v18 = vld.sshfl [vmem:[%s3205_s26 + $0xc] sm:$0xf pattern:$0x76325410]  ;;  %s2450_s26 = sshll.u32 %s3702_s28, 1 }
  0x5f   : > { %s382_s24 = scalar_lea.vmem %s3693_s7, %s2450_s26  ;;  %s386_s9 = scalar_lea.vmem %s3694_s8, %s2450_s26 }
  0x60   : > { %950 = vmatpush1.bf16.msra.mxu1 %v2937_v9  ;;  %v2009_v9 = vrot.slane %v2007_v4, 6 }
  0x61   : > { %951 = vmatprep.subr.bf16.mxu1 %v2945_v13  ;;  %1719 = vmatpush1.bf16.msra.mxu0 %v2940_v30  ;;  %v2992_v13 = vld [vmem:[%s3690_s4 + $0x3e4] ss:$8 sps:$4 sm:$0xff]   ;;  %v2045_v30 = vrot.slane %v2037_v25, %v3214_v36  ;;  %v3006_v25 = vld [vmem:[%s3690_s4 + $0x410] ss:$8 sps:$4 sm:$0xff]  }
  0x62   : > { %1720 = vmatprep.subr.bf16.mxu0 %v2948_v33  ;;  %v2013_v14 = vor.u32 %v2012_v10, %v2009_v9  ;;  %v1795_v33 = vcombine.low %v3037_v17, %v3038_v18 }
  0x64   : > { %952 = vmatpush1.bf16.msra.mxu1 %v2943_v21  ;;  %v2014_v21 = vrot.slane %v2013_v14, 2 }
  0x65   : > { %1107 = vmatprep.subr.bf16.mxu1 %v2951_v22  ;;  %1721 = vmatpush1.bf16.msra.mxu0 %v2946_v37  ;;  %v2998_v22 = vld [vmem:[%s3690_s4 + $0x3f4] ss:$8 sps:$4 sm:$0xff]   ;;  %v3017_v37 = vld [vmem:[%s3690_s4 + $0x444] ss:$8 sps:$4 sm:$0xff]  }
  0x66   : > { %1877 = vmatprep.subr.bf16.mxu0 %v2954_v40  ;;  %v2019_v26 = vsel %vm3358_vm6, %v2014_v21, %v2018_v15  ;;  %v3018_v40 = vld [vmem:[%s3690_s4 + $0x450] ss:$8 sps:$4 sm:$0xff]   ;;  %v3049_v21 = vmov 1966171168  }
  0x67   : > { %970 = vmatmul.mubr.bf16.vlgmr.msra.gmra.mrb[0].mxu1 %v855_v38  ;;  %v2038_v29 = vcombine.low %v3492_v27, %v2019_v26  ;;  %v3015_v38 = vld [vmem:[%s3690_s4 + $0x440] ss:$8 sps:$4 sm:$0xff]  }
  0x68   : > { %1108 = vmatpush1.bf16.msra.mxu1 %v2949_v35  ;;  %1139 = vmatprep.mubr.bf16.mxu1 %v3047_v2  ;;  %v3014_v35 = vld [vmem:[%s3690_s4 + $0x434] ss:$8 sps:$4 sm:$0xff]  }
  0x69   : > { %1109 = vmatprep.subr.bf16.mxu1 %v2959_v39  ;;  %1739 = vmatmul.mubr.bf16.vlgmr.msra.gmra.mrb[0].mxu0 %v1624_v41  ;;  %v2052_v43 = vrot.slane %v2038_v29, %v3214_v36  ;;  %v3011_v36 = vld [vmem:[%s3690_s4 + $0x424] ss:$8 sps:$4 sm:$0xff]   ;;  %v3020_v39 = vld [vmem:[%s3690_s4 + $0x454] ss:$8 sps:$4 sm:$0xff]  }
  0x6a   : > { %1878 = vmatpush1.bf16.msra.mxu0 %v2952_v44  ;;  %1909 = vmatprep.mubr.bf16.mxu0 %v3047_v2  ;;  %v3023_v41 = vld [vmem:[%s3690_s4 + $0x464] ss:$8 sps:$4 sm:$0xff]   ;;  %v3026_v44 = vld [vmem:[%s3690_s4 + $0x474] ss:$8 sps:$4 sm:$0xff]  }
  0x6b   : > { %1879 = vmatprep.subr.bf16.mxu0 %v2962_v46  ;;  %v2053_v27 = vcombine.low %v2045_v30, %v2052_v43 }
  0x6c   : > { %1110 = vmatpush1.bf16.msra.mxu1 %v2957_v42  ;;  %v3021_v42 = vld [vmem:[%s3690_s4 + $0x460] ss:$8 sps:$4 sm:$0xff]  }
  0x6d   : > { %1111 = vmatprep.subr.bf16.mxu1 %v2965_v45  ;;  %v3024_v45 = vld [vmem:[%s3690_s4 + $0x470] ss:$8 sps:$4 sm:$0xff]  }
  0x6e   : > { %1880 = vmatpush1.bf16.msra.mxu0 %v2960_v47 }
  0x6f   : > { %1881 = vmatprep.subr.bf16.mxu0 %v2968_v50  ;;  %v2186_v50 = vsub.s32 0, %v3184_v28 }
  0x70   : > { %1112 = vmatpush1.bf16.msra.mxu1 %v2963_v48 }
  0x71   : > { %1113 = vmatprep.subr.bf16.mxu1 %v2971_v49 }
  0x72   : > { %1882 = vmatpush1.bf16.msra.mxu0 %v2966_v52  ;;  %v2190_v52 = vsub.s32 1, %v3184_v28 }
  0x73   : > { %1883 = vmatprep.subr.bf16.mxu0 %v2974_v54 }
  0x74   : > { %1114 = vmatpush1.bf16.msra.mxu1 %v2969_v51  ;;  %v2182_v51 = vld [vmem:[%s3691_s5] sm:$0x3] }
  0x75   : > { %1115 = vmatprep.subr.bf16.mxu1 %v2977_v53  ;;  %v2187_v53 = vrot.slane %v2182_v51, %v2186_v50 }
  0x76   : > { %1884 = vmatpush1.bf16.msra.mxu0 %v2972_v56 }
  0x77   : > { %1885 = vmatprep.subr.bf16.mxu0 %v2980_v58 }
  0x78   : > { %1116 = vmatpush1.bf16.msra.mxu1 %v2975_v55  ;;  %v2191_v55 = vrot.slane %v2182_v51, %v2190_v52 }
  0x79   : > { %1117 = vmatprep.subr.bf16.mxu1 %v2983_v57 }
  0x7a   : > { %1886 = vmatpush1.bf16.msra.mxu0 %v2978_v60 }
  0x7b   : > { %1887 = vmatprep.subr.bf16.mxu0 %v2986_v62 }
  0x7c   : > { %1118 = vmatpush1.bf16.msra.mxu1 %v2981_v59 }
  0x7d   : > { %1119 = vmatprep.subr.bf16.mxu1 %v2989_v61 }
  0x7e   : > { %1888 = vmatpush1.bf16.msra.mxu0 %v2984_v6 }
  0x7f   : > { %1889 = vmatprep.subr.bf16.mxu0 %v2992_v13 }
  0x80   : > { %1120 = vmatpush1.bf16.msra.mxu1 %v2987_v7 }
  0x81   : > { %1121 = vmatprep.subr.bf16.mxu1 %v2995_v8 }
  0x82   : > { %1890 = vmatpush1.bf16.msra.mxu0 %v2990_v20 }
  0x83   : > { %1891 = vmatprep.subr.bf16.mxu0 %v2998_v22  ;;  %v2230_v22 = vunpack.c.l.s4 %v3049_v21 }
  0x84   : > { %1122 = vmatpush1.bf16.msra.mxu1 %v2993_v16 }
  0x86   : > { %1892 = vmatpush1.bf16.msra.mxu0 %v2996_v31 }
  0x87   : > { %1140 = vmatmul.mubr.bf16.vlgmr.msra.gmra.mrb[0].mxu1 %v1025_v24  ;;  %2135 = vmatprep.subr.bf16.mxu0 %v3003_v32 }
  0x89   : > { %1910 = vmatmul.mubr.bf16.vlgmr.msra.gmra.mrb[0].mxu0 %v1795_v33 }
  0x8a   : > { %2136 = vmatpush1.bf16.msra.mxu0 %v3001_v11  ;;  %2167 = vmatprep.mubr.bf16.mxu0 %v3047_v2  ;;  %v3012_v2 = vld [vmem:[%s3690_s4 + $0x430] ss:$8 sps:$4 sm:$0xff]  }
  0x8b   : > { %2137 = vmatprep.subr.bf16.mxu0 %v3008_v19 }
  0x8e   : > { %2138 = vmatpush1.bf16.msra.mxu0 %v3006_v25 }
  0x8f   : > { %2139 = vmatprep.subr.bf16.mxu0 %v3011_v36 }
  0x92   : > { %2140 = vmatpush1.bf16.msra.mxu0 %v3009_v34 }
  0x93   : > { %2141 = vmatprep.subr.bf16.mxu0 %v3014_v35 }
  0x96   : > { %2142 = vmatpush1.bf16.msra.mxu0 %v3012_v2 }
  0x97   : > { %2143 = vmatprep.subr.bf16.mxu0 %v3017_v37 }
  0x9a   : > { %2144 = vmatpush1.bf16.msra.mxu0 %v3015_v38 }
  0x9b   : > { %2145 = vmatprep.subr.bf16.mxu0 %v3020_v39 }
  0x9e   : > { %2146 = vmatpush1.bf16.msra.mxu0 %v3018_v40 }
  0x9f   : > { %2147 = vmatprep.subr.bf16.mxu0 %v3023_v41 }
  0xa2   : > { %2148 = vmatpush1.bf16.msra.mxu0 %v3021_v42 }
  0xa3   : > { %2149 = vmatprep.subr.bf16.mxu0 %v3026_v44 }
  0xa6   : > { %2150 = vmatpush1.bf16.msra.mxu0 %v3024_v45 }
  0xa9   : > { %2168 = vmatmul.mubr.bf16.vlgmr.msra.gmra.mrb[0].mxu0 %v2053_v27  ;;  %v2231_v27 = vunpack.c.0.s8 %v2230_v22 }
  0xab   : > { %v2234_v38 = vsub.s32 %v2231_v27, %v3184_v28 }
 0x15a   : > { %v1141_v46 = vpop.f32.mrb[0].mxu1 }
 0x15b   : > { %v1143_v47 = vpop.f32.mrb[1].mxu1 }
 0x15c   : > { %v1145_v48 = vpop.f32.mrb[2].mxu1 }
 0x15d   : > { %v1147_v49 = vpop.f32.mrb[3].mxu1 }
 0x17c   : > { %v2169_v54 = vpop.f32.mrb[0].mxu0 }
 0x17d   : > { %v2755_v56 = vadd.f32 %v2169_v54, %v1141_v46  ;;  %v2171_v57 = vpop.f32.mrb[1].mxu0 }
 0x17e   : > { %v2756_v58 = vadd.f32 %v2171_v57, %v1143_v47  ;;  %v2173_v59 = vpop.f32.mrb[2].mxu0 }
 0x17f   : > { %v2194_v60 = vadd.f32 %v2755_v56, %v2187_v53  ;;  %v2757_v61 = vadd.f32 %v2173_v59, %v1145_v48  ;;  %v2175_v62 = vpop.f32.mrb[3].mxu0 }
 0x180   : > { %v2195_v63 = vadd.f32 %v2756_v58, %v2191_v55  ;;  %v2758_v0 = vadd.f32 %v2175_v62, %v1147_v49 }
 0x181   : > { %v2196_v1 = vadd.f32 %v2757_v61, %v2187_v53  ;;  %v2249_v5 = vmul.f32 %v2194_v60, %v2194_v60 }
 0x182   : > { %v2753_v3 = vpack.c.bf16 %v2195_v63, %v2194_v60  ;;  %v2197_v4 = vadd.f32 %v2758_v0, %v2191_v55  ;;  %v2250_v8 = vmul.f32 %v2195_v63, %v2195_v63 }
 0x183   : > { %v2212_v6 = vadd.f32 %v2196_v1, %v2194_v60  ;;  %v2251_v7 = vmul.f32 %v2196_v1, %v2196_v1 }
 0x184   : > { %2210 = vst [vmem:[%s378_s21] sm:$0xff] %v2753_v3  ;;  %v2754_v9 = vpack.c.bf16 %v2197_v4, %v2196_v1  ;;  %v2219_v10 = vadd.f32 %v2197_v4, %v2195_v63  ;;  %v2252_v12 = vmul.f32 %v2197_v4, %v2197_v4 }
 0x185   : > { %v2213_v13 = vrot.slane %v2212_v6, 4  ;;  %v2253_v14 = vadd.f32 %v2251_v7, %v2249_v5 }
 0x186   : > { %2211 = vst [vmem:[%s378_s21 + $0x8] sm:$0xff] %v2754_v9  ;;  %v2220_v15 = vrot.slane %v2219_v10, 4  ;;  %v2260_v16 = vadd.f32 %v2252_v12, %v2250_v8 }
 0x187   : > { %v2214_v17 = vadd.f32 %v2213_v13, %v2212_v6  ;;  %v2254_v18 = vrot.slane %v2253_v14, 4 }
 0x188   : > { %v2221_v20 = vadd.f32 %v2220_v15, %v2219_v10  ;;  %v2261_v24 = vrot.slane %v2260_v16, 4 }
 0x189   : > { %v2215_v26 = vrot.slane %v2214_v17, 2  ;;  %v2255_v29 = vadd.f32 %v2254_v18, %v2253_v14 }
 0x18a   : > { %v2222_v30 = vrot.slane %v2221_v20, 2  ;;  %v2262_v31 = vadd.f32 %v2261_v24, %v2260_v16 }
 0x18b   : > { %v2216_v32 = vadd.f32 %v2215_v26, %v2214_v17  ;;  %v2256_v43 = vrot.slane %v2255_v29, 2 }
 0x18c   : > { %v2223_v33 = vadd.f32 %v2222_v30, %v2221_v20  ;;  %v2263_v11 = vrot.slane %v2262_v31, 2 }
 0x18d   : > { %v2217_v19 = vrot.slane %v2216_v32, 1  ;;  %v2257_v25 = vadd.f32 %v2256_v43, %v2255_v29 }
 0x18e   : > { %v2224_v36 = vrot.slane %v2223_v33, 1  ;;  %v2264_v34 = vadd.f32 %v2263_v11, %v2262_v31 }
 0x18f   : > { %v2218_v35 = vadd.f32 %v2217_v19, %v2216_v32  ;;  %v2258_v2 = vrot.slane %v2257_v25, 1 }
 0x190   : > { %v2225_v37 = vadd.f32 %v2224_v36, %v2223_v33  ;;  %v2265_v39 = vrot.slane %v2264_v34, 1 }
 0x191   : > { %v2259_v40 = vadd.f32 %v2258_v2, %v2257_v25 }
 0x192   : > { %v2228_v41 = vcombine.low %v2218_v35, %v2225_v37  ;;  %v2266_v42 = vadd.f32 %v2265_v39, %v2264_v34 }
 0x194   : > { %v2235_v44 = vrot.slane %v2228_v41, %v2234_v38  ;;  %v2269_v45 = vcombine.low %v2259_v40, %v2266_v42 }
 0x196   : > { %v2242_v46 = vrot.slane %v2235_v44, %v2234_v38  ;;  %v2276_v47 = vrot.slane %v2269_v45, %v2234_v38 }
 0x198   : > { %2248 = vst.msk [vmem:[%s382_s24] sm:$0x3] %vm2246_vm7, %v2242_v46  ;;  %v2283_v28 = vrot.slane %v2276_v47, %v2234_v38 }
 0x19a   : > { %2285 = vst.msk [vmem:[%s386_s9] sm:$0x3] %vm2246_vm7, %v2283_v28 }
 0x19b PF: > { %s19_s27 = sadd.s32 1, %s3045_s27  }
 0x19c   : > { %p16_p4 = scmp.ge.s32.totalorder %s19_s27, 4  }
 0x19e   :  { %18 = sbr.rel (!%p16_p4) target bundleno = 1 (0x1), region = 117 }

// kernel: discriminator_forward.8
= control target key start
LH: loop header
LB: loop body
LE: loop exit
PB: predicated region body
PF: predicated region fallthrough
CT: control target
= control target key end

     0   :  { %s7478_s27 = smov 0   ;;  %s9454_s0 = inlined_call_operand.vmem [shape: bf16[2,3,3,256], index: 0, kind: input, shape index: {}]   ;;  %s9455_s1 = inlined_call_operand.vmem [shape: bf16[2,3,3,256], index: 1, kind: input, shape index: {}]   ;;  %s9456_s2 = inlined_call_operand.vmem [shape: bf16[2,3,3,256], index: 2, kind: input, shape index: {}]   ;;  %s9457_s3 = inlined_call_operand.vmem [shape: bf16[2,3,3,256], index: 3, kind: input, shape index: {}]   ;;  %s9458_s4 = inlined_call_operand.vmem [shape: bf16[9,256,512], index: 4, kind: input, shape index: {}]   ;;  %s9459_s5 = inlined_call_operand.vmem [shape: f32[1,512], index: 5, kind: input, shape index: {}]   ;;  %s9460_s6 = inlined_call_operand.vmem [shape: bf16[2,4,512], index: 6, kind: output, shape index: {0}]   ;;  %s9461_s7 = inlined_call_operand.vmem [shape: f32[2,1,512], index: 7, kind: output, shape index: {1}]   ;;  %s9462_s8 = inlined_call_operand.vmem [shape: f32[2,1,512], index: 8, kind: output, shape index: {2}]  }
   0x1 LB: > { %s5412_s28 = sadd.s32 4294967295, %s7429_s27   ;;  %p5416_p0 = scmp.ge.s32.totalorder %s7429_s27, 1  ;;  %s7429_s27 = sphi %s7478_s27, %s19_s27  }
   0x2   : > { %p297_p1 = scmp.lt.s32.totalorder %s7429_s27, 3 }
   0x4   : > { %p298_p2 = pnand %p5416_p0, %p297_p1 }
   0x5   : > { %v6559_v0 = vld [vmem:[%s9458_s4 + $0x204] ss:$16 sps:$4 sm:$0xff] (!%p298_p2)   ;;  %v6561_v1 = vld [vmem:[%s9458_s4 + $0x20c] ss:$16 sps:$4 sm:$0xff] (!%p298_p2)   ;;  %v6563_v2 = vld [vmem:[%s9458_s4 + $0x200] ss:$16 sps:$4 sm:$0xff] (!%p298_p2)   ;;  %v556_v41 = vlaneseq (!%p298_p2) }
   0x6   : > { %301 = sbr.rel (%p298_p2) target bundleno = 831 (0x33f), region = 44  ;;  %897 = vmatprep.subr.bf16.mxu0 (!%p298_p2), %v6559_v0  ;;  %v6564_v3 = vld [vmem:[%s9458_s4 + $0x208] ss:$16 sps:$4 sm:$0xff] (!%p298_p2)   ;;  %938 = vmatprep.subr.bf16.mxu1 (!%p298_p2), %v6561_v1  ;;  %v6565_v4 = vld [vmem:[%s9458_s4 + $0x224] ss:$16 sps:$4 sm:$0xff] (!%p298_p2)   ;;  %p354_p3 = scmp.lt.s32.totalorder (!%p298_p2), %s5412_s28, 1 }
   0x7   : > { %898 = vmatpush1.bf16.msra.mxu0 (!%p298_p2), %v6563_v2  ;;  %939 = vmatpush1.bf16.msra.mxu1 (!%p298_p2), %v6564_v3  ;;  %v6567_v5 = vld [vmem:[%s9458_s4 + $0x22c] ss:$16 sps:$4 sm:$0xff] (!%p298_p2)   ;;  %v6569_v6 = vld [vmem:[%s9458_s4 + $0x220] ss:$16 sps:$4 sm:$0xff] (!%p298_p2)   ;;  %v6570_v7 = vld [vmem:[%s9458_s4 + $0x228] ss:$16 sps:$4 sm:$0xff] (!%p298_p2)  }
   0x8   : > { %899 = vmatprep.subr.bf16.mxu0 (!%p298_p2), %v6565_v4  ;;  %940 = vmatprep.subr.bf16.mxu1 (!%p298_p2), %v6567_v5  ;;  %v6571_v8 = vld [vmem:[%s9458_s4 + $0x244] ss:$16 sps:$4 sm:$0xff] (!%p298_p2)   ;;  %v6573_v9 = vld [vmem:[%s9458_s4 + $0x24c] ss:$16 sps:$4 sm:$0xff] (!%p298_p2)   ;;  %v6575_v10 = vld [vmem:[%s9458_s4 + $0x240] ss:$16 sps:$4 sm:$0xff] (!%p298_p2)  }
   0x9   : > { %v6576_v11 = vld [vmem:[%s9458_s4 + $0x248] ss:$16 sps:$4 sm:$0xff] (!%p298_p2)   ;;  %v6577_v12 = vld [vmem:[%s9458_s4 + $0x264] ss:$16 sps:$4 sm:$0xff] (!%p298_p2)   ;;  %v6579_v13 = vld [vmem:[%s9458_s4 + $0x26c] ss:$16 sps:$4 sm:$0xff] (!%p298_p2)  }
   0xa   : > { %v6581_v14 = vld [vmem:[%s9458_s4 + $0x260] ss:$16 sps:$4 sm:$0xff] (!%p298_p2)   ;;  %v6582_v15 = vld [vmem:[%s9458_s4 + $0x268] ss:$16 sps:$4 sm:$0xff] (!%p298_p2)   ;;  %v6583_v16 = vld [vmem:[%s9458_s4 + $0x284] ss:$16 sps:$4 sm:$0xff] (!%p298_p2)  }
   0xb   : > { %900 = vmatpush1.bf16.msra.mxu0 (!%p298_p2), %v6569_v6  ;;  %941 = vmatpush1.bf16.msra.mxu1 (!%p298_p2), %v6570_v7  ;;  %v6585_v17 = vld [vmem:[%s9458_s4 + $0x28c] ss:$16 sps:$4 sm:$0xff] (!%p298_p2)   ;;  %v6587_v18 = vld [vmem:[%s9458_s4 + $0x280] ss:$16 sps:$4 sm:$0xff] (!%p298_p2)   ;;  %v6588_v19 = vld [vmem:[%s9458_s4 + $0x288] ss:$16 sps:$4 sm:$0xff] (!%p298_p2)  }
   0xc   : > { %901 = vmatprep.subr.bf16.mxu0 (!%p298_p2), %v6571_v8  ;;  %942 = vmatprep.subr.bf16.mxu1 (!%p298_p2), %v6573_v9  ;;  %v6589_v20 = vld [vmem:[%s9458_s4 + $0x2a4] ss:$16 sps:$4 sm:$0xff] (!%p298_p2)   ;;  %v6591_v21 = vld [vmem:[%s9458_s4 + $0x2ac] ss:$16 sps:$4 sm:$0xff] (!%p298_p2)   ;;  %v6593_v22 = vld [vmem:[%s9458_s4 + $0x2a0] ss:$16 sps:$4 sm:$0xff] (!%p298_p2)  }
   0xd   : > { %v6594_v23 = vld [vmem:[%s9458_s4 + $0x2a8] ss:$16 sps:$4 sm:$0xff]   ;;  %v6595_v24 = vld [vmem:[%s9458_s4 + $0x2c4] ss:$16 sps:$4 sm:$0xff]   ;;  %v6597_v25 = vld [vmem:[%s9458_s4 + $0x2cc] ss:$16 sps:$4 sm:$0xff]  }
   0xe   : > { %v6599_v26 = vld [vmem:[%s9458_s4 + $0x2c0] ss:$16 sps:$4 sm:$0xff]   ;;  %v6600_v27 = vld [vmem:[%s9458_s4 + $0x2c8] ss:$16 sps:$4 sm:$0xff]   ;;  %v6601_v28 = vld [vmem:[%s9458_s4 + $0x2e4] ss:$16 sps:$4 sm:$0xff]  }
   0xf   : > { %902 = vmatpush1.bf16.msra.mxu0 %v6575_v10  ;;  %943 = vmatpush1.bf16.msra.mxu1 %v6576_v11  ;;  %v6603_v29 = vld [vmem:[%s9458_s4 + $0x2ec] ss:$16 sps:$4 sm:$0xff]   ;;  %v6605_v30 = vld [vmem:[%s9458_s4 + $0x2e0] ss:$16 sps:$4 sm:$0xff]   ;;  %v6606_v31 = vld [vmem:[%s9458_s4 + $0x2e8] ss:$16 sps:$4 sm:$0xff]  }
  0x10   : > { %903 = vmatprep.subr.bf16.mxu0 %v6577_v12  ;;  %944 = vmatprep.subr.bf16.mxu1 %v6579_v13  ;;  %v6607_v32 = vld [vmem:[%s9458_s4 + $0x304] ss:$16 sps:$4 sm:$0xff]   ;;  %v6609_v33 = vld [vmem:[%s9458_s4 + $0x30c] ss:$16 sps:$4 sm:$0xff]   ;;  %v6611_v34 = vld [vmem:[%s9458_s4 + $0x300] ss:$16 sps:$4 sm:$0xff]  }
  0x11   : > { %v6612_v35 = vld [vmem:[%s9458_s4 + $0x308] ss:$16 sps:$4 sm:$0xff]   ;;  %v6613_v36 = vld [vmem:[%s9458_s4 + $0x324] ss:$16 sps:$4 sm:$0xff]   ;;  %s9466_s28 = smov (!%p354_p3, %s5412_s28), 1  ;;  %v7628_v48 = vshrl.u32 %v556_v41, 7 }
  0x12   : > { %v6615_v37 = vld [vmem:[%s9458_s4 + $0x32c] ss:$16 sps:$4 sm:$0xff]   ;;  %v6617_v38 = vld [vmem:[%s9458_s4 + $0x320] ss:$16 sps:$4 sm:$0xff]   ;;  %v7431_v39 = vmov 1966171168  }
  0x13   : > { %904 = vmatpush1.bf16.msra.mxu0 %v6581_v14  ;;  %945 = vmatpush1.bf16.msra.mxu1 %v6582_v15  ;;  %v554_v40 = vunpack.c.l.s4 %v7431_v39  ;;  %v6618_v42 = vld [vmem:[%s9458_s4 + $0x328] ss:$16 sps:$4 sm:$0xff]   ;;  %v6619_v43 = vld [vmem:[%s9458_s4 + $0x344] ss:$16 sps:$4 sm:$0xff]   ;;  %s7616_s9 = smul.u32 12, %s9466_s28  ;;  %vm5134_vm15 = vcmask 1043456  }
  0x14   : > { %905 = vmatprep.subr.bf16.mxu0 %v6583_v16  ;;  %946 = vmatprep.subr.bf16.mxu1 %v6585_v17  ;;  %v6621_v44 = vld [vmem:[%s9458_s4 + $0x34c] ss:$16 sps:$4 sm:$0xff]   ;;  %v6623_v45 = vld [vmem:[%s9458_s4 + $0x340] ss:$16 sps:$4 sm:$0xff]   ;;  %v6624_v46 = vld [vmem:[%s9458_s4 + $0x348] ss:$16 sps:$4 sm:$0xff]  }
  0x15   : > { %v555_v47 = vunpack.c.0.s8 %v554_v40  ;;  %v6625_v49 = vld [vmem:[%s9458_s4 + $0x364] ss:$16 sps:$4 sm:$0xff]   ;;  %s7637_s20 = scalar_lea.vmem %s9455_s1, %s7616_s9  ;;  %v6627_v50 = vld [vmem:[%s9458_s4 + $0x36c] ss:$16 sps:$4 sm:$0xff]   ;;  %v6629_v51 = vld [vmem:[%s9458_s4 + $0x360] ss:$16 sps:$4 sm:$0xff]   ;;  %s7777_s16 = scalar_lea.vmem %s9454_s0, %s7616_s9 }
  0x16   : > { %v5427_v52 = vld.sshfl [vmem:[%s7637_s20] sm:$0x3 pattern:$0x75316420]  ;;  %v6630_v54 = vld [vmem:[%s9458_s4 + $0x368] ss:$16 sps:$4 sm:$0xff]   ;;  %s8092_s15 = scalar_lea.vmem %s9456_s2, %s7616_s9  ;;  %s373_s22 = scalar_lea.vmem %s9457_s3, %s7616_s9 }
  0x17   : > { %906 = vmatpush1.bf16.msra.mxu0 %v6587_v18  ;;  %947 = vmatpush1.bf16.msra.mxu1 %v6588_v19  ;;  %v7647_v53 = vsub.s32 %v555_v47, %v7628_v48  ;;  %v5428_v55 = vld.sshfl [vmem:[%s7637_s20 + $0x4] sm:$0x3 pattern:$0x75316420]  ;;  %v6633_v57 = vld [vmem:[%s9458_s4 + $0x38c] ss:$16 sps:$4 sm:$0xff]  }
  0x18   : > { %907 = vmatprep.subr.bf16.mxu0 %v6589_v20  ;;  %948 = vmatprep.subr.bf16.mxu1 %v6591_v21  ;;  %v6631_v56 = vld [vmem:[%s9458_s4 + $0x384] ss:$16 sps:$4 sm:$0xff]   ;;  %v552_v58 = vcombine.low %v5427_v52, %v5428_v55  ;;  %v6635_v59 = vld [vmem:[%s9458_s4 + $0x380] ss:$16 sps:$4 sm:$0xff]   ;;  %v6636_v61 = vld [vmem:[%s9458_s4 + $0x388] ss:$16 sps:$4 sm:$0xff]  }
  0x19   : > { %v6637_v62 = vld [vmem:[%s9458_s4 + $0x3a4] ss:$16 sps:$4 sm:$0xff]   ;;  %v6639_v63 = vld [vmem:[%s9458_s4 + $0x3ac] ss:$16 sps:$4 sm:$0xff]   ;;  %v6641_v1 = vld [vmem:[%s9458_s4 + $0x3a0] ss:$16 sps:$4 sm:$0xff]  }
  0x1a   : > { %v559_v60 = vrot.slane %v552_v58, %v7647_v53  ;;  %v6642_v3 = vld [vmem:[%s9458_s4 + $0x3a8] ss:$16 sps:$4 sm:$0xff]   ;;  %v6643_v4 = vld [vmem:[%s9458_s4 + $0x3c4] ss:$16 sps:$4 sm:$0xff]   ;;  %v6645_v5 = vld [vmem:[%s9458_s4 + $0x3cc] ss:$16 sps:$4 sm:$0xff]  }
  0x1b   : > { %908 = vmatpush1.bf16.msra.mxu0 %v6593_v22  ;;  %949 = vmatpush1.bf16.msra.mxu1 %v6594_v23  ;;  %v6647_v6 = vld [vmem:[%s9458_s4 + $0x3c0] ss:$16 sps:$4 sm:$0xff]   ;;  %v6648_v7 = vld [vmem:[%s9458_s4 + $0x3c8] ss:$16 sps:$4 sm:$0xff]   ;;  %v6649_v8 = vld [vmem:[%s9458_s4 + $0x3e4] ss:$16 sps:$4 sm:$0xff]  }
  0x1c   : > { %909 = vmatprep.subr.bf16.mxu0 %v6595_v24  ;;  %950 = vmatprep.subr.bf16.mxu1 %v6597_v25  ;;  %v560_v0 = vcombine.high %v559_v60, %v559_v60  ;;  %v6651_v9 = vld [vmem:[%s9458_s4 + $0x3ec] ss:$16 sps:$4 sm:$0xff]   ;;  %v6653_v10 = vld [vmem:[%s9458_s4 + $0x3e0] ss:$16 sps:$4 sm:$0xff]   ;;  %v6654_v11 = vld [vmem:[%s9458_s4 + $0x3e8] ss:$16 sps:$4 sm:$0xff]   ;;  %v567_v14 = vrot.slane %v559_v60, %v7647_v53 }
  0x1d   : > { %v6657_v12 = vld [vmem:[%s9458_s4 + $0x4] ss:$16 sps:$4 sm:$0xff]   ;;  %v6660_v13 = vld [vmem:[%s9458_s4 + $0xc] ss:$16 sps:$4 sm:$0xff]   ;;  %v6655_v15 = vld [vmem:[%s9458_s4] ss:$16 sps:$4 sm:$0xff]  }
  0x1e   : > { %v574_v2 = vrot.slane %v560_v0, %v7647_v53  ;;  %v6658_v16 = vld [vmem:[%s9458_s4 + $0x8] ss:$16 sps:$4 sm:$0xff]   ;;  %v6663_v17 = vld [vmem:[%s9458_s4 + $0x24] ss:$16 sps:$4 sm:$0xff]   ;;  %v6666_v18 = vld [vmem:[%s9458_s4 + $0x2c] ss:$16 sps:$4 sm:$0xff]  }
  0x1f   : > { %910 = vmatpush1.bf16.msra.mxu0 %v6599_v26  ;;  %951 = vmatpush1.bf16.msra.mxu1 %v6600_v27  ;;  %v6661_v19 = vld [vmem:[%s9458_s4 + $0x20] ss:$16 sps:$4 sm:$0xff]   ;;  %v6664_v20 = vld [vmem:[%s9458_s4 + $0x28] ss:$16 sps:$4 sm:$0xff]   ;;  %v6669_v21 = vld [vmem:[%s9458_s4 + $0x44] ss:$16 sps:$4 sm:$0xff]  }
  0x20   : > { %911 = vmatprep.subr.bf16.mxu0 %v6601_v28  ;;  %952 = vmatprep.subr.bf16.mxu1 %v6603_v29  ;;  %v6672_v22 = vld [vmem:[%s9458_s4 + $0x4c] ss:$16 sps:$4 sm:$0xff]   ;;  %v6667_v23 = vld [vmem:[%s9458_s4 + $0x40] ss:$16 sps:$4 sm:$0xff]   ;;  %v6670_v24 = vld [vmem:[%s9458_s4 + $0x48] ss:$16 sps:$4 sm:$0xff]  }
  0x21   : > { %929 = vmatprep.mubr.bf16.mxu0 %v574_v2  ;;  %970 = vmatprep.mubr.bf16.mxu1 %v574_v2  ;;  %v6675_v25 = vld [vmem:[%s9458_s4 + $0x64] ss:$16 sps:$4 sm:$0xff]   ;;  %v6678_v26 = vld [vmem:[%s9458_s4 + $0x6c] ss:$16 sps:$4 sm:$0xff]   ;;  %v6673_v27 = vld [vmem:[%s9458_s4 + $0x60] ss:$16 sps:$4 sm:$0xff]  }
  0x22   : > { %v6676_v28 = vld [vmem:[%s9458_s4 + $0x68] ss:$16 sps:$4 sm:$0xff]   ;;  %v6681_v29 = vld [vmem:[%s9458_s4 + $0x84] ss:$16 sps:$4 sm:$0xff]   ;;  %v6709_v60 = vld [vmem:[%s9458_s4 + $0x120] ss:$16 sps:$4 sm:$0xff]  }
  0x23   : > { %912 = vmatpush1.bf16.msra.mxu0 %v6605_v30  ;;  %953 = vmatpush1.bf16.msra.mxu1 %v6606_v31  ;;  %v6684_v30 = vld [vmem:[%s9458_s4 + $0x8c] ss:$16 sps:$4 sm:$0xff]   ;;  %v6679_v31 = vld [vmem:[%s9458_s4 + $0x80] ss:$16 sps:$4 sm:$0xff]   ;;  %v6705_v52 = vld [vmem:[%s9458_s4 + $0x104] ss:$16 sps:$4 sm:$0xff]  }
  0x24   : > { %913 = vmatprep.subr.bf16.mxu0 %v6607_v32  ;;  %954 = vmatprep.subr.bf16.mxu1 %v6609_v33  ;;  %v6682_v32 = vld [vmem:[%s9458_s4 + $0x88] ss:$16 sps:$4 sm:$0xff]   ;;  %v6687_v33 = vld [vmem:[%s9458_s4 + $0xa4] ss:$16 sps:$4 sm:$0xff]   ;;  %v6715_v0 = vld [vmem:[%s9458_s4 + $0x140] ss:$16 sps:$4 sm:$0xff]  }
  0x25   : > { %v5425_v39 = vld.sshfl [vmem:[%s7777_s16] sm:$0x3 pattern:$0x75316420]  ;;  %v6711_v58 = vld [vmem:[%s9458_s4 + $0x124] ss:$16 sps:$4 sm:$0xff]  }
  0x26   : > { %v5426_v40 = vld.sshfl [vmem:[%s7777_s16 + $0x4] sm:$0x3 pattern:$0x75316420]  ;;  %vm1426_vm0 = vsmask.f32 256 }
  0x27   : > { %914 = vmatpush1.bf16.msra.mxu0 %v6611_v34  ;;  %955 = vmatpush1.bf16.msra.mxu1 %v6612_v35  ;;  %v6690_v34 = vld [vmem:[%s9458_s4 + $0xac] ss:$16 sps:$4 sm:$0xff]   ;;  %v6685_v35 = vld [vmem:[%s9458_s4 + $0xa0] ss:$16 sps:$4 sm:$0xff]   ;;  %v6723_v2 = vld [vmem:[%s9458_s4 + $0x164] ss:$16 sps:$4 sm:$0xff]  }
  0x28   : > { %915 = vmatprep.subr.bf16.mxu0 %v6613_v36  ;;  %956 = vmatprep.subr.bf16.mxu1 %v6615_v37  ;;  %v6688_v36 = vld [vmem:[%s9458_s4 + $0xa8] ss:$16 sps:$4 sm:$0xff]   ;;  %v6693_v37 = vld [vmem:[%s9458_s4 + $0xc4] ss:$16 sps:$4 sm:$0xff]   ;;  %vm1427_vm1 = vsmask.f32 1284 }
  0x29   : > { %vm1429_vm2 = vsmask.f32 2312  ;;  %vm1431_vm3 = vsmask.f32 3340  ;;  %vm1433_vm4 = vsmask.f32 4368  ;;  %vm1428_vm6 = vmor %vm1426_vm0, %vm1427_vm1 }
  0x2a   : > { %vm1435_vm5 = vsmask.f32 5396  ;;  %vm1437_vm7 = vsmask.f32 6424  ;;  %vm1439_vm8 = vsmask.f32 7452  ;;  %vm1430_vm9 = vmor %vm1428_vm6, %vm1429_vm2 }
  0x2b   : > { %916 = vmatpush1.bf16.msra.mxu0 %v6617_v38  ;;  %957 = vmatpush1.bf16.msra.mxu1 %v6618_v42  ;;  %v6696_v38 = vld [vmem:[%s9458_s4 + $0xcc] ss:$16 sps:$4 sm:$0xff]   ;;  %v6691_v42 = vld [vmem:[%s9458_s4 + $0xc0] ss:$16 sps:$4 sm:$0xff]   ;;  %vm1432_vm10 = vmor %vm1430_vm9, %vm1431_vm3  ;;  %s6547_s24 = sshll.u32 %s9466_s28, 3  ;;  %s5423_s30 = sshll.u32 %s9466_s28, 2 }
  0x2c   : > { %917 = vmatprep.subr.bf16.mxu0 %v6619_v43  ;;  %958 = vmatprep.subr.bf16.mxu1 %v6621_v44  ;;  %v6694_v43 = vld [vmem:[%s9458_s4 + $0xc8] ss:$16 sps:$4 sm:$0xff]   ;;  %v979_v44 = vcombine.low %v5425_v39, %v5426_v40  ;;  %vm1434_vm11 = vmor %vm1432_vm10, %vm1433_vm4  ;;  %s378_s29 = scalar_lea.vmem %s9460_s6, %s6547_s24  ;;  %s382_s11 = scalar_lea.vmem %s9461_s7, %s5423_s30  ;;  %vm5194_vm0 = vcmp.lt.s32.totalorder %v556_v41, 512 }
  0x2d   : > { %vm1436_vm12 = vmor %vm1434_vm11, %vm1435_vm5  ;;  %s386_s12 = scalar_lea.vmem %s9462_s8, %s5423_s30 }
  0x2e   : > { %v7803_v47 = vrot.slane %v979_v44, %v7647_v53  ;;  %vm1438_vm13 = vmor %vm1436_vm12, %vm1437_vm7  ;;  %v6766_v44 = vld [vmem:[%s9458_s4 + $0x448] ss:$16 sps:$4 sm:$0xff]  }
  0x2f   : > { %918 = vmatpush1.bf16.msra.mxu0 %v6623_v45  ;;  %959 = vmatpush1.bf16.msra.mxu1 %v6624_v46  ;;  %v6699_v45 = vld [vmem:[%s9458_s4 + $0xe4] ss:$16 sps:$4 sm:$0xff]   ;;  %v6702_v46 = vld [vmem:[%s9458_s4 + $0xec] ss:$16 sps:$4 sm:$0xff]   ;;  %vm7951_vm14 = vmor %vm1438_vm13, %vm1439_vm8 }
  0x30   : > { %919 = vmatprep.subr.bf16.mxu0 %v6625_v49  ;;  %960 = vmatprep.subr.bf16.mxu1 %v6627_v50  ;;  %v6697_v49 = vld [vmem:[%s9458_s4 + $0xe0] ss:$16 sps:$4 sm:$0xff]   ;;  %v6700_v50 = vld [vmem:[%s9458_s4 + $0xe8] ss:$16 sps:$4 sm:$0xff]  }
  0x33   : > { %920 = vmatpush1.bf16.msra.mxu0 %v6629_v51  ;;  %961 = vmatpush1.bf16.msra.mxu1 %v6630_v54  ;;  %v987_v51 = vcombine.high %v7803_v47, %v7803_v47  ;;  %v6708_v54 = vld [vmem:[%s9458_s4 + $0x10c] ss:$16 sps:$4 sm:$0xff]  }
  0x34   : > { %921 = vmatprep.subr.bf16.mxu0 %v6631_v56  ;;  %962 = vmatprep.subr.bf16.mxu1 %v6633_v57  ;;  %v6703_v56 = vld [vmem:[%s9458_s4 + $0x100] ss:$16 sps:$4 sm:$0xff]   ;;  %v6706_v57 = vld [vmem:[%s9458_s4 + $0x108] ss:$16 sps:$4 sm:$0xff]  }
  0x35   : > { %v1001_v55 = vrot.slane %v987_v51, %v7647_v53 }
  0x37   : > { %922 = vmatpush1.bf16.msra.mxu0 %v6635_v59  ;;  %963 = vmatpush1.bf16.msra.mxu1 %v6636_v61  ;;  %v6714_v59 = vld [vmem:[%s9458_s4 + $0x12c] ss:$16 sps:$4 sm:$0xff]   ;;  %v6712_v61 = vld [vmem:[%s9458_s4 + $0x128] ss:$16 sps:$4 sm:$0xff]  }
  0x38   : > { %923 = vmatprep.subr.bf16.mxu0 %v6637_v62  ;;  %964 = vmatprep.subr.bf16.mxu1 %v6639_v63  ;;  %v6717_v62 = vld [vmem:[%s9458_s4 + $0x144] ss:$16 sps:$4 sm:$0xff]   ;;  %v6720_v63 = vld [vmem:[%s9458_s4 + $0x14c] ss:$16 sps:$4 sm:$0xff]  }
  0x3b   : > { %924 = vmatpush1.bf16.msra.mxu0 %v6641_v1  ;;  %965 = vmatpush1.bf16.msra.mxu1 %v6642_v3  ;;  %v6718_v1 = vld [vmem:[%s9458_s4 + $0x148] ss:$16 sps:$4 sm:$0xff]   ;;  %v6726_v3 = vld [vmem:[%s9458_s4 + $0x16c] ss:$16 sps:$4 sm:$0xff]  }
  0x3c   : > { %925 = vmatprep.subr.bf16.mxu0 %v6643_v4  ;;  %966 = vmatprep.subr.bf16.mxu1 %v6645_v5  ;;  %v6721_v4 = vld [vmem:[%s9458_s4 + $0x160] ss:$16 sps:$4 sm:$0xff]   ;;  %v6724_v5 = vld [vmem:[%s9458_s4 + $0x168] ss:$16 sps:$4 sm:$0xff]  }
  0x3f   : > { %926 = vmatpush1.bf16.msra.mxu0 %v6647_v6  ;;  %967 = vmatpush1.bf16.msra.mxu1 %v6648_v7  ;;  %v6729_v6 = vld [vmem:[%s9458_s4 + $0x184] ss:$16 sps:$4 sm:$0xff]   ;;  %v6732_v7 = vld [vmem:[%s9458_s4 + $0x18c] ss:$16 sps:$4 sm:$0xff]  }
  0x40   : > { %927 = vmatprep.subr.bf16.mxu0 %v6649_v8  ;;  %968 = vmatprep.subr.bf16.mxu1 %v6651_v9  ;;  %v6727_v8 = vld [vmem:[%s9458_s4 + $0x180] ss:$16 sps:$4 sm:$0xff]   ;;  %v6730_v9 = vld [vmem:[%s9458_s4 + $0x188] ss:$16 sps:$4 sm:$0xff]  }
  0x43   : > { %928 = vmatpush1.bf16.msra.mxu0 %v6653_v10  ;;  %969 = vmatpush1.bf16.msra.mxu1 %v6654_v11  ;;  %v6735_v10 = vld [vmem:[%s9458_s4 + $0x1a4] ss:$16 sps:$4 sm:$0xff]   ;;  %v6738_v11 = vld [vmem:[%s9458_s4 + $0x1ac] ss:$16 sps:$4 sm:$0xff]  }
  0x44   : > { %1324 = vmatprep.subr.bf16.mxu0 %v6657_v12  ;;  %1365 = vmatprep.subr.bf16.mxu1 %v6660_v13  ;;  %v6733_v12 = vld [vmem:[%s9458_s4 + $0x1a0] ss:$16 sps:$4 sm:$0xff]   ;;  %v6736_v13 = vld [vmem:[%s9458_s4 + $0x1a8] ss:$16 sps:$4 sm:$0xff]  }
  0x46   : > { %930 = vmatmul.mubr.bf16.vlgmr.msra.gmra.mrb[0].mxu0 %v567_v14  ;;  %971 = vmatmul.mubr.bf16.vlgmr.msra.gmra.mrb[0].mxu1 %v567_v14  ;;  %v6741_v14 = vld [vmem:[%s9458_s4 + $0x1c4] ss:$16 sps:$4 sm:$0xff]  }
  0x47   : > { %1325 = vmatpush1.bf16.msra.mxu0 %v6655_v15  ;;  %1366 = vmatpush1.bf16.msra.mxu1 %v6658_v16  ;;  %v6744_v15 = vld [vmem:[%s9458_s4 + $0x1cc] ss:$16 sps:$4 sm:$0xff]   ;;  %v6739_v16 = vld [vmem:[%s9458_s4 + $0x1c0] ss:$16 sps:$4 sm:$0xff]  }
  0x48   : > { %1326 = vmatprep.subr.bf16.mxu0 %v6663_v17  ;;  %1367 = vmatprep.subr.bf16.mxu1 %v6666_v18  ;;  %v6742_v17 = vld [vmem:[%s9458_s4 + $0x1c8] ss:$16 sps:$4 sm:$0xff]   ;;  %v6747_v18 = vld [vmem:[%s9458_s4 + $0x1e4] ss:$16 sps:$4 sm:$0xff]  }
  0x49   : > { %1356 = vmatprep.mubr.bf16.mxu0 %v1001_v55  ;;  %1397 = vmatprep.mubr.bf16.mxu1 %v1001_v55  ;;  %v6777_v55 = vld [vmem:[%s9458_s4 + $0x484] ss:$16 sps:$4 sm:$0xff]  }
  0x4b   : > { %1327 = vmatpush1.bf16.msra.mxu0 %v6661_v19  ;;  %1368 = vmatpush1.bf16.msra.mxu1 %v6664_v20  ;;  %v6750_v19 = vld [vmem:[%s9458_s4 + $0x1ec] ss:$16 sps:$4 sm:$0xff]   ;;  %v6745_v20 = vld [vmem:[%s9458_s4 + $0x1e0] ss:$16 sps:$4 sm:$0xff]  }
  0x4c   : > { %1328 = vmatprep.subr.bf16.mxu0 %v6669_v21  ;;  %1369 = vmatprep.subr.bf16.mxu1 %v6672_v22  ;;  %v6748_v21 = vld [vmem:[%s9458_s4 + $0x1e8] ss:$16 sps:$4 sm:$0xff]   ;;  %v6753_v22 = vld [vmem:[%s9458_s4 + $0x404] ss:$16 sps:$4 sm:$0xff]  }
  0x4f   : > { %1329 = vmatpush1.bf16.msra.mxu0 %v6667_v23  ;;  %1370 = vmatpush1.bf16.msra.mxu1 %v6670_v24  ;;  %v6756_v23 = vld [vmem:[%s9458_s4 + $0x40c] ss:$16 sps:$4 sm:$0xff]   ;;  %v994_v24 = vrot.slane %v7803_v47, %v7647_v53  ;;  %v6771_v47 = vld [vmem:[%s9458_s4 + $0x464] ss:$16 sps:$4 sm:$0xff]  }
  0x50   : > { %1330 = vmatprep.subr.bf16.mxu0 %v6675_v25  ;;  %1371 = vmatprep.subr.bf16.mxu1 %v6678_v26  ;;  %v6751_v25 = vld [vmem:[%s9458_s4 + $0x400] ss:$16 sps:$4 sm:$0xff]   ;;  %v6754_v26 = vld [vmem:[%s9458_s4 + $0x408] ss:$16 sps:$4 sm:$0xff]  }
  0x53   : > { %1331 = vmatpush1.bf16.msra.mxu0 %v6673_v27  ;;  %1372 = vmatpush1.bf16.msra.mxu1 %v6676_v28  ;;  %v6759_v27 = vld [vmem:[%s9458_s4 + $0x424] ss:$16 sps:$4 sm:$0xff]   ;;  %v6762_v28 = vld [vmem:[%s9458_s4 + $0x42c] ss:$16 sps:$4 sm:$0xff]  }
  0x54   : > { %1332 = vmatprep.subr.bf16.mxu0 %v6681_v29  ;;  %1373 = vmatprep.subr.bf16.mxu1 %v6684_v30  ;;  %v6757_v29 = vld [vmem:[%s9458_s4 + $0x420] ss:$16 sps:$4 sm:$0xff]   ;;  %v6760_v30 = vld [vmem:[%s9458_s4 + $0x428] ss:$16 sps:$4 sm:$0xff]  }
  0x57   : > { %1333 = vmatpush1.bf16.msra.mxu0 %v6679_v31  ;;  %1374 = vmatpush1.bf16.msra.mxu1 %v6682_v32  ;;  %v5621_v31 = vld.sshfl [vmem:[%s7777_s16] sm:$0x33 pattern:$0x75316420] }
  0x58   : > { %1334 = vmatprep.subr.bf16.mxu0 %v6687_v33  ;;  %1375 = vmatprep.subr.bf16.mxu1 %v6690_v34  ;;  %v5622_v32 = vld.sshfl [vmem:[%s7777_s16 + $0x4] sm:$0x33 pattern:$0x75316420]  ;;  %v1417_v33 = vcombine.high %v5621_v31, %v5621_v31 }
  0x59   : > { %v6765_v34 = vld [vmem:[%s9458_s4 + $0x444] ss:$16 sps:$4 sm:$0xff]  }
  0x5a   : > { %v1447_v39 = vshll.u32 %v1417_v33, 16  ;;  %v5754_v33 = vld.sshfl [vmem:[%s8092_s15 + $0x4] sm:$0x3 pattern:$0x75316420] }
  0x5b   : > { %1335 = vmatpush1.bf16.msra.mxu0 %v6685_v35  ;;  %1376 = vmatpush1.bf16.msra.mxu1 %v6688_v36  ;;  %v6768_v35 = vld [vmem:[%s9458_s4 + $0x44c] ss:$16 sps:$4 sm:$0xff]   ;;  %v1425_v36 = vcombine.high %v5622_v32, %v5622_v32 }
  0x5c   : > { %1336 = vmatprep.subr.bf16.mxu0 %v6693_v37  ;;  %1377 = vmatprep.subr.bf16.mxu1 %v6696_v38  ;;  %v1442_v37 = vshrl.u32 %v5621_v31, 16  ;;  %v1451_v38 = vshrl.u32 %v5622_v32, 16  ;;  %v6829_v31 = vld [vmem:[%s9458_s4 + $0x5a0] ss:$16 sps:$4 sm:$0xff]  }
  0x5d   : > { %v1456_v40 = vshll.u32 %v1425_v36, 16  ;;  %v5753_v32 = vld.sshfl [vmem:[%s8092_s15] sm:$0x3 pattern:$0x75316420] }
  0x5e   : > { %v6840_v36 = vld [vmem:[%s9458_s4 + $0x5cc] ss:$16 sps:$4 sm:$0xff]  }
  0x5f   : > { %1337 = vmatpush1.bf16.msra.mxu0 %v6691_v42  ;;  %1378 = vmatpush1.bf16.msra.mxu1 %v6694_v43  ;;  %v6763_v43 = vld [vmem:[%s9458_s4 + $0x440] ss:$16 sps:$4 sm:$0xff]   ;;  %v7320_v42 = vld [vmem:[%s9458_s4 + $0xfcc] ss:$16 sps:$4 sm:$0xff]  }
  0x60   : > { %1338 = vmatprep.subr.bf16.mxu0 %v6699_v45  ;;  %1379 = vmatprep.subr.bf16.mxu1 %v6702_v46  ;;  %v1449_v45 = vsel %vm7951_vm14, %v1442_v37, %v1447_v39  ;;  %v1458_v46 = vsel %vm7951_vm14, %v1451_v38, %v1456_v40  ;;  %v2038_v37 = vcombine.low %v5753_v32, %v5754_v33  ;;  %v6835_v38 = vld [vmem:[%s9458_s4 + $0x5c0] ss:$16 sps:$4 sm:$0xff]   ;;  %v6838_v39 = vld [vmem:[%s9458_s4 + $0x5c8] ss:$16 sps:$4 sm:$0xff]   ;;  %v6843_v40 = vld [vmem:[%s9458_s4 + $0x5e4] ss:$16 sps:$4 sm:$0xff]  }
  0x61   : > { %v6915_v32 = vld [vmem:[%s9458_s4 + $0x764] ss:$16 sps:$4 sm:$0xff]   ;;  %v6918_v33 = vld [vmem:[%s9458_s4 + $0x76c] ss:$16 sps:$4 sm:$0xff]  }
  0x63   : > { %1339 = vmatpush1.bf16.msra.mxu0 %v6697_v49  ;;  %1380 = vmatpush1.bf16.msra.mxu1 %v6700_v50  ;;  %v6774_v49 = vld [vmem:[%s9458_s4 + $0x46c] ss:$16 sps:$4 sm:$0xff]   ;;  %v1524_v50 = vcombine.low %v1449_v45, %v1458_v46  ;;  %v6841_v45 = vld [vmem:[%s9458_s4 + $0x5e0] ss:$16 sps:$4 sm:$0xff]   ;;  %v6844_v46 = vld [vmem:[%s9458_s4 + $0x5e8] ss:$16 sps:$4 sm:$0xff]  }
  0x64   : > { %1340 = vmatprep.subr.bf16.mxu0 %v6705_v52  ;;  %1381 = vmatprep.subr.bf16.mxu1 %v6708_v54  ;;  %v6769_v52 = vld [vmem:[%s9458_s4 + $0x460] ss:$16 sps:$4 sm:$0xff]   ;;  %v6772_v54 = vld [vmem:[%s9458_s4 + $0x468] ss:$16 sps:$4 sm:$0xff]  }
  0x65   : > { %v7972_v51 = vrot.slane %v1524_v50, %v7647_v53 }
  0x67   : > { %1341 = vmatpush1.bf16.msra.mxu0 %v6703_v56  ;;  %1382 = vmatpush1.bf16.msra.mxu1 %v6706_v57  ;;  %v6780_v56 = vld [vmem:[%s9458_s4 + $0x48c] ss:$16 sps:$4 sm:$0xff]   ;;  %v1532_v57 = vcombine.high %v7972_v51, %v7972_v51 }
  0x68   : > { %1342 = vmatprep.subr.bf16.mxu0 %v6711_v58  ;;  %1383 = vmatprep.subr.bf16.mxu1 %v6714_v59  ;;  %v6775_v59 = vld [vmem:[%s9458_s4 + $0x480] ss:$16 sps:$4 sm:$0xff]  }
  0x69   : > { %v1546_v58 = vrot.slane %v1532_v57, %v7647_v53 }
  0x6b   : > { %1343 = vmatpush1.bf16.msra.mxu0 %v6709_v60  ;;  %1384 = vmatpush1.bf16.msra.mxu1 %v6712_v61  ;;  %v6778_v60 = vld [vmem:[%s9458_s4 + $0x488] ss:$16 sps:$4 sm:$0xff]   ;;  %v6783_v61 = vld [vmem:[%s9458_s4 + $0x4a4] ss:$16 sps:$4 sm:$0xff]  }
  0x6c   : > { %1344 = vmatprep.subr.bf16.mxu0 %v6717_v62  ;;  %1385 = vmatprep.subr.bf16.mxu1 %v6720_v63  ;;  %v6786_v62 = vld [vmem:[%s9458_s4 + $0x4ac] ss:$16 sps:$4 sm:$0xff]   ;;  %v6781_v63 = vld [vmem:[%s9458_s4 + $0x4a0] ss:$16 sps:$4 sm:$0xff]  }
  0x6f   : > { %1345 = vmatpush1.bf16.msra.mxu0 %v6715_v0  ;;  %1386 = vmatpush1.bf16.msra.mxu1 %v6718_v1  ;;  %v6784_v0 = vld [vmem:[%s9458_s4 + $0x4a8] ss:$16 sps:$4 sm:$0xff]   ;;  %v6789_v1 = vld [vmem:[%s9458_s4 + $0x4c4] ss:$16 sps:$4 sm:$0xff]  }
  0x70   : > { %1346 = vmatprep.subr.bf16.mxu0 %v6723_v2  ;;  %1387 = vmatprep.subr.bf16.mxu1 %v6726_v3  ;;  %v6792_v2 = vld [vmem:[%s9458_s4 + $0x4cc] ss:$16 sps:$4 sm:$0xff]   ;;  %v6787_v3 = vld [vmem:[%s9458_s4 + $0x4c0] ss:$16 sps:$4 sm:$0xff]  }
  0x73   : > { %1347 = vmatpush1.bf16.msra.mxu0 %v6721_v4  ;;  %1388 = vmatpush1.bf16.msra.mxu1 %v6724_v5  ;;  %v6790_v4 = vld [vmem:[%s9458_s4 + $0x4c8] ss:$16 sps:$4 sm:$0xff]   ;;  %v6795_v5 = vld [vmem:[%s9458_s4 + $0x4e4] ss:$16 sps:$4 sm:$0xff]  }
  0x74   : > { %1348 = vmatprep.subr.bf16.mxu0 %v6729_v6  ;;  %1389 = vmatprep.subr.bf16.mxu1 %v6732_v7  ;;  %v6798_v6 = vld [vmem:[%s9458_s4 + $0x4ec] ss:$16 sps:$4 sm:$0xff]   ;;  %v6793_v7 = vld [vmem:[%s9458_s4 + $0x4e0] ss:$16 sps:$4 sm:$0xff]  }
  0x77   : > { %1349 = vmatpush1.bf16.msra.mxu0 %v6727_v8  ;;  %1390 = vmatpush1.bf16.msra.mxu1 %v6730_v9  ;;  %v6796_v8 = vld [vmem:[%s9458_s4 + $0x4e8] ss:$16 sps:$4 sm:$0xff]   ;;  %v6801_v9 = vld [vmem:[%s9458_s4 + $0x504] ss:$16 sps:$4 sm:$0xff]  }
  0x78   : > { %1350 = vmatprep.subr.bf16.mxu0 %v6735_v10  ;;  %1391 = vmatprep.subr.bf16.mxu1 %v6738_v11  ;;  %v6804_v10 = vld [vmem:[%s9458_s4 + $0x50c] ss:$16 sps:$4 sm:$0xff]   ;;  %v6799_v11 = vld [vmem:[%s9458_s4 + $0x500] ss:$16 sps:$4 sm:$0xff]  }
  0x7b   : > { %1351 = vmatpush1.bf16.msra.mxu0 %v6733_v12  ;;  %1392 = vmatpush1.bf16.msra.mxu1 %v6736_v13  ;;  %v6802_v12 = vld [vmem:[%s9458_s4 + $0x508] ss:$16 sps:$4 sm:$0xff]   ;;  %v6807_v13 = vld [vmem:[%s9458_s4 + $0x524] ss:$16 sps:$4 sm:$0xff]  }
  0x7c   : > { %1352 = vmatprep.subr.bf16.mxu0 %v6741_v14  ;;  %1393 = vmatprep.subr.bf16.mxu1 %v6744_v15  ;;  %v6810_v14 = vld [vmem:[%s9458_s4 + $0x52c] ss:$16 sps:$4 sm:$0xff]   ;;  %v6805_v15 = vld [vmem:[%s9458_s4 + $0x520] ss:$16 sps:$4 sm:$0xff]  }
  0x7f   : > { %1353 = vmatpush1.bf16.msra.mxu0 %v6739_v16  ;;  %1394 = vmatpush1.bf16.msra.mxu1 %v6742_v17  ;;  %v6808_v16 = vld [vmem:[%s9458_s4 + $0x528] ss:$16 sps:$4 sm:$0xff]   ;;  %v6813_v17 = vld [vmem:[%s9458_s4 + $0x544] ss:$16 sps:$4 sm:$0xff]  }
  0x80   : > { %1354 = vmatprep.subr.bf16.mxu0 %v6747_v18  ;;  %1395 = vmatprep.subr.bf16.mxu1 %v6750_v19  ;;  %v6816_v18 = vld [vmem:[%s9458_s4 + $0x54c] ss:$16 sps:$4 sm:$0xff]   ;;  %v6811_v19 = vld [vmem:[%s9458_s4 + $0x540] ss:$16 sps:$4 sm:$0xff]  }
  0x83   : > { %1355 = vmatpush1.bf16.msra.mxu0 %v6745_v20  ;;  %1396 = vmatpush1.bf16.msra.mxu1 %v6748_v21  ;;  %v6814_v20 = vld [vmem:[%s9458_s4 + $0x548] ss:$16 sps:$4 sm:$0xff]   ;;  %v6819_v21 = vld [vmem:[%s9458_s4 + $0x564] ss:$16 sps:$4 sm:$0xff]  }
  0x84   : > { %1869 = vmatprep.subr.bf16.mxu0 %v6753_v22  ;;  %1910 = vmatprep.subr.bf16.mxu1 %v6756_v23  ;;  %v6822_v22 = vld [vmem:[%s9458_s4 + $0x56c] ss:$16 sps:$4 sm:$0xff]   ;;  %v6817_v23 = vld [vmem:[%s9458_s4 + $0x560] ss:$16 sps:$4 sm:$0xff]  }
  0x86   : > { %1357 = vmatmul.mubr.bf16.vlgmr.msra.gmra.mrb[4].mxu0 %v994_v24  ;;  %1398 = vmatmul.mubr.bf16.vlgmr.msra.gmra.mrb[4].mxu1 %v994_v24  ;;  %v6820_v24 = vld [vmem:[%s9458_s4 + $0x568] ss:$16 sps:$4 sm:$0xff]  }
  0x87   : > { %1870 = vmatpush1.bf16.msra.mxu0 %v6751_v25  ;;  %1911 = vmatpush1.bf16.msra.mxu1 %v6754_v26  ;;  %v6825_v25 = vld [vmem:[%s9458_s4 + $0x584] ss:$16 sps:$4 sm:$0xff]   ;;  %v6828_v26 = vld [vmem:[%s9458_s4 + $0x58c] ss:$16 sps:$4 sm:$0xff]  }
  0x88   : > { %1871 = vmatprep.subr.bf16.mxu0 %v6759_v27  ;;  %1912 = vmatprep.subr.bf16.mxu1 %v6762_v28  ;;  %v6823_v27 = vld [vmem:[%s9458_s4 + $0x580] ss:$16 sps:$4 sm:$0xff]   ;;  %v6826_v28 = vld [vmem:[%s9458_s4 + $0x588] ss:$16 sps:$4 sm:$0xff]  }
  0x89   : > { %1901 = vmatprep.mubr.bf16.mxu0 %v1546_v58  ;;  %1942 = vmatprep.mubr.bf16.mxu1 %v1546_v58  ;;  %v6853_v58 = vld [vmem:[%s9458_s4 + $0x620] ss:$16 sps:$4 sm:$0xff]  }
  0x8b   : > { %1872 = vmatpush1.bf16.msra.mxu0 %v6757_v29  ;;  %1913 = vmatpush1.bf16.msra.mxu1 %v6760_v30  ;;  %v6831_v29 = vld [vmem:[%s9458_s4 + $0x5a4] ss:$16 sps:$4 sm:$0xff]   ;;  %v6834_v30 = vld [vmem:[%s9458_s4 + $0x5ac] ss:$16 sps:$4 sm:$0xff]  }
  0x8c   : > { %1873 = vmatprep.subr.bf16.mxu0 %v6765_v34  ;;  %1914 = vmatprep.subr.bf16.mxu1 %v6768_v35  ;;  %v6832_v34 = vld [vmem:[%s9458_s4 + $0x5a8] ss:$16 sps:$4 sm:$0xff]   ;;  %v6837_v35 = vld [vmem:[%s9458_s4 + $0x5c4] ss:$16 sps:$4 sm:$0xff]  }
  0x8f   : > { %1874 = vmatpush1.bf16.msra.mxu0 %v6763_v43  ;;  %1915 = vmatpush1.bf16.msra.mxu1 %v6766_v44  ;;  %v6846_v43 = vld [vmem:[%s9458_s4 + $0x5ec] ss:$16 sps:$4 sm:$0xff]   ;;  %v8130_v44 = vrot.slane %v2038_v37, %v7647_v53 }
  0x90   : > { %1875 = vmatprep.subr.bf16.mxu0 %v6771_v47  ;;  %1916 = vmatprep.subr.bf16.mxu1 %v6774_v49  ;;  %v6849_v47 = vld [vmem:[%s9458_s4 + $0x604] ss:$16 sps:$4 sm:$0xff]   ;;  %v6852_v49 = vld [vmem:[%s9458_s4 + $0x60c] ss:$16 sps:$4 sm:$0xff]  }
  0x91   : > { %v2046_v50 = vcombine.high %v8130_v44, %v8130_v44  ;;  %v6924_v37 = vld [vmem:[%s9458_s4 + $0x78c] ss:$16 sps:$4 sm:$0xff]  }
  0x93   : > { %1876 = vmatpush1.bf16.msra.mxu0 %v6769_v52  ;;  %1917 = vmatpush1.bf16.msra.mxu1 %v6772_v54  ;;  %v1539_v52 = vrot.slane %v7972_v51, %v7647_v53  ;;  %v6847_v54 = vld [vmem:[%s9458_s4 + $0x600] ss:$16 sps:$4 sm:$0xff]   ;;  %v6858_v51 = vld [vmem:[%s9458_s4 + $0x62c] ss:$16 sps:$4 sm:$0xff]   ;;  %v2060_v57 = vrot.slane %v2046_v50, %v7647_v53  ;;  %v6933_v50 = vld [vmem:[%s9458_s4 + $0x7c4] ss:$16 sps:$4 sm:$0xff]  }
  0x94   : > { %1877 = vmatprep.subr.bf16.mxu0 %v6777_v55  ;;  %1918 = vmatprep.subr.bf16.mxu1 %v6780_v56  ;;  %v6850_v55 = vld [vmem:[%s9458_s4 + $0x608] ss:$16 sps:$4 sm:$0xff]   ;;  %v6855_v56 = vld [vmem:[%s9458_s4 + $0x624] ss:$16 sps:$4 sm:$0xff]  }
  0x97   : > { %1878 = vmatpush1.bf16.msra.mxu0 %v6775_v59  ;;  %1919 = vmatpush1.bf16.msra.mxu1 %v6778_v60  ;;  %v6856_v59 = vld [vmem:[%s9458_s4 + $0x628] ss:$16 sps:$4 sm:$0xff]   ;;  %v6861_v60 = vld [vmem:[%s9458_s4 + $0x644] ss:$16 sps:$4 sm:$0xff]  }
  0x98   : > { %1879 = vmatprep.subr.bf16.mxu0 %v6783_v61  ;;  %1920 = vmatprep.subr.bf16.mxu1 %v6786_v62  ;;  %v6864_v61 = vld [vmem:[%s9458_s4 + $0x64c] ss:$16 sps:$4 sm:$0xff]   ;;  %v6859_v62 = vld [vmem:[%s9458_s4 + $0x640] ss:$16 sps:$4 sm:$0xff]  }
  0x9b   : > { %1880 = vmatpush1.bf16.msra.mxu0 %v6781_v63  ;;  %1921 = vmatpush1.bf16.msra.mxu1 %v6784_v0  ;;  %v6862_v63 = vld [vmem:[%s9458_s4 + $0x648] ss:$16 sps:$4 sm:$0xff]   ;;  %v6867_v0 = vld [vmem:[%s9458_s4 + $0x664] ss:$16 sps:$4 sm:$0xff]  }
  0x9c   : > { %1881 = vmatprep.subr.bf16.mxu0 %v6789_v1  ;;  %1922 = vmatprep.subr.bf16.mxu1 %v6792_v2  ;;  %v6870_v1 = vld [vmem:[%s9458_s4 + $0x66c] ss:$16 sps:$4 sm:$0xff]   ;;  %v6865_v2 = vld [vmem:[%s9458_s4 + $0x660] ss:$16 sps:$4 sm:$0xff]  }
  0x9f   : > { %1882 = vmatpush1.bf16.msra.mxu0 %v6787_v3  ;;  %1923 = vmatpush1.bf16.msra.mxu1 %v6790_v4  ;;  %v6868_v3 = vld [vmem:[%s9458_s4 + $0x668] ss:$16 sps:$4 sm:$0xff]   ;;  %v6873_v4 = vld [vmem:[%s9458_s4 + $0x684] ss:$16 sps:$4 sm:$0xff]  }
  0xa0   : > { %1883 = vmatprep.subr.bf16.mxu0 %v6795_v5  ;;  %1924 = vmatprep.subr.bf16.mxu1 %v6798_v6  ;;  %v6876_v5 = vld [vmem:[%s9458_s4 + $0x68c] ss:$16 sps:$4 sm:$0xff]   ;;  %v6871_v6 = vld [vmem:[%s9458_s4 + $0x680] ss:$16 sps:$4 sm:$0xff]  }
  0xa3   : > { %1884 = vmatpush1.bf16.msra.mxu0 %v6793_v7  ;;  %1925 = vmatpush1.bf16.msra.mxu1 %v6796_v8  ;;  %v6874_v7 = vld [vmem:[%s9458_s4 + $0x688] ss:$16 sps:$4 sm:$0xff]   ;;  %v6879_v8 = vld [vmem:[%s9458_s4 + $0x6a4] ss:$16 sps:$4 sm:$0xff]  }
  0xa4   : > { %1885 = vmatprep.subr.bf16.mxu0 %v6801_v9  ;;  %1926 = vmatprep.subr.bf16.mxu1 %v6804_v10  ;;  %v6882_v9 = vld [vmem:[%s9458_s4 + $0x6ac] ss:$16 sps:$4 sm:$0xff]   ;;  %v6877_v10 = vld [vmem:[%s9458_s4 + $0x6a0] ss:$16 sps:$4 sm:$0xff]  }
  0xa7   : > { %1886 = vmatpush1.bf16.msra.mxu0 %v6799_v11  ;;  %1927 = vmatpush1.bf16.msra.mxu1 %v6802_v12  ;;  %v6880_v11 = vld [vmem:[%s9458_s4 + $0x6a8] ss:$16 sps:$4 sm:$0xff]   ;;  %v6885_v12 = vld [vmem:[%s9458_s4 + $0x6c4] ss:$16 sps:$4 sm:$0xff]  }
  0xa8   : > { %1887 = vmatprep.subr.bf16.mxu0 %v6807_v13  ;;  %1928 = vmatprep.subr.bf16.mxu1 %v6810_v14  ;;  %v6888_v13 = vld [vmem:[%s9458_s4 + $0x6cc] ss:$16 sps:$4 sm:$0xff]   ;;  %v6883_v14 = vld [vmem:[%s9458_s4 + $0x6c0] ss:$16 sps:$4 sm:$0xff]  }
  0xab   : > { %1888 = vmatpush1.bf16.msra.mxu0 %v6805_v15  ;;  %1929 = vmatpush1.bf16.msra.mxu1 %v6808_v16  ;;  %v6886_v15 = vld [vmem:[%s9458_s4 + $0x6c8] ss:$16 sps:$4 sm:$0xff]   ;;  %v6891_v16 = vld [vmem:[%s9458_s4 + $0x6e4] ss:$16 sps:$4 sm:$0xff]  }
  0xac   : > { %1889 = vmatprep.subr.bf16.mxu0 %v6813_v17  ;;  %1930 = vmatprep.subr.bf16.mxu1 %v6816_v18  ;;  %v6894_v17 = vld [vmem:[%s9458_s4 + $0x6ec] ss:$16 sps:$4 sm:$0xff]   ;;  %v6889_v18 = vld [vmem:[%s9458_s4 + $0x6e0] ss:$16 sps:$4 sm:$0xff]  }
  0xaf   : > { %1890 = vmatpush1.bf16.msra.mxu0 %v6811_v19  ;;  %1931 = vmatpush1.bf16.msra.mxu1 %v6814_v20  ;;  %v6892_v19 = vld [vmem:[%s9458_s4 + $0x6e8] ss:$16 sps:$4 sm:$0xff]   ;;  %v6897_v20 = vld [vmem:[%s9458_s4 + $0x704] ss:$16 sps:$4 sm:$0xff]  }
  0xb0   : > { %1891 = vmatprep.subr.bf16.mxu0 %v6819_v21  ;;  %1932 = vmatprep.subr.bf16.mxu1 %v6822_v22  ;;  %v6900_v21 = vld [vmem:[%s9458_s4 + $0x70c] ss:$16 sps:$4 sm:$0xff]   ;;  %v6895_v22 = vld [vmem:[%s9458_s4 + $0x700] ss:$16 sps:$4 sm:$0xff]  }
  0xb3   : > { %1892 = vmatpush1.bf16.msra.mxu0 %v6817_v23  ;;  %1933 = vmatpush1.bf16.msra.mxu1 %v6820_v24  ;;  %v6898_v23 = vld [vmem:[%s9458_s4 + $0x708] ss:$16 sps:$4 sm:$0xff]   ;;  %v6903_v24 = vld [vmem:[%s9458_s4 + $0x724] ss:$16 sps:$4 sm:$0xff]  }
  0xb4   : > { %1893 = vmatprep.subr.bf16.mxu0 %v6825_v25  ;;  %1934 = vmatprep.subr.bf16.mxu1 %v6828_v26  ;;  %v6906_v25 = vld [vmem:[%s9458_s4 + $0x72c] ss:$16 sps:$4 sm:$0xff]   ;;  %v6901_v26 = vld [vmem:[%s9458_s4 + $0x720] ss:$16 sps:$4 sm:$0xff]  }
  0xb7   : > { %1894 = vmatpush1.bf16.msra.mxu0 %v6823_v27  ;;  %1935 = vmatpush1.bf16.msra.mxu1 %v6826_v28  ;;  %v6904_v27 = vld [vmem:[%s9458_s4 + $0x728] ss:$16 sps:$4 sm:$0xff]   ;;  %v6909_v28 = vld [vmem:[%s9458_s4 + $0x744] ss:$16 sps:$4 sm:$0xff]  }
  0xb8   : > { %1895 = vmatprep.subr.bf16.mxu0 %v6831_v29  ;;  %1936 = vmatprep.subr.bf16.mxu1 %v6834_v30  ;;  %v6912_v29 = vld [vmem:[%s9458_s4 + $0x74c] ss:$16 sps:$4 sm:$0xff]   ;;  %v6907_v30 = vld [vmem:[%s9458_s4 + $0x740] ss:$16 sps:$4 sm:$0xff]  }
  0xbb   : > { %1896 = vmatpush1.bf16.msra.mxu0 %v6829_v31  ;;  %1937 = vmatpush1.bf16.msra.mxu1 %v6832_v34  ;;  %v6910_v31 = vld [vmem:[%s9458_s4 + $0x748] ss:$16 sps:$4 sm:$0xff]   ;;  %v6913_v34 = vld [vmem:[%s9458_s4 + $0x760] ss:$16 sps:$4 sm:$0xff]  }
  0xbc   : > { %1897 = vmatprep.subr.bf16.mxu0 %v6837_v35  ;;  %1938 = vmatprep.subr.bf16.mxu1 %v6840_v36  ;;  %v6916_v35 = vld [vmem:[%s9458_s4 + $0x768] ss:$16 sps:$4 sm:$0xff]   ;;  %v6921_v36 = vld [vmem:[%s9458_s4 + $0x784] ss:$16 sps:$4 sm:$0xff]  }
  0xbf   : > { %1898 = vmatpush1.bf16.msra.mxu0 %v6835_v38  ;;  %1939 = vmatpush1.bf16.msra.mxu1 %v6838_v39  ;;  %v6919_v38 = vld [vmem:[%s9458_s4 + $0x780] ss:$16 sps:$4 sm:$0xff]   ;;  %v6922_v39 = vld [vmem:[%s9458_s4 + $0x788] ss:$16 sps:$4 sm:$0xff]  }
  0xc0   : > { %1899 = vmatprep.subr.bf16.mxu0 %v6843_v40  ;;  %1940 = vmatprep.subr.bf16.mxu1 %v6846_v43  ;;  %v6927_v40 = vld [vmem:[%s9458_s4 + $0x7a4] ss:$16 sps:$4 sm:$0xff]   ;;  %v6930_v43 = vld [vmem:[%s9458_s4 + $0x7ac] ss:$16 sps:$4 sm:$0xff]  }
  0xc3   : > { %1900 = vmatpush1.bf16.msra.mxu0 %v6841_v45  ;;  %1941 = vmatpush1.bf16.msra.mxu1 %v6844_v46  ;;  %v6925_v45 = vld [vmem:[%s9458_s4 + $0x7a0] ss:$16 sps:$4 sm:$0xff]   ;;  %v6928_v46 = vld [vmem:[%s9458_s4 + $0x7a8] ss:$16 sps:$4 sm:$0xff]  }
  0xc4   : > { %2383 = vmatprep.subr.bf16.mxu0 %v6849_v47  ;;  %2424 = vmatprep.subr.bf16.mxu1 %v6852_v49  ;;  %v5883_v47 = vld.sshfl [vmem:[%s373_s22] sm:$0x3 pattern:$0x75316420] }
  0xc5   : > { %v5884_v49 = vld.sshfl [vmem:[%s373_s22 + $0x4] sm:$0x3 pattern:$0x75316420] }
  0xc6   : > { %1902 = vmatmul.mubr.bf16.vlgmr.msra.gmra.mrb[8].mxu0 %v1539_v52  ;;  %1943 = vmatmul.mubr.bf16.vlgmr.msra.gmra.mrb[8].mxu1 %v1539_v52  ;;  %v6936_v52 = vld [vmem:[%s9458_s4 + $0x7cc] ss:$16 sps:$4 sm:$0xff]  }
  0xc7   : > { %2384 = vmatpush1.bf16.msra.mxu0 %v6847_v54  ;;  %2425 = vmatpush1.bf16.msra.mxu1 %v6850_v55  ;;  %v2552_v54 = vcombine.low %v5883_v47, %v5884_v49  ;;  %v6931_v55 = vld [vmem:[%s9458_s4 + $0x7c0] ss:$16 sps:$4 sm:$0xff]   ;;  %v7002_v47 = vld [vmem:[%s9458_s4 + $0x92c] ss:$16 sps:$4 sm:$0xff]  }
  0xc8   : > { %2385 = vmatprep.subr.bf16.mxu0 %v6855_v56  ;;  %2426 = vmatprep.subr.bf16.mxu1 %v6858_v51  ;;  %v6934_v56 = vld [vmem:[%s9458_s4 + $0x7c8] ss:$16 sps:$4 sm:$0xff]   ;;  %v6939_v51 = vld [vmem:[%s9458_s4 + $0x7e4] ss:$16 sps:$4 sm:$0xff]   ;;  %v6997_v49 = vld [vmem:[%s9458_s4 + $0x920] ss:$16 sps:$4 sm:$0xff]  }
  0xc9   : > { %2415 = vmatprep.mubr.bf16.mxu0 %v2060_v57  ;;  %2456 = vmatprep.mubr.bf16.mxu1 %v2060_v57  ;;  %v6942_v57 = vld [vmem:[%s9458_s4 + $0x7ec] ss:$16 sps:$4 sm:$0xff]  }
  0xcb   : > { %2386 = vmatpush1.bf16.msra.mxu0 %v6853_v58  ;;  %2427 = vmatpush1.bf16.msra.mxu1 %v6856_v59  ;;  %v8334_v58 = vrot.slane %v2552_v54, %v7647_v53  ;;  %v6937_v59 = vld [vmem:[%s9458_s4 + $0x7e0] ss:$16 sps:$4 sm:$0xff]   ;;  %v7008_v54 = vld [vmem:[%s9458_s4 + $0x94c] ss:$16 sps:$4 sm:$0xff]  }
  0xcc   : > { %2387 = vmatprep.subr.bf16.mxu0 %v6861_v60  ;;  %2428 = vmatprep.subr.bf16.mxu1 %v6864_v61  ;;  %v6940_v60 = vld [vmem:[%s9458_s4 + $0x7e8] ss:$16 sps:$4 sm:$0xff]   ;;  %v6945_v61 = vld [vmem:[%s9458_s4 + $0x804] ss:$16 sps:$4 sm:$0xff]  }
  0xcf   : > { %2388 = vmatpush1.bf16.msra.mxu0 %v6859_v62  ;;  %2429 = vmatpush1.bf16.msra.mxu1 %v6862_v63  ;;  %v6948_v62 = vld [vmem:[%s9458_s4 + $0x80c] ss:$16 sps:$4 sm:$0xff]   ;;  %v2560_v63 = vcombine.high %v8334_v58, %v8334_v58 }
  0xd0   : > { %2389 = vmatprep.subr.bf16.mxu0 %v6867_v0  ;;  %2430 = vmatprep.subr.bf16.mxu1 %v6870_v1  ;;  %v2053_v0 = vrot.slane %v8130_v44, %v7647_v53  ;;  %v6943_v1 = vld [vmem:[%s9458_s4 + $0x800] ss:$16 sps:$4 sm:$0xff]   ;;  %v6954_v44 = vld [vmem:[%s9458_s4 + $0x82c] ss:$16 sps:$4 sm:$0xff]  }
  0xd3   : > { %2390 = vmatpush1.bf16.msra.mxu0 %v6865_v2  ;;  %2431 = vmatpush1.bf16.msra.mxu1 %v6868_v3  ;;  %v6946_v2 = vld [vmem:[%s9458_s4 + $0x808] ss:$16 sps:$4 sm:$0xff]   ;;  %v6951_v3 = vld [vmem:[%s9458_s4 + $0x824] ss:$16 sps:$4 sm:$0xff]  }
  0xd4   : > { %2391 = vmatprep.subr.bf16.mxu0 %v6873_v4  ;;  %2432 = vmatprep.subr.bf16.mxu1 %v6876_v5  ;;  %v2574_v4 = vrot.slane %v2560_v63, %v7647_v53  ;;  %v6949_v5 = vld [vmem:[%s9458_s4 + $0x820] ss:$16 sps:$4 sm:$0xff]  }
  0xd5   : > { %v7009_v63 = vld [vmem:[%s9458_s4 + $0x960] ss:$16 sps:$4 sm:$0xff]  }
  0xd7   : > { %2392 = vmatpush1.bf16.msra.mxu0 %v6871_v6  ;;  %2433 = vmatpush1.bf16.msra.mxu1 %v6874_v7  ;;  %v6952_v6 = vld [vmem:[%s9458_s4 + $0x828] ss:$16 sps:$4 sm:$0xff]   ;;  %v6957_v7 = vld [vmem:[%s9458_s4 + $0x844] ss:$16 sps:$4 sm:$0xff]  }
  0xd8   : > { %2393 = vmatprep.subr.bf16.mxu0 %v6879_v8  ;;  %2434 = vmatprep.subr.bf16.mxu1 %v6882_v9  ;;  %v6960_v8 = vld [vmem:[%s9458_s4 + $0x84c] ss:$16 sps:$4 sm:$0xff]   ;;  %v6955_v9 = vld [vmem:[%s9458_s4 + $0x840] ss:$16 sps:$4 sm:$0xff]  }
  0xdb   : > { %2394 = vmatpush1.bf16.msra.mxu0 %v6877_v10  ;;  %2435 = vmatpush1.bf16.msra.mxu1 %v6880_v11  ;;  %v6958_v10 = vld [vmem:[%s9458_s4 + $0x848] ss:$16 sps:$4 sm:$0xff]   ;;  %v6963_v11 = vld [vmem:[%s9458_s4 + $0x864] ss:$16 sps:$4 sm:$0xff]  }
  0xdc   : > { %2395 = vmatprep.subr.bf16.mxu0 %v6885_v12  ;;  %2436 = vmatprep.subr.bf16.mxu1 %v6888_v13  ;;  %v6966_v12 = vld [vmem:[%s9458_s4 + $0x86c] ss:$16 sps:$4 sm:$0xff]   ;;  %v6961_v13 = vld [vmem:[%s9458_s4 + $0x860] ss:$16 sps:$4 sm:$0xff]  }
  0xdf   : > { %2396 = vmatpush1.bf16.msra.mxu0 %v6883_v14  ;;  %2437 = vmatpush1.bf16.msra.mxu1 %v6886_v15  ;;  %v6964_v14 = vld [vmem:[%s9458_s4 + $0x868] ss:$16 sps:$4 sm:$0xff]   ;;  %v6969_v15 = vld [vmem:[%s9458_s4 + $0x884] ss:$16 sps:$4 sm:$0xff]  }
  0xe0   : > { %2397 = vmatprep.subr.bf16.mxu0 %v6891_v16  ;;  %2438 = vmatprep.subr.bf16.mxu1 %v6894_v17  ;;  %v6972_v16 = vld [vmem:[%s9458_s4 + $0x88c] ss:$16 sps:$4 sm:$0xff]   ;;  %v6967_v17 = vld [vmem:[%s9458_s4 + $0x880] ss:$16 sps:$4 sm:$0xff]  }
  0xe3   : > { %2398 = vmatpush1.bf16.msra.mxu0 %v6889_v18  ;;  %2439 = vmatpush1.bf16.msra.mxu1 %v6892_v19  ;;  %v6970_v18 = vld [vmem:[%s9458_s4 + $0x888] ss:$16 sps:$4 sm:$0xff]   ;;  %v6975_v19 = vld [vmem:[%s9458_s4 + $0x8a4] ss:$16 sps:$4 sm:$0xff]  }
  0xe4   : > { %2399 = vmatprep.subr.bf16.mxu0 %v6897_v20  ;;  %2440 = vmatprep.subr.bf16.mxu1 %v6900_v21  ;;  %v6978_v20 = vld [vmem:[%s9458_s4 + $0x8ac] ss:$16 sps:$4 sm:$0xff]   ;;  %v6973_v21 = vld [vmem:[%s9458_s4 + $0x8a0] ss:$16 sps:$4 sm:$0xff]  }
  0xe7   : > { %2400 = vmatpush1.bf16.msra.mxu0 %v6895_v22  ;;  %2441 = vmatpush1.bf16.msra.mxu1 %v6898_v23  ;;  %v6976_v22 = vld [vmem:[%s9458_s4 + $0x8a8] ss:$16 sps:$4 sm:$0xff]   ;;  %v6981_v23 = vld [vmem:[%s9458_s4 + $0x8c4] ss:$16 sps:$4 sm:$0xff]  }
  0xe8   : > { %2401 = vmatprep.subr.bf16.mxu0 %v6903_v24  ;;  %2442 = vmatprep.subr.bf16.mxu1 %v6906_v25  ;;  %v6984_v24 = vld [vmem:[%s9458_s4 + $0x8cc] ss:$16 sps:$4 sm:$0xff]  }
  0xeb   : > { %2402 = vmatpush1.bf16.msra.mxu0 %v6901_v26  ;;  %2443 = vmatpush1.bf16.msra.mxu1 %v6904_v27 }
  0xec   : > { %2403 = vmatprep.subr.bf16.mxu0 %v6909_v28  ;;  %2444 = vmatprep.subr.bf16.mxu1 %v6912_v29  ;;  %v6979_v29 = vld [vmem:[%s9458_s4 + $0x8c0] ss:$16 sps:$4 sm:$0xff]  }
  0xef   : > { %2404 = vmatpush1.bf16.msra.mxu0 %v6907_v30  ;;  %2445 = vmatpush1.bf16.msra.mxu1 %v6910_v31  ;;  %v6982_v30 = vld [vmem:[%s9458_s4 + $0x8c8] ss:$16 sps:$4 sm:$0xff]  }
  0xf0   : > { %2405 = vmatprep.subr.bf16.mxu0 %v6915_v32  ;;  %2446 = vmatprep.subr.bf16.mxu1 %v6918_v33 }
  0xf3   : > { %2406 = vmatpush1.bf16.msra.mxu0 %v6913_v34  ;;  %2447 = vmatpush1.bf16.msra.mxu1 %v6916_v35  ;;  %v6987_v35 = vld [vmem:[%s9458_s4 + $0x8e4] ss:$16 sps:$4 sm:$0xff]  }
  0xf4   : > { %2407 = vmatprep.subr.bf16.mxu0 %v6921_v36  ;;  %2448 = vmatprep.subr.bf16.mxu1 %v6924_v37  ;;  %v6990_v36 = vld [vmem:[%s9458_s4 + $0x8ec] ss:$16 sps:$4 sm:$0xff]   ;;  %v6985_v37 = vld [vmem:[%s9458_s4 + $0x8e0] ss:$16 sps:$4 sm:$0xff]  }
  0xf7   : > { %2408 = vmatpush1.bf16.msra.mxu0 %v6919_v38  ;;  %2449 = vmatpush1.bf16.msra.mxu1 %v6922_v39  ;;  %v6988_v38 = vld [vmem:[%s9458_s4 + $0x8e8] ss:$16 sps:$4 sm:$0xff]   ;;  %v6993_v39 = vld [vmem:[%s9458_s4 + $0x904] ss:$16 sps:$4 sm:$0xff]  }
  0xf8   : > { %2409 = vmatprep.subr.bf16.mxu0 %v6927_v40  ;;  %2450 = vmatprep.subr.bf16.mxu1 %v6930_v43  ;;  %v6996_v40 = vld [vmem:[%s9458_s4 + $0x90c] ss:$16 sps:$4 sm:$0xff]   ;;  %v6991_v43 = vld [vmem:[%s9458_s4 + $0x900] ss:$16 sps:$4 sm:$0xff]  }
  0xfb   : > { %2410 = vmatpush1.bf16.msra.mxu0 %v6925_v45  ;;  %2451 = vmatpush1.bf16.msra.mxu1 %v6928_v46  ;;  %v6994_v45 = vld [vmem:[%s9458_s4 + $0x908] ss:$16 sps:$4 sm:$0xff]   ;;  %v6999_v46 = vld [vmem:[%s9458_s4 + $0x924] ss:$16 sps:$4 sm:$0xff]  }
  0xfc   : > { %2411 = vmatprep.subr.bf16.mxu0 %v6933_v50  ;;  %2452 = vmatprep.subr.bf16.mxu1 %v6936_v52  ;;  %v7000_v50 = vld [vmem:[%s9458_s4 + $0x928] ss:$16 sps:$4 sm:$0xff]   ;;  %v7005_v52 = vld [vmem:[%s9458_s4 + $0x944] ss:$16 sps:$4 sm:$0xff]  }
  0xff   : > { %2412 = vmatpush1.bf16.msra.mxu0 %v6931_v55  ;;  %2453 = vmatpush1.bf16.msra.mxu1 %v6934_v56  ;;  %v7003_v55 = vld [vmem:[%s9458_s4 + $0x940] ss:$16 sps:$4 sm:$0xff]   ;;  %v7006_v56 = vld [vmem:[%s9458_s4 + $0x948] ss:$16 sps:$4 sm:$0xff]  }
 0x100   : > { %2413 = vmatprep.subr.bf16.mxu0 %v6939_v51  ;;  %2454 = vmatprep.subr.bf16.mxu1 %v6942_v57  ;;  %v6013_v51 = vld.sshfl [vmem:[%s8092_s15] sm:$0x33 pattern:$0x75316420] }
 0x101   : > { %v6014_v57 = vld.sshfl [vmem:[%s8092_s15 + $0x4] sm:$0x33 pattern:$0x75316420] }
 0x103   : > { %2414 = vmatpush1.bf16.msra.mxu0 %v6937_v59  ;;  %2455 = vmatpush1.bf16.msra.mxu1 %v6940_v60  ;;  %v7011_v59 = vld [vmem:[%s9458_s4 + $0x964] ss:$16 sps:$4 sm:$0xff]   ;;  %v7014_v60 = vld [vmem:[%s9458_s4 + $0x96c] ss:$16 sps:$4 sm:$0xff]  }
 0x104   : > { %2897 = vmatprep.subr.bf16.mxu0 %v6945_v61  ;;  %2938 = vmatprep.subr.bf16.mxu1 %v6948_v62  ;;  %v2994_v61 = vcombine.high %v6013_v51, %v6013_v51  ;;  %v3002_v62 = vcombine.high %v6014_v57, %v6014_v57 }
 0x106   : > { %2416 = vmatmul.mubr.bf16.vlgmr.msra.gmra.mrb[12].mxu0 %v2053_v0  ;;  %2457 = vmatmul.mubr.bf16.vlgmr.msra.gmra.mrb[12].mxu1 %v2053_v0  ;;  %v7012_v0 = vld [vmem:[%s9458_s4 + $0x968] ss:$16 sps:$4 sm:$0xff]  }
 0x107   : > { %2898 = vmatpush1.bf16.msra.mxu0 %v6943_v1  ;;  %2939 = vmatpush1.bf16.msra.mxu1 %v6946_v2  ;;  %v7017_v1 = vld [vmem:[%s9458_s4 + $0x984] ss:$16 sps:$4 sm:$0xff]   ;;  %v7020_v2 = vld [vmem:[%s9458_s4 + $0x98c] ss:$16 sps:$4 sm:$0xff]  }
 0x108   : > { %2899 = vmatprep.subr.bf16.mxu0 %v6951_v3  ;;  %2940 = vmatprep.subr.bf16.mxu1 %v6954_v44  ;;  %v3004_v3 = vshrl.u32 %v6013_v51, 16  ;;  %v3009_v44 = vshll.u32 %v2994_v61, 16  ;;  %v7074_v51 = vld [vmem:[%s9458_s4 + $0xaac] ss:$16 sps:$4 sm:$0xff]  }
 0x109   : > { %2929 = vmatprep.mubr.bf16.mxu0 %v2574_v4  ;;  %2970 = vmatprep.mubr.bf16.mxu1 %v2574_v4  ;;  %v3013_v4 = vshrl.u32 %v6014_v57, 16  ;;  %v7069_v57 = vld [vmem:[%s9458_s4 + $0xaa0] ss:$16 sps:$4 sm:$0xff]   ;;  %v7080_v61 = vld [vmem:[%s9458_s4 + $0xacc] ss:$16 sps:$4 sm:$0xff]  }
 0x10b   : > { %2900 = vmatpush1.bf16.msra.mxu0 %v6949_v5  ;;  %2941 = vmatpush1.bf16.msra.mxu1 %v6952_v6  ;;  %v3018_v5 = vshll.u32 %v3002_v62, 16  ;;  %v7015_v6 = vld [vmem:[%s9458_s4 + $0x980] ss:$16 sps:$4 sm:$0xff]  }
 0x10c   : > { %2901 = vmatprep.subr.bf16.mxu0 %v6957_v7  ;;  %2942 = vmatprep.subr.bf16.mxu1 %v6960_v8  ;;  %v7018_v7 = vld [vmem:[%s9458_s4 + $0x988] ss:$16 sps:$4 sm:$0xff]   ;;  %v7023_v8 = vld [vmem:[%s9458_s4 + $0x9a4] ss:$16 sps:$4 sm:$0xff]  }
 0x10f   : > { %2902 = vmatpush1.bf16.msra.mxu0 %v6955_v9  ;;  %2943 = vmatpush1.bf16.msra.mxu1 %v6958_v10  ;;  %v7026_v9 = vld [vmem:[%s9458_s4 + $0x9ac] ss:$16 sps:$4 sm:$0xff]   ;;  %v3011_v10 = vsel %vm7951_vm14, %v3004_v3, %v3009_v44 }
 0x110   : > { %2903 = vmatprep.subr.bf16.mxu0 %v6963_v11  ;;  %2944 = vmatprep.subr.bf16.mxu1 %v6966_v12  ;;  %v3020_v11 = vsel %vm7951_vm14, %v3013_v4, %v3018_v5  ;;  %v7021_v12 = vld [vmem:[%s9458_s4 + $0x9a0] ss:$16 sps:$4 sm:$0xff]  }
 0x113   : > { %2904 = vmatpush1.bf16.msra.mxu0 %v6961_v13  ;;  %2945 = vmatpush1.bf16.msra.mxu1 %v6964_v14  ;;  %v7024_v13 = vld [vmem:[%s9458_s4 + $0x9a8] ss:$16 sps:$4 sm:$0xff]   ;;  %v7029_v14 = vld [vmem:[%s9458_s4 + $0x9c4] ss:$16 sps:$4 sm:$0xff]  }
 0x114   : > { %2905 = vmatprep.subr.bf16.mxu0 %v6969_v15  ;;  %2946 = vmatprep.subr.bf16.mxu1 %v6972_v16  ;;  %v7032_v15 = vld [vmem:[%s9458_s4 + $0x9cc] ss:$16 sps:$4 sm:$0xff]   ;;  %v3086_v16 = vcombine.low %v3011_v10, %v3020_v11  ;;  %v7089_v11 = vld [vmem:[%s9458_s4 + $0xb04] ss:$16 sps:$4 sm:$0xff]  }
 0x117   : > { %2906 = vmatpush1.bf16.msra.mxu0 %v6967_v17  ;;  %2947 = vmatpush1.bf16.msra.mxu1 %v6970_v18  ;;  %v7027_v17 = vld [vmem:[%s9458_s4 + $0x9c0] ss:$16 sps:$4 sm:$0xff]   ;;  %v7030_v18 = vld [vmem:[%s9458_s4 + $0x9c8] ss:$16 sps:$4 sm:$0xff]  }
 0x118   : > { %2907 = vmatprep.subr.bf16.mxu0 %v6975_v19  ;;  %2948 = vmatprep.subr.bf16.mxu1 %v6978_v20  ;;  %v7035_v19 = vld [vmem:[%s9458_s4 + $0x9e4] ss:$16 sps:$4 sm:$0xff]   ;;  %v7038_v20 = vld [vmem:[%s9458_s4 + $0x9ec] ss:$16 sps:$4 sm:$0xff]  }
 0x119   : > { %v8425_v25 = vpop.f32.mrb[0].mxu0  ;;  %v8427_v26 = vpop.f32.mrb[0].mxu1 }
 0x11a   : > { %v8429_v27 = vpop.f32.mrb[1].mxu0  ;;  %v8431_v28 = vpop.f32.mrb[1].mxu1 }
 0x11b   : > { %v935_v31 = vpop.f32.mrb[2].mxu0  ;;  %v976_v32 = vpop.f32.mrb[2].mxu1  ;;  %2908 = vmatpush1.bf16.msra.mxu0 %v6973_v21  ;;  %2949 = vmatpush1.bf16.msra.mxu1 %v6976_v22  ;;  %v8548_v21 = vrot.slane %v3086_v16, %v7647_v53  ;;  %v7033_v22 = vld [vmem:[%s9458_s4 + $0x9e0] ss:$16 sps:$4 sm:$0xff]   ;;  %v7098_v16 = vld [vmem:[%s9458_s4 + $0xb2c] ss:$16 sps:$4 sm:$0xff]  }
 0x11c   : > { %v936_v33 = vpop.f32.mrb[3].mxu0  ;;  %v977_v34 = vpop.f32.mrb[3].mxu1  ;;  %2909 = vmatprep.subr.bf16.mxu0 %v6981_v23  ;;  %2950 = vmatprep.subr.bf16.mxu1 %v6984_v24  ;;  %v7036_v23 = vld [vmem:[%s9458_s4 + $0x9e8] ss:$16 sps:$4 sm:$0xff]   ;;  %v7041_v24 = vld [vmem:[%s9458_s4 + $0xa04] ss:$16 sps:$4 sm:$0xff]  }
 0x11d   : > { %v7042_v31 = vld [vmem:[%s9458_s4 + $0xa08] ss:$16 sps:$4 sm:$0xff]   ;;  %v3094_v32 = vcombine.high %v8548_v21, %v8548_v21  ;;  %v2567_v33 = vrot.slane %v8334_v58, %v7647_v53  ;;  %v7047_v34 = vld [vmem:[%s9458_s4 + $0xa24] ss:$16 sps:$4 sm:$0xff]   ;;  %v7045_v58 = vld [vmem:[%s9458_s4 + $0xa20] ss:$16 sps:$4 sm:$0xff]  }
 0x11f   : > { %2910 = vmatpush1.bf16.msra.mxu0 %v6979_v29  ;;  %2951 = vmatpush1.bf16.msra.mxu1 %v6982_v30  ;;  %v7044_v29 = vld [vmem:[%s9458_s4 + $0xa0c] ss:$16 sps:$4 sm:$0xff]   ;;  %v7039_v30 = vld [vmem:[%s9458_s4 + $0xa00] ss:$16 sps:$4 sm:$0xff]  }
 0x120   : > { %2911 = vmatprep.subr.bf16.mxu0 %v6987_v35  ;;  %2952 = vmatprep.subr.bf16.mxu1 %v6990_v36  ;;  %v7050_v35 = vld [vmem:[%s9458_s4 + $0xa2c] ss:$16 sps:$4 sm:$0xff]   ;;  %v3108_v36 = vrot.slane %v3094_v32, %v7647_v53  ;;  %v7113_v32 = vld [vmem:[%s9458_s4 + $0xb84] ss:$16 sps:$4 sm:$0xff]  }
 0x123   : > { %2912 = vmatpush1.bf16.msra.mxu0 %v6985_v37  ;;  %2953 = vmatpush1.bf16.msra.mxu1 %v6988_v38  ;;  %v7048_v37 = vld [vmem:[%s9458_s4 + $0xa28] ss:$16 sps:$4 sm:$0xff]   ;;  %v7053_v38 = vld [vmem:[%s9458_s4 + $0xa44] ss:$16 sps:$4 sm:$0xff]  }
 0x124   : > { %2913 = vmatprep.subr.bf16.mxu0 %v6993_v39  ;;  %2954 = vmatprep.subr.bf16.mxu1 %v6996_v40  ;;  %v7056_v39 = vld [vmem:[%s9458_s4 + $0xa4c] ss:$16 sps:$4 sm:$0xff]   ;;  %v7051_v40 = vld [vmem:[%s9458_s4 + $0xa40] ss:$16 sps:$4 sm:$0xff]  }
 0x127   : > { %2914 = vmatpush1.bf16.msra.mxu0 %v6991_v43  ;;  %2955 = vmatpush1.bf16.msra.mxu1 %v6994_v45  ;;  %v7054_v43 = vld [vmem:[%s9458_s4 + $0xa48] ss:$16 sps:$4 sm:$0xff]   ;;  %v7059_v45 = vld [vmem:[%s9458_s4 + $0xa64] ss:$16 sps:$4 sm:$0xff]  }
 0x128   : > { %2915 = vmatprep.subr.bf16.mxu0 %v6999_v46  ;;  %2956 = vmatprep.subr.bf16.mxu1 %v7002_v47  ;;  %v7062_v46 = vld [vmem:[%s9458_s4 + $0xa6c] ss:$16 sps:$4 sm:$0xff]   ;;  %v7057_v47 = vld [vmem:[%s9458_s4 + $0xa60] ss:$16 sps:$4 sm:$0xff]  }
 0x12b   : > { %2916 = vmatpush1.bf16.msra.mxu0 %v6997_v49  ;;  %2957 = vmatpush1.bf16.msra.mxu1 %v7000_v50  ;;  %v7060_v49 = vld [vmem:[%s9458_s4 + $0xa68] ss:$16 sps:$4 sm:$0xff]   ;;  %v7065_v50 = vld [vmem:[%s9458_s4 + $0xa84] ss:$16 sps:$4 sm:$0xff]  }
 0x12c   : > { %2917 = vmatprep.subr.bf16.mxu0 %v7005_v52  ;;  %2958 = vmatprep.subr.bf16.mxu1 %v7008_v54  ;;  %v7068_v52 = vld [vmem:[%s9458_s4 + $0xa8c] ss:$16 sps:$4 sm:$0xff]   ;;  %v7063_v54 = vld [vmem:[%s9458_s4 + $0xa80] ss:$16 sps:$4 sm:$0xff]  }
 0x12f   : > { %2918 = vmatpush1.bf16.msra.mxu0 %v7003_v55  ;;  %2959 = vmatpush1.bf16.msra.mxu1 %v7006_v56  ;;  %v7066_v55 = vld [vmem:[%s9458_s4 + $0xa88] ss:$16 sps:$4 sm:$0xff]   ;;  %v7071_v56 = vld [vmem:[%s9458_s4 + $0xaa4] ss:$16 sps:$4 sm:$0xff]  }
 0x130   : > { %2919 = vmatprep.subr.bf16.mxu0 %v7011_v59  ;;  %2960 = vmatprep.subr.bf16.mxu1 %v7014_v60  ;;  %v7072_v59 = vld [vmem:[%s9458_s4 + $0xaa8] ss:$16 sps:$4 sm:$0xff]   ;;  %v7077_v60 = vld [vmem:[%s9458_s4 + $0xac4] ss:$16 sps:$4 sm:$0xff]  }
 0x133   : > { %2920 = vmatpush1.bf16.msra.mxu0 %v7009_v63  ;;  %2961 = vmatpush1.bf16.msra.mxu1 %v7012_v0  ;;  %v7075_v0 = vld [vmem:[%s9458_s4 + $0xac0] ss:$16 sps:$4 sm:$0xff]  }
 0x134   : > { %2921 = vmatprep.subr.bf16.mxu0 %v7017_v1  ;;  %2962 = vmatprep.subr.bf16.mxu1 %v7020_v2  ;;  %v7078_v1 = vld [vmem:[%s9458_s4 + $0xac8] ss:$16 sps:$4 sm:$0xff]  }
 0x137   : > { %2922 = vmatpush1.bf16.msra.mxu0 %v7015_v6  ;;  %2963 = vmatpush1.bf16.msra.mxu1 %v7018_v7 }
 0x138   : > { %2923 = vmatprep.subr.bf16.mxu0 %v7023_v8  ;;  %2964 = vmatprep.subr.bf16.mxu1 %v7026_v9 }
 0x13b   : > { %2924 = vmatpush1.bf16.msra.mxu0 %v7021_v12  ;;  %2965 = vmatpush1.bf16.msra.mxu1 %v7024_v13  ;;  %v7092_v12 = vld [vmem:[%s9458_s4 + $0xb0c] ss:$16 sps:$4 sm:$0xff]   ;;  %v7087_v13 = vld [vmem:[%s9458_s4 + $0xb00] ss:$16 sps:$4 sm:$0xff]  }
 0x13c   : > { %2925 = vmatprep.subr.bf16.mxu0 %v7029_v14  ;;  %2966 = vmatprep.subr.bf16.mxu1 %v7032_v15  ;;  %v7090_v14 = vld [vmem:[%s9458_s4 + $0xb08] ss:$16 sps:$4 sm:$0xff]   ;;  %v7095_v15 = vld [vmem:[%s9458_s4 + $0xb24] ss:$16 sps:$4 sm:$0xff]  }
 0x13f   : > { %2926 = vmatpush1.bf16.msra.mxu0 %v7027_v17  ;;  %2967 = vmatpush1.bf16.msra.mxu1 %v7030_v18  ;;  %v7093_v17 = vld [vmem:[%s9458_s4 + $0xb20] ss:$16 sps:$4 sm:$0xff]   ;;  %v7096_v18 = vld [vmem:[%s9458_s4 + $0xb28] ss:$16 sps:$4 sm:$0xff]  }
 0x140   : > { %2927 = vmatprep.subr.bf16.mxu0 %v7035_v19  ;;  %2968 = vmatprep.subr.bf16.mxu1 %v7038_v20  ;;  %v7101_v19 = vld [vmem:[%s9458_s4 + $0xb44] ss:$16 sps:$4 sm:$0xff]   ;;  %v7104_v20 = vld [vmem:[%s9458_s4 + $0xb4c] ss:$16 sps:$4 sm:$0xff]  }
 0x143   : > { %2928 = vmatpush1.bf16.msra.mxu0 %v7033_v22  ;;  %2969 = vmatpush1.bf16.msra.mxu1 %v7036_v23  ;;  %v7099_v22 = vld [vmem:[%s9458_s4 + $0xb40] ss:$16 sps:$4 sm:$0xff]   ;;  %v7102_v23 = vld [vmem:[%s9458_s4 + $0xb48] ss:$16 sps:$4 sm:$0xff]  }
 0x144   : > { %3431 = vmatprep.subr.bf16.mxu0 %v7041_v24  ;;  %3472 = vmatprep.subr.bf16.mxu1 %v7044_v29  ;;  %v7107_v24 = vld [vmem:[%s9458_s4 + $0xb64] ss:$16 sps:$4 sm:$0xff]   ;;  %v7110_v29 = vld [vmem:[%s9458_s4 + $0xb6c] ss:$16 sps:$4 sm:$0xff]  }
 0x146   : > { %2930 = vmatmul.mubr.bf16.vlgmr.msra.gmra.mrb[16].mxu0 %v2567_v33  ;;  %2971 = vmatmul.mubr.bf16.vlgmr.msra.gmra.mrb[16].mxu1 %v2567_v33  ;;  %v7116_v33 = vld [vmem:[%s9458_s4 + $0xb8c] ss:$16 sps:$4 sm:$0xff]  }
 0x147   : > { %3432 = vmatpush1.bf16.msra.mxu0 %v7039_v30  ;;  %3473 = vmatpush1.bf16.msra.mxu1 %v7042_v31  ;;  %v7105_v30 = vld [vmem:[%s9458_s4 + $0xb60] ss:$16 sps:$4 sm:$0xff]   ;;  %v7108_v31 = vld [vmem:[%s9458_s4 + $0xb68] ss:$16 sps:$4 sm:$0xff]  }
 0x148   : > { %3433 = vmatprep.subr.bf16.mxu0 %v7047_v34  ;;  %3474 = vmatprep.subr.bf16.mxu1 %v7050_v35  ;;  %v7111_v34 = vld [vmem:[%s9458_s4 + $0xb80] ss:$16 sps:$4 sm:$0xff]   ;;  %v7114_v35 = vld [vmem:[%s9458_s4 + $0xb88] ss:$16 sps:$4 sm:$0xff]  }
 0x149   : > { %3463 = vmatprep.mubr.bf16.mxu0 %v3108_v36  ;;  %3504 = vmatprep.mubr.bf16.mxu1 %v3108_v36  ;;  %v7119_v36 = vld [vmem:[%s9458_s4 + $0xba4] ss:$16 sps:$4 sm:$0xff]  }
 0x14b   : > { %3434 = vmatpush1.bf16.msra.mxu0 %v7045_v58  ;;  %3475 = vmatpush1.bf16.msra.mxu1 %v7048_v37  ;;  %v7122_v58 = vld [vmem:[%s9458_s4 + $0xbac] ss:$16 sps:$4 sm:$0xff]   ;;  %v6147_v37 = vld.sshfl [vmem:[%s7777_s16 + $0x4] sm:$0x3 pattern:$0x75316420] }
 0x14c   : > { %3435 = vmatprep.subr.bf16.mxu0 %v7053_v38  ;;  %3476 = vmatprep.subr.bf16.mxu1 %v7056_v39  ;;  %v6148_v38 = vld.sshfl [vmem:[%s7777_s16 + $0x8] sm:$0x3 pattern:$0x75316420]  ;;  %v7117_v39 = vld [vmem:[%s9458_s4 + $0xba0] ss:$16 sps:$4 sm:$0xff]  }
 0x14f   : > { %3436 = vmatpush1.bf16.msra.mxu0 %v7051_v40  ;;  %3477 = vmatpush1.bf16.msra.mxu1 %v7054_v43  ;;  %v7120_v40 = vld [vmem:[%s9458_s4 + $0xba8] ss:$16 sps:$4 sm:$0xff]   ;;  %v7125_v43 = vld [vmem:[%s9458_s4 + $0xbc4] ss:$16 sps:$4 sm:$0xff]  }
 0x150   : > { %3437 = vmatprep.subr.bf16.mxu0 %v7059_v45  ;;  %3478 = vmatprep.subr.bf16.mxu1 %v7062_v46  ;;  %v7128_v45 = vld [vmem:[%s9458_s4 + $0xbcc] ss:$16 sps:$4 sm:$0xff]   ;;  %v3601_v46 = vcombine.low %v6147_v37, %v6148_v38  ;;  %v7180_v37 = vld [vmem:[%s9458_s4 + $0xce8] ss:$16 sps:$4 sm:$0xff]   ;;  %v7185_v38 = vld [vmem:[%s9458_s4 + $0xd04] ss:$16 sps:$4 sm:$0xff]  }
 0x153   : > { %3438 = vmatpush1.bf16.msra.mxu0 %v7057_v47  ;;  %3479 = vmatpush1.bf16.msra.mxu1 %v7060_v49  ;;  %v7123_v47 = vld [vmem:[%s9458_s4 + $0xbc0] ss:$16 sps:$4 sm:$0xff]   ;;  %v7126_v49 = vld [vmem:[%s9458_s4 + $0xbc8] ss:$16 sps:$4 sm:$0xff]  }
 0x154   : > { %3439 = vmatprep.subr.bf16.mxu0 %v7065_v50  ;;  %3480 = vmatprep.subr.bf16.mxu1 %v7068_v52  ;;  %v7131_v50 = vld [vmem:[%s9458_s4 + $0xbe4] ss:$16 sps:$4 sm:$0xff]   ;;  %v7134_v52 = vld [vmem:[%s9458_s4 + $0xbec] ss:$16 sps:$4 sm:$0xff]  }
 0x157   : > { %3440 = vmatpush1.bf16.msra.mxu0 %v7063_v54  ;;  %3481 = vmatpush1.bf16.msra.mxu1 %v7066_v55  ;;  %v8762_v54 = vrot.slane %v3601_v46, %v7647_v53  ;;  %v7129_v55 = vld [vmem:[%s9458_s4 + $0xbe0] ss:$16 sps:$4 sm:$0xff]   ;;  %v7194_v46 = vld [vmem:[%s9458_s4 + $0xd2c] ss:$16 sps:$4 sm:$0xff]  }
 0x158   : > { %3441 = vmatprep.subr.bf16.mxu0 %v7071_v56  ;;  %3482 = vmatprep.subr.bf16.mxu1 %v7074_v51  ;;  %v7132_v56 = vld [vmem:[%s9458_s4 + $0xbe8] ss:$16 sps:$4 sm:$0xff]   ;;  %v7137_v51 = vld [vmem:[%s9458_s4 + $0xc04] ss:$16 sps:$4 sm:$0xff]  }
 0x159   : > { %v1358_v62 = vpop.f32.mrb[4].mxu0  ;;  %v1399_v63 = vpop.f32.mrb[4].mxu1 }
 0x15a   : > { %v8646_v2 = vadd.f32 %v1358_v62, %v8425_v25  ;;  %v8649_v3 = vadd.f32 %v1399_v63, %v8427_v26  ;;  %v1360_v44 = vpop.f32.mrb[5].mxu0  ;;  %v1401_v4 = vpop.f32.mrb[5].mxu1  ;;  %v7083_v25 = vld [vmem:[%s9458_s4 + $0xae4] ss:$16 sps:$4 sm:$0xff]   ;;  %v7086_v26 = vld [vmem:[%s9458_s4 + $0xaec] ss:$16 sps:$4 sm:$0xff]  }
 0x15b   : > { %v8652_v5 = vadd.f32 %v1360_v44, %v8429_v27  ;;  %v8655_v6 = vadd.f32 %v1401_v4, %v8431_v28  ;;  %v1362_v7 = vpop.f32.mrb[6].mxu0  ;;  %v1403_v8 = vpop.f32.mrb[6].mxu1  ;;  %3442 = vmatpush1.bf16.msra.mxu0 %v7069_v57  ;;  %3483 = vmatpush1.bf16.msra.mxu1 %v7072_v59  ;;  %v7081_v27 = vld [vmem:[%s9458_s4 + $0xae0] ss:$16 sps:$4 sm:$0xff]   ;;  %v7084_v28 = vld [vmem:[%s9458_s4 + $0xae8] ss:$16 sps:$4 sm:$0xff]   ;;  %v3609_v59 = vcombine.high %v8762_v54, %v8762_v54 }
 0x15c   : > { %v1363_v9 = vpop.f32.mrb[7].mxu0  ;;  %v1404_v10 = vpop.f32.mrb[7].mxu1  ;;  %3443 = vmatprep.subr.bf16.mxu0 %v7077_v60  ;;  %3484 = vmatprep.subr.bf16.mxu1 %v7080_v61  ;;  %v7140_v57 = vld [vmem:[%s9458_s4 + $0xc0c] ss:$16 sps:$4 sm:$0xff]   ;;  %v3101_v60 = vrot.slane %v8548_v21, %v7647_v53  ;;  %v7135_v61 = vld [vmem:[%s9458_s4 + $0xc00] ss:$16 sps:$4 sm:$0xff]  }
 0x15d   : > { %v7138_v62 = vld [vmem:[%s9458_s4 + $0xc08] ss:$16 sps:$4 sm:$0xff]   ;;  %v7143_v63 = vld [vmem:[%s9458_s4 + $0xc24] ss:$16 sps:$4 sm:$0xff]   ;;  %v7146_v21 = vld [vmem:[%s9458_s4 + $0xc2c] ss:$16 sps:$4 sm:$0xff]  }
 0x15e   : > { %v7144_v44 = vld [vmem:[%s9458_s4 + $0xc28] ss:$16 sps:$4 sm:$0xff]   ;;  %v7149_v4 = vld [vmem:[%s9458_s4 + $0xc44] ss:$16 sps:$4 sm:$0xff]   ;;  %v7152_v7 = vld [vmem:[%s9458_s4 + $0xc4c] ss:$16 sps:$4 sm:$0xff]  }
 0x15f   : > { %3444 = vmatpush1.bf16.msra.mxu0 %v7075_v0  ;;  %3485 = vmatpush1.bf16.msra.mxu1 %v7078_v1  ;;  %v3623_v0 = vrot.slane %v3609_v59, %v7647_v53  ;;  %v7141_v1 = vld [vmem:[%s9458_s4 + $0xc20] ss:$16 sps:$4 sm:$0xff]   ;;  %v7150_v9 = vld [vmem:[%s9458_s4 + $0xc48] ss:$16 sps:$4 sm:$0xff]   ;;  %v7155_v10 = vld [vmem:[%s9458_s4 + $0xc64] ss:$16 sps:$4 sm:$0xff]  }
 0x160   : > { %3445 = vmatprep.subr.bf16.mxu0 %v7083_v25  ;;  %3486 = vmatprep.subr.bf16.mxu1 %v7086_v26  ;;  %v7147_v8 = vld [vmem:[%s9458_s4 + $0xc40] ss:$16 sps:$4 sm:$0xff]   ;;  %v7158_v25 = vld [vmem:[%s9458_s4 + $0xc6c] ss:$16 sps:$4 sm:$0xff]  }
 0x161   : > { %v7153_v26 = vld [vmem:[%s9458_s4 + $0xc60] ss:$16 sps:$4 sm:$0xff]  }
 0x162   : > { %v7201_v59 = vld [vmem:[%s9458_s4 + $0xd60] ss:$16 sps:$4 sm:$0xff]  }
 0x163   : > { %3446 = vmatpush1.bf16.msra.mxu0 %v7081_v27  ;;  %3487 = vmatpush1.bf16.msra.mxu1 %v7084_v28  ;;  %v7156_v27 = vld [vmem:[%s9458_s4 + $0xc68] ss:$16 sps:$4 sm:$0xff]   ;;  %v7161_v28 = vld [vmem:[%s9458_s4 + $0xc84] ss:$16 sps:$4 sm:$0xff]  }
 0x164   : > { %3447 = vmatprep.subr.bf16.mxu0 %v7089_v11  ;;  %3488 = vmatprep.subr.bf16.mxu1 %v7092_v12  ;;  %v7164_v11 = vld [vmem:[%s9458_s4 + $0xc8c] ss:$16 sps:$4 sm:$0xff]   ;;  %v7159_v12 = vld [vmem:[%s9458_s4 + $0xc80] ss:$16 sps:$4 sm:$0xff]  }
 0x167   : > { %3448 = vmatpush1.bf16.msra.mxu0 %v7087_v13  ;;  %3489 = vmatpush1.bf16.msra.mxu1 %v7090_v14  ;;  %v7162_v13 = vld [vmem:[%s9458_s4 + $0xc88] ss:$16 sps:$4 sm:$0xff]   ;;  %v7167_v14 = vld [vmem:[%s9458_s4 + $0xca4] ss:$16 sps:$4 sm:$0xff]  }
 0x168   : > { %3449 = vmatprep.subr.bf16.mxu0 %v7095_v15  ;;  %3490 = vmatprep.subr.bf16.mxu1 %v7098_v16  ;;  %v7170_v15 = vld [vmem:[%s9458_s4 + $0xcac] ss:$16 sps:$4 sm:$0xff]   ;;  %v7165_v16 = vld [vmem:[%s9458_s4 + $0xca0] ss:$16 sps:$4 sm:$0xff]  }
 0x16b   : > { %3450 = vmatpush1.bf16.msra.mxu0 %v7093_v17  ;;  %3491 = vmatpush1.bf16.msra.mxu1 %v7096_v18  ;;  %v7168_v17 = vld [vmem:[%s9458_s4 + $0xca8] ss:$16 sps:$4 sm:$0xff]   ;;  %v7173_v18 = vld [vmem:[%s9458_s4 + $0xcc4] ss:$16 sps:$4 sm:$0xff]  }
 0x16c   : > { %3451 = vmatprep.subr.bf16.mxu0 %v7101_v19  ;;  %3492 = vmatprep.subr.bf16.mxu1 %v7104_v20  ;;  %v7176_v19 = vld [vmem:[%s9458_s4 + $0xccc] ss:$16 sps:$4 sm:$0xff]  }
 0x16f   : > { %3452 = vmatpush1.bf16.msra.mxu0 %v7099_v22  ;;  %3493 = vmatpush1.bf16.msra.mxu1 %v7102_v23 }
 0x170   : > { %3453 = vmatprep.subr.bf16.mxu0 %v7107_v24  ;;  %3494 = vmatprep.subr.bf16.mxu1 %v7110_v29 }
 0x173   : > { %3454 = vmatpush1.bf16.msra.mxu0 %v7105_v30  ;;  %3495 = vmatpush1.bf16.msra.mxu1 %v7108_v31 }
 0x174   : > { %3455 = vmatprep.subr.bf16.mxu0 %v7113_v32  ;;  %3496 = vmatprep.subr.bf16.mxu1 %v7116_v33 }
 0x177   : > { %3456 = vmatpush1.bf16.msra.mxu0 %v7111_v34  ;;  %3497 = vmatpush1.bf16.msra.mxu1 %v7114_v35 }
 0x178   : > { %3457 = vmatprep.subr.bf16.mxu0 %v7119_v36  ;;  %3498 = vmatprep.subr.bf16.mxu1 %v7122_v58  ;;  %v7177_v58 = vld [vmem:[%s9458_s4 + $0xce0] ss:$16 sps:$4 sm:$0xff]  }
 0x17b   : > { %3458 = vmatpush1.bf16.msra.mxu0 %v7117_v39  ;;  %3499 = vmatpush1.bf16.msra.mxu1 %v7120_v40  ;;  %v7188_v39 = vld [vmem:[%s9458_s4 + $0xd0c] ss:$16 sps:$4 sm:$0xff]   ;;  %v7183_v40 = vld [vmem:[%s9458_s4 + $0xd00] ss:$16 sps:$4 sm:$0xff]  }
 0x17c   : > { %3459 = vmatprep.subr.bf16.mxu0 %v7125_v43  ;;  %3500 = vmatprep.subr.bf16.mxu1 %v7128_v45  ;;  %v7186_v43 = vld [vmem:[%s9458_s4 + $0xd08] ss:$16 sps:$4 sm:$0xff]   ;;  %v7191_v45 = vld [vmem:[%s9458_s4 + $0xd24] ss:$16 sps:$4 sm:$0xff]  }
 0x17f   : > { %3460 = vmatpush1.bf16.msra.mxu0 %v7123_v47  ;;  %3501 = vmatpush1.bf16.msra.mxu1 %v7126_v49  ;;  %v7189_v47 = vld [vmem:[%s9458_s4 + $0xd20] ss:$16 sps:$4 sm:$0xff]   ;;  %v7192_v49 = vld [vmem:[%s9458_s4 + $0xd28] ss:$16 sps:$4 sm:$0xff]  }
 0x180   : > { %3461 = vmatprep.subr.bf16.mxu0 %v7131_v50  ;;  %3502 = vmatprep.subr.bf16.mxu1 %v7134_v52  ;;  %v7197_v50 = vld [vmem:[%s9458_s4 + $0xd44] ss:$16 sps:$4 sm:$0xff]   ;;  %v7200_v52 = vld [vmem:[%s9458_s4 + $0xd4c] ss:$16 sps:$4 sm:$0xff]  }
 0x183   : > { %3462 = vmatpush1.bf16.msra.mxu0 %v7129_v55  ;;  %3503 = vmatpush1.bf16.msra.mxu1 %v7132_v56  ;;  %v7195_v55 = vld [vmem:[%s9458_s4 + $0xd40] ss:$16 sps:$4 sm:$0xff]   ;;  %v7198_v56 = vld [vmem:[%s9458_s4 + $0xd48] ss:$16 sps:$4 sm:$0xff]  }
 0x184   : > { %3946 = vmatprep.subr.bf16.mxu0 %v7137_v51  ;;  %3987 = vmatprep.subr.bf16.mxu1 %v7140_v57  ;;  %v7203_v51 = vld [vmem:[%s9458_s4 + $0xd64] ss:$16 sps:$4 sm:$0xff]   ;;  %v7206_v57 = vld [vmem:[%s9458_s4 + $0xd6c] ss:$16 sps:$4 sm:$0xff]  }
 0x186   : > { %3464 = vmatmul.mubr.bf16.vlgmr.msra.gmra.mrb[20].mxu0 %v3101_v60  ;;  %3505 = vmatmul.mubr.bf16.vlgmr.msra.gmra.mrb[20].mxu1 %v3101_v60  ;;  %v7204_v60 = vld [vmem:[%s9458_s4 + $0xd68] ss:$16 sps:$4 sm:$0xff]  }
 0x187   : > { %3947 = vmatpush1.bf16.msra.mxu0 %v7135_v61  ;;  %3988 = vmatpush1.bf16.msra.mxu1 %v7138_v62  ;;  %v7209_v61 = vld [vmem:[%s9458_s4 + $0xd84] ss:$16 sps:$4 sm:$0xff]   ;;  %v7212_v62 = vld [vmem:[%s9458_s4 + $0xd8c] ss:$16 sps:$4 sm:$0xff]  }
 0x188   : > { %3948 = vmatprep.subr.bf16.mxu0 %v7143_v63  ;;  %3989 = vmatprep.subr.bf16.mxu1 %v7146_v21  ;;  %v7207_v63 = vld [vmem:[%s9458_s4 + $0xd80] ss:$16 sps:$4 sm:$0xff]   ;;  %v7210_v21 = vld [vmem:[%s9458_s4 + $0xd88] ss:$16 sps:$4 sm:$0xff]  }
 0x189   : > { %3978 = vmatprep.mubr.bf16.mxu0 %v3623_v0  ;;  %4019 = vmatprep.mubr.bf16.mxu1 %v3623_v0  ;;  %v7215_v0 = vld [vmem:[%s9458_s4 + $0xda4] ss:$16 sps:$4 sm:$0xff]  }
 0x18b   : > { %3949 = vmatpush1.bf16.msra.mxu0 %v7141_v1  ;;  %3990 = vmatpush1.bf16.msra.mxu1 %v7144_v44  ;;  %v7218_v1 = vld [vmem:[%s9458_s4 + $0xdac] ss:$16 sps:$4 sm:$0xff]   ;;  %v6279_v44 = vld.sshfl [vmem:[%s7637_s20 + $0x4] sm:$0x3 pattern:$0x75316420] }
 0x18c   : > { %3950 = vmatprep.subr.bf16.mxu0 %v7149_v4  ;;  %3991 = vmatprep.subr.bf16.mxu1 %v7152_v7  ;;  %v6280_v4 = vld.sshfl [vmem:[%s7637_s20 + $0x8] sm:$0x3 pattern:$0x75316420]  ;;  %v7213_v7 = vld [vmem:[%s9458_s4 + $0xda0] ss:$16 sps:$4 sm:$0xff]  }
 0x18f   : > { %3951 = vmatpush1.bf16.msra.mxu0 %v7147_v8  ;;  %3992 = vmatpush1.bf16.msra.mxu1 %v7150_v9  ;;  %v7216_v8 = vld [vmem:[%s9458_s4 + $0xda8] ss:$16 sps:$4 sm:$0xff]   ;;  %v7221_v9 = vld [vmem:[%s9458_s4 + $0xdc4] ss:$16 sps:$4 sm:$0xff]  }
 0x190   : > { %3952 = vmatprep.subr.bf16.mxu0 %v7155_v10  ;;  %3993 = vmatprep.subr.bf16.mxu1 %v7158_v25  ;;  %v7224_v10 = vld [vmem:[%s9458_s4 + $0xdcc] ss:$16 sps:$4 sm:$0xff]   ;;  %v4116_v25 = vcombine.low %v6279_v44, %v6280_v4  ;;  %v7276_v44 = vld [vmem:[%s9458_s4 + $0xee8] ss:$16 sps:$4 sm:$0xff]   ;;  %v7281_v4 = vld [vmem:[%s9458_s4 + $0xf04] ss:$16 sps:$4 sm:$0xff]  }
 0x193   : > { %3953 = vmatpush1.bf16.msra.mxu0 %v7153_v26  ;;  %3994 = vmatpush1.bf16.msra.mxu1 %v7156_v27  ;;  %v7219_v26 = vld [vmem:[%s9458_s4 + $0xdc0] ss:$16 sps:$4 sm:$0xff]   ;;  %v7222_v27 = vld [vmem:[%s9458_s4 + $0xdc8] ss:$16 sps:$4 sm:$0xff]  }
 0x194   : > { %3954 = vmatprep.subr.bf16.mxu0 %v7161_v28  ;;  %3995 = vmatprep.subr.bf16.mxu1 %v7164_v11  ;;  %v7227_v28 = vld [vmem:[%s9458_s4 + $0xde4] ss:$16 sps:$4 sm:$0xff]   ;;  %v7230_v11 = vld [vmem:[%s9458_s4 + $0xdec] ss:$16 sps:$4 sm:$0xff]  }
 0x197   : > { %3955 = vmatpush1.bf16.msra.mxu0 %v7159_v12  ;;  %3996 = vmatpush1.bf16.msra.mxu1 %v7162_v13  ;;  %v8976_v12 = vrot.slane %v4116_v25, %v7647_v53  ;;  %v7225_v13 = vld [vmem:[%s9458_s4 + $0xde0] ss:$16 sps:$4 sm:$0xff]   ;;  %v7290_v25 = vld [vmem:[%s9458_s4 + $0xf2c] ss:$16 sps:$4 sm:$0xff]  }
 0x198   : > { %3956 = vmatprep.subr.bf16.mxu0 %v7167_v14  ;;  %3997 = vmatprep.subr.bf16.mxu1 %v7170_v15  ;;  %v7228_v14 = vld [vmem:[%s9458_s4 + $0xde8] ss:$16 sps:$4 sm:$0xff]   ;;  %v7233_v15 = vld [vmem:[%s9458_s4 + $0xe04] ss:$16 sps:$4 sm:$0xff]  }
 0x199   : > { %v1903_v20 = vpop.f32.mrb[8].mxu0  ;;  %v1944_v22 = vpop.f32.mrb[8].mxu1 }
 0x19a   : > { %v8854_v23 = vadd.f32 %v1903_v20, %v8646_v2  ;;  %v8857_v24 = vadd.f32 %v1944_v22, %v8649_v3  ;;  %v1905_v29 = vpop.f32.mrb[9].mxu0  ;;  %v1946_v30 = vpop.f32.mrb[9].mxu1  ;;  %v7171_v2 = vld [vmem:[%s9458_s4 + $0xcc0] ss:$16 sps:$4 sm:$0xff]   ;;  %v7174_v3 = vld [vmem:[%s9458_s4 + $0xcc8] ss:$16 sps:$4 sm:$0xff]  }
 0x19b   : > { %v8860_v31 = vadd.f32 %v1905_v29, %v8652_v5  ;;  %v8863_v32 = vadd.f32 %v1946_v30, %v8655_v6  ;;  %v1907_v33 = vpop.f32.mrb[10].mxu0  ;;  %v1948_v34 = vpop.f32.mrb[10].mxu1  ;;  %3957 = vmatpush1.bf16.msra.mxu0 %v7165_v16  ;;  %3998 = vmatpush1.bf16.msra.mxu1 %v7168_v17  ;;  %v7179_v5 = vld [vmem:[%s9458_s4 + $0xce4] ss:$16 sps:$4 sm:$0xff]   ;;  %v7182_v6 = vld [vmem:[%s9458_s4 + $0xcec] ss:$16 sps:$4 sm:$0xff]   ;;  %v4124_v17 = vcombine.high %v8976_v12, %v8976_v12 }
 0x19c   : > { %v1908_v35 = vpop.f32.mrb[11].mxu0  ;;  %v1949_v36 = vpop.f32.mrb[11].mxu1  ;;  %3958 = vmatprep.subr.bf16.mxu0 %v7173_v18  ;;  %3999 = vmatprep.subr.bf16.mxu1 %v7176_v19  ;;  %v7236_v16 = vld [vmem:[%s9458_s4 + $0xe0c] ss:$16 sps:$4 sm:$0xff]   ;;  %v3616_v18 = vrot.slane %v8762_v54, %v7647_v53  ;;  %v7231_v19 = vld [vmem:[%s9458_s4 + $0xe00] ss:$16 sps:$4 sm:$0xff]  }
 0x19d   : > { %v7234_v20 = vld [vmem:[%s9458_s4 + $0xe08] ss:$16 sps:$4 sm:$0xff]   ;;  %v7239_v22 = vld [vmem:[%s9458_s4 + $0xe24] ss:$16 sps:$4 sm:$0xff]   ;;  %v7242_v54 = vld [vmem:[%s9458_s4 + $0xe2c] ss:$16 sps:$4 sm:$0xff]   ;;  %v4138_v29 = vrot.slane %v4124_v17, %v7647_v53 }
 0x19e   : > { %v7237_v30 = vld [vmem:[%s9458_s4 + $0xe20] ss:$16 sps:$4 sm:$0xff]   ;;  %v7240_v33 = vld [vmem:[%s9458_s4 + $0xe28] ss:$16 sps:$4 sm:$0xff]   ;;  %v7245_v34 = vld [vmem:[%s9458_s4 + $0xe44] ss:$16 sps:$4 sm:$0xff]  }
 0x19f   : > { %3959 = vmatpush1.bf16.msra.mxu0 %v7171_v2  ;;  %4000 = vmatpush1.bf16.msra.mxu1 %v7174_v3  ;;  %v7248_v2 = vld [vmem:[%s9458_s4 + $0xe4c] ss:$16 sps:$4 sm:$0xff]   ;;  %v7243_v3 = vld [vmem:[%s9458_s4 + $0xe40] ss:$16 sps:$4 sm:$0xff]   ;;  %v7246_v35 = vld [vmem:[%s9458_s4 + $0xe48] ss:$16 sps:$4 sm:$0xff]  }
 0x1a0   : > { %3960 = vmatprep.subr.bf16.mxu0 %v7179_v5  ;;  %4001 = vmatprep.subr.bf16.mxu1 %v7182_v6  ;;  %v7251_v36 = vld [vmem:[%s9458_s4 + $0xe64] ss:$16 sps:$4 sm:$0xff]   ;;  %v7254_v5 = vld [vmem:[%s9458_s4 + $0xe6c] ss:$16 sps:$4 sm:$0xff]   ;;  %v7249_v6 = vld [vmem:[%s9458_s4 + $0xe60] ss:$16 sps:$4 sm:$0xff]  }
 0x1a1   : > { %v7299_v17 = vld [vmem:[%s9458_s4 + $0xf64] ss:$16 sps:$4 sm:$0xff]  }
 0x1a3   : > { %3961 = vmatpush1.bf16.msra.mxu0 %v7177_v58  ;;  %4002 = vmatpush1.bf16.msra.mxu1 %v7180_v37  ;;  %v7252_v58 = vld [vmem:[%s9458_s4 + $0xe68] ss:$16 sps:$4 sm:$0xff]   ;;  %v7257_v37 = vld [vmem:[%s9458_s4 + $0xe84] ss:$16 sps:$4 sm:$0xff]  }
 0x1a4   : > { %3962 = vmatprep.subr.bf16.mxu0 %v7185_v38  ;;  %4003 = vmatprep.subr.bf16.mxu1 %v7188_v39  ;;  %v7260_v38 = vld [vmem:[%s9458_s4 + $0xe8c] ss:$16 sps:$4 sm:$0xff]   ;;  %v7255_v39 = vld [vmem:[%s9458_s4 + $0xe80] ss:$16 sps:$4 sm:$0xff]  }
 0x1a7   : > { %3963 = vmatpush1.bf16.msra.mxu0 %v7183_v40  ;;  %4004 = vmatpush1.bf16.msra.mxu1 %v7186_v43  ;;  %v7258_v40 = vld [vmem:[%s9458_s4 + $0xe88] ss:$16 sps:$4 sm:$0xff]   ;;  %v7263_v43 = vld [vmem:[%s9458_s4 + $0xea4] ss:$16 sps:$4 sm:$0xff]  }
 0x1a8   : > { %3964 = vmatprep.subr.bf16.mxu0 %v7191_v45  ;;  %4005 = vmatprep.subr.bf16.mxu1 %v7194_v46  ;;  %v7266_v45 = vld [vmem:[%s9458_s4 + $0xeac] ss:$16 sps:$4 sm:$0xff]   ;;  %v7261_v46 = vld [vmem:[%s9458_s4 + $0xea0] ss:$16 sps:$4 sm:$0xff]  }
 0x1ab   : > { %3965 = vmatpush1.bf16.msra.mxu0 %v7189_v47  ;;  %4006 = vmatpush1.bf16.msra.mxu1 %v7192_v49  ;;  %v7264_v47 = vld [vmem:[%s9458_s4 + $0xea8] ss:$16 sps:$4 sm:$0xff]   ;;  %v7269_v49 = vld [vmem:[%s9458_s4 + $0xec4] ss:$16 sps:$4 sm:$0xff]  }
 0x1ac   : > { %3966 = vmatprep.subr.bf16.mxu0 %v7197_v50  ;;  %4007 = vmatprep.subr.bf16.mxu1 %v7200_v52  ;;  %v7272_v50 = vld [vmem:[%s9458_s4 + $0xecc] ss:$16 sps:$4 sm:$0xff]  }
 0x1af   : > { %3967 = vmatpush1.bf16.msra.mxu0 %v7195_v55  ;;  %4008 = vmatpush1.bf16.msra.mxu1 %v7198_v56 }
 0x1b0   : > { %3968 = vmatprep.subr.bf16.mxu0 %v7203_v51  ;;  %4009 = vmatprep.subr.bf16.mxu1 %v7206_v57 }
 0x1b3   : > { %3969 = vmatpush1.bf16.msra.mxu0 %v7201_v59  ;;  %4010 = vmatpush1.bf16.msra.mxu1 %v7204_v60 }
 0x1b4   : > { %3970 = vmatprep.subr.bf16.mxu0 %v7209_v61  ;;  %4011 = vmatprep.subr.bf16.mxu1 %v7212_v62 }
 0x1b7   : > { %3971 = vmatpush1.bf16.msra.mxu0 %v7207_v63  ;;  %4012 = vmatpush1.bf16.msra.mxu1 %v7210_v21 }
 0x1b8   : > { %3972 = vmatprep.subr.bf16.mxu0 %v7215_v0  ;;  %4013 = vmatprep.subr.bf16.mxu1 %v7218_v1  ;;  %v7273_v1 = vld [vmem:[%s9458_s4 + $0xee0] ss:$16 sps:$4 sm:$0xff]  }
 0x1bb   : > { %3973 = vmatpush1.bf16.msra.mxu0 %v7213_v7  ;;  %4014 = vmatpush1.bf16.msra.mxu1 %v7216_v8  ;;  %v7284_v7 = vld [vmem:[%s9458_s4 + $0xf0c] ss:$16 sps:$4 sm:$0xff]   ;;  %v7279_v8 = vld [vmem:[%s9458_s4 + $0xf00] ss:$16 sps:$4 sm:$0xff]  }
 0x1bc   : > { %3974 = vmatprep.subr.bf16.mxu0 %v7221_v9  ;;  %4015 = vmatprep.subr.bf16.mxu1 %v7224_v10  ;;  %v7282_v9 = vld [vmem:[%s9458_s4 + $0xf08] ss:$16 sps:$4 sm:$0xff]   ;;  %v7287_v10 = vld [vmem:[%s9458_s4 + $0xf24] ss:$16 sps:$4 sm:$0xff]  }
 0x1bf   : > { %3975 = vmatpush1.bf16.msra.mxu0 %v7219_v26  ;;  %4016 = vmatpush1.bf16.msra.mxu1 %v7222_v27  ;;  %v7285_v26 = vld [vmem:[%s9458_s4 + $0xf20] ss:$16 sps:$4 sm:$0xff]   ;;  %v7288_v27 = vld [vmem:[%s9458_s4 + $0xf28] ss:$16 sps:$4 sm:$0xff]  }
 0x1c0   : > { %3976 = vmatprep.subr.bf16.mxu0 %v7227_v28  ;;  %4017 = vmatprep.subr.bf16.mxu1 %v7230_v11  ;;  %v7293_v28 = vld [vmem:[%s9458_s4 + $0xf44] ss:$16 sps:$4 sm:$0xff]   ;;  %v7296_v11 = vld [vmem:[%s9458_s4 + $0xf4c] ss:$16 sps:$4 sm:$0xff]  }
 0x1c3   : > { %3977 = vmatpush1.bf16.msra.mxu0 %v7225_v13  ;;  %4018 = vmatpush1.bf16.msra.mxu1 %v7228_v14  ;;  %v7291_v13 = vld [vmem:[%s9458_s4 + $0xf40] ss:$16 sps:$4 sm:$0xff]   ;;  %v6411_v14 = vld.sshfl [vmem:[%s7777_s16 + $0x4] sm:$0x33 pattern:$0x75316420] }
 0x1c4   : > { %4461 = vmatprep.subr.bf16.mxu0 %v7233_v15  ;;  %4502 = vmatprep.subr.bf16.mxu1 %v7236_v16  ;;  %v7294_v15 = vld [vmem:[%s9458_s4 + $0xf48] ss:$16 sps:$4 sm:$0xff]  }
 0x1c5   : > { %v6412_v16 = vld.sshfl [vmem:[%s7777_s16 + $0x8] sm:$0x33 pattern:$0x75316420] }
 0x1c6   : > { %3979 = vmatmul.mubr.bf16.vlgmr.msra.gmra.mrb[24].mxu0 %v3616_v18  ;;  %4020 = vmatmul.mubr.bf16.vlgmr.msra.gmra.mrb[24].mxu1 %v3616_v18  ;;  %v7302_v18 = vld [vmem:[%s9458_s4 + $0xf6c] ss:$16 sps:$4 sm:$0xff]  }
 0x1c7   : > { %4462 = vmatpush1.bf16.msra.mxu0 %v7231_v19  ;;  %4503 = vmatpush1.bf16.msra.mxu1 %v7234_v20  ;;  %v4558_v19 = vcombine.high %v6411_v14, %v6411_v14  ;;  %v4566_v20 = vcombine.high %v6412_v16, %v6412_v16 }
 0x1c8   : > { %4463 = vmatprep.subr.bf16.mxu0 %v7239_v22  ;;  %4504 = vmatprep.subr.bf16.mxu1 %v7242_v54  ;;  %v7297_v22 = vld [vmem:[%s9458_s4 + $0xf60] ss:$16 sps:$4 sm:$0xff]   ;;  %v7300_v54 = vld [vmem:[%s9458_s4 + $0xf68] ss:$16 sps:$4 sm:$0xff]  }
 0x1c9   : > { %4493 = vmatprep.mubr.bf16.mxu0 %v4138_v29  ;;  %4534 = vmatprep.mubr.bf16.mxu1 %v4138_v29  ;;  %v7305_v29 = vld [vmem:[%s9458_s4 + $0xf84] ss:$16 sps:$4 sm:$0xff]  }
 0x1cb   : > { %4464 = vmatpush1.bf16.msra.mxu0 %v7237_v30  ;;  %4505 = vmatpush1.bf16.msra.mxu1 %v7240_v33  ;;  %v7308_v30 = vld [vmem:[%s9458_s4 + $0xf8c] ss:$16 sps:$4 sm:$0xff]   ;;  %v4568_v33 = vshrl.u32 %v6411_v14, 16 }
 0x1cc   : > { %4465 = vmatprep.subr.bf16.mxu0 %v7245_v34  ;;  %4506 = vmatprep.subr.bf16.mxu1 %v7248_v2  ;;  %v4573_v34 = vshll.u32 %v4558_v19, 16  ;;  %v4577_v2 = vshrl.u32 %v6412_v16, 16  ;;  %v7362_v14 = vld [vmem:[%s9458_s4 + $0x10ac] ss:$16 sps:$4 sm:$0xff]   ;;  %v7360_v16 = vld [vmem:[%s9458_s4 + $0x10a8] ss:$16 sps:$4 sm:$0xff]  }
 0x1cf   : > { %4466 = vmatpush1.bf16.msra.mxu0 %v7243_v3  ;;  %4507 = vmatpush1.bf16.msra.mxu1 %v7246_v35  ;;  %v4582_v3 = vshll.u32 %v4566_v20, 16  ;;  %v7303_v35 = vld [vmem:[%s9458_s4 + $0xf80] ss:$16 sps:$4 sm:$0xff]  }
 0x1d0   : > { %4467 = vmatprep.subr.bf16.mxu0 %v7251_v36  ;;  %4508 = vmatprep.subr.bf16.mxu1 %v7254_v5  ;;  %v7306_v36 = vld [vmem:[%s9458_s4 + $0xf88] ss:$16 sps:$4 sm:$0xff]   ;;  %v7311_v5 = vld [vmem:[%s9458_s4 + $0xfa4] ss:$16 sps:$4 sm:$0xff]  }
 0x1d3   : > { %4468 = vmatpush1.bf16.msra.mxu0 %v7249_v6  ;;  %4509 = vmatpush1.bf16.msra.mxu1 %v7252_v58  ;;  %v7314_v6 = vld [vmem:[%s9458_s4 + $0xfac] ss:$16 sps:$4 sm:$0xff]   ;;  %v4575_v58 = vsel %vm7951_vm14, %v4568_v33, %v4573_v34 }
 0x1d4   : > { %4469 = vmatprep.subr.bf16.mxu0 %v7257_v37  ;;  %4510 = vmatprep.subr.bf16.mxu1 %v7260_v38  ;;  %v4584_v37 = vsel %vm7951_vm14, %v4577_v2, %v4582_v3  ;;  %v7309_v38 = vld [vmem:[%s9458_s4 + $0xfa0] ss:$16 sps:$4 sm:$0xff]  }
 0x1d7   : > { %4470 = vmatpush1.bf16.msra.mxu0 %v7255_v39  ;;  %4511 = vmatpush1.bf16.msra.mxu1 %v7258_v40  ;;  %v7312_v39 = vld [vmem:[%s9458_s4 + $0xfa8] ss:$16 sps:$4 sm:$0xff]   ;;  %v7317_v40 = vld [vmem:[%s9458_s4 + $0xfc4] ss:$16 sps:$4 sm:$0xff]  }
 0x1d8   : > { %4471 = vmatprep.subr.bf16.mxu0 %v7263_v43  ;;  %4512 = vmatprep.subr.bf16.mxu1 %v7266_v45  ;;  %v4650_v43 = vcombine.low %v4575_v58, %v4584_v37  ;;  %v7315_v45 = vld [vmem:[%s9458_s4 + $0xfc0] ss:$16 sps:$4 sm:$0xff]   ;;  %v7377_v58 = vld [vmem:[%s9458_s4 + $0x1104] ss:$16 sps:$4 sm:$0xff]   ;;  %v7380_v37 = vld [vmem:[%s9458_s4 + $0x110c] ss:$16 sps:$4 sm:$0xff]  }
 0x1d9   : > { %v2417_v52 = vpop.f32.mrb[12].mxu0  ;;  %v2458_v55 = vpop.f32.mrb[12].mxu1 }
 0x1da   : > { %v9068_v56 = vadd.f32 %v2417_v52, %v8854_v23  ;;  %v9071_v51 = vadd.f32 %v2458_v55, %v8857_v24  ;;  %v2419_v57 = vpop.f32.mrb[13].mxu0  ;;  %v2460_v59 = vpop.f32.mrb[13].mxu1  ;;  %v7267_v23 = vld [vmem:[%s9458_s4 + $0xec0] ss:$16 sps:$4 sm:$0xff]   ;;  %v7270_v24 = vld [vmem:[%s9458_s4 + $0xec8] ss:$16 sps:$4 sm:$0xff]  }
 0x1db   : > { %v9074_v60 = vadd.f32 %v2419_v57, %v8860_v31  ;;  %v9077_v61 = vadd.f32 %v2460_v59, %v8863_v32  ;;  %v2421_v62 = vpop.f32.mrb[14].mxu0  ;;  %v2462_v63 = vpop.f32.mrb[14].mxu1  ;;  %4472 = vmatpush1.bf16.msra.mxu0 %v7261_v46  ;;  %4513 = vmatpush1.bf16.msra.mxu1 %v7264_v47  ;;  %v7275_v31 = vld [vmem:[%s9458_s4 + $0xee4] ss:$16 sps:$4 sm:$0xff]   ;;  %v7278_v32 = vld [vmem:[%s9458_s4 + $0xeec] ss:$16 sps:$4 sm:$0xff]  }
 0x1dc   : > { %v2422_v21 = vpop.f32.mrb[15].mxu0  ;;  %v2463_v0 = vpop.f32.mrb[15].mxu1  ;;  %4473 = vmatprep.subr.bf16.mxu0 %v7269_v49  ;;  %4514 = vmatprep.subr.bf16.mxu1 %v7272_v50  ;;  %v7318_v46 = vld [vmem:[%s9458_s4 + $0xfc8] ss:$16 sps:$4 sm:$0xff]   ;;  %v7323_v47 = vld [vmem:[%s9458_s4 + $0xfe4] ss:$16 sps:$4 sm:$0xff]   ;;  %v9194_v50 = vrot.slane %v4650_v43, %v7647_v53  ;;  %v4131_v63 = vrot.slane %v8976_v12, %v7647_v53 }
 0x1dd   : > { %v7326_v49 = vld [vmem:[%s9458_s4 + $0xfec] ss:$16 sps:$4 sm:$0xff]   ;;  %v7321_v52 = vld [vmem:[%s9458_s4 + $0xfe0] ss:$16 sps:$4 sm:$0xff]   ;;  %v7324_v55 = vld [vmem:[%s9458_s4 + $0xfe8] ss:$16 sps:$4 sm:$0xff]  }
 0x1de   : > { %v7329_v57 = vld [vmem:[%s9458_s4 + $0x1004] ss:$16 sps:$4 sm:$0xff]   ;;  %v7332_v59 = vld [vmem:[%s9458_s4 + $0x100c] ss:$16 sps:$4 sm:$0xff]   ;;  %v4658_v62 = vcombine.high %v9194_v50, %v9194_v50  ;;  %v7381_v43 = vld [vmem:[%s9458_s4 + $0x1120] ss:$16 sps:$4 sm:$0xff]  }
 0x1df   : > { %4474 = vmatpush1.bf16.msra.mxu0 %v7267_v23  ;;  %4515 = vmatpush1.bf16.msra.mxu1 %v7270_v24  ;;  %v7327_v23 = vld [vmem:[%s9458_s4 + $0x1000] ss:$16 sps:$4 sm:$0xff]   ;;  %v7330_v24 = vld [vmem:[%s9458_s4 + $0x1008] ss:$16 sps:$4 sm:$0xff]   ;;  %v7335_v21 = vld [vmem:[%s9458_s4 + $0x1024] ss:$16 sps:$4 sm:$0xff]  }
 0x1e0   : > { %4475 = vmatprep.subr.bf16.mxu0 %v7275_v31  ;;  %4516 = vmatprep.subr.bf16.mxu1 %v7278_v32  ;;  %v7338_v12 = vld [vmem:[%s9458_s4 + $0x102c] ss:$16 sps:$4 sm:$0xff]   ;;  %v4672_v0 = vrot.slane %v4658_v62, %v7647_v53  ;;  %v7333_v31 = vld [vmem:[%s9458_s4 + $0x1020] ss:$16 sps:$4 sm:$0xff]   ;;  %v7336_v32 = vld [vmem:[%s9458_s4 + $0x1028] ss:$16 sps:$4 sm:$0xff]  }
 0x1e1   : > { %v7396_v62 = vld [vmem:[%s9458_s4 + $0x1168] ss:$16 sps:$4 sm:$0xff]  }
 0x1e3   : > { %4476 = vmatpush1.bf16.msra.mxu0 %v7273_v1  ;;  %4517 = vmatpush1.bf16.msra.mxu1 %v7276_v44  ;;  %v7341_v1 = vld [vmem:[%s9458_s4 + $0x1044] ss:$16 sps:$4 sm:$0xff]   ;;  %v7344_v44 = vld [vmem:[%s9458_s4 + $0x104c] ss:$16 sps:$4 sm:$0xff]  }
 0x1e4   : > { %4477 = vmatprep.subr.bf16.mxu0 %v7281_v4  ;;  %4518 = vmatprep.subr.bf16.mxu1 %v7284_v7  ;;  %v7339_v4 = vld [vmem:[%s9458_s4 + $0x1040] ss:$16 sps:$4 sm:$0xff]   ;;  %v7342_v7 = vld [vmem:[%s9458_s4 + $0x1048] ss:$16 sps:$4 sm:$0xff]  }
 0x1e7   : > { %4478 = vmatpush1.bf16.msra.mxu0 %v7279_v8  ;;  %4519 = vmatpush1.bf16.msra.mxu1 %v7282_v9  ;;  %v7347_v8 = vld [vmem:[%s9458_s4 + $0x1064] ss:$16 sps:$4 sm:$0xff]   ;;  %v7350_v9 = vld [vmem:[%s9458_s4 + $0x106c] ss:$16 sps:$4 sm:$0xff]  }
 0x1e8   : > { %4479 = vmatprep.subr.bf16.mxu0 %v7287_v10  ;;  %4520 = vmatprep.subr.bf16.mxu1 %v7290_v25  ;;  %v7345_v10 = vld [vmem:[%s9458_s4 + $0x1060] ss:$16 sps:$4 sm:$0xff]   ;;  %v7348_v25 = vld [vmem:[%s9458_s4 + $0x1068] ss:$16 sps:$4 sm:$0xff]  }
 0x1eb   : > { %4480 = vmatpush1.bf16.msra.mxu0 %v7285_v26  ;;  %4521 = vmatpush1.bf16.msra.mxu1 %v7288_v27  ;;  %v7353_v26 = vld [vmem:[%s9458_s4 + $0x1084] ss:$16 sps:$4 sm:$0xff]   ;;  %v7356_v27 = vld [vmem:[%s9458_s4 + $0x108c] ss:$16 sps:$4 sm:$0xff]  }
 0x1ec   : > { %4481 = vmatprep.subr.bf16.mxu0 %v7293_v28  ;;  %4522 = vmatprep.subr.bf16.mxu1 %v7296_v11  ;;  %v7351_v28 = vld [vmem:[%s9458_s4 + $0x1080] ss:$16 sps:$4 sm:$0xff]   ;;  %v7354_v11 = vld [vmem:[%s9458_s4 + $0x1088] ss:$16 sps:$4 sm:$0xff]  }
 0x1ef   : > { %4482 = vmatpush1.bf16.msra.mxu0 %v7291_v13  ;;  %4523 = vmatpush1.bf16.msra.mxu1 %v7294_v15  ;;  %v7359_v13 = vld [vmem:[%s9458_s4 + $0x10a4] ss:$16 sps:$4 sm:$0xff]   ;;  %v7357_v15 = vld [vmem:[%s9458_s4 + $0x10a0] ss:$16 sps:$4 sm:$0xff]  }
 0x1f0   : > { %4483 = vmatprep.subr.bf16.mxu0 %v7299_v17  ;;  %4524 = vmatprep.subr.bf16.mxu1 %v7302_v18  ;;  %v7365_v17 = vld [vmem:[%s9458_s4 + $0x10c4] ss:$16 sps:$4 sm:$0xff]   ;;  %v7368_v18 = vld [vmem:[%s9458_s4 + $0x10cc] ss:$16 sps:$4 sm:$0xff]  }
 0x1f3   : > { %4484 = vmatpush1.bf16.msra.mxu0 %v7297_v22  ;;  %4525 = vmatpush1.bf16.msra.mxu1 %v7300_v54 }
 0x1f4   : > { %4485 = vmatprep.subr.bf16.mxu0 %v7305_v29  ;;  %4526 = vmatprep.subr.bf16.mxu1 %v7308_v30 }
 0x1f7   : > { %4486 = vmatpush1.bf16.msra.mxu0 %v7303_v35  ;;  %4527 = vmatpush1.bf16.msra.mxu1 %v7306_v36 }
 0x1f8   : > { %4487 = vmatprep.subr.bf16.mxu0 %v7311_v5  ;;  %4528 = vmatprep.subr.bf16.mxu1 %v7314_v6  ;;  %v7369_v5 = vld [vmem:[%s9458_s4 + $0x10e0] ss:$16 sps:$4 sm:$0xff]   ;;  %v7372_v6 = vld [vmem:[%s9458_s4 + $0x10e8] ss:$16 sps:$4 sm:$0xff]  }
 0x1fb   : > { %4488 = vmatpush1.bf16.msra.mxu0 %v7309_v38  ;;  %4529 = vmatpush1.bf16.msra.mxu1 %v7312_v39  ;;  %v7375_v38 = vld [vmem:[%s9458_s4 + $0x1100] ss:$16 sps:$4 sm:$0xff]   ;;  %v7378_v39 = vld [vmem:[%s9458_s4 + $0x1108] ss:$16 sps:$4 sm:$0xff]  }
 0x1fc   : > { %4489 = vmatprep.subr.bf16.mxu0 %v7317_v40  ;;  %4530 = vmatprep.subr.bf16.mxu1 %v7320_v42  ;;  %v7383_v40 = vld [vmem:[%s9458_s4 + $0x1124] ss:$16 sps:$4 sm:$0xff]   ;;  %v7386_v42 = vld [vmem:[%s9458_s4 + $0x112c] ss:$16 sps:$4 sm:$0xff]  }
 0x1ff   : > { %4490 = vmatpush1.bf16.msra.mxu0 %v7315_v45  ;;  %4531 = vmatpush1.bf16.msra.mxu1 %v7318_v46  ;;  %v7384_v45 = vld [vmem:[%s9458_s4 + $0x1128] ss:$16 sps:$4 sm:$0xff]   ;;  %v7389_v46 = vld [vmem:[%s9458_s4 + $0x1144] ss:$16 sps:$4 sm:$0xff]  }
 0x200   : > { %4491 = vmatprep.subr.bf16.mxu0 %v7323_v47  ;;  %4532 = vmatprep.subr.bf16.mxu1 %v7326_v49  ;;  %v7392_v47 = vld [vmem:[%s9458_s4 + $0x114c] ss:$16 sps:$4 sm:$0xff]   ;;  %v7387_v49 = vld [vmem:[%s9458_s4 + $0x1140] ss:$16 sps:$4 sm:$0xff]  }
 0x203   : > { %4492 = vmatpush1.bf16.msra.mxu0 %v7321_v52  ;;  %4533 = vmatpush1.bf16.msra.mxu1 %v7324_v55  ;;  %v7390_v52 = vld [vmem:[%s9458_s4 + $0x1148] ss:$16 sps:$4 sm:$0xff]   ;;  %v7395_v55 = vld [vmem:[%s9458_s4 + $0x1164] ss:$16 sps:$4 sm:$0xff]  }
 0x204   : > { %4995 = vmatprep.subr.bf16.mxu0 %v7329_v57  ;;  %5036 = vmatprep.subr.bf16.mxu1 %v7332_v59  ;;  %v7398_v57 = vld [vmem:[%s9458_s4 + $0x116c] ss:$16 sps:$4 sm:$0xff]   ;;  %v7393_v59 = vld [vmem:[%s9458_s4 + $0x1160] ss:$16 sps:$4 sm:$0xff]  }
 0x206   : > { %4494 = vmatmul.mubr.bf16.vlgmr.msra.gmra.mrb[28].mxu0 %v4131_v63  ;;  %4535 = vmatmul.mubr.bf16.vlgmr.msra.gmra.mrb[28].mxu1 %v4131_v63  ;;  %v7401_v63 = vld [vmem:[%s9458_s4 + $0x1184] ss:$16 sps:$4 sm:$0xff]  }
 0x207   : > { %4996 = vmatpush1.bf16.msra.mxu0 %v7327_v23  ;;  %5037 = vmatpush1.bf16.msra.mxu1 %v7330_v24  ;;  %v7404_v23 = vld [vmem:[%s9458_s4 + $0x118c] ss:$16 sps:$4 sm:$0xff]   ;;  %v7399_v24 = vld [vmem:[%s9458_s4 + $0x1180] ss:$16 sps:$4 sm:$0xff]  }
 0x208   : > { %4997 = vmatprep.subr.bf16.mxu0 %v7335_v21  ;;  %5038 = vmatprep.subr.bf16.mxu1 %v7338_v12  ;;  %v7402_v21 = vld [vmem:[%s9458_s4 + $0x1188] ss:$16 sps:$4 sm:$0xff]   ;;  %v7407_v12 = vld [vmem:[%s9458_s4 + $0x11a4] ss:$16 sps:$4 sm:$0xff]  }
 0x209   : > { %5027 = vmatprep.mubr.bf16.mxu0 %v4672_v0  ;;  %5068 = vmatprep.mubr.bf16.mxu1 %v4672_v0  ;;  %v7410_v0 = vld [vmem:[%s9458_s4 + $0x11ac] ss:$16 sps:$4 sm:$0xff]  }
 0x20b   : > { %4998 = vmatpush1.bf16.msra.mxu0 %v7333_v31  ;;  %5039 = vmatpush1.bf16.msra.mxu1 %v7336_v32  ;;  %v7405_v31 = vld [vmem:[%s9458_s4 + $0x11a0] ss:$16 sps:$4 sm:$0xff]   ;;  %v7408_v32 = vld [vmem:[%s9458_s4 + $0x11a8] ss:$16 sps:$4 sm:$0xff]  }
 0x20c   : > { %4999 = vmatprep.subr.bf16.mxu0 %v7341_v1  ;;  %5040 = vmatprep.subr.bf16.mxu1 %v7344_v44  ;;  %v7413_v1 = vld [vmem:[%s9458_s4 + $0x11c4] ss:$16 sps:$4 sm:$0xff]   ;;  %v7416_v44 = vld [vmem:[%s9458_s4 + $0x11cc] ss:$16 sps:$4 sm:$0xff]  }
 0x20f   : > { %5000 = vmatpush1.bf16.msra.mxu0 %v7339_v4  ;;  %5041 = vmatpush1.bf16.msra.mxu1 %v7342_v7  ;;  %v7411_v4 = vld [vmem:[%s9458_s4 + $0x11c0] ss:$16 sps:$4 sm:$0xff]   ;;  %v7414_v7 = vld [vmem:[%s9458_s4 + $0x11c8] ss:$16 sps:$4 sm:$0xff]  }
 0x210   : > { %5001 = vmatprep.subr.bf16.mxu0 %v7347_v8  ;;  %5042 = vmatprep.subr.bf16.mxu1 %v7350_v9  ;;  %v7419_v8 = vld [vmem:[%s9458_s4 + $0x11e4] ss:$16 sps:$4 sm:$0xff]   ;;  %v7422_v9 = vld [vmem:[%s9458_s4 + $0x11ec] ss:$16 sps:$4 sm:$0xff]  }
 0x213   : > { %5002 = vmatpush1.bf16.msra.mxu0 %v7345_v10  ;;  %5043 = vmatpush1.bf16.msra.mxu1 %v7348_v25  ;;  %v7417_v10 = vld [vmem:[%s9458_s4 + $0x11e0] ss:$16 sps:$4 sm:$0xff]   ;;  %v7420_v25 = vld [vmem:[%s9458_s4 + $0x11e8] ss:$16 sps:$4 sm:$0xff]  }
 0x214   : > { %5003 = vmatprep.subr.bf16.mxu0 %v7353_v26  ;;  %5044 = vmatprep.subr.bf16.mxu1 %v7356_v27  ;;  %v4665_v26 = vrot.slane %v9194_v50, %v7647_v53 }
 0x217   : > { %5004 = vmatpush1.bf16.msra.mxu0 %v7351_v28  ;;  %5045 = vmatpush1.bf16.msra.mxu1 %v7354_v11 }
 0x218   : > { %5005 = vmatprep.subr.bf16.mxu0 %v7359_v13  ;;  %5046 = vmatprep.subr.bf16.mxu1 %v7362_v14 }
 0x219   : > { %v2931_v19 = vpop.f32.mrb[16].mxu0  ;;  %v2972_v20 = vpop.f32.mrb[16].mxu1 }
 0x21a   : > { %v9286_v22 = vadd.f32 %v2931_v19, %v9068_v56  ;;  %v9289_v54 = vadd.f32 %v2972_v20, %v9071_v51  ;;  %v2933_v29 = vpop.f32.mrb[17].mxu0  ;;  %v2974_v30 = vpop.f32.mrb[17].mxu1  ;;  %v7363_v56 = vld [vmem:[%s9458_s4 + $0x10c0] ss:$16 sps:$4 sm:$0xff]   ;;  %v7366_v51 = vld [vmem:[%s9458_s4 + $0x10c8] ss:$16 sps:$4 sm:$0xff]  }
 0x21b   : > { %v9292_v33 = vadd.f32 %v2933_v29, %v9074_v60  ;;  %v9295_v34 = vadd.f32 %v2974_v30, %v9077_v61  ;;  %v2935_v2 = vpop.f32.mrb[18].mxu0  ;;  %v2976_v3 = vpop.f32.mrb[18].mxu1  ;;  %5006 = vmatpush1.bf16.msra.mxu0 %v7357_v15  ;;  %5047 = vmatpush1.bf16.msra.mxu1 %v7360_v16  ;;  %v7371_v60 = vld [vmem:[%s9458_s4 + $0x10e4] ss:$16 sps:$4 sm:$0xff]   ;;  %v7374_v61 = vld [vmem:[%s9458_s4 + $0x10ec] ss:$16 sps:$4 sm:$0xff]  }
 0x21c   : > { %v2936_v35 = vpop.f32.mrb[19].mxu0  ;;  %v2977_v36 = vpop.f32.mrb[19].mxu1  ;;  %5007 = vmatprep.subr.bf16.mxu0 %v7365_v17  ;;  %5048 = vmatprep.subr.bf16.mxu1 %v7368_v18 }
 0x21f   : > { %5008 = vmatpush1.bf16.msra.mxu0 %v7363_v56  ;;  %5049 = vmatpush1.bf16.msra.mxu1 %v7366_v51 }
 0x220   : > { %5009 = vmatprep.subr.bf16.mxu0 %v7371_v60  ;;  %5050 = vmatprep.subr.bf16.mxu1 %v7374_v61 }
 0x223   : > { %5010 = vmatpush1.bf16.msra.mxu0 %v7369_v5  ;;  %5051 = vmatpush1.bf16.msra.mxu1 %v7372_v6 }
 0x224   : > { %5011 = vmatprep.subr.bf16.mxu0 %v7377_v58  ;;  %5052 = vmatprep.subr.bf16.mxu1 %v7380_v37 }
 0x227   : > { %5012 = vmatpush1.bf16.msra.mxu0 %v7375_v38  ;;  %5053 = vmatpush1.bf16.msra.mxu1 %v7378_v39 }
 0x228   : > { %5013 = vmatprep.subr.bf16.mxu0 %v7383_v40  ;;  %5054 = vmatprep.subr.bf16.mxu1 %v7386_v42 }
 0x22b   : > { %5014 = vmatpush1.bf16.msra.mxu0 %v7381_v43  ;;  %5055 = vmatpush1.bf16.msra.mxu1 %v7384_v45 }
 0x22c   : > { %5015 = vmatprep.subr.bf16.mxu0 %v7389_v46  ;;  %5056 = vmatprep.subr.bf16.mxu1 %v7392_v47  ;;  %v5085_v46 = vsub.s32 0, %v7628_v48  ;;  %v5093_v47 = vsub.s32 2, %v7628_v48 }
 0x22f   : > { %5016 = vmatpush1.bf16.msra.mxu0 %v7387_v49  ;;  %5057 = vmatpush1.bf16.msra.mxu1 %v7390_v52  ;;  %v5081_v49 = vld [vmem:[%s9459_s5] sm:$0xf]  ;;  %v5089_v52 = vsub.s32 1, %v7628_v48 }
 0x230   : > { %5017 = vmatprep.subr.bf16.mxu0 %v7395_v55  ;;  %5058 = vmatprep.subr.bf16.mxu1 %v7398_v57  ;;  %v7432_v55 = vmov 1983009808  }
 0x231   : > { %v5118_v57 = vunpack.c.l.s4 %v7432_v55 }
 0x233   : > { %5018 = vmatpush1.bf16.msra.mxu0 %v7393_v59  ;;  %5059 = vmatpush1.bf16.msra.mxu1 %v7396_v62  ;;  %v5097_v59 = vsub.s32 3, %v7628_v48  ;;  %v5086_v62 = vrot.slane %v5081_v49, %v5085_v46 }
 0x234   : > { %5019 = vmatprep.subr.bf16.mxu0 %v7401_v63  ;;  %5060 = vmatprep.subr.bf16.mxu1 %v7404_v23  ;;  %v5094_v63 = vrot.slane %v5081_v49, %v5093_v47 }
 0x237   : > { %5020 = vmatpush1.bf16.msra.mxu0 %v7399_v24  ;;  %5061 = vmatpush1.bf16.msra.mxu1 %v7402_v21  ;;  %v5090_v21 = vrot.slane %v5081_v49, %v5089_v52 }
 0x238   : > { %5021 = vmatprep.subr.bf16.mxu0 %v7407_v12  ;;  %5062 = vmatprep.subr.bf16.mxu1 %v7410_v0  ;;  %v5119_v12 = vunpack.c.0.s8 %v5118_v57  ;;  %v5098_v0 = vrot.slane %v5081_v49, %v5097_v59 }
 0x23b   : > { %5022 = vmatpush1.bf16.msra.mxu0 %v7405_v31  ;;  %5063 = vmatpush1.bf16.msra.mxu1 %v7408_v32 }
 0x23c   : > { %5023 = vmatprep.subr.bf16.mxu0 %v7413_v1  ;;  %5064 = vmatprep.subr.bf16.mxu1 %v7416_v44 }
 0x23f   : > { %5024 = vmatpush1.bf16.msra.mxu0 %v7411_v4  ;;  %5065 = vmatpush1.bf16.msra.mxu1 %v7414_v7 }
 0x240   : > { %5025 = vmatprep.subr.bf16.mxu0 %v7419_v8  ;;  %5066 = vmatprep.subr.bf16.mxu1 %v7422_v9 }
 0x243   : > { %5026 = vmatpush1.bf16.msra.mxu0 %v7417_v10  ;;  %5067 = vmatpush1.bf16.msra.mxu1 %v7420_v25 }
 0x246   : > { %5028 = vmatmul.mubr.bf16.vlgmr.msra.gmra.mrb[32].mxu0 %v4665_v26  ;;  %5069 = vmatmul.mubr.bf16.vlgmr.msra.gmra.mrb[32].mxu1 %v4665_v26 }
 0x259   : > { %v3465_v27 = vpop.f32.mrb[20].mxu0  ;;  %v3506_v28 = vpop.f32.mrb[20].mxu1 }
 0x25a   : > { %v3513_v11 = vadd.f32 %v3465_v27, %v9286_v22  ;;  %v3515_v13 = vadd.f32 %v3506_v28, %v9289_v54  ;;  %v3467_v14 = vpop.f32.mrb[21].mxu0  ;;  %v3508_v15 = vpop.f32.mrb[21].mxu1 }
 0x25b   : > { %v3514_v16 = vadd.f32 %v3467_v14, %v9292_v33  ;;  %v3516_v17 = vadd.f32 %v3508_v15, %v9295_v34  ;;  %v3469_v18 = vpop.f32.mrb[22].mxu0  ;;  %v3510_v19 = vpop.f32.mrb[22].mxu1 }
 0x25c   : > { %v3470_v20 = vpop.f32.mrb[23].mxu0  ;;  %v3511_v50 = vpop.f32.mrb[23].mxu1 }
 0x299   : > { %v3980_v29 = vpop.f32.mrb[24].mxu0  ;;  %v4021_v30 = vpop.f32.mrb[24].mxu1 }
 0x29a   : > { %v4028_v2 = vadd.f32 %v3980_v29, %v3513_v11  ;;  %v4030_v3 = vadd.f32 %v4021_v30, %v3515_v13  ;;  %v3982_v56 = vpop.f32.mrb[25].mxu0  ;;  %v4023_v51 = vpop.f32.mrb[25].mxu1  ;;  %v5122_v11 = vsub.s32 %v5119_v12, %v7628_v48 }
 0x29b   : > { %v4029_v35 = vadd.f32 %v3982_v56, %v3514_v16  ;;  %v4031_v22 = vadd.f32 %v4023_v51, %v3516_v17  ;;  %v3984_v36 = vpop.f32.mrb[26].mxu0  ;;  %v4025_v54 = vpop.f32.mrb[26].mxu1 }
 0x29c   : > { %v3985_v60 = vpop.f32.mrb[27].mxu0  ;;  %v4026_v61 = vpop.f32.mrb[27].mxu1 }
 0x2d9   : > { %v4495_v5 = vpop.f32.mrb[28].mxu0  ;;  %v4536_v33 = vpop.f32.mrb[28].mxu1 }
 0x2da   : > { %v4543_v6 = vadd.f32 %v4495_v5, %v4028_v2  ;;  %v4545_v34 = vadd.f32 %v4536_v33, %v4030_v3  ;;  %v4497_v58 = vpop.f32.mrb[29].mxu0  ;;  %v4538_v37 = vpop.f32.mrb[29].mxu1 }
 0x2db   : > { %v4544_v38 = vadd.f32 %v4497_v58, %v4029_v35  ;;  %v4546_v39 = vadd.f32 %v4538_v37, %v4031_v22  ;;  %v4499_v40 = vpop.f32.mrb[30].mxu0  ;;  %v4540_v42 = vpop.f32.mrb[30].mxu1 }
 0x2dc   : > { %v4500_v43 = vpop.f32.mrb[31].mxu0  ;;  %v4541_v45 = vpop.f32.mrb[31].mxu1 }
 0x319   : > { %v5029_v23 = vpop.f32.mrb[32].mxu0  ;;  %v5070_v24 = vpop.f32.mrb[32].mxu1 }
 0x31a   : > { %v5077_v31 = vadd.f32 %v5029_v23, %v4543_v6  ;;  %v5079_v32 = vadd.f32 %v5070_v24, %v4545_v34  ;;  %v5031_v1 = vpop.f32.mrb[33].mxu0  ;;  %v5072_v44 = vpop.f32.mrb[33].mxu1 }
 0x31b   : > { %v5078_v4 = vadd.f32 %v5031_v1, %v4544_v38  ;;  %v5080_v7 = vadd.f32 %v5072_v44, %v4546_v39  ;;  %v5033_v8 = vpop.f32.mrb[34].mxu0  ;;  %v5074_v9 = vpop.f32.mrb[34].mxu1 }
 0x31c   : > { %v5103_v10 = vadd.f32 %v5086_v62, %v5077_v31  ;;  %v5105_v25 = vadd.f32 %v5094_v63, %v5079_v32  ;;  %v5034_v26 = vpop.f32.mrb[35].mxu0  ;;  %v5075_v27 = vpop.f32.mrb[35].mxu1 }
 0x31d   : > { %v5104_v28 = vadd.f32 %v5090_v21, %v5078_v4  ;;  %v5106_v13 = vadd.f32 %v5098_v0, %v5080_v7 }
 0x31e   : > { %v5135_v14 = vsel %vm5134_vm15, %v5103_v10, 0.0  ;;  %v5197_v15 = vmul.f32 %v5103_v10, %v5103_v10  ;;  %v5149_v16 = vsel %vm5134_vm15, %v5105_v25, 0.0  ;;  %v5199_v17 = vmul.f32 %v5105_v25, %v5105_v25 }
 0x31f   : > { %v5136_v18 = vrot.slane %v5135_v14, 4  ;;  %v5150_v19 = vrot.slane %v5149_v16, 4  ;;  %v6543_v20 = vpack.c.bf16 %v5104_v28, %v5103_v10  ;;  %v5142_v50 = vsel %vm5134_vm15, %v5104_v28, 0.0 }
 0x320   : > { %v5201_v29 = vsel %vm5134_vm15, %v5197_v15, 0.0  ;;  %v5215_v30 = vsel %vm5134_vm15, %v5199_v17, 0.0  ;;  %v5143_v2 = vrot.slane %v5142_v50, 4  ;;  %v5198_v3 = vmul.f32 %v5104_v28, %v5104_v28 }
 0x321   : > { %v5137_v48 = vadd.f32 %v5136_v18, %v5135_v14  ;;  %v5202_v56 = vrot.slane %v5201_v29, 4  ;;  %v5151_v51 = vadd.f32 %v5150_v19, %v5149_v16  ;;  %v5216_v35 = vrot.slane %v5215_v30, 4 }
 0x322   : > { %v5123_v22 = vrot.slane %v6543_v20, %v5122_v11  ;;  %v5144_v36 = vadd.f32 %v5143_v2, %v5142_v50  ;;  %v5208_v54 = vsel %vm5134_vm15, %v5198_v3, 0.0  ;;  %v6544_v60 = vpack.c.bf16 %v5106_v13, %v5105_v25 }
 0x323   : > { %v5138_v61 = vrot.slane %v5137_v48, 2  ;;  %v5203_v5 = vadd.f32 %v5202_v56, %v5201_v29  ;;  %v5152_v33 = vrot.slane %v5151_v51, 2  ;;  %v5217_v6 = vadd.f32 %v5216_v35, %v5215_v30 }
 0x324   : > { %v5145_v34 = vrot.slane %v5144_v36, 2  ;;  %v5209_v58 = vrot.slane %v5208_v54, 4  ;;  %v5130_v37 = vrot.slane %v6544_v60, %v5122_v11  ;;  %v5156_v38 = vsel %vm5134_vm15, %v5106_v13, 0.0 }
 0x325   : > { %v5139_v39 = vadd.f32 %v5138_v61, %v5137_v48  ;;  %v5204_v40 = vrot.slane %v5203_v5, 2  ;;  %v5153_v42 = vadd.f32 %v5152_v33, %v5151_v51  ;;  %v5157_v47 = vrot.slane %v5156_v38, 4 }
 0x326   : > { %v5146_v43 = vadd.f32 %v5145_v34, %v5144_v36  ;;  %v5210_v45 = vadd.f32 %v5209_v58, %v5208_v54  ;;  %v5131_v46 = vcombine.low %v5123_v22, %v5130_v37  ;;  %v5218_v55 = vrot.slane %v5217_v6, 2 }
 0x327   : > { %v5140_v49 = vrot.slane %v5139_v39, 1  ;;  %v5205_v52 = vadd.f32 %v5204_v40, %v5203_v5  ;;  %v5158_v62 = vadd.f32 %v5157_v47, %v5156_v38  ;;  %v5200_v63 = vmul.f32 %v5106_v13, %v5106_v13 }
 0x328   : > { %v5147_v57 = vrot.slane %v5146_v43, 1  ;;  %v5211_v59 = vrot.slane %v5210_v45, 2  ;;  %5133 = vst [vmem:[%s378_s29] sm:$0xff] %v5131_v46  ;;  %v5154_v21 = vrot.slane %v5153_v42, 1  ;;  %v5219_v1 = vadd.f32 %v5218_v55, %v5217_v6 }
 0x329   : > { %v5141_v23 = vadd.f32 %v5140_v49, %v5139_v39  ;;  %v5206_v24 = vrot.slane %v5205_v52, 1  ;;  %v5159_v31 = vrot.slane %v5158_v62, 2  ;;  %v5222_v32 = vsel %vm5134_vm15, %v5200_v63, 0.0 }
 0x32a   : > { %v5148_v12 = vadd.f32 %v5147_v57, %v5146_v43  ;;  %v5212_v0 = vadd.f32 %v5211_v59, %v5210_v45  ;;  %v5223_v44 = vrot.slane %v5222_v32, 4  ;;  %v5155_v25 = vadd.f32 %v5154_v21, %v5153_v42 }
 0x32b   : > { %v5207_v4 = vadd.f32 %v5206_v24, %v5205_v52  ;;  %v5160_v9 = vadd.f32 %v5159_v31, %v5158_v62  ;;  %v5220_v28 = vrot.slane %v5219_v1, 1 }
 0x32c   : > { %v5167_v7 = vcombine.low %v5141_v23, %v5148_v12  ;;  %v5213_v8 = vrot.slane %v5212_v0, 1  ;;  %v5224_v10 = vadd.f32 %v5223_v44, %v5222_v32 }
 0x32d   : > { %v5161_v27 = vrot.slane %v5160_v9, 1  ;;  %v5221_v18 = vadd.f32 %v5220_v28, %v5219_v1 }
 0x32e   : > { %v5214_v26 = vadd.f32 %v5213_v8, %v5212_v0  ;;  %v5225_v11 = vrot.slane %v5224_v10, 2  ;;  %v5175_v16 = vrot.slane %v5167_v7, %v7647_v53 }
 0x32f   : > { %v5162_v14 = vadd.f32 %v5161_v27, %v5160_v9 }
 0x330   : > { %v5233_v13 = vcombine.low %v5207_v4, %v5214_v26  ;;  %v5226_v15 = vadd.f32 %v5225_v11, %v5224_v10 }
 0x331   : > { %v5168_v17 = vcombine.low %v5155_v25, %v5162_v14 }
 0x332   : > { %v5227_v19 = vrot.slane %v5226_v15, 1  ;;  %v5241_v30 = vrot.slane %v5233_v13, %v7647_v53 }
 0x333   : > { %v5182_v20 = vrot.slane %v5168_v17, %v7647_v53 }
 0x334   : > { %v5228_v50 = vadd.f32 %v5227_v19, %v5226_v15 }
 0x335   : > { %v5183_v29 = vcombine.low %v5175_v16, %v5182_v20 }
 0x336   : > { %v5234_v2 = vcombine.low %v5221_v18, %v5228_v50 }
 0x337   : > { %v5190_v3 = vrot.slane %v5183_v29, %v7647_v53 }
 0x338   : > { %v5248_v48 = vrot.slane %v5234_v2, %v7647_v53 }
 0x339   : > { %5196 = vst.msk [vmem:[%s382_s11] sm:$0xf] %vm5194_vm0, %v5190_v3 }
 0x33a   : > { %v5249_v56 = vcombine.low %v5241_v30, %v5248_v48 }
 0x33c   : > { %v5256_v51 = vrot.slane %v5249_v56, %v7647_v53 }
 0x33e   : > { %5258 = vst.msk [vmem:[%s386_s12] sm:$0xf] %vm5194_vm0, %v5256_v51 }
 0x33f PF: > { %s19_s27 = sadd.s32 1, %s7429_s27  }
 0x340   : > { %p16_p4 = scmp.ge.s32.totalorder %s19_s27, 4  }
 0x342   :  { %18 = sbr.rel (!%p16_p4) target bundleno = 1 (0x1), region = 117 }

// kernel: discriminator_forward.9
= control target key start
LH: loop header
LB: loop body
LE: loop exit
PB: predicated region body
PF: predicated region fallthrough
CT: control target
= control target key end

     0   :  { %s5350_s12 = smov 0   ;;  %s6324_s0 = inlined_call_operand.vmem [shape: bf16[2,4,4,512], index: 0, kind: input, shape index: {}]   ;;  %s6325_s1 = inlined_call_operand.vmem [shape: bf16[9,512,128], index: 1, kind: input, shape index: {}]   ;;  %s6326_s2 = inlined_call_operand.vmem [shape: f32[1,128], index: 2, kind: input, shape index: {}]   ;;  %s6327_s3 = inlined_call_operand.vmem [shape: f32[2,4,128], index: 3, kind: output, shape index: {}]  }
   0x1 LB: > { %s3777_s13 = sadd.s32 4294967295, %s5327_s12   ;;  %p3781_p0 = scmp.ge.s32.totalorder %s5327_s12, 1  ;;  %s5327_s12 = sphi %s5350_s12, %s13_s12  }
   0x2   : > { %p137_p1 = scmp.lt.s32.totalorder %s5327_s12, 3 }
   0x4   : > { %p138_p2 = pnand %p3781_p0, %p137_p1 }
   0x5   : > { %v5033_v0 = vld [vmem:[%s6325_s1 + $0x140] sm:$0xff] (!%p138_p2)   ;;  %v5037_v4 = vld [vmem:[%s6325_s1 + $0x148] sm:$0xff] (!%p138_p2)   ;;  %v5041_v8 = vld [vmem:[%s6325_s1 + $0x150] sm:$0xff] (!%p138_p2)   ;;  %p160_p3 = scmp.lt.s32.totalorder (!%p138_p2), %s3777_s13, 1  ;;  %vm272_vm0 = vsmask.f32 (!%p138_p2), 256  ;;  %v374_v36 = vlaneseq (!%p138_p2) }
   0x6   : > { %141 = sbr.rel (%p138_p2) target bundleno = 518 (0x206), region = 32  ;;  %v5034_v1 = vld [vmem:[%s6325_s1 + $0x1c0] sm:$0xff] (!%p138_p2)   ;;  %4628 = vmatprep.subr.bf16.mxu0 (!%p138_p2), %v5033_v0  ;;  %v5038_v5 = vld [vmem:[%s6325_s1 + $0x1c8] sm:$0xff] (!%p138_p2)   ;;  %v5042_v9 = vld [vmem:[%s6325_s1 + $0x1d0] sm:$0xff] (!%p138_p2)   ;;  %vm273_vm1 = vsmask.f32 (!%p138_p2), 1284 }
   0x7   : > { %v5035_v2 = vld [vmem:[%s6325_s1 + $0x100] sm:$0xff] (!%p138_p2)   ;;  %4650 = vmatprep.subr.bf16.mxu1 (!%p138_p2), %v5034_v1  ;;  %v5039_v6 = vld [vmem:[%s6325_s1 + $0x108] sm:$0xff] (!%p138_p2)   ;;  %v5043_v10 = vld [vmem:[%s6325_s1 + $0x110] sm:$0xff] (!%p138_p2)   ;;  %vm275_vm3 = vsmask.f32 (!%p138_p2), 2312  ;;  %v375_v44 = vshrl.u32 (!%p138_p2), %v374_v36, 7 }
   0x8   : > { %v5036_v3 = vld [vmem:[%s6325_s1 + $0x180] sm:$0xff] (!%p138_p2)   ;;  %4629 = vmatpush3.bf16.msra.mxu0 (!%p138_p2), %v5035_v2  ;;  %v5040_v7 = vld [vmem:[%s6325_s1 + $0x188] sm:$0xff] (!%p138_p2)   ;;  %v5044_v11 = vld [vmem:[%s6325_s1 + $0x190] sm:$0xff] (!%p138_p2)   ;;  %vm277_vm4 = vsmask.f32 (!%p138_p2), 3340 }
   0x9   : > { %4651 = vmatpush3.bf16.msra.mxu1 (!%p138_p2), %v5036_v3  ;;  %4630 = vmatprep.subr.bf16.mxu0 (!%p138_p2), %v5037_v4  ;;  %v5045_v12 = vld [vmem:[%s6325_s1 + $0x158] sm:$0xff] (!%p138_p2)   ;;  %v5049_v16 = vld [vmem:[%s6325_s1 + $0x160] sm:$0xff] (!%p138_p2)   ;;  %v5053_v20 = vld [vmem:[%s6325_s1 + $0x168] sm:$0xff] (!%p138_p2)   ;;  %vm279_vm5 = vsmask.f32 (!%p138_p2), 4368 }
   0xa   : > { %4652 = vmatprep.subr.bf16.mxu1 (!%p138_p2), %v5038_v5  ;;  %v5046_v13 = vld [vmem:[%s6325_s1 + $0x1d8] sm:$0xff] (!%p138_p2)   ;;  %v5050_v17 = vld [vmem:[%s6325_s1 + $0x1e0] sm:$0xff] (!%p138_p2)   ;;  %v5054_v21 = vld [vmem:[%s6325_s1 + $0x1e8] sm:$0xff] (!%p138_p2)   ;;  %vm281_vm7 = vsmask.f32 (!%p138_p2), 5396 }
   0xb   : > { %v5047_v14 = vld [vmem:[%s6325_s1 + $0x118] sm:$0xff] (!%p138_p2)   ;;  %v5051_v18 = vld [vmem:[%s6325_s1 + $0x120] sm:$0xff] (!%p138_p2)   ;;  %v5055_v22 = vld [vmem:[%s6325_s1 + $0x128] sm:$0xff] (!%p138_p2)   ;;  %vm283_vm8 = vsmask.f32 (!%p138_p2), 6424 }
   0xc   : > { %4631 = vmatpush3.bf16.msra.mxu0 (!%p138_p2), %v5039_v6  ;;  %v5048_v15 = vld [vmem:[%s6325_s1 + $0x198] sm:$0xff] (!%p138_p2)   ;;  %v5052_v19 = vld [vmem:[%s6325_s1 + $0x1a0] sm:$0xff] (!%p138_p2)   ;;  %v5056_v23 = vld [vmem:[%s6325_s1 + $0x1a8] sm:$0xff] (!%p138_p2)   ;;  %vm285_vm9 = vsmask.f32 (!%p138_p2), 7452 }
   0xd   : > { %4653 = vmatpush3.bf16.msra.mxu1 %v5040_v7  ;;  %4632 = vmatprep.subr.bf16.mxu0 %v5041_v8  ;;  %s6331_s13 = smov (!%p160_p3, %s3777_s13), 1  ;;  %v5057_v24 = vld [vmem:[%s6325_s1 + $0x170] sm:$0xff]   ;;  %v5061_v28 = vld [vmem:[%s6325_s1 + $0x178] sm:$0xff]   ;;  %vm274_vm2 = vmor %vm272_vm0, %vm273_vm1  ;;  %v5329_v42 = vmov 1966171168  }
   0xe   : > { %4654 = vmatprep.subr.bf16.mxu1 %v5042_v9  ;;  %v5058_v25 = vld [vmem:[%s6325_s1 + $0x1f0] sm:$0xff]   ;;  %s4627_s18 = sshll.u32 %s6331_s13, 5  ;;  %v5062_v29 = vld [vmem:[%s6325_s1 + $0x1f8] sm:$0xff]   ;;  %vm276_vm6 = vmor %vm274_vm2, %vm275_vm3  ;;  %v372_v43 = vunpack.c.l.s4 %v5329_v42  ;;  %s3784_s14 = sshll.u32 %s6331_s13, 2 }
   0xf   : > { %v5059_v26 = vld [vmem:[%s6325_s1 + $0x130] sm:$0xff]   ;;  %s5458_s27 = scalar_lea.vmem %s6324_s0, %s4627_s18  ;;  %v5063_v30 = vld [vmem:[%s6325_s1 + $0x138] sm:$0xff]   ;;  %vm278_vm10 = vmor %vm276_vm6, %vm277_vm4  ;;  %s168_s19 = scalar_lea.vmem %s6327_s3, %s3784_s14 }
  0x10   : > { %4633 = vmatpush3.bf16.msra.mxu0 %v5043_v10  ;;  %v5060_v27 = vld [vmem:[%s6325_s1 + $0x1b0] sm:$0xff]   ;;  %v5064_v31 = vld [vmem:[%s6325_s1 + $0x1b8] sm:$0xff]   ;;  %v3787_v32 = vld.sshfl [vmem:[%s5458_s27] sm:$0xff pattern:$0x75316420]  ;;  %v373_v47 = vunpack.c.0.s8 %v372_v43 }
  0x11   : > { %4655 = vmatpush3.bf16.msra.mxu1 %v5044_v11  ;;  %4634 = vmatprep.subr.bf16.mxu0 %v5045_v12  ;;  %v3788_v33 = vld.sshfl [vmem:[%s5458_s27 + $0x8] sm:$0xff pattern:$0x75316420]  ;;  %v263_v34 = vcombine.high %v3787_v32, %v3787_v32  ;;  %v288_v37 = vshrl.u32 %v3787_v32, 16  ;;  %vm280_vm11 = vmor %vm278_vm10, %vm279_vm5  ;;  %v5065_v41 = vld [vmem:[%s6325_s1 + $0x40] sm:$0xff]  }
  0x12   : > { %4656 = vmatprep.subr.bf16.mxu1 %v5046_v13  ;;  %v271_v35 = vcombine.high %v3788_v33, %v3788_v33  ;;  %v297_v39 = vshrl.u32 %v3788_v33, 16  ;;  %vm282_vm12 = vmor %vm280_vm11, %vm281_vm7  ;;  %v5066_v45 = vld [vmem:[%s6325_s1 + $0xc0] sm:$0xff]   ;;  %v5483_v51 = vsub.s32 %v373_v47, %v375_v44  ;;  %v5069_v59 = vld [vmem:[%s6325_s1 + $0x48] sm:$0xff]  }
  0x13   : > { %v293_v38 = vshll.u32 %v263_v34, 16  ;;  %vm284_vm13 = vmor %vm282_vm12, %vm283_vm8  ;;  %v5067_v55 = vld [vmem:[%s6325_s1] sm:$0xff]   ;;  %v5070_v61 = vld [vmem:[%s6325_s1 + $0xc8] sm:$0xff]  }
  0x14   : > { %4635 = vmatpush3.bf16.msra.mxu0 %v5047_v14  ;;  %v302_v40 = vshll.u32 %v271_v35, 16  ;;  %vm5475_vm14 = vmor %vm284_vm13, %vm285_vm9  ;;  %v5068_v57 = vld [vmem:[%s6325_s1 + $0x80] sm:$0xff]   ;;  %v5071_v62 = vld [vmem:[%s6325_s1 + $0x8] sm:$0xff]  }
  0x15   : > { %4657 = vmatpush3.bf16.msra.mxu1 %v5048_v15  ;;  %4636 = vmatprep.subr.bf16.mxu0 %v5049_v16  ;;  %v295_v48 = vsel %vm5475_vm14, %v288_v37, %v293_v38  ;;  %v5072_v63 = vld [vmem:[%s6325_s1 + $0x88] sm:$0xff]   ;;  %v5073_v0 = vld [vmem:[%s6325_s1 + $0x50] sm:$0xff]   ;;  %v5077_v4 = vld [vmem:[%s6325_s1 + $0x58] sm:$0xff]  }
  0x16   : > { %4658 = vmatprep.subr.bf16.mxu1 %v5050_v17  ;;  %v304_v49 = vsel %vm5475_vm14, %v297_v39, %v302_v40  ;;  %v5074_v1 = vld [vmem:[%s6325_s1 + $0xd0] sm:$0xff]   ;;  %v5078_v5 = vld [vmem:[%s6325_s1 + $0xd8] sm:$0xff]   ;;  %v5081_v8 = vld [vmem:[%s6325_s1 + $0x60] sm:$0xff]  }
  0x17   : > { %v370_v50 = vcombine.low %v295_v48, %v304_v49  ;;  %v5075_v2 = vld [vmem:[%s6325_s1 + $0x10] sm:$0xff]   ;;  %v5079_v6 = vld [vmem:[%s6325_s1 + $0x18] sm:$0xff]   ;;  %v5082_v9 = vld [vmem:[%s6325_s1 + $0xe0] sm:$0xff]  }
  0x18   : > { %4637 = vmatpush3.bf16.msra.mxu0 %v5051_v18  ;;  %v5076_v3 = vld [vmem:[%s6325_s1 + $0x90] sm:$0xff]   ;;  %v5080_v7 = vld [vmem:[%s6325_s1 + $0x98] sm:$0xff]   ;;  %v5083_v10 = vld [vmem:[%s6325_s1 + $0x20] sm:$0xff]  }
  0x19   : > { %4659 = vmatpush3.bf16.msra.mxu1 %v5052_v19  ;;  %4638 = vmatprep.subr.bf16.mxu0 %v5053_v20  ;;  %v377_v52 = vrot.slane %v370_v50, %v5483_v51  ;;  %v5084_v11 = vld [vmem:[%s6325_s1 + $0xa0] sm:$0xff]   ;;  %v5085_v12 = vld [vmem:[%s6325_s1 + $0x68] sm:$0xff]   ;;  %v5089_v16 = vld [vmem:[%s6325_s1 + $0x70] sm:$0xff]  }
  0x1a   : > { %4660 = vmatprep.subr.bf16.mxu1 %v5054_v21  ;;  %v5086_v13 = vld [vmem:[%s6325_s1 + $0xe8] sm:$0xff]   ;;  %v3785_v17 = vld.sshfl [vmem:[%s5458_s27] sm:$0xf pattern:$0x75316420]  ;;  %v5090_v18 = vld [vmem:[%s6325_s1 + $0xf0] sm:$0xff]  }
  0x1b   : > { %v378_v53 = vcombine.high %v377_v52, %v377_v52  ;;  %v385_v54 = vrot.slane %v377_v52, %v5483_v51  ;;  %v5087_v14 = vld [vmem:[%s6325_s1 + $0x28] sm:$0xff]   ;;  %v5091_v19 = vld [vmem:[%s6325_s1 + $0x30] sm:$0xff]   ;;  %v5098_v32 = vld [vmem:[%s6325_s1 + $0x2c0] sm:$0xff]  }
  0x1c   : > { %4639 = vmatpush3.bf16.msra.mxu0 %v5055_v22  ;;  %v5088_v15 = vld [vmem:[%s6325_s1 + $0xa8] sm:$0xff]   ;;  %v5092_v21 = vld [vmem:[%s6325_s1 + $0xb0] sm:$0xff]   ;;  %v5099_v33 = vld [vmem:[%s6325_s1 + $0x200] sm:$0xff]  }
  0x1d   : > { %4661 = vmatpush3.bf16.msra.mxu1 %v5056_v23  ;;  %4640 = vmatprep.subr.bf16.mxu0 %v5057_v24  ;;  %v392_v56 = vrot.slane %v378_v53, %v5483_v51  ;;  %v393_v58 = vcombine.high %v385_v54, %v385_v54  ;;  %v5565_v20 = vld.sshfl [vmem:[%s5458_s27 + $0x8] sm:$0xf pattern:$0x75316420]  ;;  %v5093_v23 = vld [vmem:[%s6325_s1 + $0x78] sm:$0xff]   ;;  %v5100_v35 = vld [vmem:[%s6325_s1 + $0x280] sm:$0xff]  }
  0x1e   : > { %4662 = vmatprep.subr.bf16.mxu1 %v5058_v25  ;;  %v671_v22 = vcombine.low %v3785_v17, %v5565_v20  ;;  %v5094_v24 = vld [vmem:[%s6325_s1 + $0xf8] sm:$0xff]   ;;  %v5101_v37 = vld [vmem:[%s6325_s1 + $0x248] sm:$0xff]   ;;  %v5106_v42 = vld [vmem:[%s6325_s1 + $0x2d0] sm:$0xff]  }
  0x1f   : > { %623 = vmatprep.mubr.bf16.mxu0 %v392_v56  ;;  %v394_v60 = vcombine.high %v392_v56, %v392_v56  ;;  %v5102_v38 = vld [vmem:[%s6325_s1 + $0x2c8] sm:$0xff]   ;;  %v5107_v43 = vld [vmem:[%s6325_s1 + $0x210] sm:$0xff]   ;;  %v5110_v47 = vld [vmem:[%s6325_s1 + $0x2d8] sm:$0xff]  }
  0x20   : > { %4641 = vmatpush3.bf16.msra.mxu0 %v5059_v26  ;;  %v678_v25 = vrot.slane %v671_v22, %v5483_v51  ;;  %v5095_v26 = vld [vmem:[%s6325_s1 + $0x38] sm:$0xff]   ;;  %v5103_v39 = vld [vmem:[%s6325_s1 + $0x208] sm:$0xff]   ;;  %v5108_v44 = vld [vmem:[%s6325_s1 + $0x290] sm:$0xff]  }
  0x21   : > { %4663 = vmatpush3.bf16.msra.mxu1 %v5060_v27  ;;  %4642 = vmatprep.subr.bf16.mxu0 %v5061_v28  ;;  %v5096_v27 = vld [vmem:[%s6325_s1 + $0xb8] sm:$0xff]   ;;  %v5104_v40 = vld [vmem:[%s6325_s1 + $0x288] sm:$0xff]   ;;  %v5113_v50 = vld [vmem:[%s6325_s1 + $0x260] sm:$0xff]  }
  0x22   : > { %4664 = vmatprep.subr.bf16.mxu1 %v5062_v29  ;;  %663 = vmatprep.mubr.bf16.mxu1 %v394_v60  ;;  %v679_v28 = vcombine.high %v678_v25, %v678_v25  ;;  %v686_v29 = vrot.slane %v678_v25, %v5483_v51  ;;  %v5111_v48 = vld [vmem:[%s6325_s1 + $0x218] sm:$0xff]   ;;  %v5114_v52 = vld [vmem:[%s6325_s1 + $0x2e0] sm:$0xff]   ;;  %v5118_v56 = vld [vmem:[%s6325_s1 + $0x2e8] sm:$0xff]  }
  0x23   : > { %v5112_v49 = vld [vmem:[%s6325_s1 + $0x298] sm:$0xff]   ;;  %v5115_v53 = vld [vmem:[%s6325_s1 + $0x220] sm:$0xff]   ;;  %v5122_v60 = vld [vmem:[%s6325_s1 + $0x2f0] sm:$0xff]  }
  0x24   : > { %4643 = vmatpush3.bf16.msra.mxu0 %v5063_v30  ;;  %v5097_v30 = vld [vmem:[%s6325_s1 + $0x240] sm:$0xff]   ;;  %v694_v36 = vcombine.high %v686_v29, %v686_v29  ;;  %v5134_v17 = vld [vmem:[%s6325_s1 + $0x3c8] sm:$0xff]   ;;  %v5138_v22 = vld [vmem:[%s6325_s1 + $0x3d0] sm:$0xff]  }
  0x25   : > { %4665 = vmatpush3.bf16.msra.mxu1 %v5064_v31  ;;  %4672 = vmatprep.subr.bf16.mxu0 %v5065_v41  ;;  %v693_v31 = vrot.slane %v679_v28, %v5483_v51  ;;  %v5105_v41 = vld [vmem:[%s6325_s1 + $0x250] sm:$0xff]   ;;  %v5141_v25 = vld [vmem:[%s6325_s1 + $0x358] sm:$0xff]  }
  0x26   : > { %4694 = vmatprep.subr.bf16.mxu1 %v5066_v45  ;;  %v5109_v45 = vld [vmem:[%s6325_s1 + $0x258] sm:$0xff]  }
  0x27   : > { %624 = vmatmul.mubr.bf16.vlgmr.msra.gmra.mrb[0].mxu0 %v385_v54  ;;  %v695_v34 = vcombine.high %v693_v31, %v693_v31  ;;  %v5116_v54 = vld [vmem:[%s6325_s1 + $0x2a0] sm:$0xff]   ;;  %v5144_v28 = vld [vmem:[%s6325_s1 + $0x398] sm:$0xff]  }
  0x28   : > { %4673 = vmatpush3.bf16.msra.mxu0 %v5067_v55  ;;  %664 = vmatmul.mubr.bf16.vlgmr.msra.gmra.mrb[0].mxu1 %v393_v58  ;;  %v5117_v55 = vld [vmem:[%s6325_s1 + $0x268] sm:$0xff]  }
  0x29   : > { %4674 = vmatprep.subr.bf16.mxu0 %v5069_v59  ;;  %4695 = vmatpush3.bf16.msra.mxu1 %v5068_v57  ;;  %v5119_v57 = vld [vmem:[%s6325_s1 + $0x228] sm:$0xff]   ;;  %v5121_v59 = vld [vmem:[%s6325_s1 + $0x270] sm:$0xff]  }
  0x2a   : > { %4696 = vmatprep.subr.bf16.mxu1 %v5070_v61  ;;  %924 = vmatprep.mubr.bf16.mxu0 %v693_v31  ;;  %v5120_v58 = vld [vmem:[%s6325_s1 + $0x2a8] sm:$0xff]   ;;  %v5123_v61 = vld [vmem:[%s6325_s1 + $0x230] sm:$0xff]   ;;  %v5147_v31 = vld [vmem:[%s6325_s1 + $0x320] sm:$0xff]  }
  0x2b   : > { %964 = vmatprep.mubr.bf16.mxu1 %v695_v34  ;;  %v5150_v34 = vld [vmem:[%s6325_s1 + $0x3e8] sm:$0xff]  }
  0x2c   : > { %4675 = vmatpush3.bf16.msra.mxu0 %v5071_v62  ;;  %v3919_v62 = vld.sshfl [vmem:[%s5458_s27] sm:$0xf0 pattern:$0x75316420] }
  0x2d   : > { %4676 = vmatprep.subr.bf16.mxu0 %v5073_v0  ;;  %4697 = vmatpush3.bf16.msra.mxu1 %v5072_v63  ;;  %v5124_v63 = vld [vmem:[%s6325_s1 + $0x2b0] sm:$0xff]   ;;  %v5125_v0 = vld [vmem:[%s6325_s1 + $0x278] sm:$0xff]  }
  0x2e   : > { %4698 = vmatprep.subr.bf16.mxu1 %v5074_v1  ;;  %v5675_v1 = vld.sshfl [vmem:[%s5458_s27 + $0x8] sm:$0xf0 pattern:$0x75316420] }
  0x30   : > { %4677 = vmatpush3.bf16.msra.mxu0 %v5075_v2  ;;  %v3985_v2 = vcombine.high %v3919_v62, %v5675_v1  ;;  %v5169_v62 = vld [vmem:[%s6325_s1 + $0x450] sm:$0xff]  }
  0x31   : > { %4678 = vmatprep.subr.bf16.mxu0 %v5077_v4  ;;  %4699 = vmatpush3.bf16.msra.mxu1 %v5076_v3  ;;  %v5126_v3 = vld [vmem:[%s6325_s1 + $0x2f8] sm:$0xff]  }
  0x32   : > { %4700 = vmatprep.subr.bf16.mxu1 %v5078_v5  ;;  %v5127_v4 = vld [vmem:[%s6325_s1 + $0x238] sm:$0xff]   ;;  %v1064_v5 = vrot.slane %v3985_v2, %v5483_v51  ;;  %v5172_v2 = vld [vmem:[%s6325_s1 + $0x490] sm:$0xff]  }
  0x34   : > { %4679 = vmatpush3.bf16.msra.mxu0 %v5079_v6  ;;  %v5128_v6 = vld [vmem:[%s6325_s1 + $0x2b8] sm:$0xff]  }
  0x35   : > { %4680 = vmatprep.subr.bf16.mxu0 %v5081_v8  ;;  %4701 = vmatpush3.bf16.msra.mxu1 %v5080_v7  ;;  %v1065_v7 = vcombine.high %v1064_v5, %v1064_v5  ;;  %v1072_v8 = vrot.slane %v1064_v5, %v5483_v51  ;;  %v5175_v5 = vld [vmem:[%s6325_s1 + $0x418] sm:$0xff]  }
  0x36   : > { %4702 = vmatprep.subr.bf16.mxu1 %v5082_v9  ;;  %v5129_v9 = vld [vmem:[%s6325_s1 + $0x340] sm:$0xff]  }
  0x38   : > { %4681 = vmatpush3.bf16.msra.mxu0 %v5083_v10  ;;  %v5130_v10 = vld [vmem:[%s6325_s1 + $0x3c0] sm:$0xff]  }
  0x39   : > { %4682 = vmatprep.subr.bf16.mxu0 %v5085_v12  ;;  %4703 = vmatpush3.bf16.msra.mxu1 %v5084_v11  ;;  %v1079_v11 = vrot.slane %v1065_v7, %v5483_v51  ;;  %v5131_v12 = vld [vmem:[%s6325_s1 + $0x300] sm:$0xff]  }
  0x3a   : > { %4704 = vmatprep.subr.bf16.mxu1 %v5086_v13  ;;  %v5132_v13 = vld [vmem:[%s6325_s1 + $0x380] sm:$0xff]  }
  0x3b   : > { %v5177_v7 = vld [vmem:[%s6325_s1 + $0x460] sm:$0xff]  }
  0x3c   : > { %4683 = vmatpush3.bf16.msra.mxu0 %v5087_v14  ;;  %v1081_v14 = vcombine.high %v1079_v11, %v1079_v11 }
  0x3d   : > { %4684 = vmatprep.subr.bf16.mxu0 %v5089_v16  ;;  %4705 = vmatpush3.bf16.msra.mxu1 %v5088_v15  ;;  %v1080_v15 = vcombine.high %v1072_v8, %v1072_v8  ;;  %v5133_v16 = vld [vmem:[%s6325_s1 + $0x348] sm:$0xff]  }
  0x3e   : > { %4706 = vmatprep.subr.bf16.mxu1 %v5090_v18  ;;  %v5135_v18 = vld [vmem:[%s6325_s1 + $0x308] sm:$0xff]  }
  0x40   : > { %4685 = vmatpush3.bf16.msra.mxu0 %v5091_v19  ;;  %v5136_v19 = vld [vmem:[%s6325_s1 + $0x388] sm:$0xff]  }
  0x41   : > { %4686 = vmatprep.subr.bf16.mxu0 %v5093_v23  ;;  %4707 = vmatpush3.bf16.msra.mxu1 %v5092_v21  ;;  %v5137_v21 = vld [vmem:[%s6325_s1 + $0x350] sm:$0xff]  }
  0x42   : > { %4708 = vmatprep.subr.bf16.mxu1 %v5094_v24  ;;  %v5139_v23 = vld [vmem:[%s6325_s1 + $0x310] sm:$0xff]  }
  0x43   : > { %v5140_v24 = vld [vmem:[%s6325_s1 + $0x390] sm:$0xff]  }
  0x44   : > { %4687 = vmatpush3.bf16.msra.mxu0 %v5095_v26  ;;  %v5142_v26 = vld [vmem:[%s6325_s1 + $0x3d8] sm:$0xff]  }
  0x45   : > { %4716 = vmatprep.subr.bf16.mxu0 %v5097_v30  ;;  %4709 = vmatpush3.bf16.msra.mxu1 %v5096_v27  ;;  %v5143_v27 = vld [vmem:[%s6325_s1 + $0x318] sm:$0xff]   ;;  %v5146_v30 = vld [vmem:[%s6325_s1 + $0x3e0] sm:$0xff]  }
  0x46   : > { %4738 = vmatprep.subr.bf16.mxu1 %v5098_v32  ;;  %v5148_v32 = vld [vmem:[%s6325_s1 + $0x3a0] sm:$0xff]  }
  0x47   : > { %925 = vmatmul.mubr.bf16.vlgmr.msra.gmra.mrb[4].mxu0 %v686_v29  ;;  %v5145_v29 = vld [vmem:[%s6325_s1 + $0x360] sm:$0xff]  }
  0x48   : > { %4717 = vmatpush3.bf16.msra.mxu0 %v5099_v33  ;;  %965 = vmatmul.mubr.bf16.vlgmr.msra.gmra.mrb[4].mxu1 %v694_v36  ;;  %v5149_v33 = vld [vmem:[%s6325_s1 + $0x368] sm:$0xff]  }
  0x49   : > { %4718 = vmatprep.subr.bf16.mxu0 %v5101_v37  ;;  %4739 = vmatpush3.bf16.msra.mxu1 %v5100_v35  ;;  %v5151_v35 = vld [vmem:[%s6325_s1 + $0x328] sm:$0xff]   ;;  %v5153_v37 = vld [vmem:[%s6325_s1 + $0x370] sm:$0xff]  }
  0x4a   : > { %4740 = vmatprep.subr.bf16.mxu1 %v5102_v38  ;;  %1310 = vmatprep.mubr.bf16.mxu0 %v1079_v11  ;;  %v5152_v36 = vld [vmem:[%s6325_s1 + $0x3a8] sm:$0xff]   ;;  %v5154_v38 = vld [vmem:[%s6325_s1 + $0x3f0] sm:$0xff]  }
  0x4b   : > { %1350 = vmatprep.mubr.bf16.mxu1 %v1081_v14  ;;  %v5181_v11 = vld [vmem:[%s6325_s1 + $0x468] sm:$0xff]  }
  0x4c   : > { %4719 = vmatpush3.bf16.msra.mxu0 %v5103_v39  ;;  %v5155_v39 = vld [vmem:[%s6325_s1 + $0x330] sm:$0xff]   ;;  %v5184_v14 = vld [vmem:[%s6325_s1 + $0x4a8] sm:$0xff]  }
  0x4d   : > { %4720 = vmatprep.subr.bf16.mxu0 %v5105_v41  ;;  %4741 = vmatpush3.bf16.msra.mxu1 %v5104_v40  ;;  %v5156_v40 = vld [vmem:[%s6325_s1 + $0x3b0] sm:$0xff]  }
  0x4e   : > { %4742 = vmatprep.subr.bf16.mxu1 %v5106_v42  ;;  %v5775_v41 = vld.sshfl [vmem:[%s5458_s27 + $0x10] sm:$0xf pattern:$0x75316420]  ;;  %v5157_v42 = vld [vmem:[%s6325_s1 + $0x378] sm:$0xff]  }
  0x50   : > { %4721 = vmatpush3.bf16.msra.mxu0 %v5107_v43  ;;  %v1443_v43 = vcombine.low %v5565_v20, %v5775_v41 }
  0x51   : > { %4722 = vmatprep.subr.bf16.mxu0 %v5109_v45  ;;  %4743 = vmatpush3.bf16.msra.mxu1 %v5108_v44  ;;  %v5158_v44 = vld [vmem:[%s6325_s1 + $0x3f8] sm:$0xff]  }
  0x52   : > { %4744 = vmatprep.subr.bf16.mxu1 %v5110_v47  ;;  %v5159_v45 = vld [vmem:[%s6325_s1 + $0x338] sm:$0xff]   ;;  %v1450_v47 = vrot.slane %v1443_v43, %v5483_v51  ;;  %v5196_v43 = vld [vmem:[%s6325_s1 + $0x580] sm:$0xff]  }
  0x54   : > { %4723 = vmatpush3.bf16.msra.mxu0 %v5111_v48  ;;  %v5160_v48 = vld [vmem:[%s6325_s1 + $0x3b8] sm:$0xff]   ;;  %v1458_v20 = vrot.slane %v1450_v47, %v5483_v51 }
  0x55   : > { %4724 = vmatprep.subr.bf16.mxu0 %v5113_v50  ;;  %4745 = vmatpush3.bf16.msra.mxu1 %v5112_v49  ;;  %v1451_v49 = vcombine.high %v1450_v47, %v1450_v47  ;;  %v5161_v50 = vld [vmem:[%s6325_s1 + $0x440] sm:$0xff]  }
  0x56   : > { %4746 = vmatprep.subr.bf16.mxu1 %v5114_v52  ;;  %v5162_v52 = vld [vmem:[%s6325_s1 + $0x4c0] sm:$0xff]  }
  0x58   : > { %4725 = vmatpush3.bf16.msra.mxu0 %v5115_v53  ;;  %v1465_v53 = vrot.slane %v1451_v49, %v5483_v51  ;;  %v5199_v49 = vld [vmem:[%s6325_s1 + $0x508] sm:$0xff]  }
  0x59   : > { %4726 = vmatprep.subr.bf16.mxu0 %v5117_v55  ;;  %4747 = vmatpush3.bf16.msra.mxu1 %v5116_v54  ;;  %v5163_v54 = vld [vmem:[%s6325_s1 + $0x400] sm:$0xff]  }
  0x5a   : > { %4748 = vmatprep.subr.bf16.mxu1 %v5118_v56  ;;  %v5164_v55 = vld [vmem:[%s6325_s1 + $0x480] sm:$0xff]   ;;  %v1467_v56 = vcombine.high %v1465_v53, %v1465_v53 }
  0x5c   : > { %4727 = vmatpush3.bf16.msra.mxu0 %v5119_v57  ;;  %v1466_v57 = vcombine.high %v1458_v20, %v1458_v20 }
  0x5d   : > { %4728 = vmatprep.subr.bf16.mxu0 %v5121_v59  ;;  %4749 = vmatpush3.bf16.msra.mxu1 %v5120_v58  ;;  %v5165_v58 = vld [vmem:[%s6325_s1 + $0x448] sm:$0xff]  }
  0x5e   : > { %4750 = vmatprep.subr.bf16.mxu1 %v5122_v60  ;;  %v5166_v59 = vld [vmem:[%s6325_s1 + $0x4c8] sm:$0xff]  }
  0x5f   : > { %v5167_v60 = vld [vmem:[%s6325_s1 + $0x408] sm:$0xff]  }
  0x60   : > { %4729 = vmatpush3.bf16.msra.mxu0 %v5123_v61  ;;  %v5168_v61 = vld [vmem:[%s6325_s1 + $0x488] sm:$0xff]  }
  0x61   : > { %4730 = vmatprep.subr.bf16.mxu0 %v5125_v0  ;;  %4751 = vmatpush3.bf16.msra.mxu1 %v5124_v63  ;;  %v5170_v63 = vld [vmem:[%s6325_s1 + $0x4d0] sm:$0xff]  }
  0x62   : > { %4752 = vmatprep.subr.bf16.mxu1 %v5126_v3  ;;  %v5171_v0 = vld [vmem:[%s6325_s1 + $0x410] sm:$0xff]   ;;  %v5173_v3 = vld [vmem:[%s6325_s1 + $0x458] sm:$0xff]  }
  0x64   : > { %4731 = vmatpush3.bf16.msra.mxu0 %v5127_v4  ;;  %v5174_v4 = vld [vmem:[%s6325_s1 + $0x4d8] sm:$0xff]  }
  0x65   : > { %4760 = vmatprep.subr.bf16.mxu0 %v5129_v9  ;;  %4753 = vmatpush3.bf16.msra.mxu1 %v5128_v6  ;;  %v5176_v6 = vld [vmem:[%s6325_s1 + $0x498] sm:$0xff]   ;;  %v5179_v9 = vld [vmem:[%s6325_s1 + $0x420] sm:$0xff]  }
  0x66   : > { %4782 = vmatprep.subr.bf16.mxu1 %v5130_v10  ;;  %v5180_v10 = vld [vmem:[%s6325_s1 + $0x4a0] sm:$0xff]  }
  0x67   : > { %1311 = vmatmul.mubr.bf16.vlgmr.msra.gmra.mrb[8].mxu0 %v1072_v8  ;;  %v5178_v8 = vld [vmem:[%s6325_s1 + $0x4e0] sm:$0xff]  }
  0x68   : > { %4761 = vmatpush3.bf16.msra.mxu0 %v5131_v12  ;;  %1351 = vmatmul.mubr.bf16.vlgmr.msra.gmra.mrb[8].mxu1 %v1080_v15  ;;  %v5182_v12 = vld [vmem:[%s6325_s1 + $0x4e8] sm:$0xff]   ;;  %v5185_v15 = vld [vmem:[%s6325_s1 + $0x470] sm:$0xff]  }
  0x69   : > { %4762 = vmatprep.subr.bf16.mxu0 %v5133_v16  ;;  %4783 = vmatpush3.bf16.msra.mxu1 %v5132_v13  ;;  %v5183_v13 = vld [vmem:[%s6325_s1 + $0x428] sm:$0xff]   ;;  %v5186_v16 = vld [vmem:[%s6325_s1 + $0x4f0] sm:$0xff]  }
  0x6a   : > { %4784 = vmatprep.subr.bf16.mxu1 %v5134_v17  ;;  %1696 = vmatprep.mubr.bf16.mxu0 %v1465_v53  ;;  %v5187_v17 = vld [vmem:[%s6325_s1 + $0x430] sm:$0xff]  }
  0x6b   : > { %1736 = vmatprep.mubr.bf16.mxu1 %v1467_v56  ;;  %v5203_v53 = vld [vmem:[%s6325_s1 + $0x510] sm:$0xff]   ;;  %v5206_v56 = vld [vmem:[%s6325_s1 + $0x5d8] sm:$0xff]  }
  0x6c   : > { %4763 = vmatpush3.bf16.msra.mxu0 %v5135_v18  ;;  %v5189_v18 = vld [vmem:[%s6325_s1 + $0x478] sm:$0xff]  }
  0x6d   : > { %4764 = vmatprep.subr.bf16.mxu0 %v5137_v21  ;;  %4785 = vmatpush3.bf16.msra.mxu1 %v5136_v19  ;;  %v4120_v19 = vld.sshfl [vmem:[%s5458_s27 + $0x8] sm:$0xff pattern:$0x75316420]  ;;  %v4121_v21 = vld.sshfl [vmem:[%s5458_s27 + $0x10] sm:$0xff pattern:$0x75316420] }
  0x6e   : > { %4786 = vmatprep.subr.bf16.mxu1 %v5138_v22  ;;  %v1756_v22 = vcombine.high %v4120_v19, %v4120_v19 }
  0x70   : > { %4765 = vmatpush3.bf16.msra.mxu0 %v5139_v23  ;;  %v1766_v23 = vshrl.u32 %v4120_v19, 16  ;;  %v5226_v19 = vld [vmem:[%s6325_s1 + $0x6c0] sm:$0xff]  }
  0x71   : > { %4766 = vmatprep.subr.bf16.mxu0 %v5141_v25  ;;  %4787 = vmatpush3.bf16.msra.mxu1 %v5140_v24  ;;  %v5188_v24 = vld [vmem:[%s6325_s1 + $0x4b0] sm:$0xff]   ;;  %v1764_v25 = vcombine.high %v4121_v21, %v4121_v21 }
  0x72   : > { %4788 = vmatprep.subr.bf16.mxu1 %v5142_v26  ;;  %v1775_v26 = vshrl.u32 %v4121_v21, 16  ;;  %v5227_v21 = vld [vmem:[%s6325_s1 + $0x600] sm:$0xff]  }
  0x74   : > { %4767 = vmatpush3.bf16.msra.mxu0 %v5143_v27  ;;  %v5190_v27 = vld [vmem:[%s6325_s1 + $0x4f8] sm:$0xff]  }
  0x75   : > { %4768 = vmatprep.subr.bf16.mxu0 %v5145_v29  ;;  %4789 = vmatpush3.bf16.msra.mxu1 %v5144_v28  ;;  %v1771_v28 = vshll.u32 %v1756_v22, 16  ;;  %v5191_v29 = vld [vmem:[%s6325_s1 + $0x438] sm:$0xff]   ;;  %v5228_v22 = vld [vmem:[%s6325_s1 + $0x680] sm:$0xff]  }
  0x76   : > { %4790 = vmatprep.subr.bf16.mxu1 %v5146_v30  ;;  %v1780_v30 = vshll.u32 %v1764_v25, 16  ;;  %v5230_v25 = vld [vmem:[%s6325_s1 + $0x6c8] sm:$0xff]  }
  0x78   : > { %4769 = vmatpush3.bf16.msra.mxu0 %v5147_v31  ;;  %v1773_v31 = vsel %vm5475_vm14, %v1766_v23, %v1771_v28  ;;  %v5233_v28 = vld [vmem:[%s6325_s1 + $0x650] sm:$0xff]  }
  0x79   : > { %4770 = vmatprep.subr.bf16.mxu0 %v5149_v33  ;;  %4791 = vmatpush3.bf16.msra.mxu1 %v5148_v32  ;;  %v5193_v32 = vld [vmem:[%s6325_s1 + $0x540] sm:$0xff]   ;;  %v5192_v33 = vld [vmem:[%s6325_s1 + $0x4b8] sm:$0xff]  }
  0x7a   : > { %4792 = vmatprep.subr.bf16.mxu1 %v5150_v34  ;;  %v5899_v34 = vsel %vm5475_vm14, %v1775_v26, %v1780_v30  ;;  %v5231_v26 = vld [vmem:[%s6325_s1 + $0x608] sm:$0xff]   ;;  %v5235_v30 = vld [vmem:[%s6325_s1 + $0x610] sm:$0xff]  }
  0x7c   : > { %4771 = vmatpush3.bf16.msra.mxu0 %v5151_v35  ;;  %v1848_v35 = vcombine.low %v1773_v31, %v5899_v34  ;;  %v5236_v31 = vld [vmem:[%s6325_s1 + $0x690] sm:$0xff]  }
  0x7d   : > { %4772 = vmatprep.subr.bf16.mxu0 %v5153_v37  ;;  %4793 = vmatpush3.bf16.msra.mxu1 %v5152_v36  ;;  %v5194_v36 = vld [vmem:[%s6325_s1 + $0x5c0] sm:$0xff]  }
  0x7e   : > { %4794 = vmatprep.subr.bf16.mxu1 %v5154_v38  ;;  %v1855_v37 = vrot.slane %v1848_v35, %v5483_v51  ;;  %v5239_v35 = vld [vmem:[%s6325_s1 + $0x618] sm:$0xff]  }
  0x80   : > { %4773 = vmatpush3.bf16.msra.mxu0 %v5155_v39  ;;  %v1856_v38 = vcombine.high %v1855_v37, %v1855_v37  ;;  %v1863_v39 = vrot.slane %v1855_v37, %v5483_v51  ;;  %v5241_v37 = vld [vmem:[%s6325_s1 + $0x660] sm:$0xff]  }
  0x81   : > { %4774 = vmatprep.subr.bf16.mxu0 %v5157_v42  ;;  %4795 = vmatpush3.bf16.msra.mxu1 %v5156_v40  ;;  %v5195_v40 = vld [vmem:[%s6325_s1 + $0x500] sm:$0xff]  }
  0x82   : > { %4796 = vmatprep.subr.bf16.mxu1 %v5158_v44  ;;  %v1870_v42 = vrot.slane %v1856_v38, %v5483_v51  ;;  %v1871_v44 = vcombine.high %v1863_v39, %v1863_v39  ;;  %v5242_v38 = vld [vmem:[%s6325_s1 + $0x6e0] sm:$0xff]  }
  0x84   : > { %4775 = vmatpush3.bf16.msra.mxu0 %v5159_v45  ;;  %v5197_v45 = vld [vmem:[%s6325_s1 + $0x548] sm:$0xff]   ;;  %v1872_v47 = vcombine.high %v1870_v42, %v1870_v42 }
  0x85   : > { %4804 = vmatprep.subr.bf16.mxu0 %v5161_v50  ;;  %4797 = vmatpush3.bf16.msra.mxu1 %v5160_v48  ;;  %v5198_v48 = vld [vmem:[%s6325_s1 + $0x5c8] sm:$0xff]   ;;  %v5201_v50 = vld [vmem:[%s6325_s1 + $0x550] sm:$0xff]  }
  0x86   : > { %4826 = vmatprep.subr.bf16.mxu1 %v5162_v52  ;;  %v5202_v52 = vld [vmem:[%s6325_s1 + $0x5d0] sm:$0xff]  }
  0x87   : > { %1697 = vmatmul.mubr.bf16.vlgmr.msra.gmra.mrb[12].mxu0 %v1458_v20  ;;  %v5200_v20 = vld [vmem:[%s6325_s1 + $0x588] sm:$0xff]  }
  0x88   : > { %4805 = vmatpush3.bf16.msra.mxu0 %v5163_v54  ;;  %1737 = vmatmul.mubr.bf16.vlgmr.msra.gmra.mrb[12].mxu1 %v1466_v57  ;;  %v5204_v54 = vld [vmem:[%s6325_s1 + $0x590] sm:$0xff]   ;;  %v5207_v57 = vld [vmem:[%s6325_s1 + $0x518] sm:$0xff]  }
  0x89   : > { %4806 = vmatprep.subr.bf16.mxu0 %v5165_v58  ;;  %4827 = vmatpush3.bf16.msra.mxu1 %v5164_v55  ;;  %v5205_v55 = vld [vmem:[%s6325_s1 + $0x558] sm:$0xff]  }
  0x8a   : > { %4828 = vmatprep.subr.bf16.mxu1 %v5166_v59  ;;  %2101 = vmatprep.mubr.bf16.mxu0 %v1870_v42  ;;  %v5208_v58 = vld [vmem:[%s6325_s1 + $0x598] sm:$0xff]   ;;  %v5209_v59 = vld [vmem:[%s6325_s1 + $0x560] sm:$0xff]   ;;  %v5245_v42 = vld [vmem:[%s6325_s1 + $0x668] sm:$0xff]  }
  0x8b   : > { %2141 = vmatprep.mubr.bf16.mxu1 %v1872_v47  ;;  %v4324_v47 = vld.sshfl [vmem:[%s5458_s27 + $0x18] sm:$0xf pattern:$0x75316420] }
  0x8c   : > { %4807 = vmatpush3.bf16.msra.mxu0 %v5167_v60  ;;  %v5210_v60 = vld [vmem:[%s6325_s1 + $0x5e0] sm:$0xff]  }
  0x8d   : > { %4808 = vmatprep.subr.bf16.mxu0 %v5169_v62  ;;  %4829 = vmatpush3.bf16.msra.mxu1 %v5168_v61  ;;  %v5211_v61 = vld [vmem:[%s6325_s1 + $0x520] sm:$0xff]  }
  0x8e   : > { %4830 = vmatprep.subr.bf16.mxu1 %v5170_v63  ;;  %v5212_v62 = vld [vmem:[%s6325_s1 + $0x5a0] sm:$0xff]   ;;  %v5213_v63 = vld [vmem:[%s6325_s1 + $0x568] sm:$0xff]  }
  0x90   : > { %4809 = vmatpush3.bf16.msra.mxu0 %v5171_v0  ;;  %v5214_v0 = vld [vmem:[%s6325_s1 + $0x5e8] sm:$0xff]  }
  0x91   : > { %4810 = vmatprep.subr.bf16.mxu0 %v5173_v3  ;;  %4831 = vmatpush3.bf16.msra.mxu1 %v5172_v2  ;;  %v5215_v2 = vld [vmem:[%s6325_s1 + $0x528] sm:$0xff]  }
  0x92   : > { %4832 = vmatprep.subr.bf16.mxu1 %v5174_v4  ;;  %v5216_v3 = vld [vmem:[%s6325_s1 + $0x5a8] sm:$0xff]   ;;  %v5217_v4 = vld [vmem:[%s6325_s1 + $0x570] sm:$0xff]  }
  0x94   : > { %4811 = vmatpush3.bf16.msra.mxu0 %v5175_v5  ;;  %v5978_v5 = vld.sshfl [vmem:[%s5458_s27 + $0x10] sm:$0xf0 pattern:$0x75316420] }
  0x95   : > { %4812 = vmatprep.subr.bf16.mxu0 %v5177_v7  ;;  %4833 = vmatpush3.bf16.msra.mxu1 %v5176_v6  ;;  %v4288_v6 = vcombine.high %v5675_v1, %v5978_v5  ;;  %v5218_v7 = vld [vmem:[%s6325_s1 + $0x5f0] sm:$0xff]   ;;  %v5221_v1 = vld [vmem:[%s6325_s1 + $0x578] sm:$0xff]  }
  0x96   : > { %4834 = vmatprep.subr.bf16.mxu1 %v5178_v8  ;;  %v5219_v8 = vld [vmem:[%s6325_s1 + $0x530] sm:$0xff]  }
  0x98   : > { %4813 = vmatpush3.bf16.msra.mxu0 %v5179_v9  ;;  %v2242_v9 = vrot.slane %v4288_v6, %v5483_v51  ;;  %v5263_v6 = vld [vmem:[%s6325_s1 + $0x708] sm:$0xff]  }
  0x99   : > { %4814 = vmatprep.subr.bf16.mxu0 %v5181_v11  ;;  %4835 = vmatpush3.bf16.msra.mxu1 %v5180_v10  ;;  %v5220_v10 = vld [vmem:[%s6325_s1 + $0x5b0] sm:$0xff]  }
  0x9a   : > { %4836 = vmatprep.subr.bf16.mxu1 %v5182_v12  ;;  %v2243_v11 = vcombine.high %v2242_v9, %v2242_v9  ;;  %v5222_v12 = vld [vmem:[%s6325_s1 + $0x5f8] sm:$0xff]  }
  0x9c   : > { %4815 = vmatpush3.bf16.msra.mxu0 %v5183_v13  ;;  %v5223_v13 = vld [vmem:[%s6325_s1 + $0x538] sm:$0xff]  }
  0x9d   : > { %4816 = vmatprep.subr.bf16.mxu0 %v5185_v15  ;;  %4837 = vmatpush3.bf16.msra.mxu1 %v5184_v14  ;;  %v2257_v14 = vrot.slane %v2243_v11, %v5483_v51  ;;  %v5224_v15 = vld [vmem:[%s6325_s1 + $0x5b8] sm:$0xff]   ;;  %v5268_v11 = vld [vmem:[%s6325_s1 + $0x790] sm:$0xff]  }
  0x9e   : > { %4838 = vmatprep.subr.bf16.mxu1 %v5186_v16 }
  0x9f   : > { %v2259_v16 = vcombine.high %v2257_v14, %v2257_v14 }
  0xa0   : > { %4817 = vmatpush3.bf16.msra.mxu0 %v5187_v17  ;;  %v2250_v17 = vrot.slane %v2242_v9, %v5483_v51  ;;  %v5266_v9 = vld [vmem:[%s6325_s1 + $0x7d0] sm:$0xff]  }
  0xa1   : > { %4818 = vmatprep.subr.bf16.mxu0 %v5189_v18  ;;  %4839 = vmatpush3.bf16.msra.mxu1 %v5188_v24  ;;  %v5225_v18 = vld [vmem:[%s6325_s1 + $0x640] sm:$0xff]   ;;  %v5229_v24 = vld [vmem:[%s6325_s1 + $0x648] sm:$0xff]  }
  0xa2   : > { %4840 = vmatprep.subr.bf16.mxu1 %v5190_v27  ;;  %v2258_v23 = vcombine.high %v2250_v17, %v2250_v17  ;;  %v5232_v27 = vld [vmem:[%s6325_s1 + $0x688] sm:$0xff]  }
  0xa4   : > { %4819 = vmatpush3.bf16.msra.mxu0 %v5191_v29  ;;  %v5234_v29 = vld [vmem:[%s6325_s1 + $0x6d0] sm:$0xff]  }
  0xa5   : > { %4848 = vmatprep.subr.bf16.mxu0 %v5193_v32  ;;  %4841 = vmatpush3.bf16.msra.mxu1 %v5192_v33  ;;  %v5237_v32 = vld [vmem:[%s6325_s1 + $0x658] sm:$0xff]  }
  0xa6   : > { %4870 = vmatprep.subr.bf16.mxu1 %v5194_v36  ;;  %v5238_v33 = vld [vmem:[%s6325_s1 + $0x6d8] sm:$0xff]  }
  0xa7   : > { %2102 = vmatmul.mubr.bf16.vlgmr.msra.gmra.mrb[16].mxu0 %v1863_v39  ;;  %v5240_v36 = vld [vmem:[%s6325_s1 + $0x698] sm:$0xff]   ;;  %v5243_v39 = vld [vmem:[%s6325_s1 + $0x620] sm:$0xff]  }
  0xa8   : > { %4849 = vmatpush3.bf16.msra.mxu0 %v5195_v40  ;;  %2142 = vmatmul.mubr.bf16.vlgmr.msra.gmra.mrb[16].mxu1 %v1871_v44  ;;  %v5244_v40 = vld [vmem:[%s6325_s1 + $0x6a0] sm:$0xff]   ;;  %v5247_v44 = vld [vmem:[%s6325_s1 + $0x628] sm:$0xff]  }
  0xa9   : > { %4850 = vmatprep.subr.bf16.mxu0 %v5197_v45  ;;  %4871 = vmatpush3.bf16.msra.mxu1 %v5196_v43  ;;  %v5246_v43 = vld [vmem:[%s6325_s1 + $0x6e8] sm:$0xff]   ;;  %v5249_v45 = vld [vmem:[%s6325_s1 + $0x670] sm:$0xff]  }
  0xaa   : > { %4872 = vmatprep.subr.bf16.mxu1 %v5198_v48  ;;  %2488 = vmatprep.mubr.bf16.mxu0 %v2257_v14  ;;  %v5248_v48 = vld [vmem:[%s6325_s1 + $0x6a8] sm:$0xff]   ;;  %v5273_v14 = vld [vmem:[%s6325_s1 + $0x760] sm:$0xff]  }
  0xab   : > { %2528 = vmatprep.mubr.bf16.mxu1 %v2259_v16  ;;  %v5274_v16 = vld [vmem:[%s6325_s1 + $0x7e0] sm:$0xff]  }
  0xac   : > { %4851 = vmatpush3.bf16.msra.mxu0 %v5199_v49  ;;  %v2621_v49 = vcombine.low %v5775_v41, %v4324_v47  ;;  %v5252_v41 = vld [vmem:[%s6325_s1 + $0x6b0] sm:$0xff]   ;;  %v5286_v47 = vld [vmem:[%s6325_s1 + $0x7f8] sm:$0xff]  }
  0xad   : > { %4852 = vmatprep.subr.bf16.mxu0 %v5201_v50  ;;  %4873 = vmatpush3.bf16.msra.mxu1 %v5200_v20  ;;  %v5250_v20 = vld [vmem:[%s6325_s1 + $0x6f0] sm:$0xff]  }
  0xae   : > { %4874 = vmatprep.subr.bf16.mxu1 %v5202_v52  ;;  %v5251_v50 = vld [vmem:[%s6325_s1 + $0x630] sm:$0xff]   ;;  %v2628_v52 = vrot.slane %v2621_v49, %v5483_v51  ;;  %v5287_v49 = vld [vmem:[%s6325_s1 + $0x738] sm:$0xff]  }
  0xb0   : > { %4853 = vmatpush3.bf16.msra.mxu0 %v5203_v53  ;;  %v5253_v53 = vld [vmem:[%s6325_s1 + $0x678] sm:$0xff]  }
  0xb1   : > { %4854 = vmatprep.subr.bf16.mxu0 %v5205_v55  ;;  %4875 = vmatpush3.bf16.msra.mxu1 %v5204_v54  ;;  %v2629_v54 = vcombine.high %v2628_v52, %v2628_v52  ;;  %v5254_v55 = vld [vmem:[%s6325_s1 + $0x6f8] sm:$0xff]  }
  0xb2   : > { %4876 = vmatprep.subr.bf16.mxu1 %v5206_v56  ;;  %v5255_v56 = vld [vmem:[%s6325_s1 + $0x638] sm:$0xff]  }
  0xb4   : > { %4855 = vmatpush3.bf16.msra.mxu0 %v5207_v57  ;;  %v2643_v57 = vrot.slane %v2629_v54, %v5483_v51 }
  0xb5   : > { %4856 = vmatprep.subr.bf16.mxu0 %v5209_v59  ;;  %4877 = vmatpush3.bf16.msra.mxu1 %v5208_v58  ;;  %v2636_v58 = vrot.slane %v2628_v52, %v5483_v51  ;;  %v5257_v59 = vld [vmem:[%s6325_s1 + $0x740] sm:$0xff]   ;;  %v5288_v52 = vld [vmem:[%s6325_s1 + $0x7b8] sm:$0xff]  }
  0xb6   : > { %4878 = vmatprep.subr.bf16.mxu1 %v5210_v60  ;;  %v5256_v60 = vld [vmem:[%s6325_s1 + $0x6b8] sm:$0xff]  }
  0xb8   : > { %4857 = vmatpush3.bf16.msra.mxu0 %v5211_v61  ;;  %v2645_v61 = vcombine.high %v2643_v57, %v2643_v57 }
  0xb9   : > { %4858 = vmatprep.subr.bf16.mxu0 %v5213_v63  ;;  %4879 = vmatpush3.bf16.msra.mxu1 %v5212_v62  ;;  %v5258_v62 = vld [vmem:[%s6325_s1 + $0x7c0] sm:$0xff]  }
  0xba   : > { %4880 = vmatprep.subr.bf16.mxu1 %v5214_v0  ;;  %v5259_v63 = vld [vmem:[%s6325_s1 + $0x700] sm:$0xff]   ;;  %v2644_v0 = vcombine.high %v2636_v58, %v2636_v58 }
  0xbc   : > { %4859 = vmatpush3.bf16.msra.mxu0 %v5215_v2  ;;  %v5261_v2 = vld [vmem:[%s6325_s1 + $0x748] sm:$0xff]  }
  0xbd   : > { %4860 = vmatprep.subr.bf16.mxu0 %v5217_v4  ;;  %4881 = vmatpush3.bf16.msra.mxu1 %v5216_v3  ;;  %v5260_v3 = vld [vmem:[%s6325_s1 + $0x780] sm:$0xff]   ;;  %v5262_v4 = vld [vmem:[%s6325_s1 + $0x7c8] sm:$0xff]  }
  0xbe   : > { %4882 = vmatprep.subr.bf16.mxu1 %v5218_v7  ;;  %v5265_v7 = vld [vmem:[%s6325_s1 + $0x750] sm:$0xff]  }
  0xc0   : > { %4861 = vmatpush3.bf16.msra.mxu0 %v5219_v8  ;;  %v5264_v8 = vld [vmem:[%s6325_s1 + $0x788] sm:$0xff]  }
  0xc1   : > { %4862 = vmatprep.subr.bf16.mxu0 %v5221_v1  ;;  %4883 = vmatpush3.bf16.msra.mxu1 %v5220_v10  ;;  %v5267_v10 = vld [vmem:[%s6325_s1 + $0x710] sm:$0xff]   ;;  %v5269_v1 = vld [vmem:[%s6325_s1 + $0x758] sm:$0xff]  }
  0xc2   : > { %4884 = vmatprep.subr.bf16.mxu1 %v5222_v12  ;;  %v5270_v12 = vld [vmem:[%s6325_s1 + $0x7d8] sm:$0xff]  }
  0xc4   : > { %4863 = vmatpush3.bf16.msra.mxu0 %v5223_v13  ;;  %v5271_v13 = vld [vmem:[%s6325_s1 + $0x718] sm:$0xff]  }
  0xc5   : > { %4892 = vmatprep.subr.bf16.mxu0 %v5225_v18  ;;  %4885 = vmatpush3.bf16.msra.mxu1 %v5224_v15  ;;  %v5272_v15 = vld [vmem:[%s6325_s1 + $0x798] sm:$0xff]  }
  0xc6   : > { %4914 = vmatprep.subr.bf16.mxu1 %v5226_v19  ;;  %v5277_v19 = vld [vmem:[%s6325_s1 + $0x768] sm:$0xff]  }
  0xc7   : > { %2489 = vmatmul.mubr.bf16.vlgmr.msra.gmra.mrb[20].mxu0 %v2250_v17  ;;  %v5275_v17 = vld [vmem:[%s6325_s1 + $0x720] sm:$0xff]  }
  0xc8   : > { %4893 = vmatpush3.bf16.msra.mxu0 %v5227_v21  ;;  %2529 = vmatmul.mubr.bf16.vlgmr.msra.gmra.mrb[20].mxu1 %v2258_v23  ;;  %v5276_v21 = vld [vmem:[%s6325_s1 + $0x7a0] sm:$0xff]  }
  0xc9   : > { %4894 = vmatprep.subr.bf16.mxu0 %v5229_v24  ;;  %4915 = vmatpush3.bf16.msra.mxu1 %v5228_v22 }
  0xca   : > { %4916 = vmatprep.subr.bf16.mxu1 %v5230_v25  ;;  %2874 = vmatprep.mubr.bf16.mxu0 %v2643_v57  ;;  %v5278_v25 = vld [vmem:[%s6325_s1 + $0x7e8] sm:$0xff]  }
  0xcb   : > { %2914 = vmatprep.mubr.bf16.mxu1 %v2645_v61  ;;  %v5293_v57 = vld [vmem:[%s6325_s1 + $0x848] sm:$0xff]  }
  0xcc   : > { %4895 = vmatpush3.bf16.msra.mxu0 %v5231_v26  ;;  %v5295_v61 = vld [vmem:[%s6325_s1 + $0x808] sm:$0xff]  }
  0xcd   : > { %4896 = vmatprep.subr.bf16.mxu0 %v5233_v28  ;;  %4917 = vmatpush3.bf16.msra.mxu1 %v5232_v27  ;;  %v5279_v27 = vld [vmem:[%s6325_s1 + $0x728] sm:$0xff]  }
  0xce   : > { %4918 = vmatprep.subr.bf16.mxu1 %v5234_v29  ;;  %v5280_v29 = vld [vmem:[%s6325_s1 + $0x7a8] sm:$0xff]  }
  0xd0   : > { %4897 = vmatpush3.bf16.msra.mxu0 %v5235_v30 }
  0xd1   : > { %4898 = vmatprep.subr.bf16.mxu0 %v5237_v32  ;;  %4919 = vmatpush3.bf16.msra.mxu1 %v5236_v31 }
  0xd2   : > { %4920 = vmatprep.subr.bf16.mxu1 %v5238_v33  ;;  %v5281_v33 = vld [vmem:[%s6325_s1 + $0x770] sm:$0xff]  }
  0xd4   : > { %4899 = vmatpush3.bf16.msra.mxu0 %v5239_v35 }
  0xd5   : > { %4900 = vmatprep.subr.bf16.mxu0 %v5241_v37  ;;  %4921 = vmatpush3.bf16.msra.mxu1 %v5240_v36  ;;  %v4424_v36 = vld.sshfl [vmem:[%s5458_s27 + $0x18] sm:$0xff pattern:$0x75316420] }
  0xd6   : > { %4922 = vmatprep.subr.bf16.mxu1 %v5242_v38  ;;  %v5282_v38 = vld [vmem:[%s6325_s1 + $0x7f0] sm:$0xff]  }
  0xd8   : > { %4901 = vmatpush3.bf16.msra.mxu0 %v5243_v39  ;;  %v2942_v39 = vcombine.high %v4424_v36, %v4424_v36 }
  0xd9   : > { %4902 = vmatprep.subr.bf16.mxu0 %v5245_v42  ;;  %4923 = vmatpush3.bf16.msra.mxu1 %v5244_v40  ;;  %v2953_v40 = vshrl.u32 %v4424_v36, 16  ;;  %v5283_v42 = vld [vmem:[%s6325_s1 + $0x730] sm:$0xff]   ;;  %v5317_v36 = vld [vmem:[%s6325_s1 + $0x878] sm:$0xff]  }
  0xda   : > { %4924 = vmatprep.subr.bf16.mxu1 %v5246_v43  ;;  %v5285_v43 = vld [vmem:[%s6325_s1 + $0x778] sm:$0xff]  }
  0xdc   : > { %4903 = vmatpush3.bf16.msra.mxu0 %v5247_v44  ;;  %v2958_v44 = vshll.u32 %v2942_v39, 16  ;;  %v5319_v39 = vld [vmem:[%s6325_s1 + $0x838] sm:$0xff]  }
  0xdd   : > { %4904 = vmatprep.subr.bf16.mxu0 %v5249_v45  ;;  %4925 = vmatpush3.bf16.msra.mxu1 %v5248_v48  ;;  %v5284_v45 = vld [vmem:[%s6325_s1 + $0x7b0] sm:$0xff]  }
  0xde   : > { %4926 = vmatprep.subr.bf16.mxu1 %v5250_v20  ;;  %v2960_v48 = vsel %vm5475_vm14, %v2953_v40, %v2958_v44 }
  0xdf   : > { %v3026_v20 = vcombine.low %v5899_v34, %v2960_v48 }
  0xe0   : > { %4905 = vmatpush3.bf16.msra.mxu0 %v5251_v50  ;;  %v5289_v50 = vld [vmem:[%s6325_s1 + $0x840] sm:$0xff]  }
  0xe1   : > { %4906 = vmatprep.subr.bf16.mxu0 %v5253_v53  ;;  %4927 = vmatpush3.bf16.msra.mxu1 %v5252_v41  ;;  %v3033_v46 = vrot.slane %v3026_v20, %v5483_v51  ;;  %v5290_v53 = vld [vmem:[%s6325_s1 + $0x8c0] sm:$0xff]  }
  0xe2   : > { %4928 = vmatprep.subr.bf16.mxu1 %v5254_v55  ;;  %v5291_v55 = vld [vmem:[%s6325_s1 + $0x800] sm:$0xff]  }
  0xe3   : > { %v3034_v41 = vcombine.high %v3033_v46, %v3033_v46  ;;  %v3041_v34 = vrot.slane %v3033_v46, %v5483_v51 }
  0xe4   : > { %4907 = vmatpush3.bf16.msra.mxu0 %v5255_v56 }
  0xe5   : > { %4936 = vmatprep.subr.bf16.mxu0 %v5257_v59  ;;  %4929 = vmatpush3.bf16.msra.mxu1 %v5256_v60  ;;  %v3048_v54 = vrot.slane %v3034_v41, %v5483_v51  ;;  %v3049_v56 = vcombine.high %v3041_v34, %v3041_v34  ;;  %v5292_v59 = vld [vmem:[%s6325_s1 + $0x880] sm:$0xff]   ;;  %v5294_v60 = vld [vmem:[%s6325_s1 + $0x8c8] sm:$0xff]  }
  0xe6   : > { %4958 = vmatprep.subr.bf16.mxu1 %v5258_v62  ;;  %v5297_v62 = vld [vmem:[%s6325_s1 + $0x850] sm:$0xff]  }
  0xe7   : > { %2875 = vmatmul.mubr.bf16.vlgmr.msra.gmra.mrb[24].mxu0 %v2636_v58  ;;  %v3050_v58 = vcombine.high %v3048_v54, %v3048_v54 }
  0xe8   : > { %4937 = vmatpush3.bf16.msra.mxu0 %v5259_v63  ;;  %2915 = vmatmul.mubr.bf16.vlgmr.msra.gmra.mrb[24].mxu1 %v2644_v0  ;;  %v5296_v63 = vld [vmem:[%s6325_s1 + $0x888] sm:$0xff]   ;;  %v5298_v0 = vld [vmem:[%s6325_s1 + $0x8d0] sm:$0xff]  }
  0xe9   : > { %4938 = vmatprep.subr.bf16.mxu0 %v5261_v2  ;;  %4959 = vmatpush3.bf16.msra.mxu1 %v5260_v3  ;;  %v5299_v2 = vld [vmem:[%s6325_s1 + $0x810] sm:$0xff]   ;;  %v5301_v3 = vld [vmem:[%s6325_s1 + $0x858] sm:$0xff]  }
  0xea   : > { %4960 = vmatprep.subr.bf16.mxu1 %v5262_v4  ;;  %3279 = vmatprep.mubr.bf16.mxu0 %v3048_v54  ;;  %v5300_v4 = vld [vmem:[%s6325_s1 + $0x890] sm:$0xff]  }
  0xeb   : > { %3319 = vmatprep.mubr.bf16.mxu1 %v3050_v58 }
  0xec   : > { %4939 = vmatpush3.bf16.msra.mxu0 %v5263_v6  ;;  %v5302_v6 = vld [vmem:[%s6325_s1 + $0x8d8] sm:$0xff]  }
  0xed   : > { %4940 = vmatprep.subr.bf16.mxu0 %v5265_v7  ;;  %4961 = vmatpush3.bf16.msra.mxu1 %v5264_v8  ;;  %v5303_v7 = vld [vmem:[%s6325_s1 + $0x818] sm:$0xff]   ;;  %v5305_v8 = vld [vmem:[%s6325_s1 + $0x860] sm:$0xff]  }
  0xee   : > { %4962 = vmatprep.subr.bf16.mxu1 %v5266_v9  ;;  %v5304_v9 = vld [vmem:[%s6325_s1 + $0x898] sm:$0xff]  }
  0xf0   : > { %4941 = vmatpush3.bf16.msra.mxu0 %v5267_v10  ;;  %v5306_v10 = vld [vmem:[%s6325_s1 + $0x8e0] sm:$0xff]  }
  0xf1   : > { %4942 = vmatprep.subr.bf16.mxu0 %v5269_v1  ;;  %4963 = vmatpush3.bf16.msra.mxu1 %v5268_v11  ;;  %v5307_v11 = vld [vmem:[%s6325_s1 + $0x820] sm:$0xff]  }
  0xf2   : > { %4964 = vmatprep.subr.bf16.mxu1 %v5270_v12 }
  0xf4   : > { %4943 = vmatpush3.bf16.msra.mxu0 %v5271_v13  ;;  %v5308_v13 = vld [vmem:[%s6325_s1 + $0x8a0] sm:$0xff]  }
  0xf5   : > { %4944 = vmatprep.subr.bf16.mxu0 %v5273_v14  ;;  %4965 = vmatpush3.bf16.msra.mxu1 %v5272_v15 }
  0xf6   : > { %4966 = vmatprep.subr.bf16.mxu1 %v5274_v16  ;;  %v5309_v16 = vld [vmem:[%s6325_s1 + $0x868] sm:$0xff]  }
  0xf8   : > { %4945 = vmatpush3.bf16.msra.mxu0 %v5275_v17 }
  0xf9   : > { %4946 = vmatprep.subr.bf16.mxu0 %v5277_v19  ;;  %4967 = vmatpush3.bf16.msra.mxu1 %v5276_v21 }
  0xfa   : > { %v4644_v18 = vpop.f32.mrb[0].mxu0  ;;  %4968 = vmatprep.subr.bf16.mxu1 %v5278_v25  ;;  %v5311_v25 = vld [vmem:[%s6325_s1 + $0x828] sm:$0xff]  }
  0xfb   : > { %v4645_v22 = vpop.f32.mrb[1].mxu0  ;;  %v4666_v23 = vpop.f32.mrb[0].mxu1 }
  0xfc   : > { %v4646_v24 = vadd.f32 %v4645_v22, %v4644_v18  ;;  %v4647_v26 = vpop.f32.mrb[2].mxu0  ;;  %v4667_v28 = vpop.f32.mrb[1].mxu1  ;;  %4947 = vmatpush3.bf16.msra.mxu0 %v5279_v27 }
  0xfd   : > { %v4648_v30 = vpop.f32.mrb[3].mxu0  ;;  %v4668_v31 = vadd.f32 %v4667_v28, %v4666_v23  ;;  %v4669_v32 = vpop.f32.mrb[2].mxu1  ;;  %4948 = vmatprep.subr.bf16.mxu0 %v5281_v33  ;;  %4969 = vmatpush3.bf16.msra.mxu1 %v5280_v29  ;;  %v5310_v23 = vld [vmem:[%s6325_s1 + $0x8e8] sm:$0xff]   ;;  %v5313_v28 = vld [vmem:[%s6325_s1 + $0x870] sm:$0xff]  }
  0xfe   : > { %v4670_v35 = vpop.f32.mrb[3].mxu1  ;;  %4970 = vmatprep.subr.bf16.mxu1 %v5282_v38  ;;  %v4526_v29 = vld.sshfl [vmem:[%s5458_s27 + $0x18] sm:$0xf0 pattern:$0x75316420]  ;;  %v5312_v30 = vld [vmem:[%s6325_s1 + $0x8a8] sm:$0xff]  }
  0xff   : > { %v6183_v37 = vadd.f32 %v4668_v31, %v4646_v24  ;;  %v4591_v31 = vcombine.high %v5978_v5, %v4526_v29  ;;  %v5314_v32 = vld [vmem:[%s6325_s1 + $0x8f0] sm:$0xff]   ;;  %v5318_v38 = vld [vmem:[%s6325_s1 + $0x8f8] sm:$0xff]  }
 0x100   : > { %4949 = vmatpush3.bf16.msra.mxu0 %v5283_v42  ;;  %v5315_v33 = vld [vmem:[%s6325_s1 + $0x830] sm:$0xff]  }
 0x101   : > { %4950 = vmatprep.subr.bf16.mxu0 %v5285_v43  ;;  %4971 = vmatpush3.bf16.msra.mxu1 %v5284_v45  ;;  %v3420_v35 = vrot.slane %v4591_v31, %v5483_v51  ;;  %v5316_v5 = vld [vmem:[%s6325_s1 + $0x8b0] sm:$0xff]   ;;  %v5320_v43 = vld [vmem:[%s6325_s1 + $0x8b8] sm:$0xff]  }
 0x102   : > { %4972 = vmatprep.subr.bf16.mxu1 %v5286_v47 }
 0x103   : > { %v3428_v42 = vrot.slane %v3420_v35, %v5483_v51 }
 0x104   : > { %4951 = vmatpush3.bf16.msra.mxu0 %v5287_v49 }
 0x105   : > { %4980 = vmatprep.subr.bf16.mxu0 %v5289_v50  ;;  %4973 = vmatpush3.bf16.msra.mxu1 %v5288_v52  ;;  %v3436_v45 = vcombine.high %v3428_v42, %v3428_v42 }
 0x106   : > { %5002 = vmatprep.subr.bf16.mxu1 %v5290_v53 }
 0x107   : > { %3280 = vmatmul.mubr.bf16.vlgmr.msra.gmra.mrb[28].mxu0 %v3041_v34 }
 0x108   : > { %4981 = vmatpush3.bf16.msra.mxu0 %v5291_v55  ;;  %3320 = vmatmul.mubr.bf16.vlgmr.msra.gmra.mrb[28].mxu1 %v3049_v56 }
 0x109   : > { %4982 = vmatprep.subr.bf16.mxu0 %v5293_v57  ;;  %5003 = vmatpush3.bf16.msra.mxu1 %v5292_v59 }
 0x10a   : > { %5004 = vmatprep.subr.bf16.mxu1 %v5294_v60 }
 0x10c   : > { %4983 = vmatpush3.bf16.msra.mxu0 %v5295_v61 }
 0x10d   : > { %4984 = vmatprep.subr.bf16.mxu0 %v5297_v62  ;;  %5005 = vmatpush3.bf16.msra.mxu1 %v5296_v63 }
 0x10e   : > { %5006 = vmatprep.subr.bf16.mxu1 %v5298_v0 }
 0x110   : > { %4985 = vmatpush3.bf16.msra.mxu0 %v5299_v2 }
 0x111   : > { %4986 = vmatprep.subr.bf16.mxu0 %v5301_v3  ;;  %5007 = vmatpush3.bf16.msra.mxu1 %v5300_v4 }
 0x112   : > { %5008 = vmatprep.subr.bf16.mxu1 %v5302_v6 }
 0x114   : > { %4987 = vmatpush3.bf16.msra.mxu0 %v5303_v7 }
 0x115   : > { %4988 = vmatprep.subr.bf16.mxu0 %v5305_v8  ;;  %5009 = vmatpush3.bf16.msra.mxu1 %v5304_v9 }
 0x116   : > { %5010 = vmatprep.subr.bf16.mxu1 %v5306_v10 }
 0x118   : > { %4989 = vmatpush3.bf16.msra.mxu0 %v5307_v11 }
 0x119   : > { %4990 = vmatprep.subr.bf16.mxu0 %v5309_v16  ;;  %5011 = vmatpush3.bf16.msra.mxu1 %v5308_v13 }
 0x11a   : > { %v4688_v1 = vpop.f32.mrb[4].mxu0  ;;  %5012 = vmatprep.subr.bf16.mxu1 %v5310_v23 }
 0x11b   : > { %v4689_v12 = vpop.f32.mrb[5].mxu0  ;;  %v4710_v14 = vpop.f32.mrb[4].mxu1 }
 0x11c   : > { %v4690_v15 = vadd.f32 %v4689_v12, %v4688_v1  ;;  %v4691_v17 = vpop.f32.mrb[6].mxu0  ;;  %v4711_v18 = vpop.f32.mrb[5].mxu1  ;;  %4991 = vmatpush3.bf16.msra.mxu0 %v5311_v25 }
 0x11d   : > { %v4692_v19 = vpop.f32.mrb[7].mxu0  ;;  %v4712_v22 = vadd.f32 %v4711_v18, %v4710_v14  ;;  %v4713_v24 = vpop.f32.mrb[6].mxu1  ;;  %4992 = vmatprep.subr.bf16.mxu0 %v5313_v28  ;;  %5013 = vmatpush3.bf16.msra.mxu1 %v5312_v30 }
 0x11e   : > { %v927_v21 = vadd.f32 %v4690_v15, %v6183_v37  ;;  %v4714_v26 = vpop.f32.mrb[7].mxu1  ;;  %v3421_v37 = vcombine.high %v3420_v35, %v3420_v35  ;;  %5014 = vmatprep.subr.bf16.mxu1 %v5314_v32 }
 0x120   : > { %v967_v27 = vadd.f32 %v4712_v22, %v927_v21  ;;  %4993 = vmatpush3.bf16.msra.mxu0 %v5315_v33  ;;  %v3435_v40 = vrot.slane %v3421_v37, %v5483_v51 }
 0x121   : > { %4994 = vmatprep.subr.bf16.mxu0 %v5317_v36  ;;  %5015 = vmatpush3.bf16.msra.mxu1 %v5316_v5 }
 0x122   : > { %3666 = vmatprep.mubr.bf16.mxu0 %v3435_v40  ;;  %v3437_v44 = vcombine.high %v3435_v40, %v3435_v40  ;;  %5016 = vmatprep.subr.bf16.mxu1 %v5318_v38 }
 0x124   : > { %4995 = vmatpush3.bf16.msra.mxu0 %v5319_v39  ;;  %3706 = vmatprep.mubr.bf16.mxu1 %v3437_v44 }
 0x125   : > { %5017 = vmatpush3.bf16.msra.mxu1 %v5320_v43 }
 0x127   : > { %3667 = vmatmul.mubr.bf16.vlgmr.msra.gmra.mrb[32].mxu0 %v3428_v42 }
 0x128   : > { %3707 = vmatmul.mubr.bf16.vlgmr.msra.gmra.mrb[32].mxu1 %v3436_v45 }
 0x13a   : > { %v4732_v47 = vpop.f32.mrb[8].mxu0 }
 0x13b   : > { %v4733_v48 = vpop.f32.mrb[9].mxu0  ;;  %v4754_v49 = vpop.f32.mrb[8].mxu1 }
 0x13c   : > { %v4734_v20 = vadd.f32 %v4733_v48, %v4732_v47  ;;  %v4735_v50 = vpop.f32.mrb[10].mxu0  ;;  %v4755_v51 = vpop.f32.mrb[9].mxu1 }
 0x13d   : > { %v4736_v52 = vpop.f32.mrb[11].mxu0  ;;  %v4756_v46 = vadd.f32 %v4755_v51, %v4754_v49  ;;  %v4757_v53 = vpop.f32.mrb[10].mxu1 }
 0x13e   : > { %v4758_v41 = vpop.f32.mrb[11].mxu1 }
 0x13f   : > { %v1353_v34 = vadd.f32 %v4756_v46, %v4734_v20 }
 0x141   : > { %v1358_v54 = vadd.f32 %v1353_v34, %v967_v27 }
 0x15a   : > { %v4776_v55 = vpop.f32.mrb[12].mxu0 }
 0x15b   : > { %v4777_v56 = vpop.f32.mrb[13].mxu0  ;;  %v4798_v57 = vpop.f32.mrb[12].mxu1 }
 0x15c   : > { %v4778_v58 = vadd.f32 %v4777_v56, %v4776_v55  ;;  %v4779_v59 = vpop.f32.mrb[14].mxu0  ;;  %v4799_v60 = vpop.f32.mrb[13].mxu1 }
 0x15d   : > { %v4780_v61 = vpop.f32.mrb[15].mxu0  ;;  %v4800_v62 = vadd.f32 %v4799_v60, %v4798_v57  ;;  %v4801_v63 = vpop.f32.mrb[14].mxu1 }
 0x15e   : > { %v4802_v0 = vpop.f32.mrb[15].mxu1 }
 0x15f   : > { %v1739_v2 = vadd.f32 %v4800_v62, %v4778_v58  ;;  %v4624_v62 = vld [vmem:[%s6326_s2] ss:$0 sm:$0xff] }
 0x161   : > { %v1744_v3 = vadd.f32 %v1739_v2, %v1358_v54 }
 0x17a   : > { %v4820_v4 = vpop.f32.mrb[16].mxu0 }
 0x17b   : > { %v4821_v6 = vpop.f32.mrb[17].mxu0  ;;  %v4842_v7 = vpop.f32.mrb[16].mxu1 }
 0x17c   : > { %v4822_v8 = vadd.f32 %v4821_v6, %v4820_v4  ;;  %v4823_v9 = vpop.f32.mrb[18].mxu0  ;;  %v4843_v10 = vpop.f32.mrb[17].mxu1 }
 0x17d   : > { %v4824_v1 = vpop.f32.mrb[19].mxu0  ;;  %v4844_v11 = vadd.f32 %v4843_v10, %v4842_v7  ;;  %v4845_v12 = vpop.f32.mrb[18].mxu1 }
 0x17e   : > { %v4846_v13 = vpop.f32.mrb[19].mxu1 }
 0x17f   : > { %v2144_v14 = vadd.f32 %v4844_v11, %v4822_v8 }
 0x181   : > { %v2149_v15 = vadd.f32 %v2144_v14, %v1744_v3 }
 0x19a   : > { %v4864_v16 = vpop.f32.mrb[20].mxu0 }
 0x19b   : > { %v4865_v17 = vpop.f32.mrb[21].mxu0  ;;  %v4886_v18 = vpop.f32.mrb[20].mxu1 }
 0x19c   : > { %v4866_v19 = vadd.f32 %v4865_v17, %v4864_v16  ;;  %v4867_v21 = vpop.f32.mrb[22].mxu0  ;;  %v4887_v22 = vpop.f32.mrb[21].mxu1 }
 0x19d   : > { %v4868_v23 = vpop.f32.mrb[23].mxu0  ;;  %v4888_v24 = vadd.f32 %v4887_v22, %v4886_v18  ;;  %v4889_v25 = vpop.f32.mrb[22].mxu1 }
 0x19e   : > { %v4890_v26 = vpop.f32.mrb[23].mxu1 }
 0x19f   : > { %v2531_v27 = vadd.f32 %v4888_v24, %v4866_v19 }
 0x1a1   : > { %v2536_v28 = vadd.f32 %v2531_v27, %v2149_v15 }
 0x1ba   : > { %v4908_v29 = vpop.f32.mrb[24].mxu0 }
 0x1bb   : > { %v4909_v30 = vpop.f32.mrb[25].mxu0  ;;  %v4930_v31 = vpop.f32.mrb[24].mxu1 }
 0x1bc   : > { %v4910_v32 = vadd.f32 %v4909_v30, %v4908_v29  ;;  %v4911_v33 = vpop.f32.mrb[26].mxu0  ;;  %v4931_v35 = vpop.f32.mrb[25].mxu1 }
 0x1bd   : > { %v4912_v36 = vpop.f32.mrb[27].mxu0  ;;  %v4932_v5 = vadd.f32 %v4931_v35, %v4930_v31  ;;  %v4933_v37 = vpop.f32.mrb[26].mxu1 }
 0x1be   : > { %v4934_v38 = vpop.f32.mrb[27].mxu1 }
 0x1bf   : > { %v2917_v39 = vadd.f32 %v4932_v5, %v4910_v32 }
 0x1c1   : > { %v2922_v40 = vadd.f32 %v2917_v39, %v2536_v28 }
 0x1da   : > { %v4952_v42 = vpop.f32.mrb[28].mxu0 }
 0x1db   : > { %v4953_v43 = vpop.f32.mrb[29].mxu0  ;;  %v4974_v44 = vpop.f32.mrb[28].mxu1 }
 0x1dc   : > { %v4954_v45 = vadd.f32 %v4953_v43, %v4952_v42  ;;  %v4955_v47 = vpop.f32.mrb[30].mxu0  ;;  %v4975_v48 = vpop.f32.mrb[29].mxu1 }
 0x1dd   : > { %v4956_v49 = vpop.f32.mrb[31].mxu0  ;;  %v4976_v20 = vadd.f32 %v4975_v48, %v4974_v44  ;;  %v4977_v50 = vpop.f32.mrb[30].mxu1 }
 0x1de   : > { %v4978_v51 = vpop.f32.mrb[31].mxu1 }
 0x1df   : > { %v3322_v52 = vadd.f32 %v4976_v20, %v4954_v45 }
 0x1e1   : > { %v3327_v46 = vadd.f32 %v3322_v52, %v2922_v40 }
 0x1fa   : > { %v4996_v53 = vpop.f32.mrb[32].mxu0 }
 0x1fb   : > { %v4997_v41 = vpop.f32.mrb[33].mxu0  ;;  %v5018_v34 = vpop.f32.mrb[32].mxu1 }
 0x1fc   : > { %v4998_v54 = vadd.f32 %v4997_v41, %v4996_v53  ;;  %v4999_v55 = vpop.f32.mrb[34].mxu0  ;;  %v5019_v56 = vpop.f32.mrb[33].mxu1 }
 0x1fd   : > { %v5000_v57 = vpop.f32.mrb[35].mxu0  ;;  %v5020_v58 = vadd.f32 %v5019_v56, %v5018_v34  ;;  %v5021_v59 = vpop.f32.mrb[34].mxu1 }
 0x1fe   : > { %v5022_v60 = vpop.f32.mrb[35].mxu1 }
 0x1ff   : > { %v3709_v61 = vadd.f32 %v5020_v58, %v4998_v54 }
 0x201   : > { %v3714_v63 = vadd.f32 %v3709_v61, %v3327_v46 }
 0x203   : > { %v3722_v0 = vadd.f32 %v4624_v62, %v3714_v63 }
 0x205   : > { %3723 = vst [vmem:[%s168_s19] sm:$0xf] %v3722_v0 }
 0x206 PF: > { %s13_s12 = sadd.s32 1, %s5327_s12  }
 0x207   : > { %p10_p4 = scmp.ge.s32.totalorder %s13_s12, 4  }
 0x209   :  { %12 = sbr.rel (!%p10_p4) target bundleno = 1 (0x1), region = 72 }

</bundles_post_ra>
